<compile_context>
chip_gen: v7x
topology: tpu7x:2x2x1
jax: 0.10.0
libtpu: 0.0.40
codegen_flags: <defaults>
</compile_context>

<pallas_src>
import jax
import jax.numpy as jnp
from jax import lax
from jax.experimental import pallas as pl
from jax.experimental.pallas import tpu as pltpu


BT = 64  # batch tile; batch is zero-padded to a multiple of BT.


# ---------------------------------------------------------------------------
# Pallas kernel: full forward pass for one batch tile of BT samples.
# ---------------------------------------------------------------------------
def _cnn_kernel(x_ref,      # (24, BT, 140) bf16  rows=(ho, b), lanes=kh*28+w
                band1_ref,  # (140, 144)    bf16  conv1 band [kh*28+wi, co*24+wo]
                b1_ref,     # (1, 144)      f32
                se1_ref,    # (144, 72)     bf16  pool1 even-column selector
                so1_ref,    # (144, 72)     bf16  pool1 odd-column selector
                band2_ref,  # (5, 72, 128)  bf16  conv2 band [kh, ci*12+wi, co*8+wo]
                b2_ref,     # (1, 128)      f32
                se2_ref,    # (128, 64)     bf16
                so2_ref,    # (128, 64)     bf16
                fc1w_ref,   # (4, 64, 128)  bf16  fc1 [h, c*4+w, out(pad 128)]
                fc1b_ref,   # (1, 128)      f32
                fc2w_ref,   # (128, 128)    bf16
                fc2b_ref,   # (1, 128)      f32
                fc3w_ref,   # (128, 128)    bf16
                fc3b_ref,   # (1, 128)      f32
                out_ref):   # (BT, 128)     f32   logits in lanes 0..9
    f32 = jnp.float32
    bf16 = jnp.bfloat16
    bt = x_ref.shape[1]

    # -------- conv1: one fused K=140 MXU matmul (im2col done in wrapper) ----
    lhs1 = x_ref[...].reshape(24 * bt, 140)                    # bf16
    c1 = jnp.dot(lhs1, band1_ref[...], preferred_element_type=f32)
    c1 = jnp.maximum(c1 + b1_ref[...], 0.0)                    # (24*bt, 144) f32

    # -------- pool1: W via one-hot selection matmuls (exact in bf16),
    #          H via tile-aligned row regrouping ----------------------------
    c1b = c1.astype(bf16)
    pw = jnp.maximum(jnp.dot(c1b, se1_ref[...], preferred_element_type=f32),
                     jnp.dot(c1b, so1_ref[...], preferred_element_type=f32))
    pwr = pw.reshape(12, 2, bt, 72)                            # leading-dim reshape
    p1 = jnp.maximum(pwr[:, 0], pwr[:, 1])                     # (12, bt, 72) f32

    # -------- conv2: 5 banded matmuls, first iteration peeled ---------------
    # TODO(synk): v7x-only — fuse into one K=360 matmul via lane concat if the
    # MXU result path turns out to be the binding slot.
    p1b = p1.astype(bf16)
    c2 = jnp.dot(p1b[0:8].reshape(8 * bt, 72), band2_ref[0],
                 preferred_element_type=f32)
    for kh in range(1, 5):                                     # static unroll
        c2 = c2 + jnp.dot(p1b[kh:kh + 8].reshape(8 * bt, 72), band2_ref[kh],
                          preferred_element_type=f32)
    c2 = jnp.maximum(c2 + b2_ref[...], 0.0)                    # (8*bt, 128) f32

    # -------- pool2 ----------------------------------------------------------
    c2b = c2.astype(bf16)
    pw2 = jnp.maximum(jnp.dot(c2b, se2_ref[...], preferred_element_type=f32),
                      jnp.dot(c2b, so2_ref[...], preferred_element_type=f32))
    pw2r = pw2.reshape(4, 2, bt, 64)
    p2 = jnp.maximum(pw2r[:, 0], pw2r[:, 1])                   # (4, bt, 64) f32

    # -------- fully connected head (first fc1 iter peeled, 128-lane dense) --
    p2b = p2.astype(bf16)
    h1 = jnp.dot(p2b[0], fc1w_ref[0], preferred_element_type=f32)
    for hq in range(1, 4):
        h1 = h1 + jnp.dot(p2b[hq], fc1w_ref[hq], preferred_element_type=f32)
    h1 = jnp.maximum(h1 + fc1b_ref[...], 0.0)                  # (bt, 128)
    h2 = jnp.maximum(
        jnp.dot(h1.astype(bf16), fc2w_ref[...], preferred_element_type=f32)
        + fc2b_ref[...], 0.0)                                  # (bt, 128)
    out_ref[...] = (
        jnp.dot(h2.astype(bf16), fc3w_ref[...], preferred_element_type=f32)
        + fc3b_ref[...])


# ---------------------------------------------------------------------------
# Wrapper: weight restructuring (pure glue on weights) + pallas_call.
# ---------------------------------------------------------------------------
@jax.jit
def cnn_forward(x_nchw, params):
    f32 = jnp.float32
    bf16 = jnp.bfloat16
    (conv1_w, conv1_b, conv2_w, conv2_b,
     fc1_w, fc1_b, fc2_w, fc2_b, fc3_w, fc3_b) = [p.astype(f32) for p in params]

    B = x_nchw.shape[0]
    B_pad = ((B + BT - 1) // BT) * BT
    nb = B_pad // BT

    # input: NCHW (B,1,28,28) -> (H, B_pad, W); then im2col the 5 kernel rows
    # into the lane dim: lanes = kh*28 + w.
    x_k = jnp.transpose(x_nchw[:, 0, :, :], (1, 0, 2)).astype(f32)
    x_k = jnp.pad(x_k, ((0, 0), (0, B_pad - B), (0, 0)))       # (28, B_pad, 28)
    x_im = jnp.concatenate([x_k[kh:kh + 24] for kh in range(5)], axis=-1)
    x_im = x_im.astype(bf16)                                   # (24, B_pad, 140)

    # conv1 band matrix: band1[kh*28+wi, co*24+wo] = w1[co,0,kh,wi-wo] (0<=wi-wo<5)
    d1 = jnp.arange(28)[:, None] - jnp.arange(24)[None, :]     # (wi, wo)
    m1 = ((d1 >= 0) & (d1 < 5)).astype(f32)
    w1 = conv1_w[:, 0]                                         # (6,5,5)
    g1 = w1[:, :, jnp.clip(d1, 0, 4)] * m1[None, None]         # (6,5,28,24)
    band1 = jnp.transpose(g1, (1, 2, 0, 3)).reshape(140, 144).astype(bf16)
    bias1 = jnp.repeat(conv1_b, 24).reshape(1, 144)

    # pool1 selectors: block-diagonal 0/1 matrices, (co*24+wo) -> (co*12+wp)
    sE = jnp.zeros((24, 12), f32).at[2 * jnp.arange(12), jnp.arange(12)].set(1.0)
    sO = jnp.zeros((24, 12), f32).at[2 * jnp.arange(12) + 1, jnp.arange(12)].set(1.0)
    se1 = jnp.kron(jnp.eye(6, dtype=f32), sE).astype(bf16)     # (144, 72)
    so1 = jnp.kron(jnp.eye(6, dtype=f32), sO).astype(bf16)

    # conv2 band matrices: band2[kh, ci*12+wi, co*8+wo] = w2[co,ci,kh,wi-wo]
    d2 = jnp.arange(12)[:, None] - jnp.arange(8)[None, :]
    m2 = ((d2 >= 0) & (d2 < 5)).astype(f32)
    g2 = conv2_w[:, :, :, jnp.clip(d2, 0, 4)] * m2[None, None, None]  # (16,6,5,12,8)
    band2 = jnp.transpose(g2, (2, 1, 3, 0, 4)).reshape(5, 72, 128).astype(bf16)
    bias2 = jnp.repeat(conv2_b, 8).reshape(1, 128)

    # pool2 selectors: (co*8+wo) -> (co*4+wp)
    sE2 = jnp.zeros((8, 4), f32).at[2 * jnp.arange(4), jnp.arange(4)].set(1.0)
    sO2 = jnp.zeros((8, 4), f32).at[2 * jnp.arange(4) + 1, jnp.arange(4)].set(1.0)
    se2 = jnp.kron(jnp.eye(16, dtype=f32), sE2).astype(bf16)   # (128, 64)
    so2 = jnp.kron(jnp.eye(16, dtype=f32), sO2).astype(bf16)

    # fc1: rows of (256,120) indexed c*16+h*4+w -> [h, c*4+w, out], lane-pad 128
    fc1w = fc1_w.reshape(16, 4, 4, 120).transpose(1, 0, 2, 3).reshape(4, 64, 120)
    fc1w = jnp.pad(fc1w, ((0, 0), (0, 0), (0, 8))).astype(bf16)
    fc1b = jnp.pad(fc1_b, (0, 8)).reshape(1, 128)
    fc2w = jnp.pad(fc2_w, ((0, 8), (0, 44))).astype(bf16)      # (128, 128)
    fc2b = jnp.pad(fc2_b, (0, 44)).reshape(1, 128)
    fc3w = jnp.pad(fc3_w, ((0, 44), (0, 118))).astype(bf16)    # (128, 128)
    fc3b = jnp.pad(fc3_b, (0, 118)).reshape(1, 128)

    def full(shape):
        return pl.BlockSpec(shape, lambda i, _n=len(shape): (0,) * _n)

    out = pl.pallas_call(
        _cnn_kernel,
        out_shape=jax.ShapeDtypeStruct((B_pad, 128), f32),
        grid=(nb,),
        in_specs=[
            pl.BlockSpec((24, BT, 140), lambda i: (0, i, 0)),  # x, blocked on batch
            full((140, 144)), full((1, 144)),
            full((144, 72)), full((144, 72)),
            full((5, 72, 128)), full((1, 128)),
            full((128, 64)), full((128, 64)),
            full((4, 64, 128)), full((1, 128)),
            full((128, 128)), full((1, 128)),
            full((128, 128)), full((1, 128)),
        ],
        out_specs=pl.BlockSpec((BT, 128), lambda i: (i, 0)),
        compiler_params=pltpu.CompilerParams(
            dimension_semantics=("parallel",)),
    )(x_im, band1, bias1, se1, so1, band2, bias2, se2, so2,
      fc1w, fc1b, fc2w, fc2b, fc3w, fc3b)

    return out[:B, :10]


# ---------------------------------------------------------------------------
# Deterministic parameter init (PyTorch-like uniform(-1/sqrt(fan_in), ...)).
# ---------------------------------------------------------------------------
def init_params(key):
    ks = jax.random.split(key, 10)

    def u(k, shape, fan_in):
        bound = 1.0 / jnp.sqrt(jnp.float32(fan_in))
        return jax.random.uniform(k, shape, jnp.float32, -bound, bound)

    conv1_w = u(ks[0], (6, 1, 5, 5), 1 * 5 * 5)      # OIHW
    conv1_b = u(ks[1], (6,), 1 * 5 * 5)
    conv2_w = u(ks[2], (16, 6, 5, 5), 6 * 5 * 5)
    conv2_b = u(ks[3], (16,), 6 * 5 * 5)
    fc1_w = u(ks[4], (256, 120), 256)                # (in, out)
    fc1_b = u(ks[5], (120,), 256)
    fc2_w = u(ks[6], (120, 84), 120)
    fc2_b = u(ks[7], (84,), 120)
    fc3_w = u(ks[8], (84, 10), 84)
    fc3_b = u(ks[9], (10,), 84)
    return (conv1_w, conv1_b, conv2_w, conv2_b,
            fc1_w, fc1_b, fc2_w, fc2_b, fc3_w, fc3_b)


# ---------------------------------------------------------------------------
# Pure-JAX f32 reference (NCHW, mirrors the PyTorch forward) for validation.
# ---------------------------------------------------------------------------
def reference_forward(x, params):
    (conv1_w, conv1_b, conv2_w, conv2_b,
     fc1_w, fc1_b, fc2_w, fc2_b, fc3_w, fc3_b) = params
    dn = ('NCHW', 'OIHW', 'NCHW')
    hi = lax.Precision.HIGHEST
    y = lax.conv_general_dilated(x, conv1_w, (1, 1), 'VALID',
                                 dimension_numbers=dn, precision=hi)
    y = jnp.maximum(y + conv1_b.reshape(1, 6, 1, 1), 0.0)
    y = lax.reduce_window(y, -jnp.inf, lax.max, (1, 1, 2, 2), (1, 1, 2, 2), 'VALID')
    y = lax.conv_general_dilated(y, conv2_w, (1, 1), 'VALID',
                                 dimension_numbers=dn, precision=hi)
    y = jnp.maximum(y + conv2_b.reshape(1, 16, 1, 1), 0.0)
    y = lax.reduce_window(y, -jnp.inf, lax.max, (1, 1, 2, 2), (1, 1, 2, 2), 'VALID')
    y = y.reshape(y.shape[0], -1)                    # (B, 16*4*4) in (C,H,W) order
    y = jnp.maximum(jnp.dot(y, fc1_w, precision=hi) + fc1_b, 0.0)
    y = jnp.maximum(jnp.dot(y, fc2_w, precision=hi) + fc2_b, 0.0)
    return jnp.dot(y, fc3_w, precision=hi) + fc3_b


if __name__ == "__main__":
    key = jax.random.PRNGKey(0)
    kx, kp = jax.random.split(key)

    # LeNet geometry: 28x28 single-channel input so that pool2 output is 16*4*4.
    x = jax.random.normal(kx, (2, 1, 28, 28), dtype=jnp.float32)
    params = init_params(kp)

    out = cnn_forward(x, params)
    out = jax.block_until_ready(out)

    ref = reference_forward(x, params)
    assert out.shape == (2, 10), out.shape
    # bf16 matmul operands with f32 accumulation -> compare at bf16 tolerance.
    if not bool(jnp.allclose(out, ref, rtol=2e-2, atol=2e-2)):
        raise AssertionError(
            f"Pallas output mismatch vs reference; max abs err = "
            f"{float(jnp.max(jnp.abs(out - ref)))}")

    print("KERNEL_OK")
</pallas_src>

<mosaic_0001>
module attributes {stable_mosaic.version = 11 : i64} {
  func.func @_cnn_kernel(%arg0: i32, %arg1: memref<24x64x140xbf16, #tpu.memory_space<vmem>>, %arg2: memref<140x144xbf16, #tpu.memory_space<vmem>>, %arg3: memref<1x144xf32, #tpu.memory_space<vmem>>, %arg4: memref<144x72xbf16, #tpu.memory_space<vmem>>, %arg5: memref<144x72xbf16, #tpu.memory_space<vmem>>, %arg6: memref<5x72x128xbf16, #tpu.memory_space<vmem>>, %arg7: memref<1x128xf32, #tpu.memory_space<vmem>>, %arg8: memref<128x64xbf16, #tpu.memory_space<vmem>>, %arg9: memref<128x64xbf16, #tpu.memory_space<vmem>>, %arg10: memref<4x64x128xbf16, #tpu.memory_space<vmem>>, %arg11: memref<1x128xf32, #tpu.memory_space<vmem>>, %arg12: memref<128x128xbf16, #tpu.memory_space<vmem>>, %arg13: memref<1x128xf32, #tpu.memory_space<vmem>>, %arg14: memref<128x128xbf16, #tpu.memory_space<vmem>>, %arg15: memref<1x128xf32, #tpu.memory_space<vmem>>, %arg16: memref<64x128xf32, #tpu.memory_space<vmem>>) attributes {dimension_semantics = [#tpu.dimension_semantics<parallel>], iteration_bounds = array<i64: 1>, scalar_prefetch = 0 : i64, scratch_operands = 0 : i64, tpu.core_type = #tpu.core_type<tc>, window_params = [{transform_indices = @transform_0, window_bounds = array<i64: 24, 64, 140>}, {pipeline_mode = #tpu.pipeline_mode<synchronous>, transform_indices = @transform_1, window_bounds = array<i64: 140, 144>}, {pipeline_mode = #tpu.pipeline_mode<synchronous>, transform_indices = @transform_2, window_bounds = array<i64: 1, 144>}, {pipeline_mode = #tpu.pipeline_mode<synchronous>, transform_indices = @transform_3, window_bounds = array<i64: 144, 72>}, {pipeline_mode = #tpu.pipeline_mode<synchronous>, transform_indices = @transform_4, window_bounds = array<i64: 144, 72>}, {pipeline_mode = #tpu.pipeline_mode<synchronous>, transform_indices = @transform_5, window_bounds = array<i64: 5, 72, 128>}, {pipeline_mode = #tpu.pipeline_mode<synchronous>, transform_indices = @transform_6, window_bounds = array<i64: 1, 128>}, {pipeline_mode = #tpu.pipeline_mode<synchronous>, transform_indices = @transform_7, window_bounds = array<i64: 128, 64>}, {pipeline_mode = #tpu.pipeline_mode<synchronous>, transform_indices = @transform_8, window_bounds = array<i64: 128, 64>}, {pipeline_mode = #tpu.pipeline_mode<synchronous>, transform_indices = @transform_9, window_bounds = array<i64: 4, 64, 128>}, {pipeline_mode = #tpu.pipeline_mode<synchronous>, transform_indices = @transform_10, window_bounds = array<i64: 1, 128>}, {pipeline_mode = #tpu.pipeline_mode<synchronous>, transform_indices = @transform_11, window_bounds = array<i64: 128, 128>}, {pipeline_mode = #tpu.pipeline_mode<synchronous>, transform_indices = @transform_12, window_bounds = array<i64: 1, 128>}, {pipeline_mode = #tpu.pipeline_mode<synchronous>, transform_indices = @transform_13, window_bounds = array<i64: 128, 128>}, {pipeline_mode = #tpu.pipeline_mode<synchronous>, transform_indices = @transform_14, window_bounds = array<i64: 1, 128>}, {transform_indices = @transform_15, window_bounds = array<i64: 64, 128>}]} {
    %c0 = arith.constant 0 : index
    %c0_0 = arith.constant 0 : index
    %c0_1 = arith.constant 0 : index
    %0 = vector.load %arg1[%c0, %c0_0, %c0_1] : memref<24x64x140xbf16, #tpu.memory_space<vmem>>, vector<24x64x140xbf16>
    %1 = vector.shape_cast %0 : vector<24x64x140xbf16> to vector<1536x140xbf16>
    %c0_2 = arith.constant 0 : index
    %c0_3 = arith.constant 0 : index
    %2 = vector.load %arg2[%c0_2, %c0_3] : memref<140x144xbf16, #tpu.memory_space<vmem>>, vector<140x144xbf16>
    %cst = arith.constant dense<0.000000e+00> : vector<1536x144xf32>
    %3 = tpu.matmul %1, %2, %cst {dimension_numbers = #tpu.dot_dimension_numbers<[1], [0], [0], [1], [0, 0, 1, 1], [], []>} : vector<1536x140xbf16>, vector<140x144xbf16>, vector<1536x144xf32> -> vector<1536x144xf32>
    %c0_4 = arith.constant 0 : index
    %c0_5 = arith.constant 0 : index
    %4 = vector.load %arg3[%c0_4, %c0_5] : memref<1x144xf32, #tpu.memory_space<vmem>>, vector<1x144xf32>
    %5 = vector.broadcast %4 : vector<1x144xf32> to vector<1536x144xf32>
    %6 = arith.addf %3, %5 : vector<1536x144xf32>
    %cst_6 = arith.constant 0.000000e+00 : f32
    %7 = vector.broadcast %cst_6 : f32 to vector<1536x144xf32>
    %8 = arith.maximumf %6, %7 : vector<1536x144xf32>
    %9 = arith.truncf %8 : vector<1536x144xf32> to vector<1536x144xbf16>
    %c0_7 = arith.constant 0 : index
    %c0_8 = arith.constant 0 : index
    %10 = vector.load %arg4[%c0_7, %c0_8] : memref<144x72xbf16, #tpu.memory_space<vmem>>, vector<144x72xbf16>
    %cst_9 = arith.constant dense<0.000000e+00> : vector<1536x72xf32>
    %11 = tpu.matmul %9, %10, %cst_9 {dimension_numbers = #tpu.dot_dimension_numbers<[1], [0], [0], [1], [0, 0, 1, 1], [], []>} : vector<1536x144xbf16>, vector<144x72xbf16>, vector<1536x72xf32> -> vector<1536x72xf32>
    %c0_10 = arith.constant 0 : index
    %c0_11 = arith.constant 0 : index
    %12 = vector.load %arg5[%c0_10, %c0_11] : memref<144x72xbf16, #tpu.memory_space<vmem>>, vector<144x72xbf16>
    %cst_12 = arith.constant dense<0.000000e+00> : vector<1536x72xf32>
    %13 = tpu.matmul %9, %12, %cst_12 {dimension_numbers = #tpu.dot_dimension_numbers<[1], [0], [0], [1], [0, 0, 1, 1], [], []>} : vector<1536x144xbf16>, vector<144x72xbf16>, vector<1536x72xf32> -> vector<1536x72xf32>
    %14 = arith.maximumf %11, %13 : vector<1536x72xf32>
    %15 = vector.shape_cast %14 : vector<1536x72xf32> to vector<12x2x64x72xf32>
    %16 = vector.extract_strided_slice %15 {offsets = [0, 0, 0, 0], sizes = [12, 1, 64, 72], strides = [1, 1, 1, 1]} : vector<12x2x64x72xf32> to vector<12x1x64x72xf32>
    %17 = vector.shape_cast %16 : vector<12x1x64x72xf32> to vector<12x64x72xf32>
    %18 = vector.extract_strided_slice %15 {offsets = [0, 1, 0, 0], sizes = [12, 1, 64, 72], strides = [1, 1, 1, 1]} : vector<12x2x64x72xf32> to vector<12x1x64x72xf32>
    %19 = vector.shape_cast %18 : vector<12x1x64x72xf32> to vector<12x64x72xf32>
    %20 = arith.maximumf %17, %19 : vector<12x64x72xf32>
    %21 = arith.truncf %20 : vector<12x64x72xf32> to vector<12x64x72xbf16>
    %22 = vector.extract_strided_slice %21 {offsets = [0, 0, 0], sizes = [8, 64, 72], strides = [1, 1, 1]} : vector<12x64x72xbf16> to vector<8x64x72xbf16>
    %23 = vector.shape_cast %22 : vector<8x64x72xbf16> to vector<512x72xbf16>
    %c0_13 = arith.constant 0 : index
    %c0_14 = arith.constant 0 : index
    %c0_15 = arith.constant 0 : index
    %24 = vector.load %arg6[%c0_13, %c0_14, %c0_15] : memref<5x72x128xbf16, #tpu.memory_space<vmem>>, vector<1x72x128xbf16>
    %25 = vector.shape_cast %24 : vector<1x72x128xbf16> to vector<72x128xbf16>
    %cst_16 = arith.constant dense<0.000000e+00> : vector<512x128xf32>
    %26 = tpu.matmul %23, %25, %cst_16 {dimension_numbers = #tpu.dot_dimension_numbers<[1], [0], [0], [1], [0, 0, 1, 1], [], []>} : vector<512x72xbf16>, vector<72x128xbf16>, vector<512x128xf32> -> vector<512x128xf32>
    %27 = vector.extract_strided_slice %21 {offsets = [1, 0, 0], sizes = [8, 64, 72], strides = [1, 1, 1]} : vector<12x64x72xbf16> to vector<8x64x72xbf16>
    %28 = vector.shape_cast %27 : vector<8x64x72xbf16> to vector<512x72xbf16>
    %c1 = arith.constant 1 : index
    %c0_17 = arith.constant 0 : index
    %c0_18 = arith.constant 0 : index
    %29 = vector.load %arg6[%c1, %c0_17, %c0_18] : memref<5x72x128xbf16, #tpu.memory_space<vmem>>, vector<1x72x128xbf16>
    %30 = vector.shape_cast %29 : vector<1x72x128xbf16> to vector<72x128xbf16>
    %cst_19 = arith.constant dense<0.000000e+00> : vector<512x128xf32>
    %31 = tpu.matmul %28, %30, %cst_19 {dimension_numbers = #tpu.dot_dimension_numbers<[1], [0], [0], [1], [0, 0, 1, 1], [], []>} : vector<512x72xbf16>, vector<72x128xbf16>, vector<512x128xf32> -> vector<512x128xf32>
    %32 = arith.addf %26, %31 : vector<512x128xf32>
    %33 = vector.extract_strided_slice %21 {offsets = [2, 0, 0], sizes = [8, 64, 72], strides = [1, 1, 1]} : vector<12x64x72xbf16> to vector<8x64x72xbf16>
    %34 = vector.shape_cast %33 : vector<8x64x72xbf16> to vector<512x72xbf16>
    %c2 = arith.constant 2 : index
    %c0_20 = arith.constant 0 : index
    %c0_21 = arith.constant 0 : index
    %35 = vector.load %arg6[%c2, %c0_20, %c0_21] : memref<5x72x128xbf16, #tpu.memory_space<vmem>>, vector<1x72x128xbf16>
    %36 = vector.shape_cast %35 : vector<1x72x128xbf16> to vector<72x128xbf16>
    %cst_22 = arith.constant dense<0.000000e+00> : vector<512x128xf32>
    %37 = tpu.matmul %34, %36, %cst_22 {dimension_numbers = #tpu.dot_dimension_numbers<[1], [0], [0], [1], [0, 0, 1, 1], [], []>} : vector<512x72xbf16>, vector<72x128xbf16>, vector<512x128xf32> -> vector<512x128xf32>
    %38 = arith.addf %32, %37 : vector<512x128xf32>
    %39 = vector.extract_strided_slice %21 {offsets = [3, 0, 0], sizes = [8, 64, 72], strides = [1, 1, 1]} : vector<12x64x72xbf16> to vector<8x64x72xbf16>
    %40 = vector.shape_cast %39 : vector<8x64x72xbf16> to vector<512x72xbf16>
    %c3 = arith.constant 3 : index
    %c0_23 = arith.constant 0 : index
    %c0_24 = arith.constant 0 : index
    %41 = vector.load %arg6[%c3, %c0_23, %c0_24] : memref<5x72x128xbf16, #tpu.memory_space<vmem>>, vector<1x72x128xbf16>
    %42 = vector.shape_cast %41 : vector<1x72x128xbf16> to vector<72x128xbf16>
    %cst_25 = arith.constant dense<0.000000e+00> : vector<512x128xf32>
    %43 = tpu.matmul %40, %42, %cst_25 {dimension_numbers = #tpu.dot_dimension_numbers<[1], [0], [0], [1], [0, 0, 1, 1], [], []>} : vector<512x72xbf16>, vector<72x128xbf16>, vector<512x128xf32> -> vector<512x128xf32>
    %44 = arith.addf %38, %43 : vector<512x128xf32>
    %45 = vector.extract_strided_slice %21 {offsets = [4, 0, 0], sizes = [8, 64, 72], strides = [1, 1, 1]} : vector<12x64x72xbf16> to vector<8x64x72xbf16>
    %46 = vector.shape_cast %45 : vector<8x64x72xbf16> to vector<512x72xbf16>
    %c4 = arith.constant 4 : index
    %c0_26 = arith.constant 0 : index
    %c0_27 = arith.constant 0 : index
    %47 = vector.load %arg6[%c4, %c0_26, %c0_27] : memref<5x72x128xbf16, #tpu.memory_space<vmem>>, vector<1x72x128xbf16>
    %48 = vector.shape_cast %47 : vector<1x72x128xbf16> to vector<72x128xbf16>
    %cst_28 = arith.constant dense<0.000000e+00> : vector<512x128xf32>
    %49 = tpu.matmul %46, %48, %cst_28 {dimension_numbers = #tpu.dot_dimension_numbers<[1], [0], [0], [1], [0, 0, 1, 1], [], []>} : vector<512x72xbf16>, vector<72x128xbf16>, vector<512x128xf32> -> vector<512x128xf32>
    %50 = arith.addf %44, %49 : vector<512x128xf32>
    %c0_29 = arith.constant 0 : index
    %c0_30 = arith.constant 0 : index
    %51 = vector.load %arg7[%c0_29, %c0_30] : memref<1x128xf32, #tpu.memory_space<vmem>>, vector<1x128xf32>
    %52 = vector.broadcast %51 : vector<1x128xf32> to vector<512x128xf32>
    %53 = arith.addf %50, %52 : vector<512x128xf32>
    %cst_31 = arith.constant 0.000000e+00 : f32
    %54 = vector.broadcast %cst_31 : f32 to vector<512x128xf32>
    %55 = arith.maximumf %53, %54 : vector<512x128xf32>
    %56 = arith.truncf %55 : vector<512x128xf32> to vector<512x128xbf16>
    %c0_32 = arith.constant 0 : index
    %c0_33 = arith.constant 0 : index
    %57 = vector.load %arg8[%c0_32, %c0_33] : memref<128x64xbf16, #tpu.memory_space<vmem>>, vector<128x64xbf16>
    %cst_34 = arith.constant dense<0.000000e+00> : vector<512x64xf32>
    %58 = tpu.matmul %56, %57, %cst_34 {dimension_numbers = #tpu.dot_dimension_numbers<[1], [0], [0], [1], [0, 0, 1, 1], [], []>} : vector<512x128xbf16>, vector<128x64xbf16>, vector<512x64xf32> -> vector<512x64xf32>
    %c0_35 = arith.constant 0 : index
    %c0_36 = arith.constant 0 : index
    %59 = vector.load %arg9[%c0_35, %c0_36] : memref<128x64xbf16, #tpu.memory_space<vmem>>, vector<128x64xbf16>
    %cst_37 = arith.constant dense<0.000000e+00> : vector<512x64xf32>
    %60 = tpu.matmul %56, %59, %cst_37 {dimension_numbers = #tpu.dot_dimension_numbers<[1], [0], [0], [1], [0, 0, 1, 1], [], []>} : vector<512x128xbf16>, vector<128x64xbf16>, vector<512x64xf32> -> vector<512x64xf32>
    %61 = arith.maximumf %58, %60 : vector<512x64xf32>
    %62 = vector.shape_cast %61 : vector<512x64xf32> to vector<4x2x64x64xf32>
    %63 = vector.extract_strided_slice %62 {offsets = [0, 0, 0, 0], sizes = [4, 1, 64, 64], strides = [1, 1, 1, 1]} : vector<4x2x64x64xf32> to vector<4x1x64x64xf32>
    %64 = vector.shape_cast %63 : vector<4x1x64x64xf32> to vector<4x64x64xf32>
    %65 = vector.extract_strided_slice %62 {offsets = [0, 1, 0, 0], sizes = [4, 1, 64, 64], strides = [1, 1, 1, 1]} : vector<4x2x64x64xf32> to vector<4x1x64x64xf32>
    %66 = vector.shape_cast %65 : vector<4x1x64x64xf32> to vector<4x64x64xf32>
    %67 = arith.maximumf %64, %66 : vector<4x64x64xf32>
    %68 = arith.truncf %67 : vector<4x64x64xf32> to vector<4x64x64xbf16>
    %69 = vector.extract_strided_slice %68 {offsets = [0, 0, 0], sizes = [1, 64, 64], strides = [1, 1, 1]} : vector<4x64x64xbf16> to vector<1x64x64xbf16>
    %70 = vector.shape_cast %69 : vector<1x64x64xbf16> to vector<64x64xbf16>
    %c0_38 = arith.constant 0 : index
    %c0_39 = arith.constant 0 : index
    %c0_40 = arith.constant 0 : index
    %71 = vector.load %arg10[%c0_38, %c0_39, %c0_40] : memref<4x64x128xbf16, #tpu.memory_space<vmem>>, vector<1x64x128xbf16>
    %72 = vector.shape_cast %71 : vector<1x64x128xbf16> to vector<64x128xbf16>
    %cst_41 = arith.constant dense<0.000000e+00> : vector<64x128xf32>
    %73 = tpu.matmul %70, %72, %cst_41 {dimension_numbers = #tpu.dot_dimension_numbers<[1], [0], [0], [1], [0, 0, 1, 1], [], []>} : vector<64x64xbf16>, vector<64x128xbf16>, vector<64x128xf32> -> vector<64x128xf32>
    %74 = vector.extract_strided_slice %68 {offsets = [1, 0, 0], sizes = [1, 64, 64], strides = [1, 1, 1]} : vector<4x64x64xbf16> to vector<1x64x64xbf16>
    %75 = vector.shape_cast %74 : vector<1x64x64xbf16> to vector<64x64xbf16>
    %c1_42 = arith.constant 1 : index
    %c0_43 = arith.constant 0 : index
    %c0_44 = arith.constant 0 : index
    %76 = vector.load %arg10[%c1_42, %c0_43, %c0_44] : memref<4x64x128xbf16, #tpu.memory_space<vmem>>, vector<1x64x128xbf16>
    %77 = vector.shape_cast %76 : vector<1x64x128xbf16> to vector<64x128xbf16>
    %cst_45 = arith.constant dense<0.000000e+00> : vector<64x128xf32>
    %78 = tpu.matmul %75, %77, %cst_45 {dimension_numbers = #tpu.dot_dimension_numbers<[1], [0], [0], [1], [0, 0, 1, 1], [], []>} : vector<64x64xbf16>, vector<64x128xbf16>, vector<64x128xf32> -> vector<64x128xf32>
    %79 = arith.addf %73, %78 : vector<64x128xf32>
    %80 = vector.extract_strided_slice %68 {offsets = [2, 0, 0], sizes = [1, 64, 64], strides = [1, 1, 1]} : vector<4x64x64xbf16> to vector<1x64x64xbf16>
    %81 = vector.shape_cast %80 : vector<1x64x64xbf16> to vector<64x64xbf16>
    %c2_46 = arith.constant 2 : index
    %c0_47 = arith.constant 0 : index
    %c0_48 = arith.constant 0 : index
    %82 = vector.load %arg10[%c2_46, %c0_47, %c0_48] : memref<4x64x128xbf16, #tpu.memory_space<vmem>>, vector<1x64x128xbf16>
    %83 = vector.shape_cast %82 : vector<1x64x128xbf16> to vector<64x128xbf16>
    %cst_49 = arith.constant dense<0.000000e+00> : vector<64x128xf32>
    %84 = tpu.matmul %81, %83, %cst_49 {dimension_numbers = #tpu.dot_dimension_numbers<[1], [0], [0], [1], [0, 0, 1, 1], [], []>} : vector<64x64xbf16>, vector<64x128xbf16>, vector<64x128xf32> -> vector<64x128xf32>
    %85 = arith.addf %79, %84 : vector<64x128xf32>
    %86 = vector.extract_strided_slice %68 {offsets = [3, 0, 0], sizes = [1, 64, 64], strides = [1, 1, 1]} : vector<4x64x64xbf16> to vector<1x64x64xbf16>
    %87 = vector.shape_cast %86 : vector<1x64x64xbf16> to vector<64x64xbf16>
    %c3_50 = arith.constant 3 : index
    %c0_51 = arith.constant 0 : index
    %c0_52 = arith.constant 0 : index
    %88 = vector.load %arg10[%c3_50, %c0_51, %c0_52] : memref<4x64x128xbf16, #tpu.memory_space<vmem>>, vector<1x64x128xbf16>
    %89 = vector.shape_cast %88 : vector<1x64x128xbf16> to vector<64x128xbf16>
    %cst_53 = arith.constant dense<0.000000e+00> : vector<64x128xf32>
    %90 = tpu.matmul %87, %89, %cst_53 {dimension_numbers = #tpu.dot_dimension_numbers<[1], [0], [0], [1], [0, 0, 1, 1], [], []>} : vector<64x64xbf16>, vector<64x128xbf16>, vector<64x128xf32> -> vector<64x128xf32>
    %91 = arith.addf %85, %90 : vector<64x128xf32>
    %c0_54 = arith.constant 0 : index
    %c0_55 = arith.constant 0 : index
    %92 = vector.load %arg11[%c0_54, %c0_55] : memref<1x128xf32, #tpu.memory_space<vmem>>, vector<1x128xf32>
    %93 = vector.broadcast %92 : vector<1x128xf32> to vector<64x128xf32>
    %94 = arith.addf %91, %93 : vector<64x128xf32>
    %cst_56 = arith.constant 0.000000e+00 : f32
    %95 = vector.broadcast %cst_56 : f32 to vector<64x128xf32>
    %96 = arith.maximumf %94, %95 : vector<64x128xf32>
    %97 = arith.truncf %96 : vector<64x128xf32> to vector<64x128xbf16>
    %c0_57 = arith.constant 0 : index
    %c0_58 = arith.constant 0 : index
    %98 = vector.load %arg12[%c0_57, %c0_58] : memref<128x128xbf16, #tpu.memory_space<vmem>>, vector<128x128xbf16>
    %cst_59 = arith.constant dense<0.000000e+00> : vector<64x128xf32>
    %99 = tpu.matmul %97, %98, %cst_59 {dimension_numbers = #tpu.dot_dimension_numbers<[1], [0], [0], [1], [0, 0, 1, 1], [], []>} : vector<64x128xbf16>, vector<128x128xbf16>, vector<64x128xf32> -> vector<64x128xf32>
    %c0_60 = arith.constant 0 : index
    %c0_61 = arith.constant 0 : index
    %100 = vector.load %arg13[%c0_60, %c0_61] : memref<1x128xf32, #tpu.memory_space<vmem>>, vector<1x128xf32>
    %101 = vector.broadcast %100 : vector<1x128xf32> to vector<64x128xf32>
    %102 = arith.addf %99, %101 : vector<64x128xf32>
    %cst_62 = arith.constant 0.000000e+00 : f32
    %103 = vector.broadcast %cst_62 : f32 to vector<64x128xf32>
    %104 = arith.maximumf %102, %103 : vector<64x128xf32>
    %105 = arith.truncf %104 : vector<64x128xf32> to vector<64x128xbf16>
    %c0_63 = arith.constant 0 : index
    %c0_64 = arith.constant 0 : index
    %106 = vector.load %arg14[%c0_63, %c0_64] : memref<128x128xbf16, #tpu.memory_space<vmem>>, vector<128x128xbf16>
    %cst_65 = arith.constant dense<0.000000e+00> : vector<64x128xf32>
    %107 = tpu.matmul %105, %106, %cst_65 {dimension_numbers = #tpu.dot_dimension_numbers<[1], [0], [0], [1], [0, 0, 1, 1], [], []>} : vector<64x128xbf16>, vector<128x128xbf16>, vector<64x128xf32> -> vector<64x128xf32>
    %c0_66 = arith.constant 0 : index
    %c0_67 = arith.constant 0 : index
    %108 = vector.load %arg15[%c0_66, %c0_67] : memref<1x128xf32, #tpu.memory_space<vmem>>, vector<1x128xf32>
    %109 = vector.broadcast %108 : vector<1x128xf32> to vector<64x128xf32>
    %110 = arith.addf %107, %109 : vector<64x128xf32>
    %c0_68 = arith.constant 0 : index
    %c0_69 = arith.constant 0 : index
    %111 = vector.load %arg16[%c0_68, %c0_69] : memref<64x128xf32, #tpu.memory_space<vmem>>, vector<64x128xf32>
    tpu.vector_store %arg16[%c0_68, %c0_69], %110 {strides = array<i32>} : memref<64x128xf32, #tpu.memory_space<vmem>>, vector<64x128xf32>,
    return
  }
  func.func @transform_0(%arg0: i32) -> (i32, i32, i32) {
    %c0_i32 = arith.constant 0 : i32
    %c0_i32_0 = arith.constant 0 : i32
    %c0_i32_1 = arith.constant 0 : i32
    return %c0_i32, %arg0, %c0_i32_0 : i32, i32, i32
  }
  func.func @transform_1(%arg0: i32) -> (i32, i32) {
    %c0_i32 = arith.constant 0 : i32
    %c0_i32_0 = arith.constant 0 : i32
    %c0_i32_1 = arith.constant 0 : i32
    return %c0_i32, %c0_i32_0 : i32, i32
  }
  func.func @transform_2(%arg0: i32) -> (i32, i32) {
    %c0_i32 = arith.constant 0 : i32
    %c0_i32_0 = arith.constant 0 : i32
    %c0_i32_1 = arith.constant 0 : i32
    return %c0_i32, %c0_i32_0 : i32, i32
  }
  func.func @transform_3(%arg0: i32) -> (i32, i32) {
    %c0_i32 = arith.constant 0 : i32
    %c0_i32_0 = arith.constant 0 : i32
    %c0_i32_1 = arith.constant 0 : i32
    return %c0_i32, %c0_i32_0 : i32, i32
  }
  func.func @transform_4(%arg0: i32) -> (i32, i32) {
    %c0_i32 = arith.constant 0 : i32
    %c0_i32_0 = arith.constant 0 : i32
    %c0_i32_1 = arith.constant 0 : i32
    return %c0_i32, %c0_i32_0 : i32, i32
  }
  func.func @transform_5(%arg0: i32) -> (i32, i32, i32) {
    %c0_i32 = arith.constant 0 : i32
    %c0_i32_0 = arith.constant 0 : i32
    %c0_i32_1 = arith.constant 0 : i32
    %c0_i32_2 = arith.constant 0 : i32
    return %c0_i32, %c0_i32_0, %c0_i32_1 : i32, i32, i32
  }
  func.func @transform_6(%arg0: i32) -> (i32, i32) {
    %c0_i32 = arith.constant 0 : i32
    %c0_i32_0 = arith.constant 0 : i32
    %c0_i32_1 = arith.constant 0 : i32
    return %c0_i32, %c0_i32_0 : i32, i32
  }
  func.func @transform_7(%arg0: i32) -> (i32, i32) {
    %c0_i32 = arith.constant 0 : i32
    %c0_i32_0 = arith.constant 0 : i32
    %c0_i32_1 = arith.constant 0 : i32
    return %c0_i32, %c0_i32_0 : i32, i32
  }
  func.func @transform_8(%arg0: i32) -> (i32, i32) {
    %c0_i32 = arith.constant 0 : i32
    %c0_i32_0 = arith.constant 0 : i32
    %c0_i32_1 = arith.constant 0 : i32
    return %c0_i32, %c0_i32_0 : i32, i32
  }
  func.func @transform_9(%arg0: i32) -> (i32, i32, i32) {
    %c0_i32 = arith.constant 0 : i32
    %c0_i32_0 = arith.constant 0 : i32
    %c0_i32_1 = arith.constant 0 : i32
    %c0_i32_2 = arith.constant 0 : i32
    return %c0_i32, %c0_i32_0, %c0_i32_1 : i32, i32, i32
  }
  func.func @transform_10(%arg0: i32) -> (i32, i32) {
    %c0_i32 = arith.constant 0 : i32
    %c0_i32_0 = arith.constant 0 : i32
    %c0_i32_1 = arith.constant 0 : i32
    return %c0_i32, %c0_i32_0 : i32, i32
  }
  func.func @transform_11(%arg0: i32) -> (i32, i32) {
    %c0_i32 = arith.constant 0 : i32
    %c0_i32_0 = arith.constant 0 : i32
    %c0_i32_1 = arith.constant 0 : i32
    return %c0_i32, %c0_i32_0 : i32, i32
  }
  func.func @transform_12(%arg0: i32) -> (i32, i32) {
    %c0_i32 = arith.constant 0 : i32
    %c0_i32_0 = arith.constant 0 : i32
    %c0_i32_1 = arith.constant 0 : i32
    return %c0_i32, %c0_i32_0 : i32, i32
  }
  func.func @transform_13(%arg0: i32) -> (i32, i32) {
    %c0_i32 = arith.constant 0 : i32
    %c0_i32_0 = arith.constant 0 : i32
    %c0_i32_1 = arith.constant 0 : i32
    return %c0_i32, %c0_i32_0 : i32, i32
  }
  func.func @transform_14(%arg0: i32) -> (i32, i32) {
    %c0_i32 = arith.constant 0 : i32
    %c0_i32_0 = arith.constant 0 : i32
    %c0_i32_1 = arith.constant 0 : i32
    return %c0_i32, %c0_i32_0 : i32, i32
  }
  func.func @transform_15(%arg0: i32) -> (i32, i32) {
    %c0_i32 = arith.constant 0 : i32
    %c0_i32_0 = arith.constant 0 : i32
    return %arg0, %c0_i32 : i32, i32
  }
}

</mosaic_0001>

<bundles_post_ra>
// kernel: cnn_forward.1
= control target key start
LH: loop header
LB: loop body
LE: loop exit
PB: predicated region body
PF: predicated region fallthrough
CT: control target
= control target key end

     0   :  { %v15407_v1 = vmov 0   ;;  %vm1225_vm0 = vcmask 97280   ;;  %vm1514_vm1 = vcmask 1045504   ;;  %vm3162_vm2 = vcmask 130048   ;;  %s15391_s1 = inlined_call_operand.vmem [shape: bf16[140,144], index: 1, kind: input, shape index: {}]   ;;  %s15392_s0 = inlined_call_operand.vmem [shape: bf16[24,64,140], index: 0, kind: input, shape index: {}]   ;;  %s15393_s4 = inlined_call_operand.vmem [shape: bf16[144,72], index: 4, kind: input, shape index: {}]   ;;  %s15394_s3 = inlined_call_operand.vmem [shape: bf16[144,72], index: 3, kind: input, shape index: {}]   ;;  %s15395_s2 = inlined_call_operand.vmem [shape: f32[1,144], index: 2, kind: input, shape index: {}]   ;;  %s15396_s5 = inlined_call_operand.vmem [shape: bf16[5,72,128], index: 5, kind: input, shape index: {}]   ;;  %s15397_s8 = inlined_call_operand.vmem [shape: bf16[128,64], index: 8, kind: input, shape index: {}]   ;;  %s15398_s7 = inlined_call_operand.vmem [shape: bf16[128,64], index: 7, kind: input, shape index: {}]   ;;  %s15399_s6 = inlined_call_operand.vmem [shape: f32[1,128], index: 6, kind: input, shape index: {}]   ;;  %s15400_s9 = inlined_call_operand.vmem [shape: bf16[4,64,128], index: 9, kind: input, shape index: {}]   ;;  %s15401_s11 = inlined_call_operand.vmem [shape: bf16[128,128], index: 11, kind: input, shape index: {}]   ;;  %s15402_s13 = inlined_call_operand.vmem [shape: bf16[128,128], index: 13, kind: input, shape index: {}]   ;;  %s15403_s10 = inlined_call_operand.vmem [shape: f32[1,128], index: 10, kind: input, shape index: {}]   ;;  %s15404_s12 = inlined_call_operand.vmem [shape: f32[1,128], index: 12, kind: input, shape index: {}]   ;;  %s15405_s14 = inlined_call_operand.vmem [shape: f32[1,128], index: 14, kind: input, shape index: {}]   ;;  %s15406_s15 = inlined_call_operand.vmem [shape: f32[64,128], index: 15, kind: output, shape index: {}]  }
   0x1   :  { %v11286_v0 = vld [vmem:[%s15391_s1 + $0x4] ss:$8 sps:$4 sm:$0xff]   ;;  %3451 = vmatprep.subr.bf16.mxu1 %v15407_v1  ;;  %v11288_v2 = vld [vmem:[%s15391_s1] ss:$8 sps:$4 sm:$0xff]   ;;  %v11289_v3 = vld [vmem:[%s15391_s1 + $0x14] ss:$8 sps:$4 sm:$0xff]  }
   0x2   :  { %1521 = vmatprep.subr.bf16.mxu0 %v11286_v0  ;;  %v11291_v4 = vld [vmem:[%s15391_s1 + $0x10] ss:$8 sps:$4 sm:$0xff]   ;;  %v11292_v5 = vld [vmem:[%s15391_s1 + $0x24] ss:$8 sps:$4 sm:$0xff]   ;;  %v11294_v6 = vld [vmem:[%s15391_s1 + $0x20] ss:$8 sps:$4 sm:$0xff]  }
   0x3   :  { %1522 = vmatpush1.bf16.msra.mxu0 %v11288_v2  ;;  %v11295_v7 = vld [vmem:[%s15391_s1 + $0x34] ss:$8 sps:$4 sm:$0xff]   ;;  %v11297_v8 = vld [vmem:[%s15391_s1 + $0x30] ss:$8 sps:$4 sm:$0xff]   ;;  %v11298_v9 = vld [vmem:[%s15391_s1 + $0x44] ss:$8 sps:$4 sm:$0xff]  }
   0x4   :  { %1523 = vmatprep.subr.bf16.mxu0 %v11289_v3  ;;  %v11315_v10 = vld [vmem:[%s15392_s0 + $0x4] ss:$8 sps:$4 sm:$0xff]   ;;  %v11300_v11 = vld [vmem:[%s15391_s1 + $0x40] ss:$8 sps:$4 sm:$0xff]   ;;  %v11301_v12 = vld [vmem:[%s15391_s1 + $0x54] ss:$8 sps:$4 sm:$0xff]  }
   0x5   :  { %9418 = vmatprep.mubr.msk.bf16.mxu0 %vm1225_vm0, %v11315_v10  ;;  %v11303_v13 = vld [vmem:[%s15391_s1 + $0x50] ss:$8 sps:$4 sm:$0xff]   ;;  %v11304_v14 = vld [vmem:[%s15391_s1 + $0x64] ss:$8 sps:$4 sm:$0xff]   ;;  %v11306_v15 = vld [vmem:[%s15391_s1 + $0x60] ss:$8 sps:$4 sm:$0xff]  }
   0x6   :  { %v11307_v16 = vld [vmem:[%s15391_s1 + $0x74] ss:$8 sps:$4 sm:$0xff]   ;;  %v11309_v17 = vld [vmem:[%s15391_s1 + $0x70] ss:$8 sps:$4 sm:$0xff]   ;;  %v11313_v21 = vld [vmem:[%s15392_s0] ss:$8 sps:$4 sm:$0xff]  }
   0x7   :  { %1524 = vmatpush1.bf16.msra.mxu0 %v11291_v4  ;;  %v11310_v18 = vld [vmem:[%s15391_s1 + $0x84] ss:$8 sps:$4 sm:$0x3f]   ;;  %v11312_v19 = vld [vmem:[%s15391_s1 + $0x80] ss:$8 sps:$4 sm:$0x3f]  }
   0x8   :  { %1525 = vmatprep.subr.bf16.mxu0 %v11292_v5  ;;  %v1516_v20 = vsel %vm1514_vm1, %v11312_v19, 0  ;;  %v11316_v22 = vld [vmem:[%s15393_s4] sm:$0xff]   ;;  %v11317_v23 = vld [vmem:[%s15392_s0 + $0x14] ss:$8 sps:$4 sm:$0xff]   ;;  %v11349_v24 = vld [vmem:[%s15393_s4 + $0x8] sm:$0xff]   ;;  %vm5604_vm3 = vcmask 1043456  }
   0x9   :  { %v11319_v25 = vld [vmem:[%s15392_s0 + $0x10] ss:$8 sps:$4 sm:$0xff]   ;;  %v11320_v26 = vld [vmem:[%s15392_s0 + $0x24] ss:$8 sps:$4 sm:$0xff]   ;;  %v11322_v27 = vld [vmem:[%s15392_s0 + $0x20] ss:$8 sps:$4 sm:$0xff]  }
   0xa   :  { %v11323_v28 = vld [vmem:[%s15392_s0 + $0x34] ss:$8 sps:$4 sm:$0xff]   ;;  %v11325_v29 = vld [vmem:[%s15392_s0 + $0x30] ss:$8 sps:$4 sm:$0xff]   ;;  %v11326_v30 = vld [vmem:[%s15392_s0 + $0x44] ss:$8 sps:$4 sm:$0xff]  }
   0xb   :  { %1526 = vmatpush1.bf16.msra.mxu0 %v11294_v6  ;;  %v11328_v31 = vld [vmem:[%s15392_s0 + $0x40] ss:$8 sps:$4 sm:$0xff]   ;;  %v11329_v32 = vld [vmem:[%s15392_s0 + $0x54] ss:$8 sps:$4 sm:$0xff]   ;;  %v11331_v33 = vld [vmem:[%s15392_s0 + $0x50] ss:$8 sps:$4 sm:$0xff]  }
   0xc   :  { %1527 = vmatprep.subr.bf16.mxu0 %v11295_v7  ;;  %v11332_v34 = vld [vmem:[%s15392_s0 + $0x64] ss:$8 sps:$4 sm:$0xff]   ;;  %v11381_v35 = vld [vmem:[%s15393_s4 + $0x10] sm:$0xff]   ;;  %v11334_v36 = vld [vmem:[%s15392_s0 + $0x60] ss:$8 sps:$4 sm:$0xff]   ;;  %vm5507_vm4 = vcmask 588800  }
   0xd   :  { %v11335_v37 = vld [vmem:[%s15392_s0 + $0x74] ss:$8 sps:$4 sm:$0xff]   ;;  %v11337_v38 = vld [vmem:[%s15392_s0 + $0x70] ss:$8 sps:$4 sm:$0xff]   ;;  %v11338_v39 = vld [vmem:[%s15392_s0 + $0x84] ss:$8 sps:$4 sm:$0xff]  }
   0xe   :  { %v11388_v40 = vld [vmem:[%s15394_s3] sm:$0xff]   ;;  %v11341_v42 = vld [vmem:[%s15392_s0 + $0x94] ss:$8 sps:$4 sm:$0xff]   ;;  %v11391_v43 = vld [vmem:[%s15394_s3 + $0x8] sm:$0xff]   ;;  %vm8469_vm5 = vcmask 523264  }
   0xf   :  { %1528 = vmatpush1.bf16.msra.mxu0 %v11297_v8  ;;  %v11340_v41 = vld [vmem:[%s15392_s0 + $0x80] ss:$8 sps:$4 sm:$0xff]   ;;  %3452 = vmatpush1.bf16.msra.mxu1 %v11388_v40  ;;  %v11393_v44 = vld [vmem:[%s15394_s3 + $0x10] sm:$0xff]   ;;  %v11396_v45 = vld [vmem:[%s15394_s3 + $0x18] sm:$0xff]  }
  0x10   :  { %1529 = vmatprep.subr.bf16.mxu0 %v11298_v9  ;;  %3453 = vmatprep.subr.bf16.mxu1 %v15407_v1  ;;  %v11343_v46 = vld [vmem:[%s15392_s0 + $0x90] ss:$8 sps:$4 sm:$0xff]   ;;  %v11344_v47 = vld [vmem:[%s15392_s0 + $0xa4] ss:$8 sps:$4 sm:$0xff]   ;;  %v11346_v50 = vld [vmem:[%s15392_s0 + $0xa0] ss:$8 sps:$4 sm:$0xff]  }
  0x11   :  { %v11398_v48 = vld [vmem:[%s15394_s3 + $0x20] sm:$0xff]   ;;  %v11401_v49 = vld [vmem:[%s15394_s3 + $0x28] sm:$0xff]   ;;  %v11347_v51 = vld [vmem:[%s15392_s0 + $0xb4] ss:$8 sps:$4 sm:$0xff]  }
  0x12   :  { %v11403_v52 = vld [vmem:[%s15394_s3 + $0x30] sm:$0xff]   ;;  %v11351_v54 = vld [vmem:[%s15392_s0 + $0xc4] ss:$8 sps:$4 sm:$0xff]   ;;  %v11406_v55 = vld [vmem:[%s15394_s3 + $0x38] sm:$0xff]  }
  0x13   :  { %1530 = vmatpush1.bf16.msra.mxu0 %v11300_v11  ;;  %3454 = vmatpush1.bf16.msra.mxu1 %v11391_v43  ;;  %v11350_v53 = vld [vmem:[%s15392_s0 + $0xb0] ss:$8 sps:$4 sm:$0xff]   ;;  %v11408_v56 = vld [vmem:[%s15394_s3 + $0x40] sm:$0xff]   ;;  %v11354_v58 = vld [vmem:[%s15392_s0 + $0xd4] ss:$8 sps:$4 sm:$0xff]  }
  0x14   :  { %1531 = vmatprep.subr.bf16.mxu0 %v11301_v12  ;;  %3455 = vmatprep.subr.bf16.mxu1 %v15407_v1  ;;  %v11353_v57 = vld [vmem:[%s15392_s0 + $0xc0] ss:$8 sps:$4 sm:$0xff]   ;;  %v11356_v59 = vld [vmem:[%s15392_s0 + $0xd0] ss:$8 sps:$4 sm:$0xff]   ;;  %v11357_v60 = vld [vmem:[%s15392_s0 + $0xe4] ss:$8 sps:$4 sm:$0xff]  }
  0x15   :  { %v11359_v61 = vld [vmem:[%s15392_s0 + $0xe0] ss:$8 sps:$4 sm:$0xff]   ;;  %v11360_v62 = vld [vmem:[%s15392_s0 + $0xf4] ss:$8 sps:$4 sm:$0xff]   ;;  %v11362_v63 = vld [vmem:[%s15392_s0 + $0xf0] ss:$8 sps:$4 sm:$0xff]  }
  0x16   :  { %v11363_v0 = vld [vmem:[%s15392_s0 + $0x104] ss:$8 sps:$4 sm:$0xff]   ;;  %v11365_v2 = vld [vmem:[%s15392_s0 + $0x100] ss:$8 sps:$4 sm:$0xff]   ;;  %v11366_v3 = vld [vmem:[%s15392_s0 + $0x114] ss:$8 sps:$4 sm:$0xff]  }
  0x17   :  { %1532 = vmatpush1.bf16.msra.mxu0 %v11303_v13  ;;  %3456 = vmatpush1.bf16.msra.mxu1 %v11393_v44  ;;  %v11424_v4 = vld [vmem:[%s15393_s4 + $0x18] sm:$0xff]   ;;  %v11369_v6 = vld [vmem:[%s15392_s0 + $0x124] ss:$8 sps:$4 sm:$0xff]   ;;  %v11371_v7 = vld [vmem:[%s15392_s0 + $0x120] ss:$8 sps:$4 sm:$0xff]  }
  0x18   :  { %1533 = vmatprep.subr.bf16.mxu0 %v11304_v14  ;;  %3457 = vmatprep.subr.bf16.mxu1 %v15407_v1  ;;  %v11368_v5 = vld [vmem:[%s15392_s0 + $0x110] ss:$8 sps:$4 sm:$0xff]   ;;  %v11372_v8 = vld [vmem:[%s15392_s0 + $0x134] ss:$8 sps:$4 sm:$0xff]   ;;  %v11375_v10 = vld [vmem:[%s15392_s0 + $0x144] ss:$8 sps:$4 sm:$0xff]  }
  0x19   :  { %v11374_v9 = vld [vmem:[%s15392_s0 + $0x130] ss:$8 sps:$4 sm:$0xff]   ;;  %v11377_v11 = vld [vmem:[%s15392_s0 + $0x140] ss:$8 sps:$4 sm:$0xff]   ;;  %v11378_v12 = vld [vmem:[%s15392_s0 + $0x154] ss:$8 sps:$4 sm:$0xff]  }
  0x1a   :  { %v11380_v13 = vld [vmem:[%s15392_s0 + $0x150] ss:$8 sps:$4 sm:$0xff]   ;;  %v11382_v14 = vld [vmem:[%s15392_s0 + $0x164] ss:$8 sps:$4 sm:$0xff]   ;;  %v11392_v19 = vld [vmem:[%s15392_s0 + $0x180] ss:$8 sps:$4 sm:$0xff]  }
  0x1b   :  { %1534 = vmatpush1.bf16.msra.mxu0 %v11306_v15  ;;  %3458 = vmatpush1.bf16.msra.mxu1 %v11396_v45  ;;  %v11384_v15 = vld [vmem:[%s15392_s0 + $0x160] ss:$8 sps:$4 sm:$0xff]  }
  0x1c   :  { %1535 = vmatprep.subr.bf16.mxu0 %v11307_v16  ;;  %3459 = vmatprep.subr.bf16.mxu1 %v15407_v1  ;;  %v11385_v16 = vld [vmem:[%s15392_s0 + $0x174] ss:$8 sps:$4 sm:$0xff]  }
  0x1f   :  { %1536 = vmatpush1.bf16.msra.mxu0 %v11309_v17  ;;  %3460 = vmatpush1.bf16.msra.mxu1 %v11398_v48  ;;  %v11387_v17 = vld [vmem:[%s15392_s0 + $0x170] ss:$8 sps:$4 sm:$0xff]  }
  0x20   :  { %9417 = vmatprep.subr.msk.bf16.mxu0 %vm1514_vm1, %v11310_v18  ;;  %3461 = vmatprep.subr.bf16.mxu1 %v15407_v1  ;;  %v11389_v18 = vld [vmem:[%s15392_s0 + $0x184] ss:$8 sps:$4 sm:$0xff]  }
  0x23   :  { %1538 = vmatpush1.bf16.msra.mxu0 %v1516_v20  ;;  %3462 = vmatpush1.bf16.msra.mxu1 %v11401_v49  ;;  %v11394_v20 = vld [vmem:[%s15392_s0 + $0x194] ss:$8 sps:$4 sm:$0xff]   ;;  %v11457_v49 = vld [vmem:[%s15393_s4 + $0x20] sm:$0xff]  }
  0x24   :  { %4324 = vmatprep.subr.bf16.mxu0 %v15407_v1  ;;  %3463 = vmatprep.subr.bf16.mxu1 %v15407_v1 }
  0x26   :  { %1554 = vmatmul.mubr.bf16.vlgmr.msra.gmra.mrb[0].mxu0 %v11313_v21  ;;  %v11397_v21 = vld [vmem:[%s15392_s0 + $0x190] ss:$8 sps:$4 sm:$0xff]  }
  0x27   :  { %4325 = vmatpush1.bf16.msra.mxu0 %v11316_v22  ;;  %9419 = vmatprep.mubr.msk.bf16.mxu0 %vm1225_vm0, %v11317_v23  ;;  %v263_v22 = vlaneseq  ;;  %v11399_v23 = vld [vmem:[%s15392_s0 + $0x1a4] ss:$8 sps:$4 sm:$0xff]  }
  0x28   :  { %4326 = vmatprep.subr.bf16.mxu0 %v15407_v1  ;;  %3464 = vmatpush1.bf16.msra.mxu1 %v11403_v52  ;;  %v11411_v52 = vld [vmem:[%s15392_s0 + $0x1c0] ss:$8 sps:$4 sm:$0xff]  }
  0x29   :  { %3465 = vmatprep.subr.bf16.mxu1 %v15407_v1 }
  0x2b   :  { %4327 = vmatpush1.bf16.msra.mxu0 %v11349_v24  ;;  %v264_v24 = vshrl.u32 %v263_v22, 7 }
  0x2c   :  { %4328 = vmatprep.subr.bf16.mxu0 %v15407_v1  ;;  %3466 = vmatpush1.bf16.msra.mxu1 %v11406_v55  ;;  %v11412_v55 = vld [vmem:[%s15392_s0 + $0x1d4] ss:$8 sps:$4 sm:$0xff]  }
  0x2d   :  { %3467 = vmatprep.subr.bf16.mxu1 %v15407_v1 }
  0x2e   :  { %1564 = vmatmul.mubr.bf16.gmra.mrb[4].mxu0 %v11319_v25  ;;  %v11402_v25 = vld [vmem:[%s15392_s0 + $0x1a0] ss:$8 sps:$4 sm:$0xff]  }
  0x2f   :  { %9420 = vmatprep.mubr.msk.bf16.mxu0 %vm1225_vm0, %v11320_v26  ;;  %4329 = vmatpush1.bf16.msra.mxu0 %v11381_v35  ;;  %v265_v26 = vsub.s32 0, %v264_v24  ;;  %v11407_v35 = vld [vmem:[%s15392_s0 + $0x1b0] ss:$8 sps:$4 sm:$0xff]  }
  0x30   :  { %4330 = vmatprep.subr.bf16.mxu0 %v15407_v1  ;;  %3468 = vmatpush1.bf16.msra.mxu1 %v11408_v56 }
  0x33   :  { %4331 = vmatpush1.bf16.msra.mxu0 %v11424_v4 }
  0x34   :  { %4332 = vmatprep.subr.bf16.mxu0 %v15407_v1 }
  0x36   :  { %1574 = vmatmul.mubr.bf16.gmra.mrb[8].mxu0 %v11322_v27  ;;  %v261_v27 = vld [vmem:[%s15395_s2] sm:$0x3] }
  0x37   :  { %9421 = vmatprep.mubr.msk.bf16.mxu0 %vm1225_vm0, %v11323_v28  ;;  %v269_v28 = vsub.s32 1, %v264_v24  ;;  %4333 = vmatpush1.bf16.msra.mxu0 %v11457_v49  ;;  %v11418_v24 = vld [vmem:[%s15392_s0 + $0x1f4] ss:$8 sps:$4 sm:$0xff]  }
  0x38   :  { %4334 = vmatprep.subr.bf16.mxu0 %v15407_v1 }
  0x3e   :  { %1584 = vmatmul.mubr.bf16.gmra.mrb[12].mxu0 %v11325_v29  ;;  %v11404_v29 = vld [vmem:[%s15392_s0 + $0x1b4] ss:$8 sps:$4 sm:$0xff]  }
  0x3f   :  { %9422 = vmatprep.mubr.msk.bf16.mxu0 %vm1225_vm0, %v11326_v30  ;;  %v12075_v30 = vrot.slane %v261_v27, %v265_v26 }
  0x46   :  { %1594 = vmatmul.mubr.bf16.gmra.mrb[16].mxu0 %v11328_v31  ;;  %v12077_v31 = vrot.slane %v261_v27, %v269_v28 }
  0x47   :  { %9423 = vmatprep.mubr.msk.bf16.mxu0 %vm1225_vm0, %v11329_v32 }
  0x4e   :  { %1604 = vmatmul.mubr.bf16.gmra.mrb[20].mxu0 %v11331_v33 }
  0x4f   :  { %9424 = vmatprep.mubr.msk.bf16.mxu0 %vm1225_vm0, %v11332_v34 }
  0x56   :  { %1614 = vmatmul.mubr.bf16.gmra.mrb[24].mxu0 %v11334_v36 }
  0x57   :  { %9425 = vmatprep.mubr.msk.bf16.mxu0 %vm1225_vm0, %v11335_v37 }
  0x5e   :  { %1624 = vmatmul.mubr.bf16.gmra.mrb[28].mxu0 %v11337_v38  ;;  %v11409_v38 = vld [vmem:[%s15392_s0 + $0x1c4] ss:$8 sps:$4 sm:$0xff]  }
  0x5f   :  { %9426 = vmatprep.mubr.msk.bf16.mxu0 %vm1225_vm0, %v11338_v39 }
  0x66   :  { %1634 = vmatmul.mubr.bf16.gmra.mrb[32].mxu0 %v11340_v41 }
  0x67   :  { %9427 = vmatprep.mubr.msk.bf16.mxu0 %vm1225_vm0, %v11341_v42 }
  0x6e   :  { %1644 = vmatmul.mubr.bf16.gmra.mrb[36].mxu0 %v11343_v46 }
  0x6f   :  { %9428 = vmatprep.mubr.msk.bf16.mxu0 %vm1225_vm0, %v11344_v47 }
  0x76   :  { %1654 = vmatmul.mubr.bf16.gmra.mrb[40].mxu0 %v11346_v50 }
  0x77   :  { %9429 = vmatprep.mubr.msk.bf16.mxu0 %vm1225_vm0, %v11347_v51 }
  0x7e   :  { %1664 = vmatmul.mubr.bf16.gmra.mrb[44].mxu0 %v11350_v53 }
  0x7f   :  { %9430 = vmatprep.mubr.msk.bf16.mxu0 %vm1225_vm0, %v11351_v54 }
  0x86   :  { %1674 = vmatmul.mubr.bf16.gmra.mrb[48].mxu0 %v11353_v57 }
  0x87   :  { %9431 = vmatprep.mubr.msk.bf16.mxu0 %vm1225_vm0, %v11354_v58 }
  0x8e   :  { %1684 = vmatmul.mubr.bf16.gmra.mrb[52].mxu0 %v11356_v59 }
  0x8f   :  { %9432 = vmatprep.mubr.msk.bf16.mxu0 %vm1225_vm0, %v11357_v60 }
  0x96   :  { %1694 = vmatmul.mubr.bf16.gmra.mrb[56].mxu0 %v11359_v61 }
  0x97   :  { %9433 = vmatprep.mubr.msk.bf16.mxu0 %vm1225_vm0, %v11360_v62 }
  0x9e   :  { %1704 = vmatmul.mubr.bf16.gmra.mrb[60].mxu0 %v11362_v63 }
  0x9f   :  { %9434 = vmatprep.mubr.msk.bf16.mxu0 %vm1225_vm0, %v11363_v0 }
  0xa6   :  { %1714 = vmatmul.mubr.bf16.gmra.mrb[64].mxu0 %v11365_v2 }
  0xa7   :  { %9435 = vmatprep.mubr.msk.bf16.mxu0 %vm1225_vm0, %v11366_v3 }
  0xae   :  { %1724 = vmatmul.mubr.bf16.gmra.mrb[68].mxu0 %v11368_v5  ;;  %v11414_v5 = vld [vmem:[%s15392_s0 + $0x1d0] ss:$8 sps:$4 sm:$0xff]  }
  0xaf   :  { %9436 = vmatprep.mubr.msk.bf16.mxu0 %vm1225_vm0, %v11369_v6 }
  0xb6   :  { %1734 = vmatmul.mubr.bf16.gmra.mrb[72].mxu0 %v11371_v7 }
  0xb7   :  { %9437 = vmatprep.mubr.msk.bf16.mxu0 %vm1225_vm0, %v11372_v8  ;;  %v11415_v8 = vld [vmem:[%s15392_s0 + $0x1e4] ss:$8 sps:$4 sm:$0xff]  }
  0xbe   :  { %1744 = vmatmul.mubr.bf16.gmra.mrb[76].mxu0 %v11374_v9 }
  0xbf   :  { %9438 = vmatprep.mubr.msk.bf16.mxu0 %vm1225_vm0, %v11375_v10 }
  0xc6   :  { %1754 = vmatmul.mubr.bf16.gmra.mrb[80].mxu0 %v11377_v11 }
  0xc7   :  { %9439 = vmatprep.mubr.msk.bf16.mxu0 %vm1225_vm0, %v11378_v12 }
  0xce   :  { %1764 = vmatmul.mubr.bf16.gmra.mrb[84].mxu0 %v11380_v13 }
  0xcf   :  { %9440 = vmatprep.mubr.msk.bf16.mxu0 %vm1225_vm0, %v11382_v14 }
  0xd6   :  { %1774 = vmatmul.mubr.bf16.gmra.mrb[88].mxu0 %v11384_v15 }
  0xd7   :  { %9441 = vmatprep.mubr.msk.bf16.mxu0 %vm1225_vm0, %v11385_v16 }
  0xde   :  { %1784 = vmatmul.mubr.bf16.gmra.mrb[92].mxu0 %v11387_v17 }
  0xdf   :  { %9442 = vmatprep.mubr.msk.bf16.mxu0 %vm1225_vm0, %v11389_v18 }
  0xe6   :  { %1794 = vmatmul.mubr.bf16.gmra.mrb[96].mxu0 %v11392_v19 }
  0xe7   :  { %9443 = vmatprep.mubr.msk.bf16.mxu0 %vm1225_vm0, %v11394_v20 }
  0xee   :  { %1804 = vmatmul.mubr.bf16.gmra.mrb[100].mxu0 %v11397_v21  ;;  %v11417_v21 = vld [vmem:[%s15392_s0 + $0x1e0] ss:$8 sps:$4 sm:$0xff]  }
  0xef   :  { %9444 = vmatprep.mubr.msk.bf16.mxu0 %vm1225_vm0, %v11399_v23 }
  0xf6   :  { %1814 = vmatmul.mubr.bf16.gmra.mrb[104].mxu0 %v11402_v25 }
  0xf7   :  { %9445 = vmatprep.mubr.msk.bf16.mxu0 %vm1225_vm0, %v11404_v29 }
  0xf9   :  { %v1555_v32 = vpop.f32.mrb[0].mxu0 }
  0xfa   :  { %v1556_v33 = vadd.f32 %v1555_v32, %v12075_v30  ;;  %v1557_v34 = vpop.f32.mrb[1].mxu0 }
  0xfb   :  { %v1558_v36 = vadd.f32 %v1557_v34, %v12077_v31  ;;  %v1559_v37 = vpop.f32.mrb[2].mxu0 }
  0xfc   :  { %v1560_v39 = vadd.f32 %v1559_v37, %v12075_v30  ;;  %v1561_v40 = vpop.f32.mrb[3].mxu0  ;;  %v2514_v42 = vmax.f32 %v1556_v33, 0.0 }
  0xfd   :  { %v1562_v41 = vadd.f32 %v1561_v40, %v12077_v31  ;;  %v2515_v44 = vmax.f32 %v1558_v36, 0.0 }
  0xfe   :  { %v2516_v43 = vmax.f32 %v1560_v39, 0.0  ;;  %1824 = vmatmul.mubr.bf16.gmra.mrb[108].mxu0 %v11407_v35  ;;  %v11420_v39 = vld [vmem:[%s15392_s0 + $0x1f0] ss:$8 sps:$4 sm:$0xff]  }
  0xff   :  { %v2517_v45 = vmax.f32 %v1562_v41, 0.0  ;;  %9446 = vmatprep.mubr.msk.bf16.mxu0 %vm1225_vm0, %v11409_v38 }
 0x100   :  { %v12091_v46 = vpack.c.bf16 %v2516_v43, %v2514_v42  ;;  %v11421_v42 = vld [vmem:[%s15392_s0 + $0x204] ss:$8 sps:$4 sm:$0xff]  }
 0x101   :  { %v1565_v47 = vpop.f32.mrb[4].mxu0  ;;  %v12093_v48 = vpack.c.bf16 %v2517_v45, %v2515_v44 }
 0x102   :  { %v1566_v50 = vadd.f32 %v1565_v47, %v12075_v30  ;;  %v1567_v51 = vpop.f32.mrb[5].mxu0 }
 0x103   :  { %v1568_v53 = vadd.f32 %v1567_v51, %v12077_v31  ;;  %v1569_v54 = vpop.f32.mrb[6].mxu0  ;;  %9523 = vmatprep.mubr.msk.bf16.mxu1 %vm3162_vm2, %v12093_v48 }
 0x104   :  { %v1570_v56 = vadd.f32 %v1569_v54, %v12075_v30  ;;  %v1571_v57 = vpop.f32.mrb[7].mxu0  ;;  %3484 = vmatmul.mubr.bf16.vlgmr.msra.gmra.mrb[0].mxu1 %v12091_v46  ;;  %v2518_v59 = vmax.f32 %v1566_v50, 0.0 }
 0x105   :  { %v1572_v58 = vadd.f32 %v1571_v57, %v12077_v31  ;;  %v2519_v61 = vmax.f32 %v1568_v53, 0.0  ;;  %v11423_v57 = vld [vmem:[%s15392_s0 + $0x200] ss:$8 sps:$4 sm:$0xff]  }
 0x106   :  { %v2520_v60 = vmax.f32 %v1570_v56, 0.0  ;;  %1834 = vmatmul.mubr.bf16.gmra.mrb[112].mxu0 %v11411_v52 }
 0x107   :  { %v2521_v62 = vmax.f32 %v1572_v58, 0.0  ;;  %9447 = vmatprep.mubr.msk.bf16.mxu0 %vm1225_vm0, %v11412_v55 }
 0x108   :  { %v12113_v63 = vpack.c.bf16 %v2520_v60, %v2518_v59  ;;  %v11425_v60 = vld [vmem:[%s15392_s0 + $0x214] ss:$8 sps:$4 sm:$0xff]  }
 0x109   :  { %v12115_v0 = vpack.c.bf16 %v2521_v62, %v2519_v61  ;;  %v1575_v2 = vpop.f32.mrb[8].mxu0 }
 0x10a   :  { %v1576_v3 = vadd.f32 %v1575_v2, %v12075_v30  ;;  %v1577_v4 = vpop.f32.mrb[9].mxu0 }
 0x10b   :  { %v1578_v6 = vadd.f32 %v1577_v4, %v12077_v31  ;;  %v1579_v7 = vpop.f32.mrb[10].mxu0  ;;  %9524 = vmatprep.mubr.msk.bf16.mxu1 %vm3162_vm2, %v12115_v0 }
 0x10c   :  { %v1580_v9 = vadd.f32 %v1579_v7, %v12075_v30  ;;  %v1581_v10 = vpop.f32.mrb[11].mxu0  ;;  %3492 = vmatmul.mubr.bf16.gmra.mrb[4].mxu1 %v12113_v63  ;;  %v2522_v12 = vmax.f32 %v1576_v3, 0.0 }
 0x10d   :  { %v1582_v11 = vadd.f32 %v1581_v10, %v12077_v31  ;;  %v2523_v14 = vmax.f32 %v1578_v6, 0.0 }
 0x10e   :  { %v2524_v13 = vmax.f32 %v1580_v9, 0.0  ;;  %1844 = vmatmul.mubr.bf16.gmra.mrb[116].mxu0 %v11414_v5 }
 0x10f   :  { %v2525_v15 = vmax.f32 %v1582_v11, 0.0  ;;  %9448 = vmatprep.mubr.msk.bf16.mxu0 %vm1225_vm0, %v11415_v8 }
 0x110   :  { %v12131_v16 = vpack.c.bf16 %v2524_v13, %v2522_v12  ;;  %v11427_v12 = vld [vmem:[%s15392_s0 + $0x210] ss:$8 sps:$4 sm:$0xff]  }
 0x111   :  { %v12133_v17 = vpack.c.bf16 %v2525_v15, %v2523_v14  ;;  %v1585_v18 = vpop.f32.mrb[12].mxu0  ;;  %v11428_v15 = vld [vmem:[%s15392_s0 + $0x224] ss:$8 sps:$4 sm:$0xff]  }
 0x112   :  { %v1586_v19 = vadd.f32 %v1585_v18, %v12075_v30  ;;  %v1587_v20 = vpop.f32.mrb[13].mxu0 }
 0x113   :  { %v1588_v22 = vadd.f32 %v1587_v20, %v12077_v31  ;;  %v1589_v23 = vpop.f32.mrb[14].mxu0  ;;  %9525 = vmatprep.mubr.msk.bf16.mxu1 %vm3162_vm2, %v12133_v17 }
 0x114   :  { %v1590_v25 = vadd.f32 %v1589_v23, %v12075_v30  ;;  %v1591_v26 = vpop.f32.mrb[15].mxu0  ;;  %3500 = vmatmul.mubr.bf16.gmra.mrb[8].mxu1 %v12131_v16  ;;  %v2526_v28 = vmax.f32 %v1586_v19, 0.0 }
 0x115   :  { %v1592_v27 = vadd.f32 %v1591_v26, %v12077_v31  ;;  %v2527_v32 = vmax.f32 %v1588_v22, 0.0 }
 0x116   :  { %v2528_v29 = vmax.f32 %v1590_v25, 0.0  ;;  %1854 = vmatmul.mubr.bf16.gmra.mrb[120].mxu0 %v11417_v21 }
 0x117   :  { %v2529_v33 = vmax.f32 %v1592_v27, 0.0  ;;  %9449 = vmatprep.mubr.msk.bf16.mxu0 %vm1225_vm0, %v11418_v24 }
 0x118   :  { %v12149_v34 = vpack.c.bf16 %v2528_v29, %v2526_v28 }
 0x119   :  { %v12151_v35 = vpack.c.bf16 %v2529_v33, %v2527_v32  ;;  %v1595_v36 = vpop.f32.mrb[16].mxu0  ;;  %v11430_v32 = vld [vmem:[%s15392_s0 + $0x220] ss:$8 sps:$4 sm:$0xff]  }
 0x11a   :  { %v1596_v37 = vadd.f32 %v1595_v36, %v12075_v30  ;;  %v1597_v38 = vpop.f32.mrb[17].mxu0 }
 0x11b   :  { %v1598_v40 = vadd.f32 %v1597_v38, %v12077_v31  ;;  %v1599_v41 = vpop.f32.mrb[18].mxu0  ;;  %9526 = vmatprep.mubr.msk.bf16.mxu1 %vm3162_vm2, %v12151_v35 }
 0x11c   :  { %v1600_v43 = vadd.f32 %v1599_v41, %v12075_v30  ;;  %v1601_v44 = vpop.f32.mrb[19].mxu0  ;;  %3508 = vmatmul.mubr.bf16.gmra.mrb[12].mxu1 %v12149_v34  ;;  %v2530_v47 = vmax.f32 %v1596_v37, 0.0  ;;  %v11431_v37 = vld [vmem:[%s15392_s0 + $0x234] ss:$8 sps:$4 sm:$0xff]  }
 0x11d   :  { %v1602_v45 = vadd.f32 %v1601_v44, %v12077_v31  ;;  %v2531_v50 = vmax.f32 %v1598_v40, 0.0 }
 0x11e   :  { %v2532_v49 = vmax.f32 %v1600_v43, 0.0  ;;  %1864 = vmatmul.mubr.bf16.gmra.mrb[124].mxu0 %v11420_v39 }
 0x11f   :  { %v2533_v51 = vmax.f32 %v1602_v45, 0.0  ;;  %9450 = vmatprep.mubr.msk.bf16.mxu0 %vm1225_vm0, %v11421_v42 }
 0x120   :  { %v12167_v52 = vpack.c.bf16 %v2532_v49, %v2530_v47 }
 0x121   :  { %v12169_v53 = vpack.c.bf16 %v2533_v51, %v2531_v50  ;;  %v1605_v54 = vpop.f32.mrb[20].mxu0 }
 0x122   :  { %v1606_v55 = vadd.f32 %v1605_v54, %v12075_v30  ;;  %v1607_v56 = vpop.f32.mrb[21].mxu0  ;;  %v11433_v54 = vld [vmem:[%s15392_s0 + $0x230] ss:$8 sps:$4 sm:$0xff]  }
 0x123   :  { %v1608_v58 = vadd.f32 %v1607_v56, %v12077_v31  ;;  %v1609_v59 = vpop.f32.mrb[22].mxu0  ;;  %9527 = vmatprep.mubr.msk.bf16.mxu1 %vm3162_vm2, %v12169_v53 }
 0x124   :  { %v1610_v61 = vadd.f32 %v1609_v59, %v12075_v30  ;;  %v1611_v62 = vpop.f32.mrb[23].mxu0  ;;  %3516 = vmatmul.mubr.bf16.gmra.mrb[16].mxu1 %v12167_v52  ;;  %v2534_v3 = vmax.f32 %v1606_v55, 0.0 }
 0x125   :  { %v1612_v2 = vadd.f32 %v1611_v62, %v12077_v31  ;;  %v2535_v5 = vmax.f32 %v1608_v58, 0.0 }
 0x126   :  { %v2536_v4 = vmax.f32 %v1610_v61, 0.0  ;;  %1874 = vmatmul.mubr.bf16.gmra.mrb[128].mxu0 %v11423_v57  ;;  %v11434_v57 = vld [vmem:[%s15392_s0 + $0x244] ss:$8 sps:$4 sm:$0xff]  }
 0x127   :  { %v2537_v6 = vmax.f32 %v1612_v2, 0.0  ;;  %9451 = vmatprep.mubr.msk.bf16.mxu0 %vm1225_vm0, %v11425_v60 }
 0x128   :  { %v12185_v7 = vpack.c.bf16 %v2536_v4, %v2534_v3 }
 0x129   :  { %v12187_v8 = vpack.c.bf16 %v2537_v6, %v2535_v5  ;;  %v1615_v9 = vpop.f32.mrb[24].mxu0 }
 0x12a   :  { %v1616_v10 = vadd.f32 %v1615_v9, %v12075_v30  ;;  %v1617_v11 = vpop.f32.mrb[25].mxu0 }
 0x12b   :  { %v1618_v13 = vadd.f32 %v1617_v11, %v12077_v31  ;;  %v1619_v14 = vpop.f32.mrb[26].mxu0  ;;  %9528 = vmatprep.mubr.msk.bf16.mxu1 %vm3162_vm2, %v12187_v8  ;;  %v11436_v11 = vld [vmem:[%s15392_s0 + $0x240] ss:$8 sps:$4 sm:$0xff]  }
 0x12c   :  { %v1620_v18 = vadd.f32 %v1619_v14, %v12075_v30  ;;  %v1621_v19 = vpop.f32.mrb[27].mxu0  ;;  %3524 = vmatmul.mubr.bf16.gmra.mrb[20].mxu1 %v12185_v7  ;;  %v2538_v21 = vmax.f32 %v1616_v10, 0.0  ;;  %v11437_v14 = vld [vmem:[%s15392_s0 + $0x254] ss:$8 sps:$4 sm:$0xff]  }
 0x12d   :  { %v1622_v20 = vadd.f32 %v1621_v19, %v12077_v31  ;;  %v2539_v23 = vmax.f32 %v1618_v13, 0.0 }
 0x12e   :  { %v2540_v22 = vmax.f32 %v1620_v18, 0.0  ;;  %1884 = vmatmul.mubr.bf16.gmra.mrb[132].mxu0 %v11427_v12 }
 0x12f   :  { %v2541_v24 = vmax.f32 %v1622_v20, 0.0  ;;  %9452 = vmatprep.mubr.msk.bf16.mxu0 %vm1225_vm0, %v11428_v15 }
 0x130   :  { %v12203_v25 = vpack.c.bf16 %v2540_v22, %v2538_v21 }
 0x131   :  { %v12205_v26 = vpack.c.bf16 %v2541_v24, %v2539_v23  ;;  %v1625_v27 = vpop.f32.mrb[28].mxu0 }
 0x132   :  { %v1626_v28 = vadd.f32 %v1625_v27, %v12075_v30  ;;  %v1627_v29 = vpop.f32.mrb[29].mxu0 }
 0x133   :  { %v1628_v33 = vadd.f32 %v1627_v29, %v12077_v31  ;;  %v1629_v36 = vpop.f32.mrb[30].mxu0  ;;  %9529 = vmatprep.mubr.msk.bf16.mxu1 %vm3162_vm2, %v12205_v26 }
 0x134   :  { %v1630_v38 = vadd.f32 %v1629_v36, %v12075_v30  ;;  %v1631_v39 = vpop.f32.mrb[31].mxu0  ;;  %3532 = vmatmul.mubr.bf16.gmra.mrb[24].mxu1 %v12203_v25  ;;  %v2542_v41 = vmax.f32 %v1626_v28, 0.0 }
 0x135   :  { %v1632_v40 = vadd.f32 %v1631_v39, %v12077_v31  ;;  %v2543_v43 = vmax.f32 %v1628_v33, 0.0  ;;  %v11439_v33 = vld [vmem:[%s15392_s0 + $0x250] ss:$8 sps:$4 sm:$0xff]  }
 0x136   :  { %v2544_v42 = vmax.f32 %v1630_v38, 0.0  ;;  %1894 = vmatmul.mubr.bf16.gmra.mrb[136].mxu0 %v11430_v32  ;;  %v11440_v38 = vld [vmem:[%s15392_s0 + $0x264] ss:$8 sps:$4 sm:$0xff]  }
 0x137   :  { %v2545_v44 = vmax.f32 %v1632_v40, 0.0  ;;  %9453 = vmatprep.mubr.msk.bf16.mxu0 %vm1225_vm0, %v11431_v37 }
 0x138   :  { %v12221_v45 = vpack.c.bf16 %v2544_v42, %v2542_v41 }
 0x139   :  { %v12223_v47 = vpack.c.bf16 %v2545_v44, %v2543_v43  ;;  %v1635_v49 = vpop.f32.mrb[32].mxu0 }
 0x13a   :  { %v1636_v50 = vadd.f32 %v1635_v49, %v12075_v30  ;;  %v1637_v51 = vpop.f32.mrb[33].mxu0 }
 0x13b   :  { %v1638_v55 = vadd.f32 %v1637_v51, %v12077_v31  ;;  %v1639_v56 = vpop.f32.mrb[34].mxu0  ;;  %9530 = vmatprep.mubr.msk.bf16.mxu1 %vm3162_vm2, %v12223_v47 }
 0x13c   :  { %v1640_v58 = vadd.f32 %v1639_v56, %v12075_v30  ;;  %v1641_v59 = vpop.f32.mrb[35].mxu0  ;;  %3540 = vmatmul.mubr.bf16.gmra.mrb[28].mxu1 %v12221_v45  ;;  %v2546_v61 = vmax.f32 %v1636_v50, 0.0 }
 0x13d   :  { %v1642_v60 = vadd.f32 %v1641_v59, %v12077_v31  ;;  %v2547_v2 = vmax.f32 %v1638_v55, 0.0 }
 0x13e   :  { %v2548_v62 = vmax.f32 %v1640_v58, 0.0  ;;  %1904 = vmatmul.mubr.bf16.gmra.mrb[140].mxu0 %v11433_v54 }
 0x13f   :  { %v2549_v3 = vmax.f32 %v1642_v60, 0.0  ;;  %9454 = vmatprep.mubr.msk.bf16.mxu0 %vm1225_vm0, %v11434_v57  ;;  %v11442_v57 = vld [vmem:[%s15392_s0 + $0x260] ss:$8 sps:$4 sm:$0xff]   ;;  %v11443_v60 = vld [vmem:[%s15392_s0 + $0x274] ss:$8 sps:$4 sm:$0xff]  }
 0x140   :  { %v12239_v4 = vpack.c.bf16 %v2548_v62, %v2546_v61 }
 0x141   :  { %v12241_v5 = vpack.c.bf16 %v2549_v3, %v2547_v2  ;;  %v1645_v6 = vpop.f32.mrb[36].mxu0  ;;  %v11489_v3 = vld [vmem:[%s15393_s4 + $0x28] sm:$0xff]  }
 0x142   :  { %v1646_v9 = vadd.f32 %v1645_v6, %v12075_v30  ;;  %v1647_v10 = vpop.f32.mrb[37].mxu0  ;;  %4335 = vmatpush1.bf16.msra.mxu0 %v11489_v3 }
 0x143   :  { %v1648_v12 = vadd.f32 %v1647_v10, %v12077_v31  ;;  %v1649_v13 = vpop.f32.mrb[38].mxu0  ;;  %9531 = vmatprep.mubr.msk.bf16.mxu1 %vm3162_vm2, %v12241_v5  ;;  %4336 = vmatprep.subr.bf16.mxu0 %v15407_v1 }
 0x144   :  { %v1650_v15 = vadd.f32 %v1649_v13, %v12075_v30  ;;  %v1651_v18 = vpop.f32.mrb[39].mxu0  ;;  %3548 = vmatmul.mubr.bf16.gmra.mrb[32].mxu1 %v12239_v4  ;;  %v2550_v20 = vmax.f32 %v1646_v9, 0.0 }
 0x145   :  { %v1652_v19 = vadd.f32 %v1651_v18, %v12077_v31  ;;  %v2551_v22 = vmax.f32 %v1648_v12, 0.0 }
 0x146   :  { %v2552_v21 = vmax.f32 %v1650_v15, 0.0  ;;  %1914 = vmatmul.mubr.bf16.gmra.mrb[144].mxu0 %v11436_v11 }
 0x147   :  { %v2553_v23 = vmax.f32 %v1652_v19, 0.0  ;;  %9455 = vmatprep.mubr.msk.bf16.mxu0 %vm1225_vm0, %v11437_v14  ;;  %v11445_v19 = vld [vmem:[%s15392_s0 + $0x270] ss:$8 sps:$4 sm:$0xff]  }
 0x148   :  { %v12257_v24 = vpack.c.bf16 %v2552_v21, %v2550_v20 }
 0x149   :  { %v12259_v27 = vpack.c.bf16 %v2553_v23, %v2551_v22  ;;  %v1655_v28 = vpop.f32.mrb[40].mxu0  ;;  %v11446_v22 = vld [vmem:[%s15392_s0 + $0x284] ss:$8 sps:$4 sm:$0xff]  }
 0x14a   :  { %v1656_v29 = vadd.f32 %v1655_v28, %v12075_v30  ;;  %v1657_v32 = vpop.f32.mrb[41].mxu0 }
 0x14b   :  { %v1658_v36 = vadd.f32 %v1657_v32, %v12077_v31  ;;  %v1659_v37 = vpop.f32.mrb[42].mxu0  ;;  %9532 = vmatprep.mubr.msk.bf16.mxu1 %vm3162_vm2, %v12259_v27 }
 0x14c   :  { %v1660_v39 = vadd.f32 %v1659_v37, %v12075_v30  ;;  %v1661_v40 = vpop.f32.mrb[43].mxu0  ;;  %3556 = vmatmul.mubr.bf16.gmra.mrb[36].mxu1 %v12257_v24  ;;  %v2554_v42 = vmax.f32 %v1656_v29, 0.0 }
 0x14d   :  { %v1662_v41 = vadd.f32 %v1661_v40, %v12077_v31  ;;  %v2555_v44 = vmax.f32 %v1658_v36, 0.0 }
 0x14e   :  { %v2556_v43 = vmax.f32 %v1660_v39, 0.0  ;;  %1924 = vmatmul.mubr.bf16.gmra.mrb[148].mxu0 %v11439_v33 }
 0x14f   :  { %v2557_v49 = vmax.f32 %v1662_v41, 0.0  ;;  %9456 = vmatprep.mubr.msk.bf16.mxu0 %vm1225_vm0, %v11440_v38 }
 0x150   :  { %v12275_v50 = vpack.c.bf16 %v2556_v43, %v2554_v42  ;;  %v11448_v43 = vld [vmem:[%s15392_s0 + $0x280] ss:$8 sps:$4 sm:$0xff]  }
 0x151   :  { %v12277_v51 = vpack.c.bf16 %v2557_v49, %v2555_v44  ;;  %v1665_v54 = vpop.f32.mrb[44].mxu0 }
 0x152   :  { %v1666_v55 = vadd.f32 %v1665_v54, %v12075_v30  ;;  %v1667_v56 = vpop.f32.mrb[45].mxu0  ;;  %v11449_v54 = vld [vmem:[%s15392_s0 + $0x294] ss:$8 sps:$4 sm:$0xff]  }
 0x153   :  { %v1668_v58 = vadd.f32 %v1667_v56, %v12077_v31  ;;  %v1669_v59 = vpop.f32.mrb[46].mxu0  ;;  %9533 = vmatprep.mubr.msk.bf16.mxu1 %vm3162_vm2, %v12277_v51 }
 0x154   :  { %v1670_v61 = vadd.f32 %v1669_v59, %v12075_v30  ;;  %v1671_v62 = vpop.f32.mrb[47].mxu0  ;;  %3564 = vmatmul.mubr.bf16.gmra.mrb[40].mxu1 %v12275_v50  ;;  %v2558_v6 = vmax.f32 %v1666_v55, 0.0 }
 0x155   :  { %v1672_v2 = vadd.f32 %v1671_v62, %v12077_v31  ;;  %v2559_v10 = vmax.f32 %v1668_v58, 0.0 }
 0x156   :  { %v2560_v9 = vmax.f32 %v1670_v61, 0.0  ;;  %1934 = vmatmul.mubr.bf16.gmra.mrb[152].mxu0 %v11442_v57 }
 0x157   :  { %v2561_v11 = vmax.f32 %v1672_v2, 0.0  ;;  %9457 = vmatprep.mubr.msk.bf16.mxu0 %vm1225_vm0, %v11443_v60 }
 0x158   :  { %v12296_v12 = vpack.c.bf16 %v2560_v9, %v2558_v6 }
 0x159   :  { %v12299_v13 = vpack.c.bf16 %v2561_v11, %v2559_v10  ;;  %v1675_v14 = vpop.f32.mrb[48].mxu0  ;;  %v11451_v10 = vld [vmem:[%s15392_s0 + $0x290] ss:$8 sps:$4 sm:$0xff]  }
 0x15a   :  { %v1676_v15 = vadd.f32 %v1675_v14, %v12075_v30  ;;  %v1677_v18 = vpop.f32.mrb[49].mxu0 }
 0x15b   :  { %v1678_v20 = vadd.f32 %v1677_v18, %v12077_v31  ;;  %v1679_v21 = vpop.f32.mrb[50].mxu0  ;;  %9534 = vmatprep.mubr.msk.bf16.mxu1 %vm3162_vm2, %v12299_v13 }
 0x15c   :  { %v1680_v23 = vadd.f32 %v1679_v21, %v12075_v30  ;;  %v1681_v28 = vpop.f32.mrb[51].mxu0  ;;  %3572 = vmatmul.mubr.bf16.gmra.mrb[44].mxu1 %v12296_v12  ;;  %v2562_v32 = vmax.f32 %v1676_v15, 0.0  ;;  %v11452_v15 = vld [vmem:[%s15392_s0 + $0x2a4] ss:$8 sps:$4 sm:$0xff]  }
 0x15d   :  { %v1682_v29 = vadd.f32 %v1681_v28, %v12077_v31  ;;  %v2563_v36 = vmax.f32 %v1678_v20, 0.0 }
 0x15e   :  { %v2564_v33 = vmax.f32 %v1680_v23, 0.0  ;;  %1944 = vmatmul.mubr.bf16.gmra.mrb[156].mxu0 %v11445_v19 }
 0x15f   :  { %v2565_v37 = vmax.f32 %v1682_v29, 0.0  ;;  %9458 = vmatprep.mubr.msk.bf16.mxu0 %vm1225_vm0, %v11446_v22 }
 0x160   :  { %v12315_v38 = vpack.c.bf16 %v2564_v33, %v2562_v32 }
 0x161   :  { %v12317_v39 = vpack.c.bf16 %v2565_v37, %v2563_v36  ;;  %v1685_v40 = vpop.f32.mrb[52].mxu0 }
 0x162   :  { %v1686_v41 = vadd.f32 %v1685_v40, %v12075_v30  ;;  %v1687_v42 = vpop.f32.mrb[53].mxu0  ;;  %v11454_v40 = vld [vmem:[%s15392_s0 + $0x2a0] ss:$8 sps:$4 sm:$0xff]  }
 0x163   :  { %v1688_v44 = vadd.f32 %v1687_v42, %v12077_v31  ;;  %v1689_v49 = vpop.f32.mrb[54].mxu0  ;;  %9535 = vmatprep.mubr.msk.bf16.mxu1 %vm3162_vm2, %v12317_v39 }
 0x164   :  { %v1690_v55 = vadd.f32 %v1689_v49, %v12075_v30  ;;  %v1691_v56 = vpop.f32.mrb[55].mxu0  ;;  %3580 = vmatmul.mubr.bf16.gmra.mrb[48].mxu1 %v12315_v38  ;;  %v2566_v58 = vmax.f32 %v1686_v41, 0.0 }
 0x165   :  { %v1692_v57 = vadd.f32 %v1691_v56, %v12077_v31  ;;  %v2567_v60 = vmax.f32 %v1688_v44, 0.0 }
 0x166   :  { %v2568_v59 = vmax.f32 %v1690_v55, 0.0  ;;  %1954 = vmatmul.mubr.bf16.gmra.mrb[160].mxu0 %v11448_v43  ;;  %v11455_v43 = vld [vmem:[%s15392_s0 + $0x2b4] ss:$8 sps:$4 sm:$0xff]  }
 0x167   :  { %v2569_v61 = vmax.f32 %v1692_v57, 0.0  ;;  %9459 = vmatprep.mubr.msk.bf16.mxu0 %vm1225_vm0, %v11449_v54 }
 0x168   :  { %v12333_v62 = vpack.c.bf16 %v2568_v59, %v2566_v58 }
 0x169   :  { %v12335_v2 = vpack.c.bf16 %v2569_v61, %v2567_v60  ;;  %v1695_v3 = vpop.f32.mrb[56].mxu0 }
 0x16a   :  { %v1696_v6 = vadd.f32 %v1695_v3, %v12075_v30  ;;  %v1697_v9 = vpop.f32.mrb[57].mxu0 }
 0x16b   :  { %v1698_v11 = vadd.f32 %v1697_v9, %v12077_v31  ;;  %v1699_v14 = vpop.f32.mrb[58].mxu0  ;;  %9536 = vmatprep.mubr.msk.bf16.mxu1 %vm3162_vm2, %v12335_v2  ;;  %v11458_v9 = vld [vmem:[%s15392_s0 + $0x2b0] ss:$8 sps:$4 sm:$0xff]  }
 0x16c   :  { %v1700_v18 = vadd.f32 %v1699_v14, %v12075_v30  ;;  %v1701_v19 = vpop.f32.mrb[59].mxu0  ;;  %3588 = vmatmul.mubr.bf16.gmra.mrb[52].mxu1 %v12333_v62  ;;  %v2570_v21 = vmax.f32 %v1696_v6, 0.0  ;;  %v11459_v14 = vld [vmem:[%s15392_s0 + $0x2c4] ss:$8 sps:$4 sm:$0xff]  }
 0x16d   :  { %v1702_v20 = vadd.f32 %v1701_v19, %v12077_v31  ;;  %v2571_v23 = vmax.f32 %v1698_v11, 0.0 }
 0x16e   :  { %v2572_v22 = vmax.f32 %v1700_v18, 0.0  ;;  %1964 = vmatmul.mubr.bf16.gmra.mrb[164].mxu0 %v11451_v10 }
 0x16f   :  { %v2573_v28 = vmax.f32 %v1702_v20, 0.0  ;;  %9460 = vmatprep.mubr.msk.bf16.mxu0 %vm1225_vm0, %v11452_v15 }
 0x170   :  { %v12351_v29 = vpack.c.bf16 %v2572_v22, %v2570_v21 }
 0x171   :  { %v12353_v32 = vpack.c.bf16 %v2573_v28, %v2571_v23  ;;  %v1705_v33 = vpop.f32.mrb[60].mxu0 }
 0x172   :  { %v1706_v36 = vadd.f32 %v1705_v33, %v12075_v30  ;;  %v1707_v37 = vpop.f32.mrb[61].mxu0 }
 0x173   :  { %v1708_v41 = vadd.f32 %v1707_v37, %v12077_v31  ;;  %v1709_v42 = vpop.f32.mrb[62].mxu0  ;;  %9537 = vmatprep.mubr.msk.bf16.mxu1 %vm3162_vm2, %v12353_v32 }
 0x174   :  { %v1710_v44 = vadd.f32 %v1709_v42, %v12075_v30  ;;  %v1711_v49 = vpop.f32.mrb[63].mxu0  ;;  %3596 = vmatmul.mubr.bf16.gmra.mrb[56].mxu1 %v12351_v29  ;;  %v2574_v55 = vmax.f32 %v1706_v36, 0.0 }
 0x175   :  { %v1712_v54 = vadd.f32 %v1711_v49, %v12077_v31  ;;  %v2575_v57 = vmax.f32 %v1708_v41, 0.0  ;;  %v11461_v41 = vld [vmem:[%s15392_s0 + $0x2c0] ss:$8 sps:$4 sm:$0xff]  }
 0x176   :  { %v2576_v56 = vmax.f32 %v1710_v44, 0.0  ;;  %1974 = vmatmul.mubr.bf16.gmra.mrb[168].mxu0 %v11454_v40  ;;  %v11462_v44 = vld [vmem:[%s15392_s0 + $0x2d4] ss:$8 sps:$4 sm:$0xff]  }
 0x177   :  { %v2577_v58 = vmax.f32 %v1712_v54, 0.0  ;;  %9461 = vmatprep.mubr.msk.bf16.mxu0 %vm1225_vm0, %v11455_v43 }
 0x178   :  { %v12369_v59 = vpack.c.bf16 %v2576_v56, %v2574_v55 }
 0x179   :  { %v12371_v60 = vpack.c.bf16 %v2577_v58, %v2575_v57  ;;  %v1715_v61 = vpop.f32.mrb[64].mxu0 }
 0x17a   :  { %v1716_v3 = vadd.f32 %v1715_v61, %v12075_v30  ;;  %v1717_v6 = vpop.f32.mrb[65].mxu0 }
 0x17b   :  { %v1718_v10 = vadd.f32 %v1717_v6, %v12077_v31  ;;  %v1719_v11 = vpop.f32.mrb[66].mxu0  ;;  %9538 = vmatprep.mubr.msk.bf16.mxu1 %vm3162_vm2, %v12371_v60 }
 0x17c   :  { %v1720_v15 = vadd.f32 %v1719_v11, %v12075_v30  ;;  %v1721_v18 = vpop.f32.mrb[67].mxu0  ;;  %3604 = vmatmul.mubr.bf16.gmra.mrb[60].mxu1 %v12369_v59  ;;  %v2578_v20 = vmax.f32 %v1716_v3, 0.0 }
 0x17d   :  { %v1722_v19 = vadd.f32 %v1721_v18, %v12077_v31  ;;  %v2579_v22 = vmax.f32 %v1718_v10, 0.0 }
 0x17e   :  { %v2580_v21 = vmax.f32 %v1720_v15, 0.0  ;;  %1984 = vmatmul.mubr.bf16.gmra.mrb[172].mxu0 %v11458_v9 }
 0x17f   :  { %v2581_v23 = vmax.f32 %v1722_v19, 0.0  ;;  %9462 = vmatprep.mubr.msk.bf16.mxu0 %vm1225_vm0, %v11459_v14  ;;  %v11464_v14 = vld [vmem:[%s15392_s0 + $0x2d0] ss:$8 sps:$4 sm:$0xff]   ;;  %v11465_v19 = vld [vmem:[%s15392_s0 + $0x2e4] ss:$8 sps:$4 sm:$0xff]  }
 0x180   :  { %v12387_v28 = vpack.c.bf16 %v2580_v21, %v2578_v20 }
 0x181   :  { %v12389_v33 = vpack.c.bf16 %v2581_v23, %v2579_v22  ;;  %v1725_v36 = vpop.f32.mrb[68].mxu0 }
 0x182   :  { %v1726_v37 = vadd.f32 %v1725_v36, %v12075_v30  ;;  %v1727_v40 = vpop.f32.mrb[69].mxu0 }
 0x183   :  { %v1728_v42 = vadd.f32 %v1727_v40, %v12077_v31  ;;  %v1729_v43 = vpop.f32.mrb[70].mxu0  ;;  %9539 = vmatprep.mubr.msk.bf16.mxu1 %vm3162_vm2, %v12389_v33 }
 0x184   :  { %v1730_v49 = vadd.f32 %v1729_v43, %v12075_v30  ;;  %v1731_v54 = vpop.f32.mrb[71].mxu0  ;;  %3612 = vmatmul.mubr.bf16.gmra.mrb[64].mxu1 %v12387_v28  ;;  %v2582_v56 = vmax.f32 %v1726_v37, 0.0 }
 0x185   :  { %v1732_v55 = vadd.f32 %v1731_v54, %v12077_v31  ;;  %v2583_v58 = vmax.f32 %v1728_v42, 0.0  ;;  %v11467_v54 = vld [vmem:[%s15392_s0 + $0x2e0] ss:$8 sps:$4 sm:$0xff]  }
 0x186   :  { %v2584_v57 = vmax.f32 %v1730_v49, 0.0  ;;  %1994 = vmatmul.mubr.bf16.gmra.mrb[176].mxu0 %v11461_v41 }
 0x187   :  { %v2585_v61 = vmax.f32 %v1732_v55, 0.0  ;;  %9463 = vmatprep.mubr.msk.bf16.mxu0 %vm1225_vm0, %v11462_v44 }
 0x188   :  { %v12405_v3 = vpack.c.bf16 %v2584_v57, %v2582_v56  ;;  %v11468_v57 = vld [vmem:[%s15392_s0 + $0x2f4] ss:$8 sps:$4 sm:$0xff]  }
 0x189   :  { %v12407_v6 = vpack.c.bf16 %v2585_v61, %v2583_v58  ;;  %v1735_v9 = vpop.f32.mrb[72].mxu0 }
 0x18a   :  { %v1736_v10 = vadd.f32 %v1735_v9, %v12075_v30  ;;  %v1737_v11 = vpop.f32.mrb[73].mxu0 }
 0x18b   :  { %v1738_v15 = vadd.f32 %v1737_v11, %v12077_v31  ;;  %v1739_v18 = vpop.f32.mrb[74].mxu0  ;;  %9540 = vmatprep.mubr.msk.bf16.mxu1 %vm3162_vm2, %v12407_v6 }
 0x18c   :  { %v1740_v20 = vadd.f32 %v1739_v18, %v12075_v30  ;;  %v1741_v21 = vpop.f32.mrb[75].mxu0  ;;  %3620 = vmatmul.mubr.bf16.gmra.mrb[68].mxu1 %v12405_v3  ;;  %v2586_v23 = vmax.f32 %v1736_v10, 0.0 }
 0x18d   :  { %v1742_v22 = vadd.f32 %v1741_v21, %v12077_v31  ;;  %v2587_v37 = vmax.f32 %v1738_v15, 0.0 }
 0x18e   :  { %v2588_v36 = vmax.f32 %v1740_v20, 0.0  ;;  %2004 = vmatmul.mubr.bf16.gmra.mrb[180].mxu0 %v11464_v14 }
 0x18f   :  { %v2589_v40 = vmax.f32 %v1742_v22, 0.0  ;;  %9464 = vmatprep.mubr.msk.bf16.mxu0 %vm1225_vm0, %v11465_v19 }
 0x190   :  { %v12423_v41 = vpack.c.bf16 %v2588_v36, %v2586_v23  ;;  %v11470_v23 = vld [vmem:[%s15392_s0 + $0x2f0] ss:$8 sps:$4 sm:$0xff]  }
 0x191   :  { %v12425_v42 = vpack.c.bf16 %v2589_v40, %v2587_v37  ;;  %v1745_v43 = vpop.f32.mrb[76].mxu0  ;;  %v11471_v40 = vld [vmem:[%s15392_s0 + $0x304] ss:$8 sps:$4 sm:$0xff]  }
 0x192   :  { %v1746_v44 = vadd.f32 %v1745_v43, %v12075_v30  ;;  %v1747_v49 = vpop.f32.mrb[77].mxu0 }
 0x193   :  { %v1748_v55 = vadd.f32 %v1747_v49, %v12077_v31  ;;  %v1749_v56 = vpop.f32.mrb[78].mxu0  ;;  %9541 = vmatprep.mubr.msk.bf16.mxu1 %vm3162_vm2, %v12425_v42 }
 0x194   :  { %v1750_v58 = vadd.f32 %v1749_v56, %v12075_v30  ;;  %v1751_v61 = vpop.f32.mrb[79].mxu0  ;;  %3628 = vmatmul.mubr.bf16.gmra.mrb[72].mxu1 %v12423_v41  ;;  %v2590_v10 = vmax.f32 %v1746_v44, 0.0 }
 0x195   :  { %v1752_v9 = vadd.f32 %v1751_v61, %v12077_v31  ;;  %v2591_v14 = vmax.f32 %v1748_v55, 0.0 }
 0x196   :  { %v2592_v11 = vmax.f32 %v1750_v58, 0.0  ;;  %2014 = vmatmul.mubr.bf16.gmra.mrb[184].mxu0 %v11467_v54 }
 0x197   :  { %v2593_v15 = vmax.f32 %v1752_v9, 0.0  ;;  %9465 = vmatprep.mubr.msk.bf16.mxu0 %vm1225_vm0, %v11468_v57 }
 0x198   :  { %v12441_v18 = vpack.c.bf16 %v2592_v11, %v2590_v10 }
 0x199   :  { %v12443_v19 = vpack.c.bf16 %v2593_v15, %v2591_v14  ;;  %v1755_v20 = vpop.f32.mrb[80].mxu0  ;;  %v11473_v14 = vld [vmem:[%s15392_s0 + $0x300] ss:$8 sps:$4 sm:$0xff]  }
 0x19a   :  { %v1756_v21 = vadd.f32 %v1755_v20, %v12075_v30  ;;  %v1757_v22 = vpop.f32.mrb[81].mxu0 }
 0x19b   :  { %v1758_v36 = vadd.f32 %v1757_v22, %v12077_v31  ;;  %v1759_v37 = vpop.f32.mrb[82].mxu0  ;;  %9542 = vmatprep.mubr.msk.bf16.mxu1 %vm3162_vm2, %v12443_v19 }
 0x19c   :  { %v1760_v43 = vadd.f32 %v1759_v37, %v12075_v30  ;;  %v1761_v44 = vpop.f32.mrb[83].mxu0  ;;  %3636 = vmatmul.mubr.bf16.gmra.mrb[76].mxu1 %v12441_v18  ;;  %v2594_v54 = vmax.f32 %v1756_v21, 0.0  ;;  %v11474_v21 = vld [vmem:[%s15392_s0 + $0x314] ss:$8 sps:$4 sm:$0xff]  }
 0x19d   :  { %v1762_v49 = vadd.f32 %v1761_v44, %v12077_v31  ;;  %v2595_v56 = vmax.f32 %v1758_v36, 0.0 }
 0x19e   :  { %v2596_v55 = vmax.f32 %v1760_v43, 0.0  ;;  %2024 = vmatmul.mubr.bf16.gmra.mrb[188].mxu0 %v11470_v23 }
 0x19f   :  { %v2597_v57 = vmax.f32 %v1762_v49, 0.0  ;;  %9466 = vmatprep.mubr.msk.bf16.mxu0 %vm1225_vm0, %v11471_v40 }
 0x1a0   :  { %v12459_v58 = vpack.c.bf16 %v2596_v55, %v2594_v54 }
 0x1a1   :  { %v12461_v61 = vpack.c.bf16 %v2597_v57, %v2595_v56  ;;  %v1765_v9 = vpop.f32.mrb[84].mxu0  ;;  %v11523_v56 = vld [vmem:[%s15393_s4 + $0x30] sm:$0xff]  }
 0x1a2   :  { %v1766_v10 = vadd.f32 %v1765_v9, %v12075_v30  ;;  %v1767_v11 = vpop.f32.mrb[85].mxu0  ;;  %4337 = vmatpush1.bf16.msra.mxu0 %v11523_v56 }
 0x1a3   :  { %v1768_v15 = vadd.f32 %v1767_v11, %v12077_v31  ;;  %v1769_v20 = vpop.f32.mrb[86].mxu0  ;;  %9543 = vmatprep.mubr.msk.bf16.mxu1 %vm3162_vm2, %v12461_v61  ;;  %4338 = vmatprep.subr.bf16.mxu0 %v15407_v1 }
 0x1a4   :  { %v1770_v22 = vadd.f32 %v1769_v20, %v12075_v30  ;;  %v1771_v23 = vpop.f32.mrb[87].mxu0  ;;  %3644 = vmatmul.mubr.bf16.gmra.mrb[80].mxu1 %v12459_v58  ;;  %v2598_v37 = vmax.f32 %v1766_v10, 0.0  ;;  %v11476_v10 = vld [vmem:[%s15392_s0 + $0x310] ss:$8 sps:$4 sm:$0xff]  }
 0x1a5   :  { %v1772_v36 = vadd.f32 %v1771_v23, %v12077_v31  ;;  %v2599_v43 = vmax.f32 %v1768_v15, 0.0  ;;  %v11477_v15 = vld [vmem:[%s15392_s0 + $0x324] ss:$8 sps:$4 sm:$0xff]  }
 0x1a6   :  { %v2600_v40 = vmax.f32 %v1770_v22, 0.0  ;;  %2034 = vmatmul.mubr.bf16.gmra.mrb[192].mxu0 %v11473_v14 }
 0x1a7   :  { %v2601_v44 = vmax.f32 %v1772_v36, 0.0  ;;  %9467 = vmatprep.mubr.msk.bf16.mxu0 %vm1225_vm0, %v11474_v21 }
 0x1a8   :  { %v12477_v49 = vpack.c.bf16 %v2600_v40, %v2598_v37 }
 0x1a9   :  { %v12479_v54 = vpack.c.bf16 %v2601_v44, %v2599_v43  ;;  %v1775_v55 = vpop.f32.mrb[88].mxu0 }
 0x1aa   :  { %15563 = vst [vmem:[#allocation2_spill] sm:$0xff] %v12477_v49  ;;  %v1776_v57 = vadd.f32 %v1775_v55, %v12075_v30  ;;  %v1777_v9 = vpop.f32.mrb[89].mxu0 }
 0x1ab   :  { %v1778_v11 = vadd.f32 %v1777_v9, %v12077_v31  ;;  %v1779_v14 = vpop.f32.mrb[90].mxu0  ;;  %9544 = vmatprep.mubr.msk.bf16.mxu1 %vm3162_vm2, %v12479_v54 }
 0x1ac   :  { %v1780_v20 = vadd.f32 %v1779_v14, %v12075_v30  ;;  %v1781_v21 = vpop.f32.mrb[91].mxu0  ;;  %3652 = vmatmul.mubr.bf16.gmra.mrb[84].mxu1 %v12477_v49  ;;  %v2602_v23 = vmax.f32 %v1776_v57, 0.0  ;;  %v11479_v14 = vld [vmem:[%s15392_s0 + $0x320] ss:$8 sps:$4 sm:$0xff]  }
 0x1ad   :  { %v1782_v22 = vadd.f32 %v1781_v21, %v12077_v31  ;;  %v2603_v37 = vmax.f32 %v1778_v11, 0.0 }
 0x1ae   :  { %v2604_v36 = vmax.f32 %v1780_v20, 0.0  ;;  %2044 = vmatmul.mubr.bf16.gmra.mrb[196].mxu0 %v11476_v10  ;;  %v11480_v10 = vld [vmem:[%s15392_s0 + $0x334] ss:$8 sps:$4 sm:$0xff]  }
 0x1af   :  { %v2605_v40 = vmax.f32 %v1782_v22, 0.0  ;;  %9468 = vmatprep.mubr.msk.bf16.mxu0 %vm1225_vm0, %v11477_v15 }
 0x1b0   :  { %v12499_v43 = vpack.c.bf16 %v2604_v36, %v2602_v23 }
 0x1b1   :  { %v12501_v44 = vpack.c.bf16 %v2605_v40, %v2603_v37  ;;  %v1785_v55 = vpop.f32.mrb[92].mxu0 }
 0x1b2   :  { %15564 = vst [vmem:[#allocation3_spill] sm:$0xff] %v12499_v43  ;;  %v1786_v56 = vadd.f32 %v1785_v55, %v12075_v30  ;;  %v1787_v9 = vpop.f32.mrb[93].mxu0 }
 0x1b3   :  { %15565 = vst [vmem:[#allocation4_spill] sm:$0xff] %v12501_v44  ;;  %v1788_v57 = vadd.f32 %v1787_v9, %v12077_v31  ;;  %v1789_v20 = vpop.f32.mrb[94].mxu0  ;;  %9545 = vmatprep.mubr.msk.bf16.mxu1 %vm3162_vm2, %v12501_v44 }
 0x1b4   :  { %v1790_v11 = vadd.f32 %v1789_v20, %v12075_v30  ;;  %v1791_v15 = vpop.f32.mrb[95].mxu0  ;;  %3660 = vmatmul.mubr.bf16.gmra.mrb[88].mxu1 %v12499_v43  ;;  %v2606_v22 = vmax.f32 %v1786_v56, 0.0  ;;  %v11482_v43 = vld [vmem:[%s15392_s0 + $0x330] ss:$8 sps:$4 sm:$0xff]  }
 0x1b5   :  { %v1792_v21 = vadd.f32 %v1791_v15, %v12077_v31  ;;  %v2607_v36 = vmax.f32 %v1788_v57, 0.0 }
 0x1b6   :  { %v2608_v23 = vmax.f32 %v1790_v11, 0.0  ;;  %2054 = vmatmul.mubr.bf16.gmra.mrb[200].mxu0 %v11479_v14  ;;  %v11483_v14 = vld [vmem:[%s15392_s0 + $0x344] ss:$8 sps:$4 sm:$0xff]  }
 0x1b7   :  { %v2609_v37 = vmax.f32 %v1792_v21, 0.0  ;;  %9469 = vmatprep.mubr.msk.bf16.mxu0 %vm1225_vm0, %v11480_v10 }
 0x1b8   :  { %v12517_v40 = vpack.c.bf16 %v2608_v23, %v2606_v22 }
 0x1b9   :  { %v12519_v55 = vpack.c.bf16 %v2609_v37, %v2607_v36  ;;  %v1795_v9 = vpop.f32.mrb[96].mxu0 }
 0x1ba   :  { %15566 = vst [vmem:[#allocation5_spill] sm:$0xff] %v12517_v40  ;;  %v1796_v1 = vadd.f32 %v1795_v9, %v12075_v30  ;;  %v1797_v20 = vpop.f32.mrb[97].mxu0 }
 0x1bb   :  { %15567 = vst [vmem:[#allocation6_spill] sm:$0xff] %v12519_v55  ;;  %v1798_v56 = vadd.f32 %v1797_v20, %v12077_v31  ;;  %v1799_v11 = vpop.f32.mrb[98].mxu0  ;;  %9546 = vmatprep.mubr.msk.bf16.mxu1 %vm3162_vm2, %v12519_v55 }
 0x1bc   :  { %v1800_v57 = vadd.f32 %v1799_v11, %v12075_v30  ;;  %v1801_v10 = vpop.f32.mrb[99].mxu0  ;;  %3668 = vmatmul.mubr.bf16.gmra.mrb[92].mxu1 %v12517_v40  ;;  %v2610_v21 = vmax.f32 %v1796_v1, 0.0  ;;  %v11485_v40 = vld [vmem:[%s15392_s0 + $0x340] ss:$8 sps:$4 sm:$0xff]  }
 0x1bd   :  { %v1802_v15 = vadd.f32 %v1801_v10, %v12077_v31  ;;  %v2611_v23 = vmax.f32 %v1798_v56, 0.0 }
 0x1be   :  { %v2612_v22 = vmax.f32 %v1800_v57, 0.0  ;;  %2064 = vmatmul.mubr.bf16.gmra.mrb[204].mxu0 %v11482_v43  ;;  %v11486_v43 = vld [vmem:[%s15392_s0 + $0x354] ss:$8 sps:$4 sm:$0xff]  }
 0x1bf   :  { %v2613_v36 = vmax.f32 %v1802_v15, 0.0  ;;  %9470 = vmatprep.mubr.msk.bf16.mxu0 %vm1225_vm0, %v11483_v14 }
 0x1c0   :  { %v12535_v37 = vpack.c.bf16 %v2612_v22, %v2610_v21 }
 0x1c1   :  { %v12537_v9 = vpack.c.bf16 %v2613_v36, %v2611_v23  ;;  %v1805_v20 = vpop.f32.mrb[100].mxu0 }
 0x1c2   :  { %15568 = vst [vmem:[#allocation7_spill] sm:$0xff] %v12535_v37  ;;  %v1806_v55 = vadd.f32 %v1805_v20, %v12075_v30  ;;  %v1807_v11 = vpop.f32.mrb[101].mxu0 }
 0x1c3   :  { %15569 = vst [vmem:[#allocation8_spill] sm:$0xff] %v12537_v9  ;;  %v1808_v1 = vadd.f32 %v1807_v11, %v12077_v31  ;;  %v1809_v57 = vpop.f32.mrb[102].mxu0  ;;  %9547 = vmatprep.mubr.msk.bf16.mxu1 %vm3162_vm2, %v12537_v9 }
 0x1c4   :  { %v1810_v56 = vadd.f32 %v1809_v57, %v12075_v30  ;;  %v1811_v14 = vpop.f32.mrb[103].mxu0  ;;  %3676 = vmatmul.mubr.bf16.gmra.mrb[96].mxu1 %v12535_v37  ;;  %v2614_v15 = vmax.f32 %v1806_v55, 0.0  ;;  %v11488_v37 = vld [vmem:[%s15392_s0 + $0x350] ss:$8 sps:$4 sm:$0xff]  }
 0x1c5   :  { %v1812_v10 = vadd.f32 %v1811_v14, %v12077_v31  ;;  %v2615_v22 = vmax.f32 %v1808_v1, 0.0 }
 0x1c6   :  { %v2616_v21 = vmax.f32 %v1810_v56, 0.0  ;;  %2074 = vmatmul.mubr.bf16.gmra.mrb[208].mxu0 %v11485_v40  ;;  %v11490_v40 = vld [vmem:[%s15392_s0 + $0x364] ss:$8 sps:$4 sm:$0xff]  }
 0x1c7   :  { %v2617_v23 = vmax.f32 %v1812_v10, 0.0  ;;  %9471 = vmatprep.mubr.msk.bf16.mxu0 %vm1225_vm0, %v11486_v43 }
 0x1c8   :  { %v12553_v36 = vpack.c.bf16 %v2616_v21, %v2614_v15 }
 0x1c9   :  { %v12555_v20 = vpack.c.bf16 %v2617_v23, %v2615_v22  ;;  %v1815_v11 = vpop.f32.mrb[104].mxu0 }
 0x1ca   :  { %15570 = vst [vmem:[#allocation9_spill] sm:$0xff] %v12553_v36  ;;  %v1816_v9 = vadd.f32 %v1815_v11, %v12075_v30  ;;  %v1817_v57 = vpop.f32.mrb[105].mxu0 }
 0x1cb   :  { %15571 = vst [vmem:[#allocation10_spill] sm:$0xff] %v12555_v20  ;;  %v1818_v55 = vadd.f32 %v1817_v57, %v12077_v31  ;;  %v1819_v56 = vpop.f32.mrb[106].mxu0  ;;  %9548 = vmatprep.mubr.msk.bf16.mxu1 %vm3162_vm2, %v12555_v20 }
 0x1cc   :  { %v1820_v1 = vadd.f32 %v1819_v56, %v12075_v30  ;;  %v1821_v43 = vpop.f32.mrb[107].mxu0  ;;  %3684 = vmatmul.mubr.bf16.gmra.mrb[100].mxu1 %v12553_v36  ;;  %v2618_v10 = vmax.f32 %v1816_v9, 0.0  ;;  %v11492_v36 = vld [vmem:[%s15392_s0 + $0x360] ss:$8 sps:$4 sm:$0xff]  }
 0x1cd   :  { %v1822_v14 = vadd.f32 %v1821_v43, %v12077_v31  ;;  %v2619_v21 = vmax.f32 %v1818_v55, 0.0 }
 0x1ce   :  { %v2620_v15 = vmax.f32 %v1820_v1, 0.0  ;;  %2084 = vmatmul.mubr.bf16.gmra.mrb[212].mxu0 %v11488_v37  ;;  %v11493_v37 = vld [vmem:[%s15392_s0 + $0x374] ss:$8 sps:$4 sm:$0xff]  }
 0x1cf   :  { %v2621_v22 = vmax.f32 %v1822_v14, 0.0  ;;  %9472 = vmatprep.mubr.msk.bf16.mxu0 %vm1225_vm0, %v11490_v40 }
 0x1d0   :  { %v12571_v23 = vpack.c.bf16 %v2620_v15, %v2618_v10 }
 0x1d1   :  { %v12573_v11 = vpack.c.bf16 %v2621_v22, %v2619_v21  ;;  %v1825_v57 = vpop.f32.mrb[108].mxu0 }
 0x1d2   :  { %15572 = vst [vmem:[#allocation11_spill] sm:$0xff] %v12571_v23  ;;  %v1826_v20 = vadd.f32 %v1825_v57, %v12075_v30  ;;  %v1827_v56 = vpop.f32.mrb[109].mxu0 }
 0x1d3   :  { %15573 = vst [vmem:[#allocation12_spill] sm:$0xff] %v12573_v11  ;;  %v1828_v9 = vadd.f32 %v1827_v56, %v12077_v31  ;;  %v1829_v1 = vpop.f32.mrb[110].mxu0  ;;  %9549 = vmatprep.mubr.msk.bf16.mxu1 %vm3162_vm2, %v12573_v11 }
 0x1d4   :  { %v1830_v55 = vadd.f32 %v1829_v1, %v12075_v30  ;;  %v1831_v40 = vpop.f32.mrb[111].mxu0  ;;  %3692 = vmatmul.mubr.bf16.gmra.mrb[104].mxu1 %v12571_v23  ;;  %v2622_v14 = vmax.f32 %v1826_v20, 0.0 }
 0x1d5   :  { %v1832_v43 = vadd.f32 %v1831_v40, %v12077_v31  ;;  %v2623_v15 = vmax.f32 %v1828_v9, 0.0 }
 0x1d6   :  { %v2624_v10 = vmax.f32 %v1830_v55, 0.0  ;;  %2094 = vmatmul.mubr.bf16.gmra.mrb[216].mxu0 %v11492_v36  ;;  %v11495_v36 = vld [vmem:[%s15392_s0 + $0x370] ss:$8 sps:$4 sm:$0xff]  }
 0x1d7   :  { %v2625_v21 = vmax.f32 %v1832_v43, 0.0  ;;  %v12588_v22 = vpop.f32.mrb[0].mxu1  ;;  %9473 = vmatprep.mubr.msk.bf16.mxu0 %vm1225_vm0, %v11493_v37  ;;  %v11496_v37 = vld [vmem:[%s15392_s0 + $0x384] ss:$8 sps:$4 sm:$0xff]  }
 0x1d8   :  { %15574 = vst [vmem:[#allocation13_spill] sm:$0xff] %v12588_v22  ;;  %v3487_v57 = vpop.f32.mrb[1].mxu1  ;;  %v12591_v56 = vpack.c.bf16 %v2624_v10, %v2622_v14 }
 0x1d9   :  { %v12593_v11 = vpack.c.bf16 %v2625_v21, %v2623_v15  ;;  %v1835_v1 = vpop.f32.mrb[112].mxu0  ;;  %v12595_v44 = vpop.f32.mrb[2].mxu1 }
 0x1da   :  { %15575 = vst [vmem:[#allocation14_spill] sm:$0xff] %v12591_v56  ;;  %15577 = vst [vmem:[#allocation16_spill] sm:$0xff] %v12595_v44  ;;  %v1836_v23 = vadd.f32 %v1835_v1, %v12075_v30  ;;  %v1837_v40 = vpop.f32.mrb[113].mxu0  ;;  %v3490_v20 = vpop.f32.mrb[3].mxu1 }
 0x1db   :  { %15576 = vst [vmem:[#allocation15_spill] sm:$0xff] %v12593_v11  ;;  %v1838_v9 = vadd.f32 %v1837_v40, %v12077_v31  ;;  %v1839_v55 = vpop.f32.mrb[114].mxu0  ;;  %9550 = vmatprep.mubr.msk.bf16.mxu1 %vm3162_vm2, %v12593_v11 }
 0x1dc   :  { %v1840_v43 = vadd.f32 %v1839_v55, %v12075_v30  ;;  %v1841_v14 = vpop.f32.mrb[115].mxu0  ;;  %3700 = vmatmul.mubr.bf16.gmra.mrb[108].mxu1 %v12591_v56  ;;  %v2626_v15 = vmax.f32 %v1836_v23, 0.0 }
 0x1dd   :  { %v1842_v10 = vadd.f32 %v1841_v14, %v12077_v31  ;;  %v2627_v57 = vmax.f32 %v1838_v9, 0.0 }
 0x1de   :  { %v2628_v21 = vmax.f32 %v1840_v43, 0.0  ;;  %2104 = vmatmul.mubr.bf16.gmra.mrb[220].mxu0 %v11495_v36  ;;  %v11498_v36 = vld [vmem:[%s15392_s0 + $0x380] ss:$8 sps:$4 sm:$0xff]  }
 0x1df   :  { %v2629_v1 = vmax.f32 %v1842_v10, 0.0  ;;  %v12610_v40 = vpop.f32.mrb[4].mxu1  ;;  %9474 = vmatprep.mubr.msk.bf16.mxu0 %vm1225_vm0, %v11496_v37  ;;  %v11499_v37 = vld [vmem:[%s15392_s0 + $0x394] ss:$8 sps:$4 sm:$0xff]  }
 0x1e0   :  { %15578 = vst [vmem:[#allocation17_spill] sm:$0xff] %v12610_v40  ;;  %v3495_v20 = vpop.f32.mrb[5].mxu1  ;;  %v12613_v44 = vpack.c.bf16 %v2628_v21, %v2626_v15 }
 0x1e1   :  { %v12615_v22 = vpack.c.bf16 %v2629_v1, %v2627_v57  ;;  %v1845_v55 = vpop.f32.mrb[116].mxu0  ;;  %v12617_v11 = vpop.f32.mrb[6].mxu1 }
 0x1e2   :  { %15579 = vst [vmem:[#allocation18_spill] sm:$0xff] %v12613_v44  ;;  %15581 = vst [vmem:[#allocation20_spill] sm:$0xff] %v12617_v11  ;;  %v1846_v56 = vadd.f32 %v1845_v55, %v12075_v30  ;;  %v1847_v14 = vpop.f32.mrb[117].mxu0  ;;  %v3498_v23 = vpop.f32.mrb[7].mxu1 }
 0x1e3   :  { %15580 = vst [vmem:[#allocation19_spill] sm:$0xff] %v12615_v22  ;;  %v1848_v9 = vadd.f32 %v1847_v14, %v12077_v31  ;;  %v1849_v43 = vpop.f32.mrb[118].mxu0  ;;  %9551 = vmatprep.mubr.msk.bf16.mxu1 %vm3162_vm2, %v12615_v22 }
 0x1e4   :  { %v1850_v10 = vadd.f32 %v1849_v43, %v12075_v30  ;;  %v1851_v15 = vpop.f32.mrb[119].mxu0  ;;  %3708 = vmatmul.mubr.bf16.gmra.mrb[112].mxu1 %v12613_v44  ;;  %v2630_v57 = vmax.f32 %v1846_v56, 0.0 }
 0x1e5   :  { %v1852_v21 = vadd.f32 %v1851_v15, %v12077_v31  ;;  %v2631_v20 = vmax.f32 %v1848_v9, 0.0 }
 0x1e6   :  { %v2632_v1 = vmax.f32 %v1850_v10, 0.0  ;;  %2114 = vmatmul.mubr.bf16.gmra.mrb[224].mxu0 %v11498_v36  ;;  %v11501_v36 = vld [vmem:[%s15392_s0 + $0x390] ss:$8 sps:$4 sm:$0xff]  }
 0x1e7   :  { %v2633_v55 = vmax.f32 %v1852_v21, 0.0  ;;  %v12632_v14 = vpop.f32.mrb[8].mxu1  ;;  %9475 = vmatprep.mubr.msk.bf16.mxu0 %vm1225_vm0, %v11499_v37  ;;  %v11502_v37 = vld [vmem:[%s15392_s0 + $0x3a4] ss:$8 sps:$4 sm:$0xff]  }
 0x1e8   :  { %15582 = vst [vmem:[#allocation21_spill] sm:$0xff] %v12632_v14  ;;  %v3503_v23 = vpop.f32.mrb[9].mxu1  ;;  %v12635_v11 = vpack.c.bf16 %v2632_v1, %v2630_v57 }
 0x1e9   :  { %v12637_v40 = vpack.c.bf16 %v2633_v55, %v2631_v20  ;;  %v1855_v43 = vpop.f32.mrb[120].mxu0  ;;  %v12639_v22 = vpop.f32.mrb[10].mxu1 }
 0x1ea   :  { %15583 = vst [vmem:[#allocation22_spill] sm:$0xff] %v12635_v11  ;;  %15585 = vst [vmem:[#allocation24_spill] sm:$0xff] %v12639_v22  ;;  %v1856_v44 = vadd.f32 %v1855_v43, %v12075_v30  ;;  %v1857_v15 = vpop.f32.mrb[121].mxu0  ;;  %v3506_v56 = vpop.f32.mrb[11].mxu1 }
 0x1eb   :  { %15584 = vst [vmem:[#allocation23_spill] sm:$0xff] %v12637_v40  ;;  %v1858_v9 = vadd.f32 %v1857_v15, %v12077_v31  ;;  %v1859_v10 = vpop.f32.mrb[122].mxu0  ;;  %9552 = vmatprep.mubr.msk.bf16.mxu1 %vm3162_vm2, %v12637_v40 }
 0x1ec   :  { %v1860_v21 = vadd.f32 %v1859_v10, %v12075_v30  ;;  %v1861_v57 = vpop.f32.mrb[123].mxu0  ;;  %3716 = vmatmul.mubr.bf16.gmra.mrb[116].mxu1 %v12635_v11  ;;  %v2634_v20 = vmax.f32 %v1856_v44, 0.0 }
 0x1ed   :  { %v1862_v1 = vadd.f32 %v1861_v57, %v12077_v31  ;;  %v2635_v23 = vmax.f32 %v1858_v9, 0.0 }
 0x1ee   :  { %v2636_v55 = vmax.f32 %v1860_v21, 0.0  ;;  %2124 = vmatmul.mubr.bf16.gmra.mrb[228].mxu0 %v11501_v36  ;;  %v11504_v36 = vld [vmem:[%s15392_s0 + $0x3a0] ss:$8 sps:$4 sm:$0xff]  }
 0x1ef   :  { %v2637_v43 = vmax.f32 %v1862_v1, 0.0  ;;  %v12654_v15 = vpop.f32.mrb[12].mxu1  ;;  %9476 = vmatprep.mubr.msk.bf16.mxu0 %vm1225_vm0, %v11502_v37  ;;  %v11505_v37 = vld [vmem:[%s15392_s0 + $0x3b4] ss:$8 sps:$4 sm:$0xff]  }
 0x1f0   :  { %15586 = vst [vmem:[#allocation25_spill] sm:$0xff] %v12654_v15  ;;  %v3511_v56 = vpop.f32.mrb[13].mxu1  ;;  %v12657_v22 = vpack.c.bf16 %v2636_v55, %v2634_v20 }
 0x1f1   :  { %v12659_v14 = vpack.c.bf16 %v2637_v43, %v2635_v23  ;;  %v1865_v10 = vpop.f32.mrb[124].mxu0  ;;  %v12661_v40 = vpop.f32.mrb[14].mxu1 }
 0x1f2   :  { %15587 = vst [vmem:[#allocation26_spill] sm:$0xff] %v12657_v22  ;;  %15589 = vst [vmem:[#allocation28_spill] sm:$0xff] %v12661_v40  ;;  %v1866_v11 = vadd.f32 %v1865_v10, %v12075_v30  ;;  %v1867_v57 = vpop.f32.mrb[125].mxu0  ;;  %v3514_v44 = vpop.f32.mrb[15].mxu1 }
 0x1f3   :  { %15588 = vst [vmem:[#allocation27_spill] sm:$0xff] %v12659_v14  ;;  %v1868_v9 = vadd.f32 %v1867_v57, %v12077_v31  ;;  %v1869_v21 = vpop.f32.mrb[126].mxu0  ;;  %9553 = vmatprep.mubr.msk.bf16.mxu1 %vm3162_vm2, %v12659_v14 }
 0x1f4   :  { %v1870_v1 = vadd.f32 %v1869_v21, %v12075_v30  ;;  %v1871_v20 = vpop.f32.mrb[127].mxu0  ;;  %3724 = vmatmul.mubr.bf16.gmra.mrb[120].mxu1 %v12657_v22  ;;  %v2638_v23 = vmax.f32 %v1866_v11, 0.0 }
 0x1f5   :  { %v1872_v55 = vadd.f32 %v1871_v20, %v12077_v31  ;;  %v2639_v56 = vmax.f32 %v1868_v9, 0.0 }
 0x1f6   :  { %v2640_v43 = vmax.f32 %v1870_v1, 0.0  ;;  %2134 = vmatmul.mubr.bf16.gmra.mrb[232].mxu0 %v11504_v36  ;;  %v11507_v36 = vld [vmem:[%s15392_s0 + $0x3b0] ss:$8 sps:$4 sm:$0xff]  }
 0x1f7   :  { %v2641_v10 = vmax.f32 %v1872_v55, 0.0  ;;  %v12676_v57 = vpop.f32.mrb[16].mxu1  ;;  %9477 = vmatprep.mubr.msk.bf16.mxu0 %vm1225_vm0, %v11505_v37  ;;  %v11508_v37 = vld [vmem:[%s15392_s0 + $0x3c4] ss:$8 sps:$4 sm:$0xff]  }
 0x1f8   :  { %15590 = vst [vmem:[#allocation29_spill] sm:$0xff] %v12676_v57  ;;  %v3519_v44 = vpop.f32.mrb[17].mxu1  ;;  %v12679_v40 = vpack.c.bf16 %v2640_v43, %v2638_v23 }
 0x1f9   :  { %v12681_v15 = vpack.c.bf16 %v2641_v10, %v2639_v56  ;;  %v1875_v21 = vpop.f32.mrb[128].mxu0  ;;  %v12683_v14 = vpop.f32.mrb[18].mxu1 }
 0x1fa   :  { %15591 = vst [vmem:[#allocation30_spill] sm:$0xff] %v12679_v40  ;;  %15593 = vst [vmem:[#allocation32_spill] sm:$0xff] %v12683_v14  ;;  %v1876_v22 = vadd.f32 %v1875_v21, %v12075_v30  ;;  %v1877_v20 = vpop.f32.mrb[129].mxu0  ;;  %v3522_v11 = vpop.f32.mrb[19].mxu1 }
 0x1fb   :  { %15592 = vst [vmem:[#allocation31_spill] sm:$0xff] %v12681_v15  ;;  %v1878_v9 = vadd.f32 %v1877_v20, %v12077_v31  ;;  %v1879_v1 = vpop.f32.mrb[130].mxu0  ;;  %9554 = vmatprep.mubr.msk.bf16.mxu1 %vm3162_vm2, %v12681_v15 }
 0x1fc   :  { %v1880_v55 = vadd.f32 %v1879_v1, %v12075_v30  ;;  %v1881_v23 = vpop.f32.mrb[131].mxu0  ;;  %3732 = vmatmul.mubr.bf16.gmra.mrb[124].mxu1 %v12679_v40  ;;  %v2642_v56 = vmax.f32 %v1876_v22, 0.0  ;;  %v11557_v22 = vld [vmem:[%s15393_s4 + $0x38] sm:$0xff]  }
 0x1fd   :  { %v1882_v43 = vadd.f32 %v1881_v23, %v12077_v31  ;;  %v2643_v44 = vmax.f32 %v1878_v9, 0.0  ;;  %4339 = vmatpush1.bf16.msra.mxu0 %v11557_v22 }
 0x1fe   :  { %v2644_v10 = vmax.f32 %v1880_v55, 0.0  ;;  %2144 = vmatmul.mubr.bf16.gmra.mrb[236].mxu0 %v11507_v36 }
 0x1ff   :  { %v2645_v21 = vmax.f32 %v1882_v43, 0.0  ;;  %v12698_v20 = vpop.f32.mrb[20].mxu1  ;;  %9478 = vmatprep.mubr.msk.bf16.mxu0 %vm1225_vm0, %v11508_v37  ;;  %v11510_v37 = vld [vmem:[%s15392_s0 + $0x3c0] ss:$8 sps:$4 sm:$0xff]  }
 0x200   :  { %15594 = vst [vmem:[#allocation33_spill] sm:$0xff] %v12698_v20  ;;  %v3527_v11 = vpop.f32.mrb[21].mxu1  ;;  %v12701_v14 = vpack.c.bf16 %v2644_v10, %v2642_v56  ;;  %v11511_v56 = vld [vmem:[%s15392_s0 + $0x3d4] ss:$8 sps:$4 sm:$0xff]  }
 0x201   :  { %v12703_v57 = vpack.c.bf16 %v2645_v21, %v2643_v44  ;;  %v1885_v1 = vpop.f32.mrb[132].mxu0  ;;  %v12705_v15 = vpop.f32.mrb[22].mxu1  ;;  %v15598_v21 = vmov 0  }
 0x202   :  { %15595 = vst [vmem:[#allocation34_spill] sm:$0xff] %v12701_v14  ;;  %15597 = vst [vmem:[#allocation36_spill] sm:$0xff] %v12705_v15  ;;  %v1886_v36 = vadd.f32 %v1885_v1, %v12075_v30  ;;  %v1887_v9 = vpop.f32.mrb[133].mxu0  ;;  %v3530_v55 = vpop.f32.mrb[23].mxu1  ;;  %4340 = vmatprep.subr.bf16.mxu0 %v15598_v21 }
 0x203   :  { %15596 = vst [vmem:[#allocation35_spill] sm:$0xff] %v12703_v57  ;;  %v1888_v23 = vadd.f32 %v1887_v9, %v12077_v31  ;;  %v1889_v43 = vpop.f32.mrb[134].mxu0  ;;  %9555 = vmatprep.mubr.msk.bf16.mxu1 %vm3162_vm2, %v12703_v57 }
 0x204   :  { %v1890_v10 = vadd.f32 %v1889_v43, %v12075_v30  ;;  %v1891_v44 = vpop.f32.mrb[135].mxu0  ;;  %3740 = vmatmul.mubr.bf16.gmra.mrb[128].mxu1 %v12701_v14  ;;  %v2646_v1 = vmax.f32 %v1886_v36, 0.0 }
 0x205   :  { %v1892_v11 = vadd.f32 %v1891_v44, %v12077_v31  ;;  %v2647_v55 = vmax.f32 %v1888_v23, 0.0 }
 0x206   :  { %v2648_v9 = vmax.f32 %v1890_v10, 0.0  ;;  %2154 = vmatmul.mubr.bf16.gmra.mrb[240].mxu0 %v11510_v37  ;;  %v11513_v37 = vld [vmem:[%s15392_s0 + $0x3d0] ss:$8 sps:$4 sm:$0xff]  }
 0x207   :  { %v2649_v15 = vmax.f32 %v1892_v11, 0.0  ;;  %v12724_v20 = vpop.f32.mrb[24].mxu1  ;;  %9479 = vmatprep.mubr.msk.bf16.mxu0 %vm1225_vm0, %v11511_v56 }
 0x208   :  { %15599 = vst [vmem:[#allocation37_spill] sm:$0xff] %v12724_v20  ;;  %v3535_v57 = vpop.f32.mrb[25].mxu1  ;;  %v12727_v22 = vpack.c.bf16 %v2648_v9, %v2646_v1 }
 0x209   :  { %v12729_v43 = vpack.c.bf16 %v2649_v15, %v2647_v55  ;;  %v1895_v40 = vpop.f32.mrb[136].mxu0  ;;  %v12731_v14 = vpop.f32.mrb[26].mxu1  ;;  %v11514_v15 = vld [vmem:[%s15392_s0 + $0x3e4] ss:$8 sps:$4 sm:$0xff]  }
 0x20a   :  { %15600 = vst [vmem:[#allocation38_spill] sm:$0xff] %v12727_v22  ;;  %15602 = vst [vmem:[#allocation40_spill] sm:$0xff] %v12731_v14  ;;  %v1896_v21 = vadd.f32 %v1895_v40, %v12075_v30  ;;  %v1897_v44 = vpop.f32.mrb[137].mxu0  ;;  %v3538_v36 = vpop.f32.mrb[27].mxu1 }
 0x20b   :  { %15601 = vst [vmem:[#allocation39_spill] sm:$0xff] %v12729_v43  ;;  %v1898_v23 = vadd.f32 %v1897_v44, %v12077_v31  ;;  %v1899_v10 = vpop.f32.mrb[138].mxu0  ;;  %9556 = vmatprep.mubr.msk.bf16.mxu1 %vm3162_vm2, %v12729_v43 }
 0x20c   :  { %v1900_v57 = vadd.f32 %v1899_v10, %v12075_v30  ;;  %v1901_v56 = vpop.f32.mrb[139].mxu0  ;;  %3748 = vmatmul.mubr.bf16.gmra.mrb[132].mxu1 %v12727_v22  ;;  %v2650_v11 = vmax.f32 %v1896_v21, 0.0 }
 0x20d   :  { %v1902_v40 = vadd.f32 %v1901_v56, %v12077_v31  ;;  %v2651_v9 = vmax.f32 %v1898_v23, 0.0 }
 0x20e   :  { %v2652_v1 = vmax.f32 %v1900_v57, 0.0  ;;  %2164 = vmatmul.mubr.bf16.gmra.mrb[244].mxu0 %v11513_v37  ;;  %v11516_v37 = vld [vmem:[%s15392_s0 + $0x3e0] ss:$8 sps:$4 sm:$0xff]  }
 0x20f   :  { %v2653_v55 = vmax.f32 %v1902_v40, 0.0  ;;  %v12746_v44 = vpop.f32.mrb[28].mxu1  ;;  %9480 = vmatprep.mubr.msk.bf16.mxu0 %vm1225_vm0, %v11514_v15  ;;  %v11517_v15 = vld [vmem:[%s15392_s0 + $0x3f4] ss:$8 sps:$4 sm:$0xff]  }
 0x210   :  { %15603 = vst [vmem:[#allocation41_spill] sm:$0xff] %v12746_v44  ;;  %v3543_v36 = vpop.f32.mrb[29].mxu1  ;;  %v12749_v14 = vpack.c.bf16 %v2652_v1, %v2650_v11 }
 0x211   :  { %v12751_v20 = vpack.c.bf16 %v2653_v55, %v2651_v9  ;;  %v1905_v10 = vpop.f32.mrb[140].mxu0  ;;  %v12753_v43 = vpop.f32.mrb[30].mxu1 }
 0x212   :  { %15604 = vst [vmem:[#allocation42_spill] sm:$0xff] %v12749_v14  ;;  %15606 = vst [vmem:[#allocation44_spill] sm:$0xff] %v12753_v43  ;;  %v1906_v22 = vadd.f32 %v1905_v10, %v12075_v30  ;;  %v1907_v56 = vpop.f32.mrb[141].mxu0  ;;  %v3546_v21 = vpop.f32.mrb[31].mxu1 }
 0x213   :  { %15605 = vst [vmem:[#allocation43_spill] sm:$0xff] %v12751_v20  ;;  %v1908_v23 = vadd.f32 %v1907_v56, %v12077_v31  ;;  %v1909_v57 = vpop.f32.mrb[142].mxu0  ;;  %9557 = vmatprep.mubr.msk.bf16.mxu1 %vm3162_vm2, %v12751_v20 }
 0x214   :  { %v1910_v40 = vadd.f32 %v1909_v57, %v12075_v30  ;;  %v1911_v11 = vpop.f32.mrb[143].mxu0  ;;  %3756 = vmatmul.mubr.bf16.gmra.mrb[136].mxu1 %v12749_v14  ;;  %v2654_v9 = vmax.f32 %v1906_v22, 0.0 }
 0x215   :  { %v1912_v1 = vadd.f32 %v1911_v11, %v12077_v31  ;;  %v2655_v36 = vmax.f32 %v1908_v23, 0.0 }
 0x216   :  { %v2656_v55 = vmax.f32 %v1910_v40, 0.0  ;;  %2174 = vmatmul.mubr.bf16.gmra.mrb[248].mxu0 %v11516_v37  ;;  %v11519_v37 = vld [vmem:[%s15392_s0 + $0x3f0] ss:$8 sps:$4 sm:$0xff]  }
 0x217   :  { %v2657_v10 = vmax.f32 %v1912_v1, 0.0  ;;  %v12768_v56 = vpop.f32.mrb[32].mxu1  ;;  %9481 = vmatprep.mubr.msk.bf16.mxu0 %vm1225_vm0, %v11517_v15  ;;  %v11522_v15 = vld [vmem:[%s15392_s0 + $0x404] ss:$8 sps:$4 sm:$0xff]  }
 0x218   :  { %15607 = vst [vmem:[#allocation45_spill] sm:$0xff] %v12768_v56  ;;  %v3551_v21 = vpop.f32.mrb[33].mxu1  ;;  %v12771_v43 = vpack.c.bf16 %v2656_v55, %v2654_v9 }
 0x219   :  { %v12773_v44 = vpack.c.bf16 %v2657_v10, %v2655_v36  ;;  %v1915_v57 = vpop.f32.mrb[144].mxu0  ;;  %v12775_v20 = vpop.f32.mrb[34].mxu1 }
 0x21a   :  { %15608 = vst [vmem:[#allocation46_spill] sm:$0xff] %v12771_v43  ;;  %15610 = vst [vmem:[#allocation48_spill] sm:$0xff] %v12775_v20  ;;  %v1916_v14 = vadd.f32 %v1915_v57, %v12075_v30  ;;  %v1917_v11 = vpop.f32.mrb[145].mxu0  ;;  %v3554_v22 = vpop.f32.mrb[35].mxu1 }
 0x21b   :  { %15609 = vst [vmem:[#allocation47_spill] sm:$0xff] %v12773_v44  ;;  %v1918_v23 = vadd.f32 %v1917_v11, %v12077_v31  ;;  %v1919_v40 = vpop.f32.mrb[146].mxu0  ;;  %9558 = vmatprep.mubr.msk.bf16.mxu1 %vm3162_vm2, %v12773_v44 }
 0x21c   :  { %v1920_v1 = vadd.f32 %v1919_v40, %v12075_v30  ;;  %v1921_v9 = vpop.f32.mrb[147].mxu0  ;;  %3764 = vmatmul.mubr.bf16.gmra.mrb[140].mxu1 %v12771_v43  ;;  %v2658_v36 = vmax.f32 %v1916_v14, 0.0 }
 0x21d   :  { %v1922_v55 = vadd.f32 %v1921_v9, %v12077_v31  ;;  %v2659_v21 = vmax.f32 %v1918_v23, 0.0 }
 0x21e   :  { %v2660_v10 = vmax.f32 %v1920_v1, 0.0  ;;  %2184 = vmatmul.mubr.bf16.gmra.mrb[252].mxu0 %v11519_v37  ;;  %v11520_v37 = vld [vmem:[%s15392_s0 + $0x400] ss:$8 sps:$4 sm:$0xff]  }
 0x21f   :  { %v2661_v57 = vmax.f32 %v1922_v55, 0.0  ;;  %v12790_v11 = vpop.f32.mrb[36].mxu1  ;;  %9482 = vmatprep.mubr.msk.bf16.mxu0 %vm1225_vm0, %v11522_v15  ;;  %v11526_v15 = vld [vmem:[%s15392_s0 + $0x414] ss:$8 sps:$4 sm:$0xff]  }
 0x220   :  { %15611 = vst [vmem:[#allocation49_spill] sm:$0xff] %v12790_v11  ;;  %v3559_v22 = vpop.f32.mrb[37].mxu1  ;;  %v12793_v20 = vpack.c.bf16 %v2660_v10, %v2658_v36 }
 0x221   :  { %v12795_v56 = vpack.c.bf16 %v2661_v57, %v2659_v21  ;;  %v1925_v40 = vpop.f32.mrb[148].mxu0  ;;  %v12797_v44 = vpop.f32.mrb[38].mxu1 }
 0x222   :  { %15612 = vst [vmem:[#allocation50_spill] sm:$0xff] %v12793_v20  ;;  %15614 = vst [vmem:[#allocation52_spill] sm:$0xff] %v12797_v44  ;;  %v1926_v43 = vadd.f32 %v1925_v40, %v12075_v30  ;;  %v1927_v9 = vpop.f32.mrb[149].mxu0  ;;  %v3562_v14 = vpop.f32.mrb[39].mxu1 }
 0x223   :  { %15613 = vst [vmem:[#allocation51_spill] sm:$0xff] %v12795_v56  ;;  %v1928_v23 = vadd.f32 %v1927_v9, %v12077_v31  ;;  %v1929_v1 = vpop.f32.mrb[150].mxu0  ;;  %9559 = vmatprep.mubr.msk.bf16.mxu1 %vm3162_vm2, %v12795_v56 }
 0x224   :  { %v1930_v55 = vadd.f32 %v1929_v1, %v12075_v30  ;;  %v1931_v36 = vpop.f32.mrb[151].mxu0  ;;  %3772 = vmatmul.mubr.bf16.gmra.mrb[144].mxu1 %v12793_v20  ;;  %v2662_v21 = vmax.f32 %v1926_v43, 0.0 }
 0x225   :  { %v1932_v10 = vadd.f32 %v1931_v36, %v12077_v31  ;;  %v2663_v22 = vmax.f32 %v1928_v23, 0.0 }
 0x226   :  { %v2664_v57 = vmax.f32 %v1930_v55, 0.0  ;;  %2194 = vmatmul.mubr.bf16.gmra.mrb[0].mxu0 %v11520_v37  ;;  %v11524_v37 = vld [vmem:[%s15392_s0 + $0x410] ss:$8 sps:$4 sm:$0xff]  }
 0x227   :  { %v2665_v40 = vmax.f32 %v1932_v10, 0.0  ;;  %v12812_v9 = vpop.f32.mrb[40].mxu1  ;;  %9483 = vmatprep.mubr.msk.bf16.mxu0 %vm1225_vm0, %v11526_v15  ;;  %v11529_v15 = vld [vmem:[%s15392_s0 + $0x424] ss:$8 sps:$4 sm:$0xff]  }
 0x228   :  { %15615 = vst [vmem:[#allocation53_spill] sm:$0xff] %v12812_v9  ;;  %v3567_v14 = vpop.f32.mrb[41].mxu1  ;;  %v12815_v44 = vpack.c.bf16 %v2664_v57, %v2662_v21 }
 0x229   :  { %v12817_v11 = vpack.c.bf16 %v2665_v40, %v2663_v22  ;;  %v1935_v1 = vpop.f32.mrb[152].mxu0  ;;  %v12819_v56 = vpop.f32.mrb[42].mxu1 }
 0x22a   :  { %15616 = vst [vmem:[#allocation54_spill] sm:$0xff] %v12815_v44  ;;  %15618 = vst [vmem:[#allocation56_spill] sm:$0xff] %v12819_v56  ;;  %v1936_v20 = vadd.f32 %v1935_v1, %v12075_v30  ;;  %v1937_v36 = vpop.f32.mrb[153].mxu0  ;;  %v3570_v43 = vpop.f32.mrb[43].mxu1 }
 0x22b   :  { %15617 = vst [vmem:[#allocation55_spill] sm:$0xff] %v12817_v11  ;;  %v1938_v23 = vadd.f32 %v1937_v36, %v12077_v31  ;;  %v1939_v55 = vpop.f32.mrb[154].mxu0  ;;  %9560 = vmatprep.mubr.msk.bf16.mxu1 %vm3162_vm2, %v12817_v11 }
 0x22c   :  { %v1940_v10 = vadd.f32 %v1939_v55, %v12075_v30  ;;  %v1941_v21 = vpop.f32.mrb[155].mxu0  ;;  %3780 = vmatmul.mubr.bf16.gmra.mrb[148].mxu1 %v12815_v44  ;;  %v2666_v22 = vmax.f32 %v1936_v20, 0.0 }
 0x22d   :  { %v1942_v57 = vadd.f32 %v1941_v21, %v12077_v31  ;;  %v2667_v14 = vmax.f32 %v1938_v23, 0.0 }
 0x22e   :  { %v2668_v40 = vmax.f32 %v1940_v10, 0.0  ;;  %2204 = vmatmul.mubr.bf16.gmra.mrb[4].mxu0 %v11524_v37  ;;  %v11527_v37 = vld [vmem:[%s15392_s0 + $0x420] ss:$8 sps:$4 sm:$0xff]  }
 0x22f   :  { %v2669_v1 = vmax.f32 %v1942_v57, 0.0  ;;  %v12834_v36 = vpop.f32.mrb[44].mxu1  ;;  %9484 = vmatprep.mubr.msk.bf16.mxu0 %vm1225_vm0, %v11529_v15  ;;  %v11532_v15 = vld [vmem:[%s15392_s0 + $0x434] ss:$8 sps:$4 sm:$0xff]  }
 0x230   :  { %15619 = vst [vmem:[#allocation57_spill] sm:$0xff] %v12834_v36  ;;  %v3575_v43 = vpop.f32.mrb[45].mxu1  ;;  %v12837_v56 = vpack.c.bf16 %v2668_v40, %v2666_v22 }
 0x231   :  { %v12839_v9 = vpack.c.bf16 %v2669_v1, %v2667_v14  ;;  %v1945_v55 = vpop.f32.mrb[156].mxu0  ;;  %v12841_v11 = vpop.f32.mrb[46].mxu1 }
 0x232   :  { %15620 = vst [vmem:[#allocation58_spill] sm:$0xff] %v12837_v56  ;;  %15622 = vst [vmem:[#allocation60_spill] sm:$0xff] %v12841_v11  ;;  %v1946_v44 = vadd.f32 %v1945_v55, %v12075_v30  ;;  %v1947_v21 = vpop.f32.mrb[157].mxu0  ;;  %v3578_v20 = vpop.f32.mrb[47].mxu1 }
 0x233   :  { %15621 = vst [vmem:[#allocation59_spill] sm:$0xff] %v12839_v9  ;;  %v1948_v23 = vadd.f32 %v1947_v21, %v12077_v31  ;;  %v1949_v10 = vpop.f32.mrb[158].mxu0  ;;  %9561 = vmatprep.mubr.msk.bf16.mxu1 %vm3162_vm2, %v12839_v9 }
 0x234   :  { %v1950_v57 = vadd.f32 %v1949_v10, %v12075_v30  ;;  %v1951_v22 = vpop.f32.mrb[159].mxu0  ;;  %3788 = vmatmul.mubr.bf16.gmra.mrb[152].mxu1 %v12837_v56  ;;  %v2670_v14 = vmax.f32 %v1946_v44, 0.0 }
 0x235   :  { %v1952_v40 = vadd.f32 %v1951_v22, %v12077_v31  ;;  %v2671_v43 = vmax.f32 %v1948_v23, 0.0 }
 0x236   :  { %v2672_v1 = vmax.f32 %v1950_v57, 0.0  ;;  %2214 = vmatmul.mubr.bf16.gmra.mrb[8].mxu0 %v11527_v37  ;;  %v11530_v37 = vld [vmem:[%s15392_s0 + $0x430] ss:$8 sps:$4 sm:$0xff]  }
 0x237   :  { %v2673_v55 = vmax.f32 %v1952_v40, 0.0  ;;  %v12856_v21 = vpop.f32.mrb[48].mxu1  ;;  %9485 = vmatprep.mubr.msk.bf16.mxu0 %vm1225_vm0, %v11532_v15  ;;  %v11535_v15 = vld [vmem:[%s15392_s0 + $0x444] ss:$8 sps:$4 sm:$0xff]  }
 0x238   :  { %15623 = vst [vmem:[#allocation61_spill] sm:$0xff] %v12856_v21  ;;  %v3583_v20 = vpop.f32.mrb[49].mxu1  ;;  %v12859_v11 = vpack.c.bf16 %v2672_v1, %v2670_v14 }
 0x239   :  { %v12861_v36 = vpack.c.bf16 %v2673_v55, %v2671_v43  ;;  %v1955_v10 = vpop.f32.mrb[160].mxu0  ;;  %v12863_v9 = vpop.f32.mrb[50].mxu1 }
 0x23a   :  { %15624 = vst [vmem:[#allocation62_spill] sm:$0xff] %v12859_v11  ;;  %15626 = vst [vmem:[#allocation64_spill] sm:$0xff] %v12863_v9  ;;  %v1956_v56 = vadd.f32 %v1955_v10, %v12075_v30  ;;  %v1957_v22 = vpop.f32.mrb[161].mxu0  ;;  %v3586_v44 = vpop.f32.mrb[51].mxu1 }
 0x23b   :  { %15625 = vst [vmem:[#allocation63_spill] sm:$0xff] %v12861_v36  ;;  %v1958_v23 = vadd.f32 %v1957_v22, %v12077_v31  ;;  %v1959_v57 = vpop.f32.mrb[162].mxu0  ;;  %9562 = vmatprep.mubr.msk.bf16.mxu1 %vm3162_vm2, %v12861_v36 }
 0x23c   :  { %v1960_v40 = vadd.f32 %v1959_v57, %v12075_v30  ;;  %v1961_v14 = vpop.f32.mrb[163].mxu0  ;;  %3796 = vmatmul.mubr.bf16.gmra.mrb[156].mxu1 %v12859_v11  ;;  %v2674_v43 = vmax.f32 %v1956_v56, 0.0 }
 0x23d   :  { %v1962_v1 = vadd.f32 %v1961_v14, %v12077_v31  ;;  %v2675_v20 = vmax.f32 %v1958_v23, 0.0 }
 0x23e   :  { %v2676_v55 = vmax.f32 %v1960_v40, 0.0  ;;  %2224 = vmatmul.mubr.bf16.gmra.mrb[12].mxu0 %v11530_v37  ;;  %v11533_v37 = vld [vmem:[%s15392_s0 + $0x440] ss:$8 sps:$4 sm:$0xff]  }
 0x23f   :  { %v2677_v10 = vmax.f32 %v1962_v1, 0.0  ;;  %v12878_v22 = vpop.f32.mrb[52].mxu1  ;;  %9486 = vmatprep.mubr.msk.bf16.mxu0 %vm1225_vm0, %v11535_v15  ;;  %v11538_v15 = vld [vmem:[%s15392_s0 + $0x454] ss:$8 sps:$4 sm:$0xff]  }
 0x240   :  { %15627 = vst [vmem:[#allocation65_spill] sm:$0xff] %v12878_v22  ;;  %v3591_v44 = vpop.f32.mrb[53].mxu1  ;;  %v12881_v9 = vpack.c.bf16 %v2676_v55, %v2674_v43 }
 0x241   :  { %v12883_v21 = vpack.c.bf16 %v2677_v10, %v2675_v20  ;;  %v1965_v57 = vpop.f32.mrb[164].mxu0  ;;  %v12885_v36 = vpop.f32.mrb[54].mxu1 }
 0x242   :  { %15628 = vst [vmem:[#allocation66_spill] sm:$0xff] %v12881_v9  ;;  %15630 = vst [vmem:[#allocation68_spill] sm:$0xff] %v12885_v36  ;;  %v1966_v11 = vadd.f32 %v1965_v57, %v12075_v30  ;;  %v1967_v14 = vpop.f32.mrb[165].mxu0  ;;  %v3594_v56 = vpop.f32.mrb[55].mxu1  ;;  %v11582_v57 = vld [vmem:[%s15396_s5 + $0x24] sm:$0xff]  }
 0x243   :  { %15629 = vst [vmem:[#allocation67_spill] sm:$0xff] %v12883_v21  ;;  %v1968_v23 = vadd.f32 %v1967_v14, %v12077_v31  ;;  %v1969_v40 = vpop.f32.mrb[166].mxu0  ;;  %9563 = vmatprep.mubr.msk.bf16.mxu1 %vm3162_vm2, %v12883_v21  ;;  %10358 = vmatprep.subr.bf16.mxu1 %v11582_v57 }
 0x244   :  { %v1970_v1 = vadd.f32 %v1969_v40, %v12075_v30  ;;  %v1971_v43 = vpop.f32.mrb[167].mxu0  ;;  %3804 = vmatmul.mubr.bf16.gmra.mrb[160].mxu1 %v12881_v9  ;;  %v2678_v55 = vmax.f32 %v1966_v11, 0.0  ;;  %v11536_v11 = vld [vmem:[%s15392_s0 + $0x450] ss:$8 sps:$4 sm:$0xff]  }
 0x245   :  { %v2679_v20 = vmax.f32 %v1968_v23, 0.0  ;;  %v1972_v10 = vadd.f32 %v1971_v43, %v12077_v31  ;;  %10359 = vmatpush3.bf16.msra.mxu1 %v11582_v57 }
 0x246   :  { %v2680_v44 = vmax.f32 %v1970_v1, 0.0  ;;  %2234 = vmatmul.mubr.bf16.gmra.mrb[16].mxu0 %v11533_v37 }
 0x247   :  { %v2681_v14 = vmax.f32 %v1972_v10, 0.0  ;;  %v12903_v56 = vpop.f32.mrb[56].mxu1  ;;  %9487 = vmatprep.mubr.msk.bf16.mxu0 %vm1225_vm0, %v11538_v15 }
 0x248   :  { %15631 = vst [vmem:[#allocation69_spill] sm:$0xff] %v12903_v56  ;;  %v3599_v36 = vpop.f32.mrb[57].mxu1  ;;  %v12906_v40 = vpack.c.bf16 %v2680_v44, %v2678_v55  ;;  %v11541_v55 = vld [vmem:[%s15392_s0 + $0x464] ss:$8 sps:$4 sm:$0xff]  }
 0x249   :  { %v12911_v23 = vpack.c.bf16 %v2681_v14, %v2679_v20  ;;  %v1975_v37 = vpop.f32.mrb[168].mxu0  ;;  %v12913_v1 = vpop.f32.mrb[58].mxu1 }
 0x24a   :  { %15632 = vst [vmem:[#allocation70_spill] sm:$0xff] %v12906_v40  ;;  %15634 = vst [vmem:[#allocation72_spill] sm:$0xff] %v12913_v1  ;;  %v1976_v43 = vadd.f32 %v1975_v37, %v12075_v30  ;;  %v1977_v10 = vpop.f32.mrb[169].mxu0  ;;  %v3602_v56 = vpop.f32.mrb[59].mxu1 }
 0x24b   :  { %15633 = vst [vmem:[#allocation71_spill] sm:$0xff] %v12911_v23  ;;  %v1978_v15 = vadd.f32 %v1977_v10, %v12077_v31  ;;  %v1979_v36 = vpop.f32.mrb[170].mxu0  ;;  %9564 = vmatprep.mubr.msk.bf16.mxu1 %vm3162_vm2, %v12911_v23 }
 0x24c   :  { %v1980_v20 = vadd.f32 %v1979_v36, %v12075_v30  ;;  %v1981_v44 = vpop.f32.mrb[171].mxu0  ;;  %3812 = vmatmul.mubr.bf16.gmra.mrb[164].mxu1 %v12906_v40  ;;  %v2682_v57 = vmax.f32 %v1976_v43, 0.0  ;;  %v11539_v36 = vld [vmem:[%s15392_s0 + $0x460] ss:$8 sps:$4 sm:$0xff]  }
 0x24d   :  { %v1982_v14 = vadd.f32 %v1981_v44, %v12077_v31  ;;  %v2683_v37 = vmax.f32 %v1978_v15, 0.0 }
 0x24e   :  { %v2684_v56 = vmax.f32 %v1980_v20, 0.0  ;;  %2244 = vmatmul.mubr.bf16.gmra.mrb[20].mxu0 %v11536_v11 }
 0x24f   :  { %v2685_v10 = vmax.f32 %v1982_v14, 0.0  ;;  %v12925_v1 = vpop.f32.mrb[60].mxu1  ;;  %9488 = vmatprep.mubr.msk.bf16.mxu0 %vm1225_vm0, %v11541_v55 }
 0x250   :  { %15635 = vst [vmem:[#allocation73_spill] sm:$0xff] %v12925_v1  ;;  %v3607_v23 = vpop.f32.mrb[61].mxu1  ;;  %v12928_v9 = vpack.c.bf16 %v2684_v56, %v2682_v57 }
 0x251   :  { %v12933_v22 = vpack.c.bf16 %v2685_v10, %v2683_v37  ;;  %v1985_v43 = vpop.f32.mrb[172].mxu0  ;;  %v12935_v40 = vpop.f32.mrb[62].mxu1  ;;  %v11544_v23 = vld [vmem:[%s15392_s0 + $0x474] ss:$8 sps:$4 sm:$0xff]   ;;  %v11589_v10 = vld [vmem:[%s15393_s4 + $0x40] sm:$0xff]  }
 0x252   :  { %15636 = vst [vmem:[#allocation74_spill] sm:$0xff] %v12928_v9  ;;  %15638 = vst [vmem:[#allocation76_spill] sm:$0xff] %v12935_v40  ;;  %v1986_v15 = vadd.f32 %v1985_v43, %v12075_v30  ;;  %v1987_v11 = vpop.f32.mrb[173].mxu0  ;;  %v3610_v20 = vpop.f32.mrb[63].mxu1  ;;  %4341 = vmatpush1.bf16.msra.mxu0 %v11589_v10 }
 0x253   :  { %15637 = vst [vmem:[#allocation75_spill] sm:$0xff] %v12933_v22  ;;  %v1988_v44 = vadd.f32 %v1987_v11, %v12077_v31  ;;  %v1989_v14 = vpop.f32.mrb[174].mxu0  ;;  %9565 = vmatprep.mubr.msk.bf16.mxu1 %vm3162_vm2, %v12933_v22 }
 0x254   :  { %v1990_v55 = vadd.f32 %v1989_v14, %v12075_v30  ;;  %v1991_v57 = vpop.f32.mrb[175].mxu0  ;;  %3820 = vmatmul.mubr.bf16.gmra.mrb[168].mxu1 %v12928_v9  ;;  %v2686_v37 = vmax.f32 %v1986_v15, 0.0  ;;  %v11542_v15 = vld [vmem:[%s15392_s0 + $0x470] ss:$8 sps:$4 sm:$0xff]  }
 0x255   :  { %v1992_v56 = vadd.f32 %v1991_v57, %v12077_v31  ;;  %v2687_v43 = vmax.f32 %v1988_v44, 0.0 }
 0x256   :  { %v2688_v11 = vmax.f32 %v1990_v55, 0.0  ;;  %2254 = vmatmul.mubr.bf16.gmra.mrb[24].mxu0 %v11539_v36 }
 0x257   :  { %v2689_v20 = vmax.f32 %v1992_v56, 0.0  ;;  %v12950_v40 = vpop.f32.mrb[64].mxu1  ;;  %9489 = vmatprep.mubr.msk.bf16.mxu0 %vm1225_vm0, %v11544_v23 }
 0x258   :  { %15639 = vst [vmem:[#allocation77_spill] sm:$0xff] %v12950_v40  ;;  %v3615_v14 = vpop.f32.mrb[65].mxu1  ;;  %v12953_v1 = vpack.c.bf16 %v2688_v11, %v2686_v37  ;;  %v11547_v37 = vld [vmem:[%s15392_s0 + $0x484] ss:$8 sps:$4 sm:$0xff]  }
 0x259   :  { %v12958_v57 = vpack.c.bf16 %v2689_v20, %v2687_v43  ;;  %v1995_v9 = vpop.f32.mrb[176].mxu0  ;;  %v12960_v22 = vpop.f32.mrb[66].mxu1 }
 0x25a   :  { %15640 = vst [vmem:[#allocation78_spill] sm:$0xff] %v12953_v1  ;;  %15642 = vst [vmem:[#allocation80_spill] sm:$0xff] %v12960_v22  ;;  %v1996_v36 = vadd.f32 %v1995_v9, %v12075_v30  ;;  %v1997_v44 = vpop.f32.mrb[177].mxu0  ;;  %v3618_v55 = vpop.f32.mrb[67].mxu1 }
 0x25b   :  { %15641 = vst [vmem:[#allocation79_spill] sm:$0xff] %v12958_v57  ;;  %v1998_v56 = vadd.f32 %v1997_v44, %v12077_v31  ;;  %v1999_v23 = vpop.f32.mrb[178].mxu0  ;;  %9566 = vmatprep.mubr.msk.bf16.mxu1 %vm3162_vm2, %v12958_v57 }
 0x25c   :  { %v2000_v10 = vadd.f32 %v1999_v23, %v12075_v30  ;;  %v2001_v43 = vpop.f32.mrb[179].mxu0  ;;  %3828 = vmatmul.mubr.bf16.gmra.mrb[172].mxu1 %v12953_v1  ;;  %v2690_v9 = vmax.f32 %v1996_v36, 0.0 }
 0x25d   :  { %v2002_v11 = vadd.f32 %v2001_v43, %v12077_v31  ;;  %v2691_v14 = vmax.f32 %v1998_v56, 0.0 }
 0x25e   :  { %v2692_v20 = vmax.f32 %v2000_v10, 0.0  ;;  %2264 = vmatmul.mubr.bf16.gmra.mrb[28].mxu0 %v11542_v15  ;;  %v11545_v15 = vld [vmem:[%s15392_s0 + $0x480] ss:$8 sps:$4 sm:$0xff]  }
 0x25f   :  { %v2693_v44 = vmax.f32 %v2002_v11, 0.0  ;;  %v12972_v55 = vpop.f32.mrb[68].mxu1  ;;  %9490 = vmatprep.mubr.msk.bf16.mxu0 %vm1225_vm0, %v11547_v37 }
 0x260   :  { %15643 = vst [vmem:[#allocation81_spill] sm:$0xff] %v12972_v55  ;;  %v3623_v22 = vpop.f32.mrb[69].mxu1  ;;  %v12975_v40 = vpack.c.bf16 %v2692_v20, %v2690_v9 }
 0x261   :  { %v12977_v57 = vpack.c.bf16 %v2693_v44, %v2691_v14  ;;  %v2005_v23 = vpop.f32.mrb[180].mxu0  ;;  %v12979_v21 = vpop.f32.mrb[70].mxu1  ;;  %v11550_v22 = vld [vmem:[%s15392_s0 + $0x494] ss:$8 sps:$4 sm:$0xff]  }
 0x262   :  { %15644 = vst [vmem:[#allocation82_spill] sm:$0xff] %v12975_v40  ;;  %15646 = vst [vmem:[#allocation84_spill] sm:$0xff] %v12979_v21  ;;  %v2006_v1 = vadd.f32 %v2005_v23, %v12075_v30  ;;  %v2007_v43 = vpop.f32.mrb[181].mxu0  ;;  %v3626_v36 = vpop.f32.mrb[71].mxu1 }
 0x263   :  { %15645 = vst [vmem:[#allocation83_spill] sm:$0xff] %v12977_v57  ;;  %v2008_v56 = vadd.f32 %v2007_v43, %v12077_v31  ;;  %v2009_v10 = vpop.f32.mrb[182].mxu0  ;;  %9567 = vmatprep.mubr.msk.bf16.mxu1 %vm3162_vm2, %v12977_v57 }
 0x264   :  { %v2010_v37 = vadd.f32 %v2009_v10, %v12075_v30  ;;  %v2011_v11 = vpop.f32.mrb[183].mxu0  ;;  %3836 = vmatmul.mubr.bf16.gmra.mrb[176].mxu1 %v12975_v40  ;;  %v2694_v20 = vmax.f32 %v2006_v1, 0.0 }
 0x265   :  { %v2012_v9 = vadd.f32 %v2011_v11, %v12077_v31  ;;  %v2695_v44 = vmax.f32 %v2008_v56, 0.0 }
 0x266   :  { %v2696_v14 = vmax.f32 %v2010_v37, 0.0  ;;  %2274 = vmatmul.mubr.bf16.gmra.mrb[32].mxu0 %v11545_v15  ;;  %v11548_v15 = vld [vmem:[%s15392_s0 + $0x490] ss:$8 sps:$4 sm:$0xff]  }
 0x267   :  { %v2697_v23 = vmax.f32 %v2012_v9, 0.0  ;;  %v12994_v43 = vpop.f32.mrb[72].mxu1  ;;  %9491 = vmatprep.mubr.msk.bf16.mxu0 %vm1225_vm0, %v11550_v22  ;;  %v11553_v22 = vld [vmem:[%s15392_s0 + $0x4a4] ss:$8 sps:$4 sm:$0xff]  }
 0x268   :  { %15647 = vst [vmem:[#allocation85_spill] sm:$0xff] %v12994_v43  ;;  %v3631_v36 = vpop.f32.mrb[73].mxu1  ;;  %v12997_v21 = vpack.c.bf16 %v2696_v14, %v2694_v20 }
 0x269   :  { %v12999_v55 = vpack.c.bf16 %v2697_v23, %v2695_v44  ;;  %v2015_v10 = vpop.f32.mrb[184].mxu0  ;;  %v13001_v57 = vpop.f32.mrb[74].mxu1 }
 0x26a   :  { %15648 = vst [vmem:[#allocation86_spill] sm:$0xff] %v12997_v21  ;;  %15650 = vst [vmem:[#allocation88_spill] sm:$0xff] %v13001_v57  ;;  %v2016_v40 = vadd.f32 %v2015_v10, %v12075_v30  ;;  %v2017_v11 = vpop.f32.mrb[185].mxu0  ;;  %v3634_v1 = vpop.f32.mrb[75].mxu1 }
 0x26b   :  { %15649 = vst [vmem:[#allocation87_spill] sm:$0xff] %v12999_v55  ;;  %v2018_v56 = vadd.f32 %v2017_v11, %v12077_v31  ;;  %v2019_v37 = vpop.f32.mrb[186].mxu0  ;;  %9568 = vmatprep.mubr.msk.bf16.mxu1 %vm3162_vm2, %v12999_v55 }
 0x26c   :  { %v2020_v9 = vadd.f32 %v2019_v37, %v12075_v30  ;;  %v2021_v20 = vpop.f32.mrb[187].mxu0  ;;  %3844 = vmatmul.mubr.bf16.gmra.mrb[180].mxu1 %v12997_v21  ;;  %v2698_v44 = vmax.f32 %v2016_v40, 0.0 }
 0x26d   :  { %v2022_v14 = vadd.f32 %v2021_v20, %v12077_v31  ;;  %v2699_v36 = vmax.f32 %v2018_v56, 0.0 }
 0x26e   :  { %v2700_v23 = vmax.f32 %v2020_v9, 0.0  ;;  %2284 = vmatmul.mubr.bf16.gmra.mrb[36].mxu0 %v11548_v15  ;;  %v11551_v15 = vld [vmem:[%s15392_s0 + $0x4a0] ss:$8 sps:$4 sm:$0xff]  }
 0x26f   :  { %v2701_v10 = vmax.f32 %v2022_v14, 0.0  ;;  %v13016_v11 = vpop.f32.mrb[76].mxu1  ;;  %9492 = vmatprep.mubr.msk.bf16.mxu0 %vm1225_vm0, %v11553_v22  ;;  %v11556_v22 = vld [vmem:[%s15392_s0 + $0x4b4] ss:$8 sps:$4 sm:$0xff]  }
 0x270   :  { %15651 = vst [vmem:[#allocation89_spill] sm:$0xff] %v13016_v11  ;;  %v3639_v1 = vpop.f32.mrb[77].mxu1  ;;  %v13019_v57 = vpack.c.bf16 %v2700_v23, %v2698_v44 }
 0x271   :  { %v13021_v43 = vpack.c.bf16 %v2701_v10, %v2699_v36  ;;  %v2025_v37 = vpop.f32.mrb[188].mxu0  ;;  %v13023_v55 = vpop.f32.mrb[78].mxu1 }
 0x272   :  { %15652 = vst [vmem:[#allocation90_spill] sm:$0xff] %v13019_v57  ;;  %15654 = vst [vmem:[#allocation92_spill] sm:$0xff] %v13023_v55  ;;  %v2026_v21 = vadd.f32 %v2025_v37, %v12075_v30  ;;  %v2027_v20 = vpop.f32.mrb[189].mxu0  ;;  %v3642_v40 = vpop.f32.mrb[79].mxu1 }
 0x273   :  { %15653 = vst [vmem:[#allocation91_spill] sm:$0xff] %v13021_v43  ;;  %v2028_v56 = vadd.f32 %v2027_v20, %v12077_v31  ;;  %v2029_v9 = vpop.f32.mrb[190].mxu0  ;;  %9569 = vmatprep.mubr.msk.bf16.mxu1 %vm3162_vm2, %v13021_v43 }
 0x274   :  { %v2030_v14 = vadd.f32 %v2029_v9, %v12075_v30  ;;  %v2031_v44 = vpop.f32.mrb[191].mxu0  ;;  %3852 = vmatmul.mubr.bf16.gmra.mrb[184].mxu1 %v13019_v57  ;;  %v2702_v36 = vmax.f32 %v2026_v21, 0.0 }
 0x275   :  { %v2032_v23 = vadd.f32 %v2031_v44, %v12077_v31  ;;  %v2703_v1 = vmax.f32 %v2028_v56, 0.0 }
 0x276   :  { %v2704_v10 = vmax.f32 %v2030_v14, 0.0  ;;  %2294 = vmatmul.mubr.bf16.gmra.mrb[40].mxu0 %v11551_v15  ;;  %v11554_v15 = vld [vmem:[%s15392_s0 + $0x4b0] ss:$8 sps:$4 sm:$0xff]  }
 0x277   :  { %v2705_v37 = vmax.f32 %v2032_v23, 0.0  ;;  %v13038_v20 = vpop.f32.mrb[80].mxu1  ;;  %9493 = vmatprep.mubr.msk.bf16.mxu0 %vm1225_vm0, %v11556_v22  ;;  %v11560_v22 = vld [vmem:[%s15392_s0 + $0x4c4] ss:$8 sps:$4 sm:$0xff]  }
 0x278   :  { %15655 = vst [vmem:[#allocation93_spill] sm:$0xff] %v13038_v20  ;;  %v3647_v40 = vpop.f32.mrb[81].mxu1  ;;  %v13041_v55 = vpack.c.bf16 %v2704_v10, %v2702_v36 }
 0x279   :  { %v13043_v11 = vpack.c.bf16 %v2705_v37, %v2703_v1  ;;  %v2035_v9 = vpop.f32.mrb[192].mxu0  ;;  %v13045_v43 = vpop.f32.mrb[82].mxu1 }
 0x27a   :  { %15656 = vst [vmem:[#allocation94_spill] sm:$0xff] %v13041_v55  ;;  %15658 = vst [vmem:[#allocation96_spill] sm:$0xff] %v13045_v43  ;;  %v2036_v57 = vadd.f32 %v2035_v9, %v12075_v30  ;;  %v2037_v44 = vpop.f32.mrb[193].mxu0  ;;  %v3650_v21 = vpop.f32.mrb[83].mxu1 }
 0x27b   :  { %15657 = vst [vmem:[#allocation95_spill] sm:$0xff] %v13043_v11  ;;  %v2038_v56 = vadd.f32 %v2037_v44, %v12077_v31  ;;  %v2039_v14 = vpop.f32.mrb[194].mxu0  ;;  %9570 = vmatprep.mubr.msk.bf16.mxu1 %vm3162_vm2, %v13043_v11 }
 0x27c   :  { %v2040_v23 = vadd.f32 %v2039_v14, %v12075_v30  ;;  %v2041_v36 = vpop.f32.mrb[195].mxu0  ;;  %3860 = vmatmul.mubr.bf16.gmra.mrb[188].mxu1 %v13041_v55  ;;  %v2706_v1 = vmax.f32 %v2036_v57, 0.0 }
 0x27d   :  { %v2042_v10 = vadd.f32 %v2041_v36, %v12077_v31  ;;  %v2707_v40 = vmax.f32 %v2038_v56, 0.0 }
 0x27e   :  { %v2708_v37 = vmax.f32 %v2040_v23, 0.0  ;;  %2304 = vmatmul.mubr.bf16.gmra.mrb[44].mxu0 %v11554_v15  ;;  %v11558_v15 = vld [vmem:[%s15392_s0 + $0x4c0] ss:$8 sps:$4 sm:$0xff]  }
 0x27f   :  { %v2709_v9 = vmax.f32 %v2042_v10, 0.0  ;;  %v13060_v44 = vpop.f32.mrb[84].mxu1  ;;  %9494 = vmatprep.mubr.msk.bf16.mxu0 %vm1225_vm0, %v11560_v22  ;;  %v11563_v22 = vld [vmem:[%s15392_s0 + $0x4d4] ss:$8 sps:$4 sm:$0xff]  }
 0x280   :  { %15659 = vst [vmem:[#allocation97_spill] sm:$0xff] %v13060_v44  ;;  %v3655_v21 = vpop.f32.mrb[85].mxu1  ;;  %v13063_v43 = vpack.c.bf16 %v2708_v37, %v2706_v1 }
 0x281   :  { %v13065_v20 = vpack.c.bf16 %v2709_v9, %v2707_v40  ;;  %v2045_v14 = vpop.f32.mrb[196].mxu0  ;;  %v13067_v11 = vpop.f32.mrb[86].mxu1 }
 0x282   :  { %15660 = vst [vmem:[#allocation98_spill] sm:$0xff] %v13063_v43  ;;  %15662 = vst [vmem:[#allocation100_spill] sm:$0xff] %v13067_v11  ;;  %v2046_v55 = vadd.f32 %v2045_v14, %v12075_v30  ;;  %v2047_v36 = vpop.f32.mrb[197].mxu0  ;;  %v3658_v57 = vpop.f32.mrb[87].mxu1 }
 0x283   :  { %15661 = vst [vmem:[#allocation99_spill] sm:$0xff] %v13065_v20  ;;  %v2048_v56 = vadd.f32 %v2047_v36, %v12077_v31  ;;  %v2049_v23 = vpop.f32.mrb[198].mxu0  ;;  %9571 = vmatprep.mubr.msk.bf16.mxu1 %vm3162_vm2, %v13065_v20 }
 0x284   :  { %v2050_v10 = vadd.f32 %v2049_v23, %v12075_v30  ;;  %v2051_v1 = vpop.f32.mrb[199].mxu0  ;;  %3868 = vmatmul.mubr.bf16.gmra.mrb[192].mxu1 %v13063_v43  ;;  %v2710_v40 = vmax.f32 %v2046_v55, 0.0 }
 0x285   :  { %v2052_v37 = vadd.f32 %v2051_v1, %v12077_v31  ;;  %v2711_v21 = vmax.f32 %v2048_v56, 0.0 }
 0x286   :  { %v2712_v9 = vmax.f32 %v2050_v10, 0.0  ;;  %2314 = vmatmul.mubr.bf16.gmra.mrb[48].mxu0 %v11558_v15  ;;  %v11561_v15 = vld [vmem:[%s15392_s0 + $0x4d0] ss:$8 sps:$4 sm:$0xff]  }
 0x287   :  { %v2713_v14 = vmax.f32 %v2052_v37, 0.0  ;;  %v13082_v36 = vpop.f32.mrb[88].mxu1  ;;  %9495 = vmatprep.mubr.msk.bf16.mxu0 %vm1225_vm0, %v11563_v22  ;;  %v11566_v22 = vld [vmem:[%s15392_s0 + $0x4e4] ss:$8 sps:$4 sm:$0xff]  }
 0x288   :  { %15663 = vst [vmem:[#allocation101_spill] sm:$0xff] %v13082_v36  ;;  %v3663_v57 = vpop.f32.mrb[89].mxu1  ;;  %v13085_v11 = vpack.c.bf16 %v2712_v9, %v2710_v40 }
 0x289   :  { %v13087_v44 = vpack.c.bf16 %v2713_v14, %v2711_v21  ;;  %v2055_v23 = vpop.f32.mrb[200].mxu0  ;;  %v13089_v20 = vpop.f32.mrb[90].mxu1 }
 0x28a   :  { %15664 = vst [vmem:[#allocation102_spill] sm:$0xff] %v13085_v11  ;;  %15666 = vst [vmem:[#allocation104_spill] sm:$0xff] %v13089_v20  ;;  %v2056_v43 = vadd.f32 %v2055_v23, %v12075_v30  ;;  %v2057_v1 = vpop.f32.mrb[201].mxu0  ;;  %v3666_v55 = vpop.f32.mrb[91].mxu1 }
 0x28b   :  { %15665 = vst [vmem:[#allocation103_spill] sm:$0xff] %v13087_v44  ;;  %v2058_v56 = vadd.f32 %v2057_v1, %v12077_v31  ;;  %v2059_v10 = vpop.f32.mrb[202].mxu0  ;;  %9572 = vmatprep.mubr.msk.bf16.mxu1 %vm3162_vm2, %v13087_v44 }
 0x28c   :  { %v2060_v37 = vadd.f32 %v2059_v10, %v12075_v30  ;;  %v2061_v40 = vpop.f32.mrb[203].mxu0  ;;  %3876 = vmatmul.mubr.bf16.gmra.mrb[196].mxu1 %v13085_v11  ;;  %v2714_v21 = vmax.f32 %v2056_v43, 0.0 }
 0x28d   :  { %v2062_v9 = vadd.f32 %v2061_v40, %v12077_v31  ;;  %v2715_v57 = vmax.f32 %v2058_v56, 0.0 }
 0x28e   :  { %v2716_v14 = vmax.f32 %v2060_v37, 0.0  ;;  %2324 = vmatmul.mubr.bf16.gmra.mrb[52].mxu0 %v11561_v15  ;;  %v11564_v15 = vld [vmem:[%s15392_s0 + $0x4e0] ss:$8 sps:$4 sm:$0xff]  }
 0x28f   :  { %v2717_v23 = vmax.f32 %v2062_v9, 0.0  ;;  %v13104_v1 = vpop.f32.mrb[92].mxu1  ;;  %9496 = vmatprep.mubr.msk.bf16.mxu0 %vm1225_vm0, %v11566_v22  ;;  %v11569_v22 = vld [vmem:[%s15392_s0 + $0x4f4] ss:$8 sps:$4 sm:$0xff]  }
 0x290   :  { %15667 = vst [vmem:[#allocation105_spill] sm:$0xff] %v13104_v1  ;;  %v3671_v55 = vpop.f32.mrb[93].mxu1  ;;  %v13107_v20 = vpack.c.bf16 %v2716_v14, %v2714_v21 }
 0x291   :  { %v13109_v36 = vpack.c.bf16 %v2717_v23, %v2715_v57  ;;  %v2065_v10 = vpop.f32.mrb[204].mxu0  ;;  %v13111_v44 = vpop.f32.mrb[94].mxu1 }
 0x292   :  { %15668 = vst [vmem:[#allocation106_spill] sm:$0xff] %v13107_v20  ;;  %15670 = vst [vmem:[#allocation108_spill] sm:$0xff] %v13111_v44  ;;  %v2066_v11 = vadd.f32 %v2065_v10, %v12075_v30  ;;  %v2067_v40 = vpop.f32.mrb[205].mxu0  ;;  %v3674_v43 = vpop.f32.mrb[95].mxu1 }
 0x293   :  { %15669 = vst [vmem:[#allocation107_spill] sm:$0xff] %v13109_v36  ;;  %v2068_v56 = vadd.f32 %v2067_v40, %v12077_v31  ;;  %v2069_v37 = vpop.f32.mrb[206].mxu0  ;;  %9573 = vmatprep.mubr.msk.bf16.mxu1 %vm3162_vm2, %v13109_v36 }
 0x294   :  { %v2070_v9 = vadd.f32 %v2069_v37, %v12075_v30  ;;  %v2071_v21 = vpop.f32.mrb[207].mxu0  ;;  %3884 = vmatmul.mubr.bf16.gmra.mrb[200].mxu1 %v13107_v20  ;;  %v2718_v57 = vmax.f32 %v2066_v11, 0.0 }
 0x295   :  { %v2072_v14 = vadd.f32 %v2071_v21, %v12077_v31  ;;  %v2719_v55 = vmax.f32 %v2068_v56, 0.0 }
 0x296   :  { %v2720_v23 = vmax.f32 %v2070_v9, 0.0  ;;  %2334 = vmatmul.mubr.bf16.gmra.mrb[56].mxu0 %v11564_v15  ;;  %v11567_v15 = vld [vmem:[%s15392_s0 + $0x4f0] ss:$8 sps:$4 sm:$0xff]  }
 0x297   :  { %v2721_v10 = vmax.f32 %v2072_v14, 0.0  ;;  %v13126_v40 = vpop.f32.mrb[96].mxu1  ;;  %9497 = vmatprep.mubr.msk.bf16.mxu0 %vm1225_vm0, %v11569_v22  ;;  %v11572_v22 = vld [vmem:[%s15392_s0 + $0x504] ss:$8 sps:$4 sm:$0xff]  }
 0x298   :  { %15671 = vst [vmem:[#allocation109_spill] sm:$0xff] %v13126_v40  ;;  %v3679_v43 = vpop.f32.mrb[97].mxu1  ;;  %v13129_v44 = vpack.c.bf16 %v2720_v23, %v2718_v57 }
 0x299   :  { %v13131_v1 = vpack.c.bf16 %v2721_v10, %v2719_v55  ;;  %v2075_v37 = vpop.f32.mrb[208].mxu0  ;;  %v13133_v36 = vpop.f32.mrb[98].mxu1 }
 0x29a   :  { %15672 = vst [vmem:[#allocation110_spill] sm:$0xff] %v13129_v44  ;;  %15674 = vst [vmem:[#allocation112_spill] sm:$0xff] %v13133_v36  ;;  %v2076_v20 = vadd.f32 %v2075_v37, %v12075_v30  ;;  %v2077_v21 = vpop.f32.mrb[209].mxu0  ;;  %v3682_v11 = vpop.f32.mrb[99].mxu1 }
 0x29b   :  { %15673 = vst [vmem:[#allocation111_spill] sm:$0xff] %v13131_v1  ;;  %v2078_v56 = vadd.f32 %v2077_v21, %v12077_v31  ;;  %v2079_v9 = vpop.f32.mrb[210].mxu0  ;;  %9574 = vmatprep.mubr.msk.bf16.mxu1 %vm3162_vm2, %v13131_v1 }
 0x29c   :  { %v2080_v14 = vadd.f32 %v2079_v9, %v12075_v30  ;;  %v2081_v57 = vpop.f32.mrb[211].mxu0  ;;  %3892 = vmatmul.mubr.bf16.gmra.mrb[204].mxu1 %v13129_v44  ;;  %v2722_v55 = vmax.f32 %v2076_v20, 0.0 }
 0x29d   :  { %v2082_v23 = vadd.f32 %v2081_v57, %v12077_v31  ;;  %v2723_v43 = vmax.f32 %v2078_v56, 0.0 }
 0x29e   :  { %v2724_v10 = vmax.f32 %v2080_v14, 0.0  ;;  %2344 = vmatmul.mubr.bf16.gmra.mrb[60].mxu0 %v11567_v15  ;;  %v11570_v15 = vld [vmem:[%s15392_s0 + $0x500] ss:$8 sps:$4 sm:$0xff]  }
 0x29f   :  { %v2725_v37 = vmax.f32 %v2082_v23, 0.0  ;;  %v13148_v21 = vpop.f32.mrb[100].mxu1  ;;  %9498 = vmatprep.mubr.msk.bf16.mxu0 %vm1225_vm0, %v11572_v22  ;;  %v11575_v22 = vld [vmem:[%s15392_s0 + $0x514] ss:$8 sps:$4 sm:$0xff]  }
 0x2a0   :  { %15675 = vst [vmem:[#allocation113_spill] sm:$0xff] %v13148_v21  ;;  %v3687_v11 = vpop.f32.mrb[101].mxu1  ;;  %v13151_v36 = vpack.c.bf16 %v2724_v10, %v2722_v55 }
 0x2a1   :  { %v13153_v40 = vpack.c.bf16 %v2725_v37, %v2723_v43  ;;  %v2085_v9 = vpop.f32.mrb[212].mxu0  ;;  %v13155_v1 = vpop.f32.mrb[102].mxu1 }
 0x2a2   :  { %15676 = vst [vmem:[#allocation114_spill] sm:$0xff] %v13151_v36  ;;  %15678 = vst [vmem:[#allocation116_spill] sm:$0xff] %v13155_v1  ;;  %v2086_v44 = vadd.f32 %v2085_v9, %v12075_v30  ;;  %v2087_v57 = vpop.f32.mrb[213].mxu0  ;;  %v3690_v20 = vpop.f32.mrb[103].mxu1 }
 0x2a3   :  { %15677 = vst [vmem:[#allocation115_spill] sm:$0xff] %v13153_v40  ;;  %v2088_v56 = vadd.f32 %v2087_v57, %v12077_v31  ;;  %v2089_v14 = vpop.f32.mrb[214].mxu0  ;;  %9575 = vmatprep.mubr.msk.bf16.mxu1 %vm3162_vm2, %v13153_v40 }
 0x2a4   :  { %v2090_v23 = vadd.f32 %v2089_v14, %v12075_v30  ;;  %v2091_v55 = vpop.f32.mrb[215].mxu0  ;;  %3900 = vmatmul.mubr.bf16.gmra.mrb[208].mxu1 %v13151_v36  ;;  %v2726_v43 = vmax.f32 %v2086_v44, 0.0 }
 0x2a5   :  { %v2092_v10 = vadd.f32 %v2091_v55, %v12077_v31  ;;  %v2727_v11 = vmax.f32 %v2088_v56, 0.0 }
 0x2a6   :  { %v2728_v37 = vmax.f32 %v2090_v23, 0.0  ;;  %2354 = vmatmul.mubr.bf16.gmra.mrb[64].mxu0 %v11570_v15  ;;  %v11573_v15 = vld [vmem:[%s15392_s0 + $0x510] ss:$8 sps:$4 sm:$0xff]  }
 0x2a7   :  { %v2729_v9 = vmax.f32 %v2092_v10, 0.0  ;;  %v13170_v57 = vpop.f32.mrb[104].mxu1  ;;  %9499 = vmatprep.mubr.msk.bf16.mxu0 %vm1225_vm0, %v11575_v22  ;;  %v11578_v22 = vld [vmem:[%s15392_s0 + $0x524] ss:$8 sps:$4 sm:$0xff]  }
 0x2a8   :  { %15679 = vst [vmem:[#allocation117_spill] sm:$0xff] %v13170_v57  ;;  %v3695_v20 = vpop.f32.mrb[105].mxu1  ;;  %v13173_v1 = vpack.c.bf16 %v2728_v37, %v2726_v43 }
 0x2a9   :  { %v13175_v21 = vpack.c.bf16 %v2729_v9, %v2727_v11  ;;  %v2095_v14 = vpop.f32.mrb[216].mxu0  ;;  %v13177_v40 = vpop.f32.mrb[106].mxu1 }
 0x2aa   :  { %15680 = vst [vmem:[#allocation118_spill] sm:$0xff] %v13173_v1  ;;  %15682 = vst [vmem:[#allocation120_spill] sm:$0xff] %v13177_v40  ;;  %v2096_v36 = vadd.f32 %v2095_v14, %v12075_v30  ;;  %v2097_v55 = vpop.f32.mrb[217].mxu0  ;;  %v3698_v44 = vpop.f32.mrb[107].mxu1 }
 0x2ab   :  { %15681 = vst [vmem:[#allocation119_spill] sm:$0xff] %v13175_v21  ;;  %v2098_v56 = vadd.f32 %v2097_v55, %v12077_v31  ;;  %v2099_v23 = vpop.f32.mrb[218].mxu0  ;;  %9576 = vmatprep.mubr.msk.bf16.mxu1 %vm3162_vm2, %v13175_v21 }
 0x2ac   :  { %v2100_v10 = vadd.f32 %v2099_v23, %v12075_v30  ;;  %v2101_v43 = vpop.f32.mrb[219].mxu0  ;;  %3908 = vmatmul.mubr.bf16.gmra.mrb[212].mxu1 %v13173_v1  ;;  %v2730_v11 = vmax.f32 %v2096_v36, 0.0 }
 0x2ad   :  { %v2102_v37 = vadd.f32 %v2101_v43, %v12077_v31  ;;  %v2731_v20 = vmax.f32 %v2098_v56, 0.0 }
 0x2ae   :  { %v2732_v9 = vmax.f32 %v2100_v10, 0.0  ;;  %2364 = vmatmul.mubr.bf16.gmra.mrb[68].mxu0 %v11573_v15  ;;  %v11576_v15 = vld [vmem:[%s15392_s0 + $0x520] ss:$8 sps:$4 sm:$0xff]  }
 0x2af   :  { %v2733_v14 = vmax.f32 %v2102_v37, 0.0  ;;  %v13192_v55 = vpop.f32.mrb[108].mxu1  ;;  %9500 = vmatprep.mubr.msk.bf16.mxu0 %vm1225_vm0, %v11578_v22  ;;  %v11581_v22 = vld [vmem:[%s15392_s0 + $0x534] ss:$8 sps:$4 sm:$0xff]  }
 0x2b0   :  { %15683 = vst [vmem:[#allocation121_spill] sm:$0xff] %v13192_v55  ;;  %v3703_v44 = vpop.f32.mrb[109].mxu1  ;;  %v13195_v40 = vpack.c.bf16 %v2732_v9, %v2730_v11 }
 0x2b1   :  { %v13197_v57 = vpack.c.bf16 %v2733_v14, %v2731_v20  ;;  %v2105_v23 = vpop.f32.mrb[220].mxu0  ;;  %v13199_v21 = vpop.f32.mrb[110].mxu1 }
 0x2b2   :  { %15684 = vst [vmem:[#allocation122_spill] sm:$0xff] %v13195_v40  ;;  %15686 = vst [vmem:[#allocation124_spill] sm:$0xff] %v13199_v21  ;;  %v2106_v1 = vadd.f32 %v2105_v23, %v12075_v30  ;;  %v2107_v43 = vpop.f32.mrb[221].mxu0  ;;  %v3706_v36 = vpop.f32.mrb[111].mxu1 }
 0x2b3   :  { %15685 = vst [vmem:[#allocation123_spill] sm:$0xff] %v13197_v57  ;;  %v2108_v56 = vadd.f32 %v2107_v43, %v12077_v31  ;;  %v2109_v10 = vpop.f32.mrb[222].mxu0  ;;  %9577 = vmatprep.mubr.msk.bf16.mxu1 %vm3162_vm2, %v13197_v57 }
 0x2b4   :  { %v2110_v37 = vadd.f32 %v2109_v10, %v12075_v30  ;;  %v2111_v11 = vpop.f32.mrb[223].mxu0  ;;  %3916 = vmatmul.mubr.bf16.gmra.mrb[216].mxu1 %v13195_v40  ;;  %v2734_v20 = vmax.f32 %v2106_v1, 0.0 }
 0x2b5   :  { %v2112_v9 = vadd.f32 %v2111_v11, %v12077_v31  ;;  %v2735_v44 = vmax.f32 %v2108_v56, 0.0 }
 0x2b6   :  { %v2736_v14 = vmax.f32 %v2110_v37, 0.0  ;;  %2374 = vmatmul.mubr.bf16.gmra.mrb[72].mxu0 %v11576_v15  ;;  %v11579_v15 = vld [vmem:[%s15392_s0 + $0x530] ss:$8 sps:$4 sm:$0xff]  }
 0x2b7   :  { %v2737_v23 = vmax.f32 %v2112_v9, 0.0  ;;  %v13214_v43 = vpop.f32.mrb[112].mxu1  ;;  %9501 = vmatprep.mubr.msk.bf16.mxu0 %vm1225_vm0, %v11581_v22  ;;  %v11585_v22 = vld [vmem:[%s15392_s0 + $0x544] ss:$8 sps:$4 sm:$0xff]  }
 0x2b8   :  { %15687 = vst [vmem:[#allocation125_spill] sm:$0xff] %v13214_v43  ;;  %v3711_v36 = vpop.f32.mrb[113].mxu1  ;;  %v13217_v21 = vpack.c.bf16 %v2736_v14, %v2734_v20 }
 0x2b9   :  { %v13219_v55 = vpack.c.bf16 %v2737_v23, %v2735_v44  ;;  %v2115_v10 = vpop.f32.mrb[224].mxu0  ;;  %v13221_v57 = vpop.f32.mrb[114].mxu1 }
 0x2ba   :  { %15688 = vst [vmem:[#allocation126_spill] sm:$0xff] %v13217_v21  ;;  %15690 = vst [vmem:[#allocation128_spill] sm:$0xff] %v13221_v57  ;;  %v2116_v40 = vadd.f32 %v2115_v10, %v12075_v30  ;;  %v2117_v11 = vpop.f32.mrb[225].mxu0  ;;  %v3714_v1 = vpop.f32.mrb[115].mxu1 }
 0x2bb   :  { %15689 = vst [vmem:[#allocation127_spill] sm:$0xff] %v13219_v55  ;;  %v2118_v56 = vadd.f32 %v2117_v11, %v12077_v31  ;;  %v2119_v37 = vpop.f32.mrb[226].mxu0  ;;  %9578 = vmatprep.mubr.msk.bf16.mxu1 %vm3162_vm2, %v13219_v55 }
 0x2bc   :  { %v2120_v9 = vadd.f32 %v2119_v37, %v12075_v30  ;;  %v2121_v20 = vpop.f32.mrb[227].mxu0  ;;  %3924 = vmatmul.mubr.bf16.gmra.mrb[220].mxu1 %v13217_v21  ;;  %v2738_v44 = vmax.f32 %v2116_v40, 0.0 }
 0x2bd   :  { %v2122_v14 = vadd.f32 %v2121_v20, %v12077_v31  ;;  %v2739_v36 = vmax.f32 %v2118_v56, 0.0 }
 0x2be   :  { %v2740_v23 = vmax.f32 %v2120_v9, 0.0  ;;  %2384 = vmatmul.mubr.bf16.gmra.mrb[76].mxu0 %v11579_v15  ;;  %v11583_v15 = vld [vmem:[%s15392_s0 + $0x540] ss:$8 sps:$4 sm:$0xff]  }
 0x2bf   :  { %v2741_v10 = vmax.f32 %v2122_v14, 0.0  ;;  %v13236_v11 = vpop.f32.mrb[116].mxu1  ;;  %9502 = vmatprep.mubr.msk.bf16.mxu0 %vm1225_vm0, %v11585_v22  ;;  %v11588_v22 = vld [vmem:[%s15392_s0 + $0x554] ss:$8 sps:$4 sm:$0xff]  }
 0x2c0   :  { %15691 = vst [vmem:[#allocation129_spill] sm:$0xff] %v13236_v11  ;;  %v3719_v1 = vpop.f32.mrb[117].mxu1  ;;  %v13239_v57 = vpack.c.bf16 %v2740_v23, %v2738_v44 }
 0x2c1   :  { %v13241_v43 = vpack.c.bf16 %v2741_v10, %v2739_v36  ;;  %v2125_v37 = vpop.f32.mrb[228].mxu0  ;;  %v13243_v55 = vpop.f32.mrb[118].mxu1 }
 0x2c2   :  { %15692 = vst [vmem:[#allocation130_spill] sm:$0xff] %v13239_v57  ;;  %15694 = vst [vmem:[#allocation132_spill] sm:$0xff] %v13243_v55  ;;  %v2126_v21 = vadd.f32 %v2125_v37, %v12075_v30  ;;  %v2127_v20 = vpop.f32.mrb[229].mxu0  ;;  %v3722_v40 = vpop.f32.mrb[119].mxu1 }
 0x2c3   :  { %15693 = vst [vmem:[#allocation131_spill] sm:$0xff] %v13241_v43  ;;  %v2128_v56 = vadd.f32 %v2127_v20, %v12077_v31  ;;  %v2129_v9 = vpop.f32.mrb[230].mxu0  ;;  %9579 = vmatprep.mubr.msk.bf16.mxu1 %vm3162_vm2, %v13241_v43 }
 0x2c4   :  { %v2130_v14 = vadd.f32 %v2129_v9, %v12075_v30  ;;  %v2131_v44 = vpop.f32.mrb[231].mxu0  ;;  %3932 = vmatmul.mubr.bf16.gmra.mrb[224].mxu1 %v13239_v57  ;;  %v2742_v36 = vmax.f32 %v2126_v21, 0.0 }
 0x2c5   :  { %v2132_v23 = vadd.f32 %v2131_v44, %v12077_v31  ;;  %v2743_v1 = vmax.f32 %v2128_v56, 0.0 }
 0x2c6   :  { %v2744_v10 = vmax.f32 %v2130_v14, 0.0  ;;  %2394 = vmatmul.mubr.bf16.gmra.mrb[80].mxu0 %v11583_v15  ;;  %v11586_v15 = vld [vmem:[%s15392_s0 + $0x550] ss:$8 sps:$4 sm:$0xff]  }
 0x2c7   :  { %v2745_v37 = vmax.f32 %v2132_v23, 0.0  ;;  %v13258_v20 = vpop.f32.mrb[120].mxu1  ;;  %9503 = vmatprep.mubr.msk.bf16.mxu0 %vm1225_vm0, %v11588_v22  ;;  %v11592_v22 = vld [vmem:[%s15392_s0 + $0x564] ss:$8 sps:$4 sm:$0xff]  }
 0x2c8   :  { %15695 = vst [vmem:[#allocation133_spill] sm:$0xff] %v13258_v20  ;;  %v3727_v40 = vpop.f32.mrb[121].mxu1  ;;  %v13261_v55 = vpack.c.bf16 %v2744_v10, %v2742_v36 }
 0x2c9   :  { %v13263_v11 = vpack.c.bf16 %v2745_v37, %v2743_v1  ;;  %v2135_v9 = vpop.f32.mrb[232].mxu0  ;;  %v13265_v43 = vpop.f32.mrb[122].mxu1 }
 0x2ca   :  { %15696 = vst [vmem:[#allocation134_spill] sm:$0xff] %v13261_v55  ;;  %15698 = vst [vmem:[#allocation136_spill] sm:$0xff] %v13265_v43  ;;  %v2136_v57 = vadd.f32 %v2135_v9, %v12075_v30  ;;  %v2137_v44 = vpop.f32.mrb[233].mxu0  ;;  %v3730_v21 = vpop.f32.mrb[123].mxu1 }
 0x2cb   :  { %15697 = vst [vmem:[#allocation135_spill] sm:$0xff] %v13263_v11  ;;  %v2138_v56 = vadd.f32 %v2137_v44, %v12077_v31  ;;  %v2139_v14 = vpop.f32.mrb[234].mxu0  ;;  %9580 = vmatprep.mubr.msk.bf16.mxu1 %vm3162_vm2, %v13263_v11 }
 0x2cc   :  { %v2140_v23 = vadd.f32 %v2139_v14, %v12075_v30  ;;  %v2141_v36 = vpop.f32.mrb[235].mxu0  ;;  %3940 = vmatmul.mubr.bf16.gmra.mrb[228].mxu1 %v13261_v55  ;;  %v2746_v1 = vmax.f32 %v2136_v57, 0.0 }
 0x2cd   :  { %v2142_v10 = vadd.f32 %v2141_v36, %v12077_v31  ;;  %v2747_v40 = vmax.f32 %v2138_v56, 0.0 }
 0x2ce   :  { %v2748_v37 = vmax.f32 %v2140_v23, 0.0  ;;  %2404 = vmatmul.mubr.bf16.gmra.mrb[84].mxu0 %v11586_v15  ;;  %v11590_v15 = vld [vmem:[%s15392_s0 + $0x560] ss:$8 sps:$4 sm:$0xff]  }
 0x2cf   :  { %v2749_v9 = vmax.f32 %v2142_v10, 0.0  ;;  %v13280_v44 = vpop.f32.mrb[124].mxu1  ;;  %9504 = vmatprep.mubr.msk.bf16.mxu0 %vm1225_vm0, %v11592_v22  ;;  %v11595_v22 = vld [vmem:[%s15392_s0 + $0x574] ss:$8 sps:$4 sm:$0xff]  }
 0x2d0   :  { %15699 = vst [vmem:[#allocation137_spill] sm:$0xff] %v13280_v44  ;;  %v3735_v21 = vpop.f32.mrb[125].mxu1  ;;  %v13283_v43 = vpack.c.bf16 %v2748_v37, %v2746_v1 }
 0x2d1   :  { %v13285_v20 = vpack.c.bf16 %v2749_v9, %v2747_v40  ;;  %v2145_v14 = vpop.f32.mrb[236].mxu0  ;;  %v13287_v11 = vpop.f32.mrb[126].mxu1 }
 0x2d2   :  { %15700 = vst [vmem:[#allocation138_spill] sm:$0xff] %v13283_v43  ;;  %15702 = vst [vmem:[#allocation140_spill] sm:$0xff] %v13287_v11  ;;  %v2146_v55 = vadd.f32 %v2145_v14, %v12075_v30  ;;  %v2147_v36 = vpop.f32.mrb[237].mxu0  ;;  %v3738_v57 = vpop.f32.mrb[127].mxu1 }
 0x2d3   :  { %15701 = vst [vmem:[#allocation139_spill] sm:$0xff] %v13285_v20  ;;  %v2148_v56 = vadd.f32 %v2147_v36, %v12077_v31  ;;  %v2149_v23 = vpop.f32.mrb[238].mxu0  ;;  %9581 = vmatprep.mubr.msk.bf16.mxu1 %vm3162_vm2, %v13285_v20 }
 0x2d4   :  { %v2150_v10 = vadd.f32 %v2149_v23, %v12075_v30  ;;  %v2151_v1 = vpop.f32.mrb[239].mxu0  ;;  %3948 = vmatmul.mubr.bf16.gmra.mrb[232].mxu1 %v13283_v43  ;;  %v2750_v40 = vmax.f32 %v2146_v55, 0.0 }
 0x2d5   :  { %v2152_v37 = vadd.f32 %v2151_v1, %v12077_v31  ;;  %v2751_v21 = vmax.f32 %v2148_v56, 0.0 }
 0x2d6   :  { %v2752_v9 = vmax.f32 %v2150_v10, 0.0  ;;  %2414 = vmatmul.mubr.bf16.gmra.mrb[88].mxu0 %v11590_v15  ;;  %v11593_v15 = vld [vmem:[%s15392_s0 + $0x570] ss:$8 sps:$4 sm:$0xff]  }
 0x2d7   :  { %v2753_v14 = vmax.f32 %v2152_v37, 0.0  ;;  %v13302_v36 = vpop.f32.mrb[128].mxu1  ;;  %9505 = vmatprep.mubr.msk.bf16.mxu0 %vm1225_vm0, %v11595_v22  ;;  %v11598_v22 = vld [vmem:[%s15392_s0 + $0x584] ss:$8 sps:$4 sm:$0xff]  }
 0x2d8   :  { %15703 = vst [vmem:[#allocation141_spill] sm:$0xff] %v13302_v36  ;;  %v3743_v57 = vpop.f32.mrb[129].mxu1  ;;  %v13305_v11 = vpack.c.bf16 %v2752_v9, %v2750_v40 }
 0x2d9   :  { %v13307_v44 = vpack.c.bf16 %v2753_v14, %v2751_v21  ;;  %v2155_v23 = vpop.f32.mrb[240].mxu0  ;;  %v13309_v20 = vpop.f32.mrb[130].mxu1 }
 0x2da   :  { %15704 = vst [vmem:[#allocation142_spill] sm:$0xff] %v13305_v11  ;;  %15706 = vst [vmem:[#allocation144_spill] sm:$0xff] %v13309_v20  ;;  %v2156_v43 = vadd.f32 %v2155_v23, %v12075_v30  ;;  %v2157_v1 = vpop.f32.mrb[241].mxu0  ;;  %v3746_v55 = vpop.f32.mrb[131].mxu1 }
 0x2db   :  { %15705 = vst [vmem:[#allocation143_spill] sm:$0xff] %v13307_v44  ;;  %v2158_v56 = vadd.f32 %v2157_v1, %v12077_v31  ;;  %v2159_v10 = vpop.f32.mrb[242].mxu0  ;;  %9582 = vmatprep.mubr.msk.bf16.mxu1 %vm3162_vm2, %v13307_v44 }
 0x2dc   :  { %v2160_v37 = vadd.f32 %v2159_v10, %v12075_v30  ;;  %v2161_v40 = vpop.f32.mrb[243].mxu0  ;;  %3956 = vmatmul.mubr.bf16.gmra.mrb[236].mxu1 %v13305_v11  ;;  %v2754_v21 = vmax.f32 %v2156_v43, 0.0  ;;  %v11620_v43 = vld [vmem:[%s15396_s5 + $0x2c] sm:$0xff]  }
 0x2dd   :  { %v2162_v9 = vadd.f32 %v2161_v40, %v12077_v31  ;;  %v2755_v57 = vmax.f32 %v2158_v56, 0.0  ;;  %10360 = vmatprep.subr.bf16.mxu1 %v11620_v43 }
 0x2de   :  { %v2756_v14 = vmax.f32 %v2160_v37, 0.0  ;;  %2424 = vmatmul.mubr.bf16.gmra.mrb[92].mxu0 %v11593_v15  ;;  %10361 = vmatpush3.bf16.msra.mxu1 %v11620_v43 }
 0x2df   :  { %v2757_v23 = vmax.f32 %v2162_v9, 0.0  ;;  %v13324_v1 = vpop.f32.mrb[132].mxu1  ;;  %9506 = vmatprep.mubr.msk.bf16.mxu0 %vm1225_vm0, %v11598_v22  ;;  %v11596_v22 = vld [vmem:[%s15392_s0 + $0x580] ss:$8 sps:$4 sm:$0xff]  }
 0x2e0   :  { %15707 = vst [vmem:[#allocation145_spill] sm:$0xff] %v13324_v1  ;;  %v3751_v55 = vpop.f32.mrb[133].mxu1  ;;  %v13327_v20 = vpack.c.bf16 %v2756_v14, %v2754_v21  ;;  %v11601_v21 = vld [vmem:[%s15392_s0 + $0x594] ss:$8 sps:$4 sm:$0xff]  }
 0x2e1   :  { %v13329_v36 = vpack.c.bf16 %v2757_v23, %v2755_v57  ;;  %v2165_v10 = vpop.f32.mrb[244].mxu0  ;;  %v13331_v44 = vpop.f32.mrb[134].mxu1 }
 0x2e2   :  { %15709 = vst [vmem:[#allocation147_spill] sm:$0xff] %v13331_v44  ;;  %v2166_v15 = vadd.f32 %v2165_v10, %v12075_v30  ;;  %v2167_v56 = vpop.f32.mrb[245].mxu0  ;;  %v3754_v37 = vpop.f32.mrb[135].mxu1 }
 0x2e3   :  { %15708 = vst [vmem:[#allocation146_spill] sm:$0xff] %v13329_v36  ;;  %v2168_v40 = vadd.f32 %v2167_v56, %v12077_v31  ;;  %v2169_v9 = vpop.f32.mrb[246].mxu0  ;;  %9583 = vmatprep.mubr.msk.bf16.mxu1 %vm3162_vm2, %v13329_v36 }
 0x2e4   :  { %v2170_v14 = vadd.f32 %v2169_v9, %v12075_v30  ;;  %v2171_v57 = vpop.f32.mrb[247].mxu0  ;;  %3964 = vmatmul.mubr.bf16.gmra.mrb[240].mxu1 %v13327_v20  ;;  %v2758_v55 = vmax.f32 %v2166_v15, 0.0 }
 0x2e5   :  { %v2172_v23 = vadd.f32 %v2171_v57, %v12077_v31  ;;  %v2759_v56 = vmax.f32 %v2168_v40, 0.0 }
 0x2e6   :  { %v2760_v10 = vmax.f32 %v2170_v14, 0.0  ;;  %2434 = vmatmul.mubr.bf16.gmra.mrb[96].mxu0 %v11596_v22  ;;  %v11599_v22 = vld [vmem:[%s15392_s0 + $0x590] ss:$8 sps:$4 sm:$0xff]  }
 0x2e7   :  { %v2761_v37 = vmax.f32 %v2172_v23, 0.0  ;;  %v13349_v44 = vpop.f32.mrb[136].mxu1  ;;  %9507 = vmatprep.mubr.msk.bf16.mxu0 %vm1225_vm0, %v11601_v21 }
 0x2e8   :  { %15710 = vst [vmem:[#allocation148_spill] sm:$0xff] %v13349_v44  ;;  %v3759_v1 = vpop.f32.mrb[137].mxu1  ;;  %v13352_v36 = vpack.c.bf16 %v2760_v10, %v2758_v55 }
 0x2e9   :  { %v13354_v11 = vpack.c.bf16 %v2761_v37, %v2759_v56  ;;  %v2175_v9 = vpop.f32.mrb[248].mxu0  ;;  %v13356_v49 = vpop.f32.mrb[138].mxu1  ;;  %v11604_v1 = vld [vmem:[%s15392_s0 + $0x5a4] ss:$8 sps:$4 sm:$0xff]  }
 0x2ea   :  { %15711 = vst [vmem:[#allocation149_spill] sm:$0xff] %v13352_v36  ;;  %15713 = vst [vmem:[#allocation151_spill] sm:$0xff] %v13356_v49  ;;  %v2176_v57 = vadd.f32 %v2175_v9, %v12075_v30  ;;  %v2177_v43 = vpop.f32.mrb[249].mxu0  ;;  %v3762_v15 = vpop.f32.mrb[139].mxu1 }
 0x2eb   :  { %15712 = vst [vmem:[#allocation150_spill] sm:$0xff] %v13354_v11  ;;  %v2178_v40 = vadd.f32 %v2177_v43, %v12077_v31  ;;  %v2179_v14 = vpop.f32.mrb[250].mxu0  ;;  %9584 = vmatprep.mubr.msk.bf16.mxu1 %vm3162_vm2, %v13354_v11 }
 0x2ec   :  { %v2180_v21 = vadd.f32 %v2179_v14, %v12075_v30  ;;  %v2181_v23 = vpop.f32.mrb[251].mxu0  ;;  %3972 = vmatmul.mubr.bf16.gmra.mrb[244].mxu1 %v13352_v36  ;;  %v2762_v10 = vmax.f32 %v2176_v57, 0.0 }
 0x2ed   :  { %v2182_v55 = vadd.f32 %v2181_v23, %v12077_v31  ;;  %v2763_v37 = vmax.f32 %v2178_v40, 0.0 }
 0x2ee   :  { %v2764_v56 = vmax.f32 %v2180_v21, 0.0  ;;  %2444 = vmatmul.mubr.bf16.gmra.mrb[100].mxu0 %v11599_v22  ;;  %v11602_v22 = vld [vmem:[%s15392_s0 + $0x5a0] ss:$8 sps:$4 sm:$0xff]  }
 0x2ef   :  { %v2765_v9 = vmax.f32 %v2182_v55, 0.0  ;;  %v13371_v43 = vpop.f32.mrb[140].mxu1  ;;  %9508 = vmatprep.mubr.msk.bf16.mxu0 %vm1225_vm0, %v11604_v1  ;;  %v11607_v1 = vld [vmem:[%s15392_s0 + $0x5b4] ss:$8 sps:$4 sm:$0xff]  }
 0x2f0   :  { %15714 = vst [vmem:[#allocation152_spill] sm:$0xff] %v13371_v43  ;;  %v3767_v15 = vpop.f32.mrb[141].mxu1  ;;  %v13374_v49 = vpack.c.bf16 %v2764_v56, %v2762_v10 }
 0x2f1   :  { %v13376_v44 = vpack.c.bf16 %v2765_v9, %v2763_v37  ;;  %v2185_v14 = vpop.f32.mrb[252].mxu0  ;;  %v13378_v11 = vpop.f32.mrb[142].mxu1 }
 0x2f2   :  { %15715 = vst [vmem:[#allocation153_spill] sm:$0xff] %v13374_v49  ;;  %15717 = vst [vmem:[#allocation155_spill] sm:$0xff] %v13378_v11  ;;  %v2186_v36 = vadd.f32 %v2185_v14, %v12075_v30  ;;  %v2187_v23 = vpop.f32.mrb[253].mxu0  ;;  %v3770_v57 = vpop.f32.mrb[143].mxu1 }
 0x2f3   :  { %15716 = vst [vmem:[#allocation154_spill] sm:$0xff] %v13376_v44  ;;  %v2188_v40 = vadd.f32 %v2187_v23, %v12077_v31  ;;  %v2189_v21 = vpop.f32.mrb[254].mxu0  ;;  %9585 = vmatprep.mubr.msk.bf16.mxu1 %vm3162_vm2, %v13376_v44 }
 0x2f4   :  { %v2190_v55 = vadd.f32 %v2189_v21, %v12075_v30  ;;  %v2191_v10 = vpop.f32.mrb[255].mxu0  ;;  %3980 = vmatmul.mubr.bf16.gmra.mrb[248].mxu1 %v13374_v49  ;;  %v2766_v37 = vmax.f32 %v2186_v36, 0.0 }
 0x2f5   :  { %v2192_v56 = vadd.f32 %v2191_v10, %v12077_v31  ;;  %v2767_v15 = vmax.f32 %v2188_v40, 0.0 }
 0x2f6   :  { %v2768_v9 = vmax.f32 %v2190_v55, 0.0  ;;  %2454 = vmatmul.mubr.bf16.gmra.mrb[104].mxu0 %v11602_v22  ;;  %v11605_v22 = vld [vmem:[%s15392_s0 + $0x5b0] ss:$8 sps:$4 sm:$0xff]  }
 0x2f7   :  { %v2769_v14 = vmax.f32 %v2192_v56, 0.0  ;;  %v13393_v23 = vpop.f32.mrb[144].mxu1  ;;  %9509 = vmatprep.mubr.msk.bf16.mxu0 %vm1225_vm0, %v11607_v1  ;;  %v11610_v1 = vld [vmem:[%s15392_s0 + $0x5c4] ss:$8 sps:$4 sm:$0xff]  }
 0x2f8   :  { %15718 = vst [vmem:[#allocation156_spill] sm:$0xff] %v13393_v23  ;;  %v3775_v57 = vpop.f32.mrb[145].mxu1  ;;  %v13396_v11 = vpack.c.bf16 %v2768_v9, %v2766_v37 }
 0x2f9   :  { %v13398_v43 = vpack.c.bf16 %v2769_v14, %v2767_v15  ;;  %v2195_v21 = vpop.f32.mrb[0].mxu0  ;;  %v13400_v44 = vpop.f32.mrb[146].mxu1 }
 0x2fa   :  { %15719 = vst [vmem:[#allocation157_spill] sm:$0xff] %v13396_v11  ;;  %15721 = vst [vmem:[#allocation159_spill] sm:$0xff] %v13400_v44  ;;  %v2196_v49 = vadd.f32 %v2195_v21, %v12075_v30  ;;  %v2197_v10 = vpop.f32.mrb[1].mxu0  ;;  %v3778_v36 = vpop.f32.mrb[147].mxu1 }
 0x2fb   :  { %15720 = vst [vmem:[#allocation158_spill] sm:$0xff] %v13398_v43  ;;  %v2198_v40 = vadd.f32 %v2197_v10, %v12077_v31  ;;  %v2199_v55 = vpop.f32.mrb[2].mxu0  ;;  %9586 = vmatprep.mubr.msk.bf16.mxu1 %vm3162_vm2, %v13398_v43 }
 0x2fc   :  { %v2200_v56 = vadd.f32 %v2199_v55, %v12075_v30  ;;  %v2201_v37 = vpop.f32.mrb[3].mxu0  ;;  %3988 = vmatmul.mubr.bf16.gmra.mrb[252].mxu1 %v13396_v11  ;;  %v2770_v15 = vmax.f32 %v2196_v49, 0.0 }
 0x2fd   :  { %v2202_v9 = vadd.f32 %v2201_v37, %v12077_v31  ;;  %v2771_v57 = vmax.f32 %v2198_v40, 0.0 }
 0x2fe   :  { %v2772_v14 = vmax.f32 %v2200_v56, 0.0  ;;  %2464 = vmatmul.mubr.bf16.gmra.mrb[108].mxu0 %v11605_v22  ;;  %v11608_v22 = vld [vmem:[%s15392_s0 + $0x5c0] ss:$8 sps:$4 sm:$0xff]  }
 0x2ff   :  { %v2773_v21 = vmax.f32 %v2202_v9, 0.0  ;;  %v13415_v10 = vpop.f32.mrb[148].mxu1  ;;  %9510 = vmatprep.mubr.msk.bf16.mxu0 %vm1225_vm0, %v11610_v1 }
 0x300   :  { %15722 = vst [vmem:[#allocation160_spill] sm:$0xff] %v13415_v10  ;;  %v13418_v36 = vpack.c.bf16 %v2772_v14, %v2770_v15  ;;  %v3783_v44 = vpop.f32.mrb[149].mxu1 }
 0x301   :  { %v13420_v23 = vpack.c.bf16 %v2773_v21, %v2771_v57  ;;  %v2205_v55 = vpop.f32.mrb[4].mxu0  ;;  %v13422_v43 = vpop.f32.mrb[150].mxu1  ;;  %v11613_v44 = vld [vmem:[%s15392_s0 + $0x5d4] ss:$8 sps:$4 sm:$0xff]  }
 0x302   :  { %15723 = vst [vmem:[#allocation161_spill] sm:$0xff] %v13418_v36  ;;  %15725 = vst [vmem:[#allocation163_spill] sm:$0xff] %v13422_v43  ;;  %v2206_v11 = vadd.f32 %v2205_v55, %v12075_v30  ;;  %v2207_v37 = vpop.f32.mrb[5].mxu0  ;;  %v3786_v49 = vpop.f32.mrb[151].mxu1 }
 0x303   :  { %15724 = vst [vmem:[#allocation162_spill] sm:$0xff] %v13420_v23  ;;  %v2208_v40 = vadd.f32 %v2207_v37, %v12077_v31  ;;  %v2209_v56 = vpop.f32.mrb[6].mxu0  ;;  %9587 = vmatprep.mubr.msk.bf16.mxu1 %vm3162_vm2, %v13420_v23 }
 0x304   :  { %v2210_v1 = vadd.f32 %v2209_v56, %v12075_v30  ;;  %v2211_v9 = vpop.f32.mrb[7].mxu0  ;;  %3996 = vmatmul.mubr.bf16.gmra.mrb[0].mxu1 %v13418_v36  ;;  %v2774_v14 = vmax.f32 %v2206_v11, 0.0 }
 0x305   :  { %v2212_v15 = vadd.f32 %v2211_v9, %v12077_v31  ;;  %v2775_v21 = vmax.f32 %v2208_v40, 0.0 }
 0x306   :  { %v2776_v57 = vmax.f32 %v2210_v1, 0.0  ;;  %2474 = vmatmul.mubr.bf16.gmra.mrb[112].mxu0 %v11608_v22  ;;  %v11611_v22 = vld [vmem:[%s15392_s0 + $0x5d0] ss:$8 sps:$4 sm:$0xff]  }
 0x307   :  { %v2777_v55 = vmax.f32 %v2212_v15, 0.0  ;;  %v13437_v37 = vpop.f32.mrb[152].mxu1  ;;  %9511 = vmatprep.mubr.msk.bf16.mxu0 %vm1225_vm0, %v11613_v44 }
 0x308   :  { %15726 = vst [vmem:[#allocation164_spill] sm:$0xff] %v13437_v37  ;;  %v13440_v49 = vpack.c.bf16 %v2776_v57, %v2774_v14  ;;  %v3791_v43 = vpop.f32.mrb[153].mxu1 }
 0x309   :  { %v13442_v10 = vpack.c.bf16 %v2777_v55, %v2775_v21  ;;  %v2215_v56 = vpop.f32.mrb[8].mxu0  ;;  %v13444_v23 = vpop.f32.mrb[154].mxu1  ;;  %v11616_v43 = vld [vmem:[%s15392_s0 + $0x5e4] ss:$8 sps:$4 sm:$0xff]  }
 0x30a   :  { %15727 = vst [vmem:[#allocation165_spill] sm:$0xff] %v13440_v49  ;;  %15729 = vst [vmem:[#allocation167_spill] sm:$0xff] %v13444_v23  ;;  %v2216_v36 = vadd.f32 %v2215_v56, %v12075_v30  ;;  %v2217_v9 = vpop.f32.mrb[9].mxu0  ;;  %v3794_v11 = vpop.f32.mrb[155].mxu1 }
 0x30b   :  { %15728 = vst [vmem:[#allocation166_spill] sm:$0xff] %v13442_v10  ;;  %v2218_v40 = vadd.f32 %v2217_v9, %v12077_v31  ;;  %v2219_v1 = vpop.f32.mrb[10].mxu0  ;;  %9588 = vmatprep.mubr.msk.bf16.mxu1 %vm3162_vm2, %v13442_v10 }
 0x30c   :  { %v2220_v44 = vadd.f32 %v2219_v1, %v12075_v30  ;;  %v2221_v15 = vpop.f32.mrb[11].mxu0  ;;  %4004 = vmatmul.mubr.bf16.gmra.mrb[4].mxu1 %v13440_v49  ;;  %v2778_v57 = vmax.f32 %v2216_v36, 0.0 }
 0x30d   :  { %v2222_v14 = vadd.f32 %v2221_v15, %v12077_v31  ;;  %v2779_v55 = vmax.f32 %v2218_v40, 0.0 }
 0x30e   :  { %v2780_v21 = vmax.f32 %v2220_v44, 0.0  ;;  %2484 = vmatmul.mubr.bf16.gmra.mrb[116].mxu0 %v11611_v22  ;;  %v11614_v22 = vld [vmem:[%s15392_s0 + $0x5e0] ss:$8 sps:$4 sm:$0xff]  }
 0x30f   :  { %v2781_v56 = vmax.f32 %v2222_v14, 0.0  ;;  %v13459_v9 = vpop.f32.mrb[156].mxu1  ;;  %9512 = vmatprep.mubr.msk.bf16.mxu0 %vm1225_vm0, %v11616_v43 }
 0x310   :  { %15730 = vst [vmem:[#allocation168_spill] sm:$0xff] %v13459_v9  ;;  %v13462_v11 = vpack.c.bf16 %v2780_v21, %v2778_v57  ;;  %v3799_v23 = vpop.f32.mrb[157].mxu1 }
 0x311   :  { %v13464_v37 = vpack.c.bf16 %v2781_v56, %v2779_v55  ;;  %v2225_v1 = vpop.f32.mrb[12].mxu0  ;;  %v13466_v10 = vpop.f32.mrb[158].mxu1  ;;  %v11619_v23 = vld [vmem:[%s15392_s0 + $0x5f4] ss:$8 sps:$4 sm:$0xff]  }
 0x312   :  { %15731 = vst [vmem:[#allocation169_spill] sm:$0xff] %v13462_v11  ;;  %15733 = vst [vmem:[#allocation171_spill] sm:$0xff] %v13466_v10  ;;  %v2226_v49 = vadd.f32 %v2225_v1, %v12075_v30  ;;  %v2227_v15 = vpop.f32.mrb[13].mxu0  ;;  %v3802_v36 = vpop.f32.mrb[159].mxu1 }
 0x313   :  { %15732 = vst [vmem:[#allocation170_spill] sm:$0xff] %v13464_v37  ;;  %v2228_v40 = vadd.f32 %v2227_v15, %v12077_v31  ;;  %v2229_v44 = vpop.f32.mrb[14].mxu0  ;;  %9589 = vmatprep.mubr.msk.bf16.mxu1 %vm3162_vm2, %v13464_v37 }
 0x314   :  { %v2230_v43 = vadd.f32 %v2229_v44, %v12075_v30  ;;  %v2231_v14 = vpop.f32.mrb[15].mxu0  ;;  %4012 = vmatmul.mubr.bf16.gmra.mrb[8].mxu1 %v13462_v11  ;;  %v2782_v21 = vmax.f32 %v2226_v49, 0.0 }
 0x315   :  { %v2232_v57 = vadd.f32 %v2231_v14, %v12077_v31  ;;  %v2783_v56 = vmax.f32 %v2228_v40, 0.0 }
 0x316   :  { %v2784_v55 = vmax.f32 %v2230_v43, 0.0  ;;  %2494 = vmatmul.mubr.bf16.gmra.mrb[120].mxu0 %v11614_v22  ;;  %v11617_v22 = vld [vmem:[%s15392_s0 + $0x5f0] ss:$8 sps:$4 sm:$0xff]  }
 0x317   :  { %v2785_v1 = vmax.f32 %v2232_v57, 0.0  ;;  %v13481_v15 = vpop.f32.mrb[160].mxu1  ;;  %9513 = vmatprep.mubr.msk.bf16.mxu0 %vm1225_vm0, %v11619_v23 }
 0x318   :  { %15734 = vst [vmem:[#allocation172_spill] sm:$0xff] %v13481_v15  ;;  %v13484_v36 = vpack.c.bf16 %v2784_v55, %v2782_v21  ;;  %v3807_v10 = vpop.f32.mrb[161].mxu1 }
 0x319   :  { %v13486_v9 = vpack.c.bf16 %v2785_v1, %v2783_v56  ;;  %v2235_v44 = vpop.f32.mrb[16].mxu0  ;;  %v13488_v37 = vpop.f32.mrb[162].mxu1 }
 0x31a   :  { %15735 = vst [vmem:[#allocation173_spill] sm:$0xff] %v13488_v37  ;;  %v2236_v11 = vadd.f32 %v2235_v44, %v12075_v30  ;;  %v2237_v14 = vpop.f32.mrb[17].mxu0  ;;  %v3810_v49 = vpop.f32.mrb[163].mxu1 }
 0x31b   :  { %v2238_v40 = vadd.f32 %v2237_v14, %v12077_v31  ;;  %v2239_v43 = vpop.f32.mrb[18].mxu0  ;;  %9590 = vmatprep.mubr.msk.bf16.mxu1 %vm3162_vm2, %v13486_v9 }
 0x31c   :  { %v2240_v10 = vadd.f32 %v2239_v43, %v12075_v30  ;;  %v2241_v23 = vpop.f32.mrb[19].mxu0  ;;  %4020 = vmatmul.mubr.bf16.gmra.mrb[12].mxu1 %v13484_v36  ;;  %v2786_v21 = vmax.f32 %v2236_v11, 0.0 }
 0x31d   :  { %v2242_v57 = vadd.f32 %v2241_v23, %v12077_v31  ;;  %v2787_v56 = vmax.f32 %v2238_v40, 0.0 }
 0x31e   :  { %v2788_v55 = vmax.f32 %v2240_v10, 0.0  ;;  %2504 = vmatmul.mubr.bf16.gmra.mrb[124].mxu0 %v11617_v22 }
 0x31f   :  { %v2789_v1 = vmax.f32 %v2242_v57, 0.0  ;;  %v13500_v44 = vpop.f32.mrb[164].mxu1  ;;  %9628 = vmatprep.mubr.msk.bf16.mxu0 %vm3162_vm2, %v12093_v48 }
 0x320   :  { %v13504_v14 = vpack.c.bf16 %v2788_v55, %v2786_v21  ;;  %v3815_v49 = vpop.f32.mrb[165].mxu1 }
 0x321   :  { %v13506_v37 = vpack.c.bf16 %v2789_v1, %v2787_v56  ;;  %v2245_v43 = vpop.f32.mrb[20].mxu0  ;;  %v13508_v15 = vpop.f32.mrb[166].mxu1 }
 0x322   :  { %15736 = vst [vmem:[#allocation174_spill] sm:$0xff] %v13504_v14  ;;  %15737 = vst [vmem:[#allocation175_spill] sm:$0xff] %v13508_v15  ;;  %v2246_v23 = vadd.f32 %v2245_v43, %v12075_v30  ;;  %v2247_v11 = vpop.f32.mrb[21].mxu0  ;;  %v3818_v10 = vpop.f32.mrb[167].mxu1 }
 0x323   :  { %v2248_v22 = vadd.f32 %v2247_v11, %v12077_v31  ;;  %v2249_v40 = vpop.f32.mrb[22].mxu0  ;;  %9591 = vmatprep.mubr.msk.bf16.mxu1 %vm3162_vm2, %v13506_v37 }
 0x324   :  { %v2250_v48 = vadd.f32 %v2249_v40, %v12075_v30  ;;  %v2251_v57 = vpop.f32.mrb[23].mxu0  ;;  %4028 = vmatmul.mubr.bf16.gmra.mrb[16].mxu1 %v13504_v14  ;;  %v2790_v55 = vmax.f32 %v2246_v23, 0.0 }
 0x325   :  { %v2252_v21 = vadd.f32 %v2251_v57, %v12077_v31  ;;  %v2791_v1 = vmax.f32 %v2248_v22, 0.0 }
 0x326   :  { %v2792_v56 = vmax.f32 %v2250_v48, 0.0  ;;  %4357 = vmatmul.mubr.bf16.vlgmr.msra.gmra.mrb[128].mxu0 %v12091_v46 }
 0x327   :  { %v2793_v49 = vmax.f32 %v2252_v21, 0.0  ;;  %v13518_v43 = vpop.f32.mrb[168].mxu1  ;;  %9629 = vmatprep.mubr.msk.bf16.mxu0 %vm3162_vm2, %v12115_v0 }
 0x328   :  { %v13522_v11 = vpack.c.bf16 %v2792_v56, %v2790_v55  ;;  %v3823_v10 = vpop.f32.mrb[169].mxu1 }
 0x329   :  { %v13524_v40 = vpack.c.bf16 %v2793_v49, %v2791_v1  ;;  %v2255_v15 = vpop.f32.mrb[24].mxu0  ;;  %v13526_v14 = vpop.f32.mrb[170].mxu1 }
 0x32a   :  { %15738 = vst [vmem:[#allocation176_spill] sm:$0xff] %v13522_v11  ;;  %15739 = vst [vmem:[#allocation177_spill] sm:$0xff] %v13526_v14  ;;  %v2256_v23 = vadd.f32 %v2255_v15, %v12075_v30  ;;  %v2257_v48 = vpop.f32.mrb[25].mxu0  ;;  %v3826_v57 = vpop.f32.mrb[171].mxu1 }
 0x32b   :  { %v2258_v46 = vadd.f32 %v2257_v48, %v12077_v31  ;;  %v2259_v22 = vpop.f32.mrb[26].mxu0  ;;  %9592 = vmatprep.mubr.msk.bf16.mxu1 %vm3162_vm2, %v13524_v40 }
 0x32c   :  { %v2260_v0 = vadd.f32 %v2259_v22, %v12075_v30  ;;  %v2261_v21 = vpop.f32.mrb[27].mxu0  ;;  %4036 = vmatmul.mubr.bf16.gmra.mrb[20].mxu1 %v13522_v11  ;;  %v2794_v56 = vmax.f32 %v2256_v23, 0.0 }
 0x32d   :  { %v2262_v55 = vadd.f32 %v2261_v21, %v12077_v31  ;;  %v2795_v15 = vmax.f32 %v2258_v46, 0.0 }
 0x32e   :  { %v2796_v1 = vmax.f32 %v2260_v0, 0.0  ;;  %4365 = vmatmul.mubr.bf16.gmra.mrb[132].mxu0 %v12113_v63 }
 0x32f   :  { %v2797_v49 = vmax.f32 %v2262_v55, 0.0  ;;  %v13536_v10 = vpop.f32.mrb[172].mxu1  ;;  %9630 = vmatprep.mubr.msk.bf16.mxu0 %vm3162_vm2, %v12133_v17 }
 0x330   :  { %v13540_v48 = vpack.c.bf16 %v2796_v1, %v2794_v56  ;;  %v3831_v57 = vpop.f32.mrb[173].mxu1 }
 0x331   :  { %v13542_v22 = vpack.c.bf16 %v2797_v49, %v2795_v15  ;;  %v2265_v14 = vpop.f32.mrb[28].mxu0  ;;  %v13544_v11 = vpop.f32.mrb[174].mxu1 }
 0x332   :  { %15740 = vst [vmem:[#allocation178_spill] sm:$0xff] %v13540_v48  ;;  %15741 = vst [vmem:[#allocation179_spill] sm:$0xff] %v13544_v11  ;;  %v2266_v23 = vadd.f32 %v2265_v14, %v12075_v30  ;;  %v2267_v0 = vpop.f32.mrb[29].mxu0  ;;  %v3834_v21 = vpop.f32.mrb[175].mxu1 }
 0x333   :  { %v2268_v63 = vadd.f32 %v2267_v0, %v12077_v31  ;;  %v2269_v46 = vpop.f32.mrb[30].mxu0  ;;  %9593 = vmatprep.mubr.msk.bf16.mxu1 %vm3162_vm2, %v13542_v22 }
 0x334   :  { %v2270_v17 = vadd.f32 %v2269_v46, %v12075_v30  ;;  %v2271_v55 = vpop.f32.mrb[31].mxu0  ;;  %4044 = vmatmul.mubr.bf16.gmra.mrb[24].mxu1 %v13540_v48  ;;  %v2798_v1 = vmax.f32 %v2266_v23, 0.0 }
 0x335   :  { %v2272_v56 = vadd.f32 %v2271_v55, %v12077_v31  ;;  %v2799_v14 = vmax.f32 %v2268_v63, 0.0 }
 0x336   :  { %v2800_v15 = vmax.f32 %v2270_v17, 0.0  ;;  %4373 = vmatmul.mubr.bf16.gmra.mrb[136].mxu0 %v12131_v16 }
 0x337   :  { %v2801_v49 = vmax.f32 %v2272_v56, 0.0  ;;  %v13554_v57 = vpop.f32.mrb[176].mxu1  ;;  %9631 = vmatprep.mubr.msk.bf16.mxu0 %vm3162_vm2, %v12151_v35 }
 0x338   :  { %v13558_v0 = vpack.c.bf16 %v2800_v15, %v2798_v1  ;;  %v3839_v21 = vpop.f32.mrb[177].mxu1 }
 0x339   :  { %v13560_v46 = vpack.c.bf16 %v2801_v49, %v2799_v14  ;;  %v2275_v11 = vpop.f32.mrb[32].mxu0  ;;  %v13562_v48 = vpop.f32.mrb[178].mxu1 }
 0x33a   :  { %15742 = vst [vmem:[#allocation180_spill] sm:$0xff] %v13558_v0  ;;  %15743 = vst [vmem:[#allocation181_spill] sm:$0xff] %v13562_v48  ;;  %v2276_v23 = vadd.f32 %v2275_v11, %v12075_v30  ;;  %v2277_v17 = vpop.f32.mrb[33].mxu0  ;;  %v3842_v55 = vpop.f32.mrb[179].mxu1 }
 0x33b   :  { %v2278_v16 = vadd.f32 %v2277_v17, %v12077_v31  ;;  %v2279_v63 = vpop.f32.mrb[34].mxu0  ;;  %9594 = vmatprep.mubr.msk.bf16.mxu1 %vm3162_vm2, %v13560_v46 }
 0x33c   :  { %v2280_v35 = vadd.f32 %v2279_v63, %v12075_v30  ;;  %v2281_v56 = vpop.f32.mrb[35].mxu0  ;;  %4052 = vmatmul.mubr.bf16.gmra.mrb[28].mxu1 %v13558_v0  ;;  %v2802_v15 = vmax.f32 %v2276_v23, 0.0 }
 0x33d   :  { %v2282_v1 = vadd.f32 %v2281_v56, %v12077_v31  ;;  %v2803_v11 = vmax.f32 %v2278_v16, 0.0 }
 0x33e   :  { %v2804_v14 = vmax.f32 %v2280_v35, 0.0  ;;  %4381 = vmatmul.mubr.bf16.gmra.mrb[140].mxu0 %v12149_v34 }
 0x33f   :  { %v2805_v49 = vmax.f32 %v2282_v1, 0.0  ;;  %v13572_v21 = vpop.f32.mrb[180].mxu1  ;;  %9632 = vmatprep.mubr.msk.bf16.mxu0 %vm3162_vm2, %v12169_v53 }
 0x340   :  { %v13576_v17 = vpack.c.bf16 %v2804_v14, %v2802_v15  ;;  %v3847_v55 = vpop.f32.mrb[181].mxu1 }
 0x341   :  { %v13578_v63 = vpack.c.bf16 %v2805_v49, %v2803_v11  ;;  %v2285_v48 = vpop.f32.mrb[36].mxu0  ;;  %v13580_v0 = vpop.f32.mrb[182].mxu1 }
 0x342   :  { %15744 = vst [vmem:[#allocation182_spill] sm:$0xff] %v13576_v17  ;;  %15745 = vst [vmem:[#allocation183_spill] sm:$0xff] %v13580_v0  ;;  %v2286_v23 = vadd.f32 %v2285_v48, %v12075_v30  ;;  %v2287_v35 = vpop.f32.mrb[37].mxu0  ;;  %v3850_v56 = vpop.f32.mrb[183].mxu1 }
 0x343   :  { %v2288_v34 = vadd.f32 %v2287_v35, %v12077_v31  ;;  %v2289_v16 = vpop.f32.mrb[38].mxu0  ;;  %9595 = vmatprep.mubr.msk.bf16.mxu1 %vm3162_vm2, %v13578_v63 }
 0x344   :  { %v2290_v53 = vadd.f32 %v2289_v16, %v12075_v30  ;;  %v2291_v1 = vpop.f32.mrb[39].mxu0  ;;  %4060 = vmatmul.mubr.bf16.gmra.mrb[32].mxu1 %v13576_v17  ;;  %v2806_v14 = vmax.f32 %v2286_v23, 0.0 }
 0x345   :  { %v2292_v15 = vadd.f32 %v2291_v1, %v12077_v31  ;;  %v2807_v48 = vmax.f32 %v2288_v34, 0.0 }
 0x346   :  { %v2808_v11 = vmax.f32 %v2290_v53, 0.0  ;;  %4389 = vmatmul.mubr.bf16.gmra.mrb[144].mxu0 %v12167_v52 }
 0x347   :  { %v2809_v49 = vmax.f32 %v2292_v15, 0.0  ;;  %v13590_v55 = vpop.f32.mrb[184].mxu1  ;;  %9633 = vmatprep.mubr.msk.bf16.mxu0 %vm3162_vm2, %v12187_v8 }
 0x348   :  { %v13594_v35 = vpack.c.bf16 %v2808_v11, %v2806_v14  ;;  %v3855_v56 = vpop.f32.mrb[185].mxu1 }
 0x349   :  { %v13596_v16 = vpack.c.bf16 %v2809_v49, %v2807_v48  ;;  %v2295_v0 = vpop.f32.mrb[40].mxu0  ;;  %v13598_v17 = vpop.f32.mrb[186].mxu1 }
 0x34a   :  { %15746 = vst [vmem:[#allocation184_spill] sm:$0xff] %v13594_v35  ;;  %15747 = vst [vmem:[#allocation185_spill] sm:$0xff] %v13598_v17  ;;  %v2296_v23 = vadd.f32 %v2295_v0, %v12075_v30  ;;  %v2297_v53 = vpop.f32.mrb[41].mxu0  ;;  %v3858_v1 = vpop.f32.mrb[187].mxu1 }
 0x34b   :  { %v2298_v52 = vadd.f32 %v2297_v53, %v12077_v31  ;;  %v2299_v34 = vpop.f32.mrb[42].mxu0  ;;  %9596 = vmatprep.mubr.msk.bf16.mxu1 %vm3162_vm2, %v13596_v16 }
 0x34c   :  { %v2300_v8 = vadd.f32 %v2299_v34, %v12075_v30  ;;  %v2301_v15 = vpop.f32.mrb[43].mxu0  ;;  %4068 = vmatmul.mubr.bf16.gmra.mrb[36].mxu1 %v13594_v35  ;;  %v2810_v11 = vmax.f32 %v2296_v23, 0.0 }
 0x34d   :  { %v2302_v14 = vadd.f32 %v2301_v15, %v12077_v31  ;;  %v2811_v0 = vmax.f32 %v2298_v52, 0.0 }
 0x34e   :  { %v2812_v48 = vmax.f32 %v2300_v8, 0.0  ;;  %4397 = vmatmul.mubr.bf16.gmra.mrb[148].mxu0 %v12185_v7 }
 0x34f   :  { %v2813_v49 = vmax.f32 %v2302_v14, 0.0  ;;  %v13608_v56 = vpop.f32.mrb[188].mxu1  ;;  %9634 = vmatprep.mubr.msk.bf16.mxu0 %vm3162_vm2, %v12205_v26 }
 0x350   :  { %v13612_v53 = vpack.c.bf16 %v2812_v48, %v2810_v11  ;;  %v3863_v1 = vpop.f32.mrb[189].mxu1 }
 0x351   :  { %v13614_v34 = vpack.c.bf16 %v2813_v49, %v2811_v0  ;;  %v2305_v17 = vpop.f32.mrb[44].mxu0  ;;  %v13616_v35 = vpop.f32.mrb[190].mxu1 }
 0x352   :  { %15748 = vst [vmem:[#allocation186_spill] sm:$0xff] %v13612_v53  ;;  %15749 = vst [vmem:[#allocation187_spill] sm:$0xff] %v13616_v35  ;;  %v2306_v23 = vadd.f32 %v2305_v17, %v12075_v30  ;;  %v2307_v8 = vpop.f32.mrb[45].mxu0  ;;  %v3866_v15 = vpop.f32.mrb[191].mxu1 }
 0x353   :  { %v2308_v7 = vadd.f32 %v2307_v8, %v12077_v31  ;;  %v2309_v52 = vpop.f32.mrb[46].mxu0  ;;  %9597 = vmatprep.mubr.msk.bf16.mxu1 %vm3162_vm2, %v13614_v34 }
 0x354   :  { %v2310_v26 = vadd.f32 %v2309_v52, %v12075_v30  ;;  %v2311_v14 = vpop.f32.mrb[47].mxu0  ;;  %4076 = vmatmul.mubr.bf16.gmra.mrb[40].mxu1 %v13612_v53  ;;  %v2814_v48 = vmax.f32 %v2306_v23, 0.0 }
 0x355   :  { %v2312_v11 = vadd.f32 %v2311_v14, %v12077_v31  ;;  %v2815_v17 = vmax.f32 %v2308_v7, 0.0 }
 0x356   :  { %v2816_v0 = vmax.f32 %v2310_v26, 0.0  ;;  %4405 = vmatmul.mubr.bf16.gmra.mrb[152].mxu0 %v12203_v25 }
 0x357   :  { %v2817_v49 = vmax.f32 %v2312_v11, 0.0  ;;  %v13626_v1 = vpop.f32.mrb[192].mxu1  ;;  %9635 = vmatprep.mubr.msk.bf16.mxu0 %vm3162_vm2, %v12223_v47 }
 0x358   :  { %v13630_v8 = vpack.c.bf16 %v2816_v0, %v2814_v48  ;;  %v3871_v15 = vpop.f32.mrb[193].mxu1 }
 0x359   :  { %v13632_v52 = vpack.c.bf16 %v2817_v49, %v2815_v17  ;;  %v2315_v35 = vpop.f32.mrb[48].mxu0  ;;  %v13634_v53 = vpop.f32.mrb[194].mxu1 }
 0x35a   :  { %15750 = vst [vmem:[#allocation188_spill] sm:$0xff] %v13630_v8  ;;  %15751 = vst [vmem:[#allocation189_spill] sm:$0xff] %v13634_v53  ;;  %v2316_v23 = vadd.f32 %v2315_v35, %v12075_v30  ;;  %v2317_v26 = vpop.f32.mrb[49].mxu0  ;;  %v3874_v14 = vpop.f32.mrb[195].mxu1 }
 0x35b   :  { %v2318_v25 = vadd.f32 %v2317_v26, %v12077_v31  ;;  %v2319_v7 = vpop.f32.mrb[50].mxu0  ;;  %9598 = vmatprep.mubr.msk.bf16.mxu1 %vm3162_vm2, %v13632_v52 }
 0x35c   :  { %v2320_v47 = vadd.f32 %v2319_v7, %v12075_v30  ;;  %v2321_v11 = vpop.f32.mrb[51].mxu0  ;;  %4084 = vmatmul.mubr.bf16.gmra.mrb[44].mxu1 %v13630_v8  ;;  %v2818_v0 = vmax.f32 %v2316_v23, 0.0 }
 0x35d   :  { %v2322_v48 = vadd.f32 %v2321_v11, %v12077_v31  ;;  %v2819_v35 = vmax.f32 %v2318_v25, 0.0 }
 0x35e   :  { %v2820_v17 = vmax.f32 %v2320_v47, 0.0  ;;  %4413 = vmatmul.mubr.bf16.gmra.mrb[156].mxu0 %v12221_v45 }
 0x35f   :  { %v2821_v49 = vmax.f32 %v2322_v48, 0.0  ;;  %v13644_v15 = vpop.f32.mrb[196].mxu1  ;;  %9636 = vmatprep.mubr.msk.bf16.mxu0 %vm3162_vm2, %v12241_v5 }
 0x360   :  { %v13648_v26 = vpack.c.bf16 %v2820_v17, %v2818_v0  ;;  %v3879_v14 = vpop.f32.mrb[197].mxu1 }
 0x361   :  { %v13650_v7 = vpack.c.bf16 %v2821_v49, %v2819_v35  ;;  %v2325_v53 = vpop.f32.mrb[52].mxu0  ;;  %v13652_v8 = vpop.f32.mrb[198].mxu1 }
 0x362   :  { %15752 = vst [vmem:[#allocation190_spill] sm:$0xff] %v13648_v26  ;;  %15753 = vst [vmem:[#allocation191_spill] sm:$0xff] %v13652_v8  ;;  %v2326_v23 = vadd.f32 %v2325_v53, %v12075_v30  ;;  %v2327_v47 = vpop.f32.mrb[53].mxu0  ;;  %v3882_v11 = vpop.f32.mrb[199].mxu1 }
 0x363   :  { %v2328_v45 = vadd.f32 %v2327_v47, %v12077_v31  ;;  %v2329_v25 = vpop.f32.mrb[54].mxu0  ;;  %9599 = vmatprep.mubr.msk.bf16.mxu1 %vm3162_vm2, %v13650_v7 }
 0x364   :  { %v2330_v5 = vadd.f32 %v2329_v25, %v12075_v30  ;;  %v2331_v48 = vpop.f32.mrb[55].mxu0  ;;  %4092 = vmatmul.mubr.bf16.gmra.mrb[48].mxu1 %v13648_v26  ;;  %v2822_v17 = vmax.f32 %v2326_v23, 0.0 }
 0x365   :  { %v2332_v0 = vadd.f32 %v2331_v48, %v12077_v31  ;;  %v2823_v53 = vmax.f32 %v2328_v45, 0.0 }
 0x366   :  { %v2824_v35 = vmax.f32 %v2330_v5, 0.0  ;;  %4421 = vmatmul.mubr.bf16.gmra.mrb[160].mxu0 %v12239_v4 }
 0x367   :  { %v2825_v49 = vmax.f32 %v2332_v0, 0.0  ;;  %v13662_v14 = vpop.f32.mrb[200].mxu1  ;;  %9637 = vmatprep.mubr.msk.bf16.mxu0 %vm3162_vm2, %v12259_v27 }
 0x368   :  { %v13666_v47 = vpack.c.bf16 %v2824_v35, %v2822_v17  ;;  %v3887_v11 = vpop.f32.mrb[201].mxu1 }
 0x369   :  { %v13668_v25 = vpack.c.bf16 %v2825_v49, %v2823_v53  ;;  %v2335_v8 = vpop.f32.mrb[56].mxu0  ;;  %v13670_v26 = vpop.f32.mrb[202].mxu1 }
 0x36a   :  { %15754 = vst [vmem:[#allocation192_spill] sm:$0xff] %v13666_v47  ;;  %15755 = vst [vmem:[#allocation193_spill] sm:$0xff] %v13670_v26  ;;  %v2336_v23 = vadd.f32 %v2335_v8, %v12075_v30  ;;  %v2337_v5 = vpop.f32.mrb[57].mxu0  ;;  %v3890_v48 = vpop.f32.mrb[203].mxu1 }
 0x36b   :  { %v2338_v4 = vadd.f32 %v2337_v5, %v12077_v31  ;;  %v2339_v45 = vpop.f32.mrb[58].mxu0  ;;  %9600 = vmatprep.mubr.msk.bf16.mxu1 %vm3162_vm2, %v13668_v25 }
 0x36c   :  { %v2340_v27 = vadd.f32 %v2339_v45, %v12075_v30  ;;  %v2341_v0 = vpop.f32.mrb[59].mxu0  ;;  %4100 = vmatmul.mubr.bf16.gmra.mrb[52].mxu1 %v13666_v47  ;;  %v2826_v35 = vmax.f32 %v2336_v23, 0.0 }
 0x36d   :  { %v2342_v17 = vadd.f32 %v2341_v0, %v12077_v31  ;;  %v2827_v8 = vmax.f32 %v2338_v4, 0.0 }
 0x36e   :  { %v2828_v53 = vmax.f32 %v2340_v27, 0.0  ;;  %4429 = vmatmul.mubr.bf16.gmra.mrb[164].mxu0 %v12257_v24 }
 0x36f   :  { %v2829_v49 = vmax.f32 %v2342_v17, 0.0  ;;  %v13680_v11 = vpop.f32.mrb[204].mxu1  ;;  %9638 = vmatprep.mubr.msk.bf16.mxu0 %vm3162_vm2, %v12277_v51 }
 0x370   :  { %v13684_v5 = vpack.c.bf16 %v2828_v53, %v2826_v35  ;;  %v3895_v48 = vpop.f32.mrb[205].mxu1 }
 0x371   :  { %v13686_v45 = vpack.c.bf16 %v2829_v49, %v2827_v8  ;;  %v2345_v26 = vpop.f32.mrb[60].mxu0  ;;  %v13688_v47 = vpop.f32.mrb[206].mxu1 }
 0x372   :  { %15756 = vst [vmem:[#allocation194_spill] sm:$0xff] %v13684_v5  ;;  %15757 = vst [vmem:[#allocation195_spill] sm:$0xff] %v13688_v47  ;;  %v2346_v23 = vadd.f32 %v2345_v26, %v12075_v30  ;;  %v2347_v27 = vpop.f32.mrb[61].mxu0  ;;  %v3898_v0 = vpop.f32.mrb[207].mxu1 }
 0x373   :  { %v2348_v24 = vadd.f32 %v2347_v27, %v12077_v31  ;;  %v2349_v4 = vpop.f32.mrb[62].mxu0  ;;  %9601 = vmatprep.mubr.msk.bf16.mxu1 %vm3162_vm2, %v13686_v45 }
 0x374   :  { %v2350_v51 = vadd.f32 %v2349_v4, %v12075_v30  ;;  %v2351_v17 = vpop.f32.mrb[63].mxu0  ;;  %4108 = vmatmul.mubr.bf16.gmra.mrb[56].mxu1 %v13684_v5  ;;  %v2830_v53 = vmax.f32 %v2346_v23, 0.0  ;;  %v11621_v23 = vld [vmem:[%s15396_s5 + $0x34] sm:$0xff]  }
 0x375   :  { %v2352_v35 = vadd.f32 %v2351_v17, %v12077_v31  ;;  %v2831_v26 = vmax.f32 %v2348_v24, 0.0  ;;  %10362 = vmatprep.subr.bf16.mxu1 %v11621_v23 }
 0x376   :  { %v2832_v8 = vmax.f32 %v2350_v51, 0.0  ;;  %4437 = vmatmul.mubr.bf16.gmra.mrb[168].mxu0 %v12275_v50  ;;  %10363 = vmatpush3.bf16.msra.mxu1 %v11621_v23 }
 0x377   :  { %v2833_v49 = vmax.f32 %v2352_v35, 0.0  ;;  %v13698_v48 = vpop.f32.mrb[208].mxu1  ;;  %9639 = vmatprep.mubr.msk.bf16.mxu0 %vm3162_vm2, %v12299_v13 }
 0x378   :  { %15758 = vst [vmem:[#allocation196_spill] sm:$0xff] %v13698_v48  ;;  %v13702_v27 = vpack.c.bf16 %v2832_v8, %v2830_v53  ;;  %v3903_v0 = vpop.f32.mrb[209].mxu1 }
 0x379   :  { %v13704_v4 = vpack.c.bf16 %v2833_v49, %v2831_v26  ;;  %v2355_v47 = vpop.f32.mrb[64].mxu0  ;;  %v13706_v5 = vpop.f32.mrb[210].mxu1 }
 0x37a   :  { %15759 = vst [vmem:[#allocation197_spill] sm:$0xff] %v13702_v27  ;;  %15760 = vst [vmem:[#allocation198_spill] sm:$0xff] %v13706_v5  ;;  %v2356_v50 = vadd.f32 %v2355_v47, %v12075_v30  ;;  %v2357_v24 = vpop.f32.mrb[65].mxu0  ;;  %v3906_v51 = vpop.f32.mrb[211].mxu1 }
 0x37b   :  { %v2358_v17 = vadd.f32 %v2357_v24, %v12077_v31  ;;  %v2359_v35 = vpop.f32.mrb[66].mxu0  ;;  %9602 = vmatprep.mubr.msk.bf16.mxu1 %vm3162_vm2, %v13704_v4 }
 0x37c   :  { %v2360_v13 = vadd.f32 %v2359_v35, %v12075_v30  ;;  %v2361_v53 = vpop.f32.mrb[67].mxu0  ;;  %4116 = vmatmul.mubr.bf16.gmra.mrb[60].mxu1 %v13702_v27  ;;  %v2834_v26 = vmax.f32 %v2356_v50, 0.0 }
 0x37d   :  { %v2362_v8 = vadd.f32 %v2361_v53, %v12077_v31  ;;  %v2835_v47 = vmax.f32 %v2358_v17, 0.0 }
 0x37e   :  { %v2836_v49 = vmax.f32 %v2360_v13, 0.0  ;;  %4445 = vmatmul.mubr.bf16.gmra.mrb[172].mxu0 %v12296_v12 }
 0x37f   :  { %v2837_v0 = vmax.f32 %v2362_v8, 0.0  ;;  %v13719_v24 = vpop.f32.mrb[212].mxu1  ;;  %9640 = vmatprep.mubr.msk.bf16.mxu0 %vm3162_vm2, %v12317_v39 }
 0x380   :  { %v13723_v51 = vpack.c.bf16 %v2836_v49, %v2834_v26  ;;  %v3911_v35 = vpop.f32.mrb[213].mxu1 }
 0x381   :  { %v13725_v5 = vpack.c.bf16 %v2837_v0, %v2835_v47  ;;  %v2365_v27 = vpop.f32.mrb[68].mxu0  ;;  %v13727_v48 = vpop.f32.mrb[214].mxu1 }
 0x382   :  { %15761 = vst [vmem:[#allocation199_spill] sm:$0xff] %v13723_v51  ;;  %v2366_v23 = vadd.f32 %v2365_v27, %v12075_v30  ;;  %v2367_v50 = vpop.f32.mrb[69].mxu0  ;;  %v3914_v13 = vpop.f32.mrb[215].mxu1 }
 0x383   :  { %v2368_v12 = vadd.f32 %v2367_v50, %v12077_v31  ;;  %v2369_v17 = vpop.f32.mrb[70].mxu0  ;;  %9603 = vmatprep.mubr.msk.bf16.mxu1 %vm3162_vm2, %v13725_v5 }
 0x384   :  { %v2370_v39 = vadd.f32 %v2369_v17, %v12075_v30  ;;  %v2371_v53 = vpop.f32.mrb[71].mxu0  ;;  %4124 = vmatmul.mubr.bf16.gmra.mrb[64].mxu1 %v13723_v51  ;;  %v2838_v26 = vmax.f32 %v2366_v23, 0.0 }
 0x385   :  { %v2372_v8 = vadd.f32 %v2371_v53, %v12077_v31  ;;  %v2839_v27 = vmax.f32 %v2368_v12, 0.0 }
 0x386   :  { %v2840_v49 = vmax.f32 %v2370_v39, 0.0  ;;  %4453 = vmatmul.mubr.bf16.gmra.mrb[176].mxu0 %v12315_v38 }
 0x387   :  { %v2841_v47 = vmax.f32 %v2372_v8, 0.0  ;;  %v13737_v0 = vpop.f32.mrb[216].mxu1  ;;  %9641 = vmatprep.mubr.msk.bf16.mxu0 %vm3162_vm2, %v12335_v2 }
 0x388   :  { %v13741_v35 = vpack.c.bf16 %v2840_v49, %v2838_v26  ;;  %v3919_v50 = vpop.f32.mrb[217].mxu1 }
 0x389   :  { %v13743_v13 = vpack.c.bf16 %v2841_v47, %v2839_v27  ;;  %v2375_v17 = vpop.f32.mrb[72].mxu0  ;;  %v13745_v51 = vpop.f32.mrb[218].mxu1 }
 0x38a   :  { %15762 = vst [vmem:[#allocation200_spill] sm:$0xff] %v13741_v35  ;;  %15763 = vst [vmem:[#allocation201_spill] sm:$0xff] %v13745_v51  ;;  %v2376_v23 = vadd.f32 %v2375_v17, %v12075_v30  ;;  %v2377_v39 = vpop.f32.mrb[73].mxu0  ;;  %v3922_v53 = vpop.f32.mrb[219].mxu1 }
 0x38b   :  { %v2378_v38 = vadd.f32 %v2377_v39, %v12077_v31  ;;  %v2379_v12 = vpop.f32.mrb[74].mxu0  ;;  %9604 = vmatprep.mubr.msk.bf16.mxu1 %vm3162_vm2, %v13743_v13 }
 0x38c   :  { %v2380_v2 = vadd.f32 %v2379_v12, %v12075_v30  ;;  %v2381_v8 = vpop.f32.mrb[75].mxu0  ;;  %4132 = vmatmul.mubr.bf16.gmra.mrb[68].mxu1 %v13741_v35  ;;  %v2842_v49 = vmax.f32 %v2376_v23, 0.0 }
 0x38d   :  { %v2382_v26 = vadd.f32 %v2381_v8, %v12077_v31  ;;  %v2843_v47 = vmax.f32 %v2378_v38, 0.0 }
 0x38e   :  { %v2844_v27 = vmax.f32 %v2380_v2, 0.0  ;;  %4461 = vmatmul.mubr.bf16.gmra.mrb[180].mxu0 %v12333_v62 }
 0x38f   :  { %v2845_v50 = vmax.f32 %v2382_v26, 0.0  ;;  %v13755_v17 = vpop.f32.mrb[220].mxu1  ;;  %9642 = vmatprep.mubr.msk.bf16.mxu0 %vm3162_vm2, %v12353_v32 }
 0x390   :  { %v13759_v39 = vpack.c.bf16 %v2844_v27, %v2842_v49  ;;  %v3927_v53 = vpop.f32.mrb[221].mxu1 }
 0x391   :  { %v13761_v12 = vpack.c.bf16 %v2845_v50, %v2843_v47  ;;  %v2385_v51 = vpop.f32.mrb[76].mxu0  ;;  %v13763_v35 = vpop.f32.mrb[222].mxu1 }
 0x392   :  { %15764 = vst [vmem:[#allocation202_spill] sm:$0xff] %v13759_v39  ;;  %15765 = vst [vmem:[#allocation203_spill] sm:$0xff] %v13763_v35  ;;  %v2386_v23 = vadd.f32 %v2385_v51, %v12075_v30  ;;  %v2387_v2 = vpop.f32.mrb[77].mxu0  ;;  %v3930_v8 = vpop.f32.mrb[223].mxu1 }
 0x393   :  { %v2388_v62 = vadd.f32 %v2387_v2, %v12077_v31  ;;  %v2389_v38 = vpop.f32.mrb[78].mxu0  ;;  %9605 = vmatprep.mubr.msk.bf16.mxu1 %vm3162_vm2, %v13761_v12 }
 0x394   :  { %v2390_v32 = vadd.f32 %v2389_v38, %v12075_v30  ;;  %v2391_v26 = vpop.f32.mrb[79].mxu0  ;;  %4140 = vmatmul.mubr.bf16.gmra.mrb[72].mxu1 %v13759_v39  ;;  %v2846_v27 = vmax.f32 %v2386_v23, 0.0 }
 0x395   :  { %v2392_v49 = vadd.f32 %v2391_v26, %v12077_v31  ;;  %v2847_v51 = vmax.f32 %v2388_v62, 0.0 }
 0x396   :  { %v2848_v47 = vmax.f32 %v2390_v32, 0.0  ;;  %4469 = vmatmul.mubr.bf16.gmra.mrb[184].mxu0 %v12351_v29 }
 0x397   :  { %v2849_v50 = vmax.f32 %v2392_v49, 0.0  ;;  %v13773_v53 = vpop.f32.mrb[224].mxu1  ;;  %9643 = vmatprep.mubr.msk.bf16.mxu0 %vm3162_vm2, %v12371_v60 }
 0x398   :  { %v13777_v2 = vpack.c.bf16 %v2848_v47, %v2846_v27  ;;  %v3935_v8 = vpop.f32.mrb[225].mxu1 }
 0x399   :  { %v13779_v38 = vpack.c.bf16 %v2849_v50, %v2847_v51  ;;  %v2395_v35 = vpop.f32.mrb[80].mxu0  ;;  %v13781_v39 = vpop.f32.mrb[226].mxu1 }
 0x39a   :  { %15766 = vst [vmem:[#allocation204_spill] sm:$0xff] %v13777_v2  ;;  %15767 = vst [vmem:[#allocation205_spill] sm:$0xff] %v13781_v39  ;;  %v2396_v23 = vadd.f32 %v2395_v35, %v12075_v30  ;;  %v2397_v32 = vpop.f32.mrb[81].mxu0  ;;  %v3938_v26 = vpop.f32.mrb[227].mxu1 }
 0x39b   :  { %v2398_v29 = vadd.f32 %v2397_v32, %v12077_v31  ;;  %v2399_v62 = vpop.f32.mrb[82].mxu0  ;;  %9606 = vmatprep.mubr.msk.bf16.mxu1 %vm3162_vm2, %v13779_v38 }
 0x39c   :  { %v2400_v60 = vadd.f32 %v2399_v62, %v12075_v30  ;;  %v2401_v49 = vpop.f32.mrb[83].mxu0  ;;  %4148 = vmatmul.mubr.bf16.gmra.mrb[76].mxu1 %v13777_v2  ;;  %v2850_v47 = vmax.f32 %v2396_v23, 0.0 }
 0x39d   :  { %v2402_v27 = vadd.f32 %v2401_v49, %v12077_v31  ;;  %v2851_v35 = vmax.f32 %v2398_v29, 0.0 }
 0x39e   :  { %v2852_v51 = vmax.f32 %v2400_v60, 0.0  ;;  %4477 = vmatmul.mubr.bf16.gmra.mrb[188].mxu0 %v12369_v59 }
 0x39f   :  { %v2853_v50 = vmax.f32 %v2402_v27, 0.0  ;;  %v13791_v8 = vpop.f32.mrb[228].mxu1  ;;  %9644 = vmatprep.mubr.msk.bf16.mxu0 %vm3162_vm2, %v12389_v33 }
 0x3a0   :  { %v13795_v32 = vpack.c.bf16 %v2852_v51, %v2850_v47  ;;  %v3943_v26 = vpop.f32.mrb[229].mxu1 }
 0x3a1   :  { %v13797_v62 = vpack.c.bf16 %v2853_v50, %v2851_v35  ;;  %v2405_v39 = vpop.f32.mrb[84].mxu0  ;;  %v13799_v2 = vpop.f32.mrb[230].mxu1 }
 0x3a2   :  { %15768 = vst [vmem:[#allocation206_spill] sm:$0xff] %v13795_v32  ;;  %15769 = vst [vmem:[#allocation207_spill] sm:$0xff] %v13799_v2  ;;  %v2406_v23 = vadd.f32 %v2405_v39, %v12075_v30  ;;  %v2407_v60 = vpop.f32.mrb[85].mxu0  ;;  %v3946_v49 = vpop.f32.mrb[231].mxu1 }
 0x3a3   :  { %v2408_v59 = vadd.f32 %v2407_v60, %v12077_v31  ;;  %v2409_v29 = vpop.f32.mrb[86].mxu0  ;;  %9607 = vmatprep.mubr.msk.bf16.mxu1 %vm3162_vm2, %v13797_v62 }
 0x3a4   :  { %v2410_v33 = vadd.f32 %v2409_v29, %v12075_v30  ;;  %v2411_v27 = vpop.f32.mrb[87].mxu0  ;;  %4156 = vmatmul.mubr.bf16.gmra.mrb[80].mxu1 %v13795_v32  ;;  %v2854_v51 = vmax.f32 %v2406_v23, 0.0 }
 0x3a5   :  { %v2412_v47 = vadd.f32 %v2411_v27, %v12077_v31  ;;  %v2855_v39 = vmax.f32 %v2408_v59, 0.0 }
 0x3a6   :  { %v2856_v35 = vmax.f32 %v2410_v33, 0.0  ;;  %4485 = vmatmul.mubr.bf16.gmra.mrb[192].mxu0 %v12387_v28 }
 0x3a7   :  { %v2857_v50 = vmax.f32 %v2412_v47, 0.0  ;;  %v13809_v26 = vpop.f32.mrb[232].mxu1  ;;  %9645 = vmatprep.mubr.msk.bf16.mxu0 %vm3162_vm2, %v12407_v6 }
 0x3a8   :  { %15770 = vst [vmem:[#allocation208_spill] sm:$0xff] %v13809_v26  ;;  %v13813_v60 = vpack.c.bf16 %v2856_v35, %v2854_v51  ;;  %v3951_v49 = vpop.f32.mrb[233].mxu1 }
 0x3a9   :  { %v13815_v29 = vpack.c.bf16 %v2857_v50, %v2855_v39  ;;  %v2415_v2 = vpop.f32.mrb[88].mxu0  ;;  %v13817_v32 = vpop.f32.mrb[234].mxu1 }
 0x3aa   :  { %15771 = vst [vmem:[#allocation209_spill] sm:$0xff] %v13813_v60  ;;  %15773 = vst [vmem:[#allocation211_spill] sm:$0xff] %v13817_v32  ;;  %v2416_v23 = vadd.f32 %v2415_v2, %v12075_v30  ;;  %v2417_v33 = vpop.f32.mrb[89].mxu0  ;;  %v3954_v27 = vpop.f32.mrb[235].mxu1 }
 0x3ab   :  { %15772 = vst [vmem:[#allocation210_spill] sm:$0xff] %v13815_v29  ;;  %v2418_v28 = vadd.f32 %v2417_v33, %v12077_v31  ;;  %v2419_v59 = vpop.f32.mrb[90].mxu0  ;;  %9608 = vmatprep.mubr.msk.bf16.mxu1 %vm3162_vm2, %v13815_v29  ;;  %v15910_v29 = vld [vmem:[#allocation67_spill] sm:$0xff] }
 0x3ac   :  { %v2420_v6 = vadd.f32 %v2419_v59, %v12075_v30  ;;  %v2421_v47 = vpop.f32.mrb[91].mxu0  ;;  %4164 = vmatmul.mubr.bf16.gmra.mrb[84].mxu1 %v13813_v60  ;;  %v2858_v35 = vmax.f32 %v2416_v23, 0.0 }
 0x3ad   :  { %v2422_v51 = vadd.f32 %v2421_v47, %v12077_v31  ;;  %v2859_v2 = vmax.f32 %v2418_v28, 0.0 }
 0x3ae   :  { %v2860_v39 = vmax.f32 %v2420_v6, 0.0  ;;  %4493 = vmatmul.mubr.bf16.gmra.mrb[196].mxu0 %v12405_v3 }
 0x3af   :  { %v2861_v50 = vmax.f32 %v2422_v51, 0.0  ;;  %v13827_v49 = vpop.f32.mrb[236].mxu1  ;;  %9646 = vmatprep.mubr.msk.bf16.mxu0 %vm3162_vm2, %v12425_v42 }
 0x3b0   :  { %15774 = vst [vmem:[#allocation212_spill] sm:$0xff] %v13827_v49  ;;  %v13831_v33 = vpack.c.bf16 %v2860_v39, %v2858_v35  ;;  %v3959_v27 = vpop.f32.mrb[237].mxu1 }
 0x3b1   :  { %v13833_v59 = vpack.c.bf16 %v2861_v50, %v2859_v2  ;;  %v2425_v32 = vpop.f32.mrb[92].mxu0  ;;  %v13835_v60 = vpop.f32.mrb[238].mxu1 }
 0x3b2   :  { %15775 = vst [vmem:[#allocation213_spill] sm:$0xff] %v13831_v33  ;;  %15777 = vst [vmem:[#allocation215_spill] sm:$0xff] %v13835_v60  ;;  %v2426_v23 = vadd.f32 %v2425_v32, %v12075_v30  ;;  %v2427_v6 = vpop.f32.mrb[93].mxu0  ;;  %v3962_v47 = vpop.f32.mrb[239].mxu1 }
 0x3b3   :  { %15776 = vst [vmem:[#allocation214_spill] sm:$0xff] %v13833_v59  ;;  %v2428_v3 = vadd.f32 %v2427_v6, %v12077_v31  ;;  %v2429_v28 = vpop.f32.mrb[94].mxu0  ;;  %9609 = vmatprep.mubr.msk.bf16.mxu1 %vm3162_vm2, %v13833_v59  ;;  %v15907_v59 = vld [vmem:[#allocation64_spill] sm:$0xff] }
 0x3b4   :  { %v2430_v42 = vadd.f32 %v2429_v28, %v12075_v30  ;;  %v2431_v51 = vpop.f32.mrb[95].mxu0  ;;  %4172 = vmatmul.mubr.bf16.gmra.mrb[88].mxu1 %v13831_v33  ;;  %v2862_v39 = vmax.f32 %v2426_v23, 0.0 }
 0x3b5   :  { %v2432_v35 = vadd.f32 %v2431_v51, %v12077_v31  ;;  %v2863_v32 = vmax.f32 %v2428_v3, 0.0 }
 0x3b6   :  { %v2864_v2 = vmax.f32 %v2430_v42, 0.0  ;;  %4501 = vmatmul.mubr.bf16.gmra.mrb[200].mxu0 %v12423_v41 }
 0x3b7   :  { %v2865_v50 = vmax.f32 %v2432_v35, 0.0  ;;  %v13845_v27 = vpop.f32.mrb[240].mxu1  ;;  %9647 = vmatprep.mubr.msk.bf16.mxu0 %vm3162_vm2, %v12443_v19 }
 0x3b8   :  { %15778 = vst [vmem:[#allocation216_spill] sm:$0xff] %v13845_v27  ;;  %v13849_v6 = vpack.c.bf16 %v2864_v2, %v2862_v39  ;;  %v3967_v47 = vpop.f32.mrb[241].mxu1  ;;  %v15850_v27 = vld [vmem:[#allocation29_spill] sm:$0xff] }
 0x3b9   :  { %v13851_v28 = vpack.c.bf16 %v2865_v50, %v2863_v32  ;;  %v2435_v60 = vpop.f32.mrb[96].mxu0  ;;  %v13853_v33 = vpop.f32.mrb[242].mxu1 }
 0x3ba   :  { %15779 = vst [vmem:[#allocation217_spill] sm:$0xff] %v13849_v6  ;;  %15781 = vst [vmem:[#allocation219_spill] sm:$0xff] %v13853_v33  ;;  %v2436_v23 = vadd.f32 %v2435_v60, %v12075_v30  ;;  %v2437_v42 = vpop.f32.mrb[97].mxu0  ;;  %v3970_v51 = vpop.f32.mrb[243].mxu1 }
 0x3bb   :  { %15780 = vst [vmem:[#allocation218_spill] sm:$0xff] %v13851_v28  ;;  %v2438_v41 = vadd.f32 %v2437_v42, %v12077_v31  ;;  %v2439_v3 = vpop.f32.mrb[98].mxu0  ;;  %9610 = vmatprep.mubr.msk.bf16.mxu1 %vm3162_vm2, %v13851_v28 }
 0x3bc   :  { %v2440_v19 = vadd.f32 %v2439_v3, %v12075_v30  ;;  %v2441_v35 = vpop.f32.mrb[99].mxu0  ;;  %4180 = vmatmul.mubr.bf16.gmra.mrb[92].mxu1 %v13849_v6  ;;  %v2866_v2 = vmax.f32 %v2436_v23, 0.0 }
 0x3bd   :  { %v2442_v39 = vadd.f32 %v2441_v35, %v12077_v31  ;;  %v2867_v60 = vmax.f32 %v2438_v41, 0.0 }
 0x3be   :  { %v2868_v32 = vmax.f32 %v2440_v19, 0.0  ;;  %4509 = vmatmul.mubr.bf16.gmra.mrb[204].mxu0 %v12441_v18 }
 0x3bf   :  { %v2869_v50 = vmax.f32 %v2442_v39, 0.0  ;;  %v13863_v47 = vpop.f32.mrb[244].mxu1  ;;  %9648 = vmatprep.mubr.msk.bf16.mxu0 %vm3162_vm2, %v12461_v61 }
 0x3c0   :  { %15782 = vst [vmem:[#allocation220_spill] sm:$0xff] %v13863_v47  ;;  %v13867_v42 = vpack.c.bf16 %v2868_v32, %v2866_v2  ;;  %v3975_v51 = vpop.f32.mrb[245].mxu1 }
 0x3c1   :  { %v13869_v3 = vpack.c.bf16 %v2869_v50, %v2867_v60  ;;  %v2445_v33 = vpop.f32.mrb[100].mxu0  ;;  %v13871_v6 = vpop.f32.mrb[246].mxu1 }
 0x3c2   :  { %15783 = vst [vmem:[#allocation221_spill] sm:$0xff] %v13867_v42  ;;  %15785 = vst [vmem:[#allocation223_spill] sm:$0xff] %v13871_v6  ;;  %v2446_v23 = vadd.f32 %v2445_v33, %v12075_v30  ;;  %v2447_v19 = vpop.f32.mrb[101].mxu0  ;;  %v3978_v35 = vpop.f32.mrb[247].mxu1 }
 0x3c3   :  { %15784 = vst [vmem:[#allocation222_spill] sm:$0xff] %v13869_v3  ;;  %v2448_v18 = vadd.f32 %v2447_v19, %v12077_v31  ;;  %v2449_v41 = vpop.f32.mrb[102].mxu0  ;;  %9611 = vmatprep.mubr.msk.bf16.mxu1 %vm3162_vm2, %v13869_v3  ;;  %v15848_v3 = vld [vmem:[#allocation31_spill] sm:$0xff] }
 0x3c4   :  { %v2450_v61 = vadd.f32 %v2449_v41, %v12075_v30  ;;  %v2451_v39 = vpop.f32.mrb[103].mxu0  ;;  %4188 = vmatmul.mubr.bf16.gmra.mrb[96].mxu1 %v13867_v42  ;;  %v2870_v32 = vmax.f32 %v2446_v23, 0.0 }
 0x3c5   :  { %v2452_v2 = vadd.f32 %v2451_v39, %v12077_v31  ;;  %v2871_v33 = vmax.f32 %v2448_v18, 0.0 }
 0x3c6   :  { %v2872_v60 = vmax.f32 %v2450_v61, 0.0  ;;  %4517 = vmatmul.mubr.bf16.gmra.mrb[208].mxu0 %v12459_v58 }
 0x3c7   :  { %v2873_v50 = vmax.f32 %v2452_v2, 0.0  ;;  %v13881_v51 = vpop.f32.mrb[248].mxu1  ;;  %9649 = vmatprep.mubr.msk.bf16.mxu0 %vm3162_vm2, %v12479_v54 }
 0x3c8   :  { %15786 = vst [vmem:[#allocation224_spill] sm:$0xff] %v13881_v51  ;;  %v13885_v19 = vpack.c.bf16 %v2872_v60, %v2870_v32  ;;  %v3983_v35 = vpop.f32.mrb[249].mxu1 }
 0x3c9   :  { %v13887_v41 = vpack.c.bf16 %v2873_v50, %v2871_v33  ;;  %v2455_v6 = vpop.f32.mrb[104].mxu0  ;;  %v13889_v42 = vpop.f32.mrb[250].mxu1  ;;  %v15790_v50 = vld [vmem:[#allocation2_spill] sm:$0xff] }
 0x3ca   :  { %15787 = vst [vmem:[#allocation225_spill] sm:$0xff] %v13885_v19  ;;  %15789 = vst [vmem:[#allocation227_spill] sm:$0xff] %v13889_v42  ;;  %v2456_v23 = vadd.f32 %v2455_v6, %v12075_v30  ;;  %v2457_v61 = vpop.f32.mrb[105].mxu0  ;;  %v3986_v39 = vpop.f32.mrb[251].mxu1 }
 0x3cb   :  { %15788 = vst [vmem:[#allocation226_spill] sm:$0xff] %v13887_v41  ;;  %v2458_v58 = vadd.f32 %v2457_v61, %v12077_v31  ;;  %v2459_v18 = vpop.f32.mrb[106].mxu0  ;;  %9612 = vmatprep.mubr.msk.bf16.mxu1 %vm3162_vm2, %v13887_v41  ;;  %v15792_v61 = vld [vmem:[#allocation4_spill] sm:$0xff] }
 0x3cc   :  { %v2460_v54 = vadd.f32 %v2459_v18, %v12075_v30  ;;  %v2461_v2 = vpop.f32.mrb[107].mxu0  ;;  %4196 = vmatmul.mubr.bf16.gmra.mrb[100].mxu1 %v13885_v19  ;;  %v2874_v60 = vmax.f32 %v2456_v23, 0.0 }
 0x3cd   :  { %v2462_v32 = vadd.f32 %v2461_v2, %v12077_v31  ;;  %v2875_v6 = vmax.f32 %v2458_v58, 0.0 }
 0x3ce   :  { %v2876_v33 = vmax.f32 %v2460_v54, 0.0  ;;  %4525 = vmatmul.mubr.bf16.gmra.mrb[212].mxu0 %v15790_v50 }
 0x3cf   :  { %v2877_v35 = vmax.f32 %v2462_v32, 0.0  ;;  %v13899_v39 = vpop.f32.mrb[252].mxu1  ;;  %9650 = vmatprep.mubr.msk.bf16.mxu0 %vm3162_vm2, %v15792_v61 }
 0x3d0   :  { %15791 = vst [vmem:[#allocation2_spill] sm:$0xff] %v13899_v39  ;;  %v13903_v42 = vpack.c.bf16 %v2876_v33, %v2874_v60  ;;  %v3991_v51 = vpop.f32.mrb[253].mxu1 }
 0x3d1   :  { %v13905_v18 = vpack.c.bf16 %v2877_v35, %v2875_v6  ;;  %v2465_v41 = vpop.f32.mrb[108].mxu0  ;;  %v13907_v19 = vpop.f32.mrb[254].mxu1  ;;  %v15796_v35 = vld [vmem:[#allocation3_spill] sm:$0xff] }
 0x3d2   :  { %15793 = vst [vmem:[#allocation4_spill] sm:$0xff] %v13903_v42  ;;  %15795 = vst [vmem:[#allocation229_spill] sm:$0xff] %v13907_v19  ;;  %v2466_v23 = vadd.f32 %v2465_v41, %v12075_v30  ;;  %v2467_v54 = vpop.f32.mrb[109].mxu0  ;;  %v3994_v2 = vpop.f32.mrb[255].mxu1 }
 0x3d3   :  { %15794 = vst [vmem:[#allocation228_spill] sm:$0xff] %v13905_v18  ;;  %v2468_v58 = vadd.f32 %v2467_v54, %v12077_v31  ;;  %v2469_v32 = vpop.f32.mrb[110].mxu0  ;;  %9613 = vmatprep.mubr.msk.bf16.mxu1 %vm3162_vm2, %v13905_v18  ;;  %v15798_v54 = vld [vmem:[#allocation6_spill] sm:$0xff] }
 0x3d4   :  { %v2470_v50 = vadd.f32 %v2469_v32, %v12075_v30  ;;  %v2471_v60 = vpop.f32.mrb[111].mxu0  ;;  %4204 = vmatmul.mubr.bf16.gmra.mrb[104].mxu1 %v13903_v42  ;;  %v2878_v33 = vmax.f32 %v2466_v23, 0.0 }
 0x3d5   :  { %v2472_v51 = vadd.f32 %v2471_v60, %v12077_v31  ;;  %v2879_v41 = vmax.f32 %v2468_v58, 0.0 }
 0x3d6   :  { %v2880_v6 = vmax.f32 %v2470_v50, 0.0  ;;  %4533 = vmatmul.mubr.bf16.gmra.mrb[216].mxu0 %v15796_v35 }
 0x3d7   :  { %v2881_v61 = vmax.f32 %v2472_v51, 0.0  ;;  %v13917_v2 = vpop.f32.mrb[0].mxu1  ;;  %9651 = vmatprep.mubr.msk.bf16.mxu0 %vm3162_vm2, %v15798_v54 }
 0x3d8   :  { %15797 = vst [vmem:[#allocation3_spill] sm:$0xff] %v13917_v2  ;;  %v13921_v19 = vpack.c.bf16 %v2880_v6, %v2878_v33  ;;  %v3999_v39 = vpop.f32.mrb[1].mxu1 }
 0x3d9   :  { %v13923_v32 = vpack.c.bf16 %v2881_v61, %v2879_v41  ;;  %v2475_v18 = vpop.f32.mrb[112].mxu0  ;;  %v13925_v42 = vpop.f32.mrb[2].mxu1  ;;  %v15802_v61 = vld [vmem:[#allocation5_spill] sm:$0xff] }
 0x3da   :  { %15799 = vst [vmem:[#allocation6_spill] sm:$0xff] %v13921_v19  ;;  %15801 = vst [vmem:[#allocation231_spill] sm:$0xff] %v13925_v42  ;;  %v2476_v23 = vadd.f32 %v2475_v18, %v12075_v30  ;;  %v2477_v50 = vpop.f32.mrb[113].mxu0  ;;  %v4002_v60 = vpop.f32.mrb[3].mxu1 }
 0x3db   :  { %15800 = vst [vmem:[#allocation230_spill] sm:$0xff] %v13923_v32  ;;  %v2478_v58 = vadd.f32 %v2477_v50, %v12077_v31  ;;  %v2479_v51 = vpop.f32.mrb[114].mxu0  ;;  %9614 = vmatprep.mubr.msk.bf16.mxu1 %vm3162_vm2, %v13923_v32  ;;  %v15804_v50 = vld [vmem:[#allocation8_spill] sm:$0xff] }
 0x3dc   :  { %v2480_v35 = vadd.f32 %v2479_v51, %v12075_v30  ;;  %v2481_v33 = vpop.f32.mrb[115].mxu0  ;;  %4212 = vmatmul.mubr.bf16.gmra.mrb[108].mxu1 %v13921_v19  ;;  %v2882_v6 = vmax.f32 %v2476_v23, 0.0  ;;  %v11622_v51 = vld [vmem:[%s15396_s5 + $0x3c] sm:$0xff]  }
 0x3dd   :  { %v2482_v39 = vadd.f32 %v2481_v33, %v12077_v31  ;;  %v2883_v18 = vmax.f32 %v2478_v58, 0.0  ;;  %10364 = vmatprep.subr.bf16.mxu1 %v11622_v51 }
 0x3de   :  { %v2884_v41 = vmax.f32 %v2480_v35, 0.0  ;;  %4541 = vmatmul.mubr.bf16.gmra.mrb[220].mxu0 %v15802_v61  ;;  %10365 = vmatpush3.bf16.msra.mxu1 %v11622_v51 }
 0x3df   :  { %v2885_v54 = vmax.f32 %v2482_v39, 0.0  ;;  %v13935_v60 = vpop.f32.mrb[4].mxu1  ;;  %9652 = vmatprep.mubr.msk.bf16.mxu0 %vm3162_vm2, %v15804_v50 }
 0x3e0   :  { %15803 = vst [vmem:[#allocation5_spill] sm:$0xff] %v13935_v60  ;;  %v13939_v42 = vpack.c.bf16 %v2884_v41, %v2882_v6  ;;  %v4007_v2 = vpop.f32.mrb[5].mxu1  ;;  %v11623_v41 = vld [vmem:[%s15396_s5 + $0x44] ss:$0 sps:$4 sm:$0xff]  }
 0x3e1   :  { %v13944_v19 = vpack.c.bf16 %v2885_v54, %v2883_v18  ;;  %v2485_v23 = vpop.f32.mrb[116].mxu0  ;;  %v13946_v35 = vpop.f32.mrb[6].mxu1  ;;  %11280 = vmatprep.subr.msk.bf16.mxu1 %vm5604_vm3, %v11623_v41  ;;  %v5606_v51 = vsel %vm5604_vm3, %v11623_v41, 0 }
 0x3e2   :  { %15805 = vst [vmem:[#allocation8_spill] sm:$0xff] %v13939_v42  ;;  %15807 = vst [vmem:[#allocation233_spill] sm:$0xff] %v13946_v35  ;;  %v2486_v58 = vadd.f32 %v2485_v23, %v12075_v30  ;;  %v2487_v33 = vpop.f32.mrb[117].mxu0  ;;  %v4010_v39 = vpop.f32.mrb[7].mxu1  ;;  %10367 = vmatpush3.bf16.msra.mxu1 %v5606_v51 }
 0x3e3   :  { %15806 = vst [vmem:[#allocation232_spill] sm:$0xff] %v13944_v19  ;;  %v2488_v61 = vadd.f32 %v2487_v33, %v12077_v31  ;;  %v2489_v50 = vpop.f32.mrb[118].mxu0  ;;  %9615 = vmatprep.mubr.msk.bf16.mxu1 %vm3162_vm2, %v13944_v19  ;;  %v15808_v33 = vld [vmem:[#allocation7_spill] sm:$0xff] }
 0x3e4   :  { %v2490_v2 = vadd.f32 %v2489_v50, %v12075_v30  ;;  %v2491_v6 = vpop.f32.mrb[119].mxu0  ;;  %4220 = vmatmul.mubr.bf16.gmra.mrb[112].mxu1 %v13939_v42  ;;  %v2886_v54 = vmax.f32 %v2486_v58, 0.0  ;;  %v15810_v42 = vld [vmem:[#allocation10_spill] sm:$0xff] }
 0x3e5   :  { %v2492_v18 = vadd.f32 %v2491_v6, %v12077_v31  ;;  %v2887_v39 = vmax.f32 %v2488_v61, 0.0 }
 0x3e6   :  { %v2888_v23 = vmax.f32 %v2490_v2, 0.0  ;;  %4549 = vmatmul.mubr.bf16.gmra.mrb[224].mxu0 %v15808_v33 }
 0x3e7   :  { %v2889_v50 = vmax.f32 %v2492_v18, 0.0  ;;  %v13961_v35 = vpop.f32.mrb[8].mxu1  ;;  %9653 = vmatprep.mubr.msk.bf16.mxu0 %vm3162_vm2, %v15810_v42 }
 0x3e8   :  { %15809 = vst [vmem:[#allocation7_spill] sm:$0xff] %v13961_v35  ;;  %v13965_v60 = vpack.c.bf16 %v2888_v23, %v2886_v54  ;;  %v4015_v6 = vpop.f32.mrb[9].mxu1 }
 0x3e9   :  { %v13967_v19 = vpack.c.bf16 %v2889_v50, %v2887_v39  ;;  %v2495_v58 = vpop.f32.mrb[120].mxu0  ;;  %v13969_v2 = vpop.f32.mrb[10].mxu1  ;;  %v15814_v50 = vld [vmem:[#allocation9_spill] sm:$0xff] }
 0x3ea   :  { %15811 = vst [vmem:[#allocation10_spill] sm:$0xff] %v13965_v60  ;;  %15813 = vst [vmem:[#allocation235_spill] sm:$0xff] %v13969_v2  ;;  %v2496_v33 = vadd.f32 %v2495_v58, %v12075_v30  ;;  %v2497_v32 = vpop.f32.mrb[121].mxu0  ;;  %v4018_v41 = vpop.f32.mrb[11].mxu1 }
 0x3eb   :  { %15812 = vst [vmem:[#allocation234_spill] sm:$0xff] %v13967_v19  ;;  %v2498_v61 = vadd.f32 %v2497_v32, %v12077_v31  ;;  %v2499_v18 = vpop.f32.mrb[122].mxu0  ;;  %9616 = vmatprep.mubr.msk.bf16.mxu1 %vm3162_vm2, %v13967_v19  ;;  %v15816_v32 = vld [vmem:[#allocation12_spill] sm:$0xff] }
 0x3ec   :  { %v2500_v42 = vadd.f32 %v2499_v18, %v12075_v30  ;;  %v2501_v54 = vpop.f32.mrb[123].mxu0  ;;  %4228 = vmatmul.mubr.bf16.gmra.mrb[116].mxu1 %v13965_v60  ;;  %v2890_v51 = vmax.f32 %v2496_v33, 0.0 }
 0x3ed   :  { %v2502_v23 = vadd.f32 %v2501_v54, %v12077_v31  ;;  %v2891_v6 = vmax.f32 %v2498_v61, 0.0 }
 0x3ee   :  { %v2892_v39 = vmax.f32 %v2500_v42, 0.0  ;;  %4557 = vmatmul.mubr.bf16.gmra.mrb[228].mxu0 %v15814_v50 }
 0x3ef   :  { %v2893_v58 = vmax.f32 %v2502_v23, 0.0  ;;  %v13979_v41 = vpop.f32.mrb[12].mxu1  ;;  %9654 = vmatprep.mubr.msk.bf16.mxu0 %vm3162_vm2, %v15816_v32 }
 0x3f0   :  { %15815 = vst [vmem:[#allocation9_spill] sm:$0xff] %v13979_v41  ;;  %v13983_v2 = vpack.c.bf16 %v2892_v39, %v2890_v51  ;;  %v4023_v35 = vpop.f32.mrb[13].mxu1 }
 0x3f1   :  { %v13985_v18 = vpack.c.bf16 %v2893_v58, %v2891_v6  ;;  %v2505_v19 = vpop.f32.mrb[124].mxu0  ;;  %v13987_v60 = vpop.f32.mrb[14].mxu1  ;;  %v15820_v58 = vld [vmem:[#allocation11_spill] sm:$0xff] }
 0x3f2   :  { %15817 = vst [vmem:[#allocation12_spill] sm:$0xff] %v13983_v2  ;;  %15819 = vst [vmem:[#allocation237_spill] sm:$0xff] %v13987_v60  ;;  %v2506_v33 = vadd.f32 %v2505_v19, %v12075_v30  ;;  %v2507_v42 = vpop.f32.mrb[125].mxu0  ;;  %v4026_v54 = vpop.f32.mrb[15].mxu1 }
 0x3f3   :  { %15818 = vst [vmem:[#allocation236_spill] sm:$0xff] %v13985_v18  ;;  %v2508_v61 = vadd.f32 %v2507_v42, %v12077_v31  ;;  %v2509_v23 = vpop.f32.mrb[126].mxu0  ;;  %9617 = vmatprep.mubr.msk.bf16.mxu1 %vm3162_vm2, %v13985_v18  ;;  %v15822_v42 = vld [vmem:[#allocation15_spill] sm:$0xff] }
 0x3f4   :  { %v2510_v50 = vadd.f32 %v2509_v23, %v12075_v30  ;;  %v2511_v51 = vpop.f32.mrb[127].mxu0  ;;  %4236 = vmatmul.mubr.bf16.gmra.mrb[120].mxu1 %v13983_v2  ;;  %v2894_v39 = vmax.f32 %v2506_v33, 0.0 }
 0x3f5   :  { %v2512_v35 = vadd.f32 %v2511_v51, %v12077_v31  ;;  %v2895_v19 = vmax.f32 %v2508_v61, 0.0  ;;  %v15826_v31 = vld [vmem:[#allocation13_spill] sm:$0xff] }
 0x3f6   :  { %v2896_v6 = vmax.f32 %v2510_v50, 0.0  ;;  %4565 = vmatmul.mubr.bf16.gmra.mrb[232].mxu0 %v15820_v58 }
 0x3f7   :  { %v2897_v32 = vmax.f32 %v2512_v35, 0.0  ;;  %v13997_v54 = vpop.f32.mrb[16].mxu1  ;;  %9655 = vmatprep.mubr.msk.bf16.mxu0 %vm3162_vm2, %v15822_v42  ;;  %v15827_v35 = vld [vmem:[#allocation16_spill] sm:$0xff] }
 0x3f8   :  { %15821 = vst [vmem:[#allocation11_spill] sm:$0xff] %v13997_v54  ;;  %v14001_v60 = vpack.c.bf16 %v2896_v6, %v2894_v39  ;;  %v4031_v41 = vpop.f32.mrb[17].mxu1  ;;  %v15828_v6 = vld [vmem:[#allocation14_spill] sm:$0xff] }
 0x3f9   :  { %v14003_v30 = vpack.c.bf16 %v2897_v32, %v2895_v19  ;;  %v14005_v23 = vpop.f32.mrb[18].mxu1  ;;  %v4358_v2 = vpop.f32.mrb[128].mxu0  ;;  %v15830_v19 = vld [vmem:[#allocation19_spill] sm:$0xff] }
 0x3fa   :  { %15823 = vst [vmem:[#allocation15_spill] sm:$0xff] %v14001_v60  ;;  %15825 = vst [vmem:[#allocation239_spill] sm:$0xff] %v14005_v23  ;;  %v5125_v33 = vmax.f32 %v15826_v31, %v4358_v2  ;;  %v4034_v50 = vpop.f32.mrb[19].mxu1  ;;  %v4360_v51 = vpop.f32.mrb[129].mxu0  ;;  %v15832_v31 = vld [vmem:[#allocation17_spill] sm:$0xff] }
 0x3fb   :  { %15824 = vst [vmem:[#allocation238_spill] sm:$0xff] %v14003_v30  ;;  %9618 = vmatprep.mubr.msk.bf16.mxu1 %vm3162_vm2, %v14003_v30  ;;  %v4361_v61 = vpop.f32.mrb[130].mxu0  ;;  %v15838_v30 = vld [vmem:[#allocation21_spill] sm:$0xff] }
 0x3fc   :  { %v5126_v58 = vmax.f32 %v15827_v35, %v4361_v61  ;;  %4244 = vmatmul.mubr.bf16.gmra.mrb[124].mxu1 %v14001_v60  ;;  %v4363_v39 = vpop.f32.mrb[131].mxu0  ;;  %v15833_v61 = vld [vmem:[#allocation20_spill] sm:$0xff] }
 0x3fd   :  { %v15834_v39 = vld [vmem:[#allocation18_spill] sm:$0xff] }
 0x3fe   :  { %4573 = vmatmul.mubr.bf16.gmra.mrb[236].mxu0 %v15828_v6 }
 0x3ff   :  { %v14013_v41 = vpop.f32.mrb[20].mxu1  ;;  %9656 = vmatprep.mubr.msk.bf16.mxu0 %vm3162_vm2, %v15830_v19 }
 0x400   :  { %15829 = vst [vmem:[#allocation13_spill] sm:$0xff] %v14013_v41  ;;  %v4039_v32 = vpop.f32.mrb[21].mxu1  ;;  %v15836_v41 = vld [vmem:[#allocation23_spill] sm:$0xff] }
 0x401   :  { %v14017_v2 = vpop.f32.mrb[22].mxu1  ;;  %v4366_v42 = vpop.f32.mrb[132].mxu0 }
 0x402   :  { %15831 = vst [vmem:[#allocation16_spill] sm:$0xff] %v14017_v2  ;;  %v5127_v50 = vmax.f32 %v15832_v31, %v4366_v42  ;;  %v4042_v51 = vpop.f32.mrb[23].mxu1  ;;  %v4368_v23 = vpop.f32.mrb[133].mxu0 }
 0x403   :  { %v4369_v54 = vpop.f32.mrb[134].mxu0  ;;  %v15839_v51 = vld [vmem:[#allocation24_spill] sm:$0xff] }
 0x404   :  { %v5128_v35 = vmax.f32 %v15833_v61, %v4369_v54  ;;  %v4371_v60 = vpop.f32.mrb[135].mxu0 }
 0x405   :  { %v15840_v60 = vld [vmem:[#allocation22_spill] sm:$0xff] }
 0x406   :  { %4581 = vmatmul.mubr.bf16.gmra.mrb[240].mxu0 %v15834_v39  ;;  %v15842_v39 = vld [vmem:[#allocation27_spill] sm:$0xff] }
 0x407   :  { %v14022_v6 = vpop.f32.mrb[24].mxu1  ;;  %9657 = vmatprep.mubr.msk.bf16.mxu0 %vm3162_vm2, %v15836_v41 }
 0x408   :  { %15835 = vst [vmem:[#allocation14_spill] sm:$0xff] %v14022_v6  ;;  %v4047_v19 = vpop.f32.mrb[25].mxu1 }
 0x409   :  { %v14026_v32 = vpop.f32.mrb[26].mxu1  ;;  %v4374_v2 = vpop.f32.mrb[136].mxu0 }
 0x40a   :  { %15837 = vst [vmem:[#allocation19_spill] sm:$0xff] %v14026_v32  ;;  %v5129_v18 = vmax.f32 %v15838_v30, %v4374_v2  ;;  %v4050_v42 = vpop.f32.mrb[27].mxu1  ;;  %v4376_v31 = vpop.f32.mrb[137].mxu0  ;;  %v15844_v30 = vld [vmem:[#allocation25_spill] sm:$0xff] }
 0x40b   :  { %v4377_v23 = vpop.f32.mrb[138].mxu0 }
 0x40c   :  { %v5130_v47 = vmax.f32 %v15839_v51, %v4377_v23  ;;  %v4379_v54 = vpop.f32.mrb[139].mxu0  ;;  %v15845_v23 = vld [vmem:[#allocation28_spill] sm:$0xff] }
 0x40e   :  { %4589 = vmatmul.mubr.bf16.gmra.mrb[244].mxu0 %v15840_v60  ;;  %v15846_v60 = vld [vmem:[#allocation26_spill] sm:$0xff] }
 0x40f   :  { %v14031_v61 = vpop.f32.mrb[28].mxu1  ;;  %9658 = vmatprep.mubr.msk.bf16.mxu0 %vm3162_vm2, %v15842_v39 }
 0x410   :  { %15841 = vst [vmem:[#allocation17_spill] sm:$0xff] %v14031_v61  ;;  %v4055_v41 = vpop.f32.mrb[29].mxu1 }
 0x411   :  { %v14035_v19 = vpop.f32.mrb[30].mxu1  ;;  %v14037_v32 = vpop.f32.mrb[140].mxu0 }
 0x412   :  { %15843 = vst [vmem:[#allocation20_spill] sm:$0xff] %v14035_v19  ;;  %v5131_v2 = vmax.f32 %v15844_v30, %v14037_v32  ;;  %v4058_v42 = vpop.f32.mrb[31].mxu1  ;;  %v4384_v31 = vpop.f32.mrb[141].mxu0 }
 0x413   :  { %v4385_v6 = vpop.f32.mrb[142].mxu0 }
 0x414   :  { %v5132_v51 = vmax.f32 %v15845_v23, %v4385_v6  ;;  %v4387_v54 = vpop.f32.mrb[143].mxu0  ;;  %v15852_v6 = vld [vmem:[#allocation32_spill] sm:$0xff] }
 0x416   :  { %4597 = vmatmul.mubr.bf16.gmra.mrb[248].mxu0 %v15846_v60 }
 0x417   :  { %v14043_v61 = vpop.f32.mrb[32].mxu1  ;;  %9659 = vmatprep.mubr.msk.bf16.mxu0 %vm3162_vm2, %v15848_v3  ;;  %v15856_v3 = vld [vmem:[#allocation35_spill] sm:$0xff] }
 0x418   :  { %15847 = vst [vmem:[#allocation18_spill] sm:$0xff] %v14043_v61  ;;  %v4063_v39 = vpop.f32.mrb[33].mxu1  ;;  %v15854_v61 = vld [vmem:[#allocation30_spill] sm:$0xff] }
 0x419   :  { %v14047_v41 = vpop.f32.mrb[34].mxu1  ;;  %v4390_v19 = vpop.f32.mrb[144].mxu0 }
 0x41a   :  { %15849 = vst [vmem:[#allocation23_spill] sm:$0xff] %v14047_v41  ;;  %v5133_v28 = vmax.f32 %v15850_v27, %v4390_v19  ;;  %v4066_v32 = vpop.f32.mrb[35].mxu1  ;;  %v4392_v30 = vpop.f32.mrb[145].mxu0  ;;  %v15864_v27 = vld [vmem:[#allocation39_spill] sm:$0xff] }
 0x41b   :  { %v4393_v42 = vpop.f32.mrb[146].mxu0 }
 0x41c   :  { %v14050_v31 = vmax.f32 %v5125_v33, %v5133_v28  ;;  %v5134_v23 = vmax.f32 %v15852_v6, %v4393_v42  ;;  %v4395_v54 = vpop.f32.mrb[147].mxu0  ;;  %v15858_v33 = vld [vmem:[#allocation33_spill] sm:$0xff] }
 0x41e   :  { %15851 = vst [vmem:[#allocation21_spill] sm:$0xff] %v14050_v31  ;;  %v14053_v60 = vmax.f32 %v5126_v58, %v5134_v23  ;;  %4605 = vmatmul.mubr.bf16.gmra.mrb[252].mxu0 %v15854_v61  ;;  %v15860_v61 = vld [vmem:[#allocation36_spill] sm:$0xff] }
 0x41f   :  { %v14056_v49 = vpop.f32.mrb[36].mxu1  ;;  %9660 = vmatprep.mubr.msk.bf16.mxu0 %vm3162_vm2, %v15856_v3  ;;  %v15862_v3 = vld [vmem:[#allocation34_spill] sm:$0xff] }
 0x420   :  { %15853 = vst [vmem:[#allocation24_spill] sm:$0xff] %v14053_v60  ;;  %15855 = vst [vmem:[#allocation22_spill] sm:$0xff] %v14056_v49  ;;  %v4071_v39 = vpop.f32.mrb[37].mxu1 }
 0x421   :  { %v14062_v19 = vpop.f32.mrb[38].mxu1  ;;  %v4398_v28 = vpop.f32.mrb[148].mxu0 }
 0x422   :  { %15857 = vst [vmem:[#allocation27_spill] sm:$0xff] %v14062_v19  ;;  %v5135_v32 = vmax.f32 %v15858_v33, %v4398_v28  ;;  %v4074_v30 = vpop.f32.mrb[39].mxu1  ;;  %v4400_v42 = vpop.f32.mrb[149].mxu0 }
 0x423   :  { %v4401_v58 = vpop.f32.mrb[150].mxu0 }
 0x424   :  { %v14065_v6 = vmax.f32 %v5127_v50, %v5135_v32  ;;  %v5136_v23 = vmax.f32 %v15860_v61, %v4401_v58  ;;  %v4403_v54 = vpop.f32.mrb[151].mxu0  ;;  %v15866_v32 = vld [vmem:[#allocation37_spill] sm:$0xff] }
 0x425   :  { %v15868_v54 = vld [vmem:[#allocation40_spill] sm:$0xff] }
 0x426   :  { %15859 = vst [vmem:[#allocation25_spill] sm:$0xff] %v14065_v6  ;;  %v14068_v49 = vmax.f32 %v5128_v35, %v5136_v23  ;;  %4613 = vmatmul.mubr.bf16.gmra.mrb[0].mxu0 %v15862_v3 }
 0x427   :  { %v14071_v39 = vpop.f32.mrb[40].mxu1  ;;  %9661 = vmatprep.mubr.msk.bf16.mxu0 %vm3162_vm2, %v15864_v27  ;;  %v15870_v27 = vld [vmem:[#allocation38_spill] sm:$0xff] }
 0x428   :  { %15861 = vst [vmem:[#allocation28_spill] sm:$0xff] %v14068_v49  ;;  %15863 = vst [vmem:[#allocation26_spill] sm:$0xff] %v14071_v39  ;;  %v4079_v33 = vpop.f32.mrb[41].mxu1 }
 0x429   :  { %v14077_v30 = vpop.f32.mrb[42].mxu1  ;;  %v4406_v50 = vpop.f32.mrb[152].mxu0  ;;  %v15872_v33 = vld [vmem:[#allocation43_spill] sm:$0xff] }
 0x42a   :  { %15865 = vst [vmem:[#allocation31_spill] sm:$0xff] %v14077_v30  ;;  %v5137_v42 = vmax.f32 %v15866_v32, %v4406_v50  ;;  %v4082_v58 = vpop.f32.mrb[43].mxu1  ;;  %v4408_v61 = vpop.f32.mrb[153].mxu0  ;;  %v15880_v50 = vld [vmem:[#allocation47_spill] sm:$0xff]  ;;  %v15888_v30 = vld [vmem:[#allocation49_spill] sm:$0xff] }
 0x42b   :  { %v4409_v35 = vpop.f32.mrb[154].mxu0 }
 0x42c   :  { %v14080_v23 = vmax.f32 %v5129_v18, %v5137_v42  ;;  %v5138_v3 = vmax.f32 %v15868_v54, %v4409_v35  ;;  %v4411_v39 = vpop.f32.mrb[155].mxu0  ;;  %v15874_v42 = vld [vmem:[#allocation41_spill] sm:$0xff]  ;;  %v15876_v54 = vld [vmem:[#allocation44_spill] sm:$0xff] }
 0x42e   :  { %15867 = vst [vmem:[#allocation29_spill] sm:$0xff] %v14080_v23  ;;  %v14083_v19 = vmax.f32 %v5130_v47, %v5138_v3  ;;  %4621 = vmatmul.mubr.bf16.gmra.mrb[4].mxu0 %v15870_v27  ;;  %v15898_v23 = vld [vmem:[#allocation59_spill] sm:$0xff] }
 0x42f   :  { %v14086_v41 = vpop.f32.mrb[44].mxu1  ;;  %9662 = vmatprep.mubr.msk.bf16.mxu0 %vm3162_vm2, %v15872_v33  ;;  %v15878_v33 = vld [vmem:[#allocation42_spill] sm:$0xff] }
 0x430   :  { %15869 = vst [vmem:[#allocation32_spill] sm:$0xff] %v14083_v19  ;;  %15871 = vst [vmem:[#allocation30_spill] sm:$0xff] %v14086_v41  ;;  %v4087_v28 = vpop.f32.mrb[45].mxu1 }
 0x431   :  { %v14092_v32 = vpop.f32.mrb[46].mxu1  ;;  %v4414_v18 = vpop.f32.mrb[156].mxu0 }
 0x432   :  { %15873 = vst [vmem:[#allocation35_spill] sm:$0xff] %v14092_v32  ;;  %v5139_v58 = vmax.f32 %v15874_v42, %v4414_v18  ;;  %v4090_v61 = vpop.f32.mrb[47].mxu1  ;;  %v4416_v39 = vpop.f32.mrb[157].mxu0  ;;  %v15884_v32 = vld [vmem:[#allocation46_spill] sm:$0xff] }
 0x433   :  { %v4417_v47 = vpop.f32.mrb[158].mxu0 }
 0x434   :  { %v14095_v35 = vmax.f32 %v5131_v2, %v5139_v58  ;;  %v5140_v3 = vmax.f32 %v15876_v54, %v4417_v47  ;;  %v4419_v27 = vpop.f32.mrb[159].mxu0  ;;  %v15882_v58 = vld [vmem:[#allocation45_spill] sm:$0xff] }
 0x436   :  { %15875 = vst [vmem:[#allocation33_spill] sm:$0xff] %v14095_v35  ;;  %v14098_v41 = vmax.f32 %v5132_v51, %v5140_v3  ;;  %4629 = vmatmul.mubr.bf16.gmra.mrb[8].mxu0 %v15878_v33  ;;  %v15883_v3 = vld [vmem:[#allocation48_spill] sm:$0xff] }
 0x437   :  { %v14101_v28 = vpop.f32.mrb[48].mxu1  ;;  %9663 = vmatprep.mubr.msk.bf16.mxu0 %vm3162_vm2, %v15880_v50  ;;  %v15886_v50 = vld [vmem:[#allocation51_spill] sm:$0xff] }
 0x438   :  { %15877 = vst [vmem:[#allocation36_spill] sm:$0xff] %v14098_v41  ;;  %15879 = vst [vmem:[#allocation34_spill] sm:$0xff] %v14101_v28  ;;  %v4095_v42 = vpop.f32.mrb[49].mxu1 }
 0x439   :  { %v14107_v61 = vpop.f32.mrb[50].mxu1  ;;  %v4422_v2 = vpop.f32.mrb[160].mxu0 }
 0x43a   :  { %15881 = vst [vmem:[#allocation39_spill] sm:$0xff] %v14107_v61  ;;  %v5141_v39 = vmax.f32 %v15882_v58, %v4422_v2  ;;  %v4098_v47 = vpop.f32.mrb[51].mxu1  ;;  %v4424_v54 = vpop.f32.mrb[161].mxu0 }
 0x43b   :  { %v4425_v51 = vpop.f32.mrb[162].mxu0  ;;  %v15889_v54 = vld [vmem:[#allocation52_spill] sm:$0xff] }
 0x43c   :  { %v5142_v27 = vmax.f32 %v15883_v3, %v4425_v51  ;;  %v4427_v33 = vpop.f32.mrb[163].mxu0  ;;  %v15890_v3 = vld [vmem:[#allocation50_spill] sm:$0xff] }
 0x43d   :  { %v15892_v33 = vld [vmem:[#allocation55_spill] sm:$0xff] }
 0x43e   :  { %4637 = vmatmul.mubr.bf16.gmra.mrb[12].mxu0 %v15884_v32 }
 0x43f   :  { %v14112_v28 = vpop.f32.mrb[52].mxu1  ;;  %9664 = vmatprep.mubr.msk.bf16.mxu0 %vm3162_vm2, %v15886_v50 }
 0x440   :  { %15885 = vst [vmem:[#allocation37_spill] sm:$0xff] %v14112_v28  ;;  %v4103_v18 = vpop.f32.mrb[53].mxu1 }
 0x441   :  { %v14116_v42 = vpop.f32.mrb[54].mxu1  ;;  %v4430_v61 = vpop.f32.mrb[164].mxu0 }
 0x442   :  { %15887 = vst [vmem:[#allocation40_spill] sm:$0xff] %v14116_v42  ;;  %v5143_v35 = vmax.f32 %v15888_v30, %v4430_v61  ;;  %v4106_v2 = vpop.f32.mrb[55].mxu1  ;;  %v4432_v58 = vpop.f32.mrb[165].mxu0  ;;  %v15894_v30 = vld [vmem:[#allocation53_spill] sm:$0xff] }
 0x443   :  { %v4433_v47 = vpop.f32.mrb[166].mxu0 }
 0x444   :  { %v5144_v41 = vmax.f32 %v15889_v54, %v4433_v47  ;;  %v4435_v51 = vpop.f32.mrb[167].mxu0  ;;  %v15895_v47 = vld [vmem:[#allocation56_spill] sm:$0xff] }
 0x446   :  { %4645 = vmatmul.mubr.bf16.gmra.mrb[16].mxu0 %v15890_v3  ;;  %v15896_v3 = vld [vmem:[#allocation54_spill] sm:$0xff] }
 0x447   :  { %v14121_v32 = vpop.f32.mrb[56].mxu1  ;;  %9665 = vmatprep.mubr.msk.bf16.mxu0 %vm3162_vm2, %v15892_v33 }
 0x448   :  { %15891 = vst [vmem:[#allocation38_spill] sm:$0xff] %v14121_v32  ;;  %v4111_v50 = vpop.f32.mrb[57].mxu1 }
 0x449   :  { %v14125_v18 = vpop.f32.mrb[58].mxu1  ;;  %v14127_v42 = vpop.f32.mrb[168].mxu0 }
 0x44a   :  { %15893 = vst [vmem:[#allocation43_spill] sm:$0xff] %v14125_v18  ;;  %v5145_v61 = vmax.f32 %v15894_v30, %v14127_v42  ;;  %v4114_v2 = vpop.f32.mrb[59].mxu1  ;;  %v4440_v58 = vpop.f32.mrb[169].mxu0  ;;  %v15900_v42 = vld [vmem:[#allocation57_spill] sm:$0xff] }
 0x44b   :  { %v4441_v28 = vpop.f32.mrb[170].mxu0  ;;  %v15906_v30 = vld [vmem:[#allocation61_spill] sm:$0xff] }
 0x44c   :  { %v5146_v54 = vmax.f32 %v15895_v47, %v4441_v28  ;;  %v4443_v51 = vpop.f32.mrb[171].mxu0  ;;  %v15901_v28 = vld [vmem:[#allocation60_spill] sm:$0xff] }
 0x44e   :  { %4653 = vmatmul.mubr.bf16.gmra.mrb[20].mxu0 %v15896_v3  ;;  %v15902_v3 = vld [vmem:[#allocation58_spill] sm:$0xff] }
 0x44f   :  { %v14133_v32 = vpop.f32.mrb[60].mxu1  ;;  %9666 = vmatprep.mubr.msk.bf16.mxu0 %vm3162_vm2, %v15898_v23  ;;  %v15904_v23 = vld [vmem:[#allocation63_spill] sm:$0xff] }
 0x450   :  { %15897 = vst [vmem:[#allocation41_spill] sm:$0xff] %v14133_v32  ;;  %v4119_v33 = vpop.f32.mrb[61].mxu1 }
 0x451   :  { %v14137_v50 = vpop.f32.mrb[62].mxu1  ;;  %v14139_v18 = vpop.f32.mrb[172].mxu0 }
 0x452   :  { %15899 = vst [vmem:[#allocation44_spill] sm:$0xff] %v14137_v50  ;;  %v4122_v2 = vpop.f32.mrb[63].mxu1  ;;  %v4448_v58 = vpop.f32.mrb[173].mxu0 }
 0x453   :  { %v14143_v19 = vpop.f32.mrb[174].mxu0 }
 0x454   :  { %v4451_v51 = vpop.f32.mrb[175].mxu0 }
 0x456   :  { %4661 = vmatmul.mubr.bf16.gmra.mrb[24].mxu0 %v15902_v3  ;;  %v15908_v3 = vld [vmem:[#allocation62_spill] sm:$0xff] }
 0x457   :  { %v14148_v32 = vpop.f32.mrb[64].mxu1  ;;  %9667 = vmatprep.mubr.msk.bf16.mxu0 %vm3162_vm2, %v15904_v23 }
 0x458   :  { %15903 = vst [vmem:[#allocation42_spill] sm:$0xff] %v14148_v32  ;;  %v4127_v33 = vpop.f32.mrb[65].mxu1 }
 0x459   :  { %v14152_v50 = vpop.f32.mrb[66].mxu1  ;;  %v4454_v6 = vpop.f32.mrb[176].mxu0 }
 0x45a   :  { %15905 = vst [vmem:[#allocation47_spill] sm:$0xff] %v14152_v50  ;;  %v5149_v2 = vmax.f32 %v15906_v30, %v4454_v6  ;;  %v4130_v58 = vpop.f32.mrb[67].mxu1  ;;  %v4456_v49 = vpop.f32.mrb[177].mxu0  ;;  %v15913_v30 = vld [vmem:[#allocation65_spill] sm:$0xff] }
 0x45b   :  { %v4457_v31 = vpop.f32.mrb[178].mxu0 }
 0x45c   :  { %v5325_v60 = vmax.f32 %v5141_v39, %v5149_v2  ;;  %v5150_v47 = vmax.f32 %v15907_v59, %v4457_v31  ;;  %v4459_v51 = vpop.f32.mrb[179].mxu0 }
 0x45e   :  { %v5326_v26 = vmax.f32 %v5142_v27, %v5150_v47  ;;  %4669 = vmatmul.mubr.bf16.gmra.mrb[28].mxu0 %v15908_v3  ;;  %v15914_v47 = vld [vmem:[#allocation68_spill] sm:$0xff]  ;;  %v15915_v3 = vld [vmem:[#allocation66_spill] sm:$0xff] }
 0x45f   :  { %v14157_v32 = vpop.f32.mrb[68].mxu1  ;;  %9668 = vmatprep.mubr.msk.bf16.mxu0 %vm3162_vm2, %v15910_v29 }
 0x460   :  { %15909 = vst [vmem:[#allocation45_spill] sm:$0xff] %v14157_v32  ;;  %v4135_v23 = vpop.f32.mrb[69].mxu1  ;;  %v14161_v33 = vpack.c.bf16 %v5326_v26, %v5325_v60  ;;  %v15917_v60 = vld [vmem:[#allocation71_spill] sm:$0xff] }
 0x461   :  { %v14163_v6 = vpop.f32.mrb[70].mxu1  ;;  %v4462_v49 = vpop.f32.mrb[180].mxu0 }
 0x462   :  { %15911 = vst [vmem:[#allocation48_spill] sm:$0xff] %v14161_v33  ;;  %15912 = vst [vmem:[#allocation46_spill] sm:$0xff] %v14163_v6  ;;  %v5151_v39 = vmax.f32 %v15913_v30, %v4462_v49  ;;  %v4138_v2 = vpop.f32.mrb[71].mxu1  ;;  %v4464_v59 = vpop.f32.mrb[181].mxu0  ;;  %10368 = vmatprep.mubr.msk.bf16.mxu1 %vm5507_vm4, %v14161_v33  ;;  %v15964_v33 = vld [vmem:[#allocation99_spill] sm:$0xff] }
 0x463   :  { %v4465_v31 = vpop.f32.mrb[182].mxu0  ;;  %v15920_v59 = vld [vmem:[#allocation69_spill] sm:$0xff] }
 0x464   :  { %v5327_v27 = vmax.f32 %v5143_v35, %v5151_v39  ;;  %v5152_v58 = vmax.f32 %v15914_v47, %v4465_v31  ;;  %v4467_v51 = vpop.f32.mrb[183].mxu0  ;;  %v15921_v47 = vld [vmem:[#allocation72_spill] sm:$0xff] }
 0x466   :  { %v5328_v29 = vmax.f32 %v5144_v41, %v5152_v58  ;;  %4677 = vmatmul.mubr.bf16.gmra.mrb[32].mxu0 %v15915_v3 }
 0x467   :  { %v14170_v26 = vpop.f32.mrb[72].mxu1  ;;  %9669 = vmatprep.mubr.msk.bf16.mxu0 %vm3162_vm2, %v15917_v60  ;;  %v15922_v60 = vld [vmem:[#allocation70_spill] sm:$0xff] }
 0x468   :  { %15916 = vst [vmem:[#allocation51_spill] sm:$0xff] %v14170_v26  ;;  %v14174_v23 = vpack.c.bf16 %v5328_v29, %v5327_v27  ;;  %v4143_v49 = vpop.f32.mrb[73].mxu1  ;;  %v15924_v29 = vld [vmem:[#allocation75_spill] sm:$0xff] }
 0x469   :  { %v14176_v30 = vpop.f32.mrb[74].mxu1  ;;  %v4470_v2 = vpop.f32.mrb[184].mxu0 }
 0x46a   :  { %15918 = vst [vmem:[#allocation49_spill] sm:$0xff] %v14174_v23  ;;  %15919 = vst [vmem:[#allocation52_spill] sm:$0xff] %v14176_v30  ;;  %v5153_v6 = vmax.f32 %v15920_v59, %v4470_v2  ;;  %v4146_v35 = vpop.f32.mrb[75].mxu1  ;;  %v4472_v39 = vpop.f32.mrb[185].mxu0  ;;  %10369 = vmatmul.mubr.msk.bf16.vlgmr.msra.gmra.mrb[128].mxu1 %vm5507_vm4, %v14174_v23 }
 0x46b   :  { %v4473_v41 = vpop.f32.mrb[186].mxu0  ;;  %v15927_v39 = vld [vmem:[#allocation73_spill] sm:$0xff] }
 0x46c   :  { %v5329_v31 = vmax.f32 %v5145_v61, %v5153_v6  ;;  %v5154_v58 = vmax.f32 %v15921_v47, %v4473_v41  ;;  %v4475_v51 = vpop.f32.mrb[187].mxu0  ;;  %v15928_v41 = vmax.f32 %v15900_v42, %v14139_v18  ;;  %v15936_v42 = vld [vmem:[#allocation77_spill] sm:$0xff] }
 0x46e   :  { %v5330_v3 = vmax.f32 %v5146_v54, %v5154_v58  ;;  %4685 = vmatmul.mubr.bf16.gmra.mrb[36].mxu0 %v15922_v60  ;;  %v15929_v58 = vld [vmem:[#allocation76_spill] sm:$0xff] }
 0x46f   :  { %v14183_v27 = vpop.f32.mrb[76].mxu1  ;;  %9670 = vmatprep.mubr.msk.bf16.mxu0 %vm3162_vm2, %v15924_v29  ;;  %v15931_v29 = vld [vmem:[#allocation74_spill] sm:$0xff] }
 0x470   :  { %15923 = vst [vmem:[#allocation50_spill] sm:$0xff] %v14183_v27  ;;  %v4151_v49 = vpop.f32.mrb[77].mxu1  ;;  %v14187_v2 = vpack.c.bf16 %v5330_v3, %v5329_v31  ;;  %v15930_v31 = vmax.f32 %v15901_v28, %v14143_v19  ;;  %v15937_v28 = vld [vmem:[#allocation80_spill] sm:$0xff] }
 0x471   :  { %v14189_v59 = vpop.f32.mrb[78].mxu1  ;;  %v4478_v35 = vpop.f32.mrb[188].mxu0 }
 0x472   :  { %15925 = vst [vmem:[#allocation55_spill] sm:$0xff] %v14187_v2  ;;  %15926 = vst [vmem:[#allocation53_spill] sm:$0xff] %v14189_v59  ;;  %v5155_v30 = vmax.f32 %v15927_v39, %v4478_v35  ;;  %v4154_v61 = vpop.f32.mrb[79].mxu1  ;;  %v4480_v6 = vpop.f32.mrb[189].mxu0  ;;  %10372 = vmatprep.mubr.msk.bf16.mxu1 %vm5507_vm4, %v14187_v2  ;;  %v15933_v35 = vld [vmem:[#allocation79_spill] sm:$0xff]  ;;  %v15961_v2 = vld [vmem:[#allocation96_spill] sm:$0xff] }
 0x473   :  { %v4481_v54 = vpop.f32.mrb[190].mxu0 }
 0x474   :  { %v5331_v47 = vmax.f32 %v15928_v41, %v5155_v30  ;;  %v5156_v51 = vmax.f32 %v15929_v58, %v4481_v54  ;;  %v4483_v60 = vpop.f32.mrb[191].mxu0 }
 0x475   :  { %v15938_v60 = vld [vmem:[#allocation78_spill] sm:$0xff] }
 0x476   :  { %v5332_v3 = vmax.f32 %v15930_v31, %v5156_v51  ;;  %4693 = vmatmul.mubr.bf16.gmra.mrb[40].mxu0 %v15931_v29 }
 0x477   :  { %v14202_v49 = vpop.f32.mrb[80].mxu1  ;;  %9671 = vmatprep.mubr.msk.bf16.mxu0 %vm3162_vm2, %v15933_v35 }
 0x478   :  { %15932 = vst [vmem:[#allocation56_spill] sm:$0xff] %v14202_v49  ;;  %v14206_v39 = vpack.c.bf16 %v5332_v3, %v5331_v47  ;;  %v4159_v61 = vpop.f32.mrb[81].mxu1  ;;  %v15940_v47 = vld [vmem:[#allocation83_spill] sm:$0xff] }
 0x479   :  { %v14208_v6 = vpop.f32.mrb[82].mxu1  ;;  %v4486_v18 = vpop.f32.mrb[192].mxu0  ;;  %v15942_v61 = vld [vmem:[#allocation81_spill] sm:$0xff] }
 0x47a   :  { %15934 = vst [vmem:[#allocation54_spill] sm:$0xff] %v14206_v39  ;;  %15935 = vst [vmem:[#allocation59_spill] sm:$0xff] %v14208_v6  ;;  %v5157_v30 = vmax.f32 %v15936_v42, %v4486_v18  ;;  %v4162_v54 = vpop.f32.mrb[83].mxu1  ;;  %v4488_v41 = vpop.f32.mrb[193].mxu0  ;;  %10373 = vmatmul.mubr.msk.bf16.gmra.mrb[132].mxu1 %vm5507_vm4, %v14206_v39  ;;  %v15943_v6 = vld [vmem:[#allocation84_spill] sm:$0xff] }
 0x47b   :  { %v4489_v19 = vpop.f32.mrb[194].mxu0 }
 0x47c   :  { %v5158_v58 = vmax.f32 %v15937_v28, %v4489_v19  ;;  %v4491_v51 = vpop.f32.mrb[195].mxu0  ;;  %v15944_v28 = vld [vmem:[#allocation82_spill] sm:$0xff] }
 0x47e   :  { %4701 = vmatmul.mubr.bf16.gmra.mrb[44].mxu0 %v15938_v60  ;;  %v15946_v60 = vld [vmem:[#allocation87_spill] sm:$0xff] }
 0x47f   :  { %v14215_v31 = vpop.f32.mrb[84].mxu1  ;;  %9672 = vmatprep.mubr.msk.bf16.mxu0 %vm3162_vm2, %v15940_v47 }
 0x480   :  { %15939 = vst [vmem:[#allocation57_spill] sm:$0xff] %v14215_v31  ;;  %v4167_v3 = vpop.f32.mrb[85].mxu1  ;;  %v15948_v31 = vld [vmem:[#allocation85_spill] sm:$0xff] }
 0x481   :  { %v14219_v29 = vpop.f32.mrb[86].mxu1  ;;  %v4494_v35 = vpop.f32.mrb[196].mxu0 }
 0x482   :  { %15941 = vst [vmem:[#allocation60_spill] sm:$0xff] %v14219_v29  ;;  %v5159_v18 = vmax.f32 %v15942_v61, %v4494_v35  ;;  %v4170_v42 = vpop.f32.mrb[87].mxu1  ;;  %v4496_v54 = vpop.f32.mrb[197].mxu0 }
 0x483   :  { %v4497_v41 = vpop.f32.mrb[198].mxu0  ;;  %v15949_v54 = vld [vmem:[#allocation88_spill] sm:$0xff] }
 0x484   :  { %v5160_v49 = vmax.f32 %v15943_v6, %v4497_v41  ;;  %v4499_v19 = vpop.f32.mrb[199].mxu0  ;;  %v15950_v41 = vld [vmem:[#allocation86_spill] sm:$0xff] }
 0x486   :  { %4709 = vmatmul.mubr.bf16.gmra.mrb[48].mxu0 %v15944_v28  ;;  %v15952_v28 = vld [vmem:[#allocation91_spill] sm:$0xff] }
 0x487   :  { %v14224_v51 = vpop.f32.mrb[88].mxu1  ;;  %9673 = vmatprep.mubr.msk.bf16.mxu0 %vm3162_vm2, %v15946_v60 }
 0x488   :  { %15945 = vst [vmem:[#allocation58_spill] sm:$0xff] %v14224_v51  ;;  %v4175_v47 = vpop.f32.mrb[89].mxu1 }
 0x489   :  { %v14228_v3 = vpop.f32.mrb[90].mxu1  ;;  %v4502_v29 = vpop.f32.mrb[200].mxu0 }
 0x48a   :  { %15947 = vst [vmem:[#allocation63_spill] sm:$0xff] %v14228_v3  ;;  %v5161_v59 = vmax.f32 %v15948_v31, %v4502_v29  ;;  %v4178_v35 = vpop.f32.mrb[91].mxu1  ;;  %v4504_v61 = vpop.f32.mrb[201].mxu0  ;;  %v15954_v31 = vld [vmem:[#allocation89_spill] sm:$0xff] }
 0x48b   :  { %v4505_v42 = vpop.f32.mrb[202].mxu0  ;;  %v15960_v29 = vld [vmem:[#allocation93_spill] sm:$0xff] }
 0x48c   :  { %v5162_v27 = vmax.f32 %v15949_v54, %v4505_v42  ;;  %v4507_v6 = vpop.f32.mrb[203].mxu0  ;;  %v15955_v42 = vld [vmem:[#allocation92_spill] sm:$0xff] }
 0x48e   :  { %4717 = vmatmul.mubr.bf16.gmra.mrb[52].mxu0 %v15950_v41  ;;  %v15956_v41 = vld [vmem:[#allocation90_spill] sm:$0xff] }
 0x48f   :  { %v14233_v19 = vpop.f32.mrb[92].mxu1  ;;  %9674 = vmatprep.mubr.msk.bf16.mxu0 %vm3162_vm2, %v15952_v28  ;;  %v15958_v28 = vld [vmem:[#allocation95_spill] sm:$0xff] }
 0x490   :  { %15951 = vst [vmem:[#allocation61_spill] sm:$0xff] %v14233_v19  ;;  %v4183_v60 = vpop.f32.mrb[93].mxu1 }
 0x491   :  { %v14237_v47 = vpop.f32.mrb[94].mxu1  ;;  %v14239_v3 = vpop.f32.mrb[204].mxu0 }
 0x492   :  { %15953 = vst [vmem:[#allocation64_spill] sm:$0xff] %v14237_v47  ;;  %v4186_v35 = vpop.f32.mrb[95].mxu1  ;;  %v4512_v61 = vpop.f32.mrb[205].mxu0 }
 0x493   :  { %v14243_v51 = vpop.f32.mrb[206].mxu0 }
 0x494   :  { %v4515_v6 = vpop.f32.mrb[207].mxu0 }
 0x496   :  { %4725 = vmatmul.mubr.bf16.gmra.mrb[56].mxu0 %v15956_v41  ;;  %v15962_v41 = vld [vmem:[#allocation94_spill] sm:$0xff] }
 0x497   :  { %v14248_v19 = vpop.f32.mrb[96].mxu1  ;;  %9675 = vmatprep.mubr.msk.bf16.mxu0 %vm3162_vm2, %v15958_v28 }
 0x498   :  { %15957 = vst [vmem:[#allocation62_spill] sm:$0xff] %v14248_v19  ;;  %v4191_v60 = vpop.f32.mrb[97].mxu1 }
 0x499   :  { %v14252_v47 = vpop.f32.mrb[98].mxu1  ;;  %v4518_v26 = vpop.f32.mrb[208].mxu0 }
 0x49a   :  { %15959 = vst [vmem:[#allocation67_spill] sm:$0xff] %v14252_v47  ;;  %v5165_v35 = vmax.f32 %v15960_v29, %v4518_v26  ;;  %v4194_v61 = vpop.f32.mrb[99].mxu1  ;;  %v4520_v32 = vpop.f32.mrb[209].mxu0 }
 0x49b   :  { %v4521_v50 = vpop.f32.mrb[210].mxu0  ;;  %v15966_v32 = vld [vmem:[#allocation97_spill] sm:$0xff] }
 0x49c   :  { %v5333_v39 = vmax.f32 %v5157_v30, %v5165_v35  ;;  %v5166_v54 = vmax.f32 %v15961_v2, %v4521_v50  ;;  %v4523_v6 = vpop.f32.mrb[211].mxu0 }
 0x49e   :  { %v5334_v23 = vmax.f32 %v5158_v58, %v5166_v54  ;;  %4733 = vmatmul.mubr.bf16.gmra.mrb[60].mxu0 %v15962_v41  ;;  %v15967_v58 = vld [vmem:[#allocation100_spill] sm:$0xff] }
 0x49f   :  { %v14257_v19 = vpop.f32.mrb[100].mxu1  ;;  %9676 = vmatprep.mubr.msk.bf16.mxu0 %vm3162_vm2, %v15964_v33  ;;  %v15968_v33 = vld [vmem:[#allocation98_spill] sm:$0xff] }
 0x4a0   :  { %15963 = vst [vmem:[#allocation65_spill] sm:$0xff] %v14257_v19  ;;  %v4199_v28 = vpop.f32.mrb[101].mxu1  ;;  %v14261_v60 = vpack.c.bf16 %v5334_v23, %v5333_v39  ;;  %v15970_v39 = vld [vmem:[#allocation103_spill] sm:$0xff] }
 0x4a1   :  { %v14263_v47 = vpop.f32.mrb[102].mxu1  ;;  %v4526_v26 = vpop.f32.mrb[212].mxu0 }
 0x4a2   :  { %15965 = vst [vmem:[#allocation68_spill] sm:$0xff] %v14263_v47  ;;  %v5167_v29 = vmax.f32 %v15966_v32, %v4526_v26  ;;  %v4202_v30 = vpop.f32.mrb[103].mxu1  ;;  %v4528_v35 = vpop.f32.mrb[213].mxu0  ;;  %10376 = vmatprep.mubr.msk.bf16.mxu1 %vm5507_vm4, %v14261_v60 }
 0x4a3   :  { %v4529_v50 = vpop.f32.mrb[214].mxu0  ;;  %v15972_v30 = vld [vmem:[#allocation101_spill] sm:$0xff] }
 0x4a4   :  { %v5335_v2 = vmax.f32 %v5159_v18, %v5167_v29  ;;  %v5168_v54 = vmax.f32 %v15967_v58, %v4529_v50  ;;  %v4531_v61 = vpop.f32.mrb[215].mxu0  ;;  %v15973_v58 = vld [vmem:[#allocation104_spill] sm:$0xff] }
 0x4a6   :  { %v5336_v6 = vmax.f32 %v5160_v49, %v5168_v54  ;;  %4741 = vmatmul.mubr.bf16.gmra.mrb[64].mxu0 %v15968_v33 }
 0x4a7   :  { %v14270_v23 = vpop.f32.mrb[104].mxu1  ;;  %9677 = vmatprep.mubr.msk.bf16.mxu0 %vm3162_vm2, %v15970_v39  ;;  %v15974_v39 = vld [vmem:[#allocation102_spill] sm:$0xff] }
 0x4a8   :  { %15969 = vst [vmem:[#allocation66_spill] sm:$0xff] %v14270_v23  ;;  %v14274_v41 = vpack.c.bf16 %v5336_v6, %v5335_v2  ;;  %v4207_v28 = vpop.f32.mrb[105].mxu1  ;;  %v15976_v6 = vld [vmem:[#allocation107_spill] sm:$0xff] }
 0x4a9   :  { %v14276_v26 = vpop.f32.mrb[106].mxu1  ;;  %v4534_v32 = vpop.f32.mrb[216].mxu0 }
 0x4aa   :  { %15971 = vst [vmem:[#allocation71_spill] sm:$0xff] %v14276_v26  ;;  %v5169_v35 = vmax.f32 %v15972_v30, %v4534_v32  ;;  %v4210_v18 = vpop.f32.mrb[107].mxu1  ;;  %v4536_v29 = vpop.f32.mrb[217].mxu0  ;;  %10377 = vmatmul.mubr.msk.bf16.gmra.mrb[136].mxu1 %vm5507_vm4, %v14274_v41 }
 0x4ab   :  { %v4537_v49 = vpop.f32.mrb[218].mxu0  ;;  %v15979_v29 = vld [vmem:[#allocation105_spill] sm:$0xff] }
 0x4ac   :  { %v5337_v50 = vmax.f32 %v5161_v59, %v5169_v35  ;;  %v5170_v54 = vmax.f32 %v15973_v58, %v4537_v49  ;;  %v4539_v61 = vpop.f32.mrb[219].mxu0  ;;  %v15980_v49 = vmax.f32 %v15954_v31, %v14239_v3  ;;  %v15988_v31 = vld [vmem:[#allocation109_spill] sm:$0xff] }
 0x4ae   :  { %v5338_v33 = vmax.f32 %v5162_v27, %v5170_v54  ;;  %4749 = vmatmul.mubr.bf16.gmra.mrb[68].mxu0 %v15974_v39  ;;  %v15981_v54 = vld [vmem:[#allocation108_spill] sm:$0xff] }
 0x4af   :  { %v14283_v2 = vpop.f32.mrb[108].mxu1  ;;  %9678 = vmatprep.mubr.msk.bf16.mxu0 %vm3162_vm2, %v15976_v6  ;;  %v15983_v6 = vld [vmem:[#allocation106_spill] sm:$0xff] }
 0x4b0   :  { %15975 = vst [vmem:[#allocation69_spill] sm:$0xff] %v14283_v2  ;;  %v4215_v28 = vpop.f32.mrb[109].mxu1  ;;  %v14287_v32 = vpack.c.bf16 %v5338_v33, %v5337_v50  ;;  %v15982_v50 = vmax.f32 %v15955_v42, %v14243_v51  ;;  %v15989_v42 = vld [vmem:[#allocation112_spill] sm:$0xff] }
 0x4b1   :  { %v14289_v30 = vpop.f32.mrb[110].mxu1  ;;  %v4542_v18 = vpop.f32.mrb[220].mxu0 }
 0x4b2   :  { %15977 = vst [vmem:[#allocation72_spill] sm:$0xff] %v14287_v32  ;;  %15978 = vst [vmem:[#allocation70_spill] sm:$0xff] %v14289_v30  ;;  %v5171_v26 = vmax.f32 %v15979_v29, %v4542_v18  ;;  %v4218_v59 = vpop.f32.mrb[111].mxu1  ;;  %v4544_v35 = vpop.f32.mrb[221].mxu0  ;;  %10380 = vmatprep.mubr.msk.bf16.mxu1 %vm5507_vm4, %v14287_v32  ;;  %v15985_v18 = vld [vmem:[#allocation111_spill] sm:$0xff] }
 0x4b3   :  { %v4545_v27 = vpop.f32.mrb[222].mxu0 }
 0x4b4   :  { %v5339_v58 = vmax.f32 %v15980_v49, %v5171_v26  ;;  %v5172_v61 = vmax.f32 %v15981_v54, %v4545_v27  ;;  %v4547_v39 = vpop.f32.mrb[223].mxu0 }
 0x4b5   :  { %v15990_v39 = vld [vmem:[#allocation110_spill] sm:$0xff] }
 0x4b6   :  { %v5340_v33 = vmax.f32 %v15982_v50, %v5172_v61  ;;  %4757 = vmatmul.mubr.bf16.gmra.mrb[72].mxu0 %v15983_v6 }
 0x4b7   :  { %v14302_v28 = vpop.f32.mrb[112].mxu1  ;;  %9679 = vmatprep.mubr.msk.bf16.mxu0 %vm3162_vm2, %v15985_v18 }
 0x4b8   :  { %15984 = vst [vmem:[#allocation75_spill] sm:$0xff] %v14302_v28  ;;  %v14306_v29 = vpack.c.bf16 %v5340_v33, %v5339_v58  ;;  %v4223_v59 = vpop.f32.mrb[113].mxu1  ;;  %v15992_v58 = vld [vmem:[#allocation115_spill] sm:$0xff] }
 0x4b9   :  { %v14308_v35 = vpop.f32.mrb[114].mxu1  ;;  %v4550_v3 = vpop.f32.mrb[224].mxu0  ;;  %v15994_v59 = vld [vmem:[#allocation113_spill] sm:$0xff] }
 0x4ba   :  { %15986 = vst [vmem:[#allocation73_spill] sm:$0xff] %v14306_v29  ;;  %15987 = vst [vmem:[#allocation76_spill] sm:$0xff] %v14308_v35  ;;  %v5173_v26 = vmax.f32 %v15988_v31, %v4550_v3  ;;  %v4226_v27 = vpop.f32.mrb[115].mxu1  ;;  %v4552_v49 = vpop.f32.mrb[225].mxu0  ;;  %10381 = vmatmul.mubr.msk.bf16.gmra.mrb[140].mxu1 %vm5507_vm4, %v14306_v29  ;;  %v15995_v35 = vld [vmem:[#allocation116_spill] sm:$0xff] }
 0x4bb   :  { %v4553_v51 = vpop.f32.mrb[226].mxu0  ;;  %v16011_v29 = vld [vmem:[#allocation128_spill] sm:$0xff] }
 0x4bc   :  { %v5174_v54 = vmax.f32 %v15989_v42, %v4553_v51  ;;  %v4555_v61 = vpop.f32.mrb[227].mxu0  ;;  %v15996_v42 = vld [vmem:[#allocation114_spill] sm:$0xff] }
 0x4be   :  { %4765 = vmatmul.mubr.bf16.gmra.mrb[76].mxu0 %v15990_v39  ;;  %v15998_v39 = vld [vmem:[#allocation119_spill] sm:$0xff] }
 0x4bf   :  { %v14315_v50 = vpop.f32.mrb[116].mxu1  ;;  %9680 = vmatprep.mubr.msk.bf16.mxu0 %vm3162_vm2, %v15992_v58 }
 0x4c0   :  { %15991 = vst [vmem:[#allocation74_spill] sm:$0xff] %v14315_v50  ;;  %v4231_v33 = vpop.f32.mrb[117].mxu1  ;;  %v16000_v50 = vld [vmem:[#allocation117_spill] sm:$0xff] }
 0x4c1   :  { %v14319_v6 = vpop.f32.mrb[118].mxu1  ;;  %v4558_v18 = vpop.f32.mrb[228].mxu0 }
 0x4c2   :  { %15993 = vst [vmem:[#allocation79_spill] sm:$0xff] %v14319_v6  ;;  %v5175_v3 = vmax.f32 %v15994_v59, %v4558_v18  ;;  %v4234_v31 = vpop.f32.mrb[119].mxu1  ;;  %v4560_v27 = vpop.f32.mrb[229].mxu0 }
 0x4c3   :  { %v4561_v49 = vpop.f32.mrb[230].mxu0  ;;  %v16001_v27 = vld [vmem:[#allocation120_spill] sm:$0xff] }
 0x4c4   :  { %v5176_v28 = vmax.f32 %v15995_v35, %v4561_v49  ;;  %v4563_v51 = vpop.f32.mrb[231].mxu0  ;;  %v16002_v49 = vld [vmem:[#allocation118_spill] sm:$0xff] }
 0x4c6   :  { %4773 = vmatmul.mubr.bf16.gmra.mrb[80].mxu0 %v15996_v42  ;;  %v16004_v42 = vld [vmem:[#allocation123_spill] sm:$0xff] }
 0x4c7   :  { %v14324_v61 = vpop.f32.mrb[120].mxu1  ;;  %9681 = vmatprep.mubr.msk.bf16.mxu0 %vm3162_vm2, %v15998_v39 }
 0x4c8   :  { %15997 = vst [vmem:[#allocation77_spill] sm:$0xff] %v14324_v61  ;;  %v4239_v58 = vpop.f32.mrb[121].mxu1  ;;  %v16006_v61 = vld [vmem:[#allocation121_spill] sm:$0xff] }
 0x4c9   :  { %v14328_v33 = vpop.f32.mrb[122].mxu1  ;;  %v4566_v6 = vpop.f32.mrb[232].mxu0 }
 0x4ca   :  { %15999 = vst [vmem:[#allocation80_spill] sm:$0xff] %v14328_v33  ;;  %v5177_v30 = vmax.f32 %v16000_v50, %v4566_v6  ;;  %v4242_v18 = vpop.f32.mrb[123].mxu1  ;;  %v4568_v59 = vpop.f32.mrb[233].mxu0 }
 0x4cb   :  { %v4569_v31 = vpop.f32.mrb[234].mxu0  ;;  %v16007_v59 = vld [vmem:[#allocation124_spill] sm:$0xff] }
 0x4cc   :  { %v5178_v2 = vmax.f32 %v16001_v27, %v4569_v31  ;;  %v4571_v35 = vpop.f32.mrb[235].mxu0  ;;  %v16008_v27 = vld [vmem:[#allocation122_spill] sm:$0xff] }
 0x4cd   :  { %v16009_v35 = vld [vmem:[#allocation127_spill] sm:$0xff] }
 0x4ce   :  { %4781 = vmatmul.mubr.bf16.gmra.mrb[84].mxu0 %v16002_v49 }
 0x4cf   :  { %v14333_v51 = vpop.f32.mrb[124].mxu1  ;;  %9682 = vmatprep.mubr.msk.bf16.mxu0 %vm3162_vm2, %v16004_v42 }
 0x4d0   :  { %16003 = vst [vmem:[#allocation78_spill] sm:$0xff] %v14333_v51  ;;  %v4247_v39 = vpop.f32.mrb[125].mxu1  ;;  %v16010_v51 = vld [vmem:[#allocation125_spill] sm:$0xff] }
 0x4d1   :  { %v14337_v58 = vpop.f32.mrb[126].mxu1  ;;  %v4574_v33 = vpop.f32.mrb[236].mxu0 }
 0x4d2   :  { %16005 = vst [vmem:[#allocation83_spill] sm:$0xff] %v14337_v58  ;;  %v5179_v23 = vmax.f32 %v16006_v61, %v4574_v33  ;;  %v4250_v50 = vpop.f32.mrb[127].mxu1  ;;  %v4576_v6 = vpop.f32.mrb[237].mxu0 }
 0x4d3   :  { %v4577_v18 = vpop.f32.mrb[238].mxu0  ;;  %v16012_v50 = vld [vmem:[#allocation126_spill] sm:$0xff]  ;;  %v16013_v6 = vld [vmem:[#allocation131_spill] sm:$0xff] }
 0x4d4   :  { %v5180_v47 = vmax.f32 %v16007_v59, %v4577_v18  ;;  %v4579_v31 = vpop.f32.mrb[239].mxu0 }
 0x4d5   :  { %v16014_v31 = vld [vmem:[#allocation129_spill] sm:$0xff] }
 0x4d6   :  { %4789 = vmatmul.mubr.bf16.gmra.mrb[88].mxu0 %v16008_v27 }
 0x4d7   :  { %9683 = vmatprep.mubr.msk.bf16.mxu0 %vm3162_vm2, %v16009_v35 }
 0x4d9   :  { %v4582_v49 = vpop.f32.mrb[240].mxu0 }
 0x4da   :  { %v5181_v42 = vmax.f32 %v16010_v51, %v4582_v49  ;;  %v4584_v39 = vpop.f32.mrb[241].mxu0  ;;  %v16015_v49 = vld [vmem:[#allocation132_spill] sm:$0xff] }
 0x4db   :  { %v4585_v19 = vpop.f32.mrb[242].mxu0 }
 0x4dc   :  { %v5341_v58 = vmax.f32 %v5173_v26, %v5181_v42  ;;  %v5182_v32 = vmax.f32 %v16011_v29, %v4585_v19  ;;  %v4587_v61 = vpop.f32.mrb[243].mxu0  ;;  %v16017_v42 = vld [vmem:[#allocation135_spill] sm:$0xff] }
 0x4dd   :  { %v16019_v61 = vld [vmem:[#allocation133_spill] sm:$0xff] }
 0x4de   :  { %v5342_v33 = vmax.f32 %v5174_v54, %v5182_v32  ;;  %4797 = vmatmul.mubr.bf16.gmra.mrb[92].mxu0 %v16012_v50  ;;  %v16016_v54 = vld [vmem:[#allocation130_spill] sm:$0xff] }
 0x4df   :  { %9684 = vmatprep.mubr.msk.bf16.mxu0 %vm3162_vm2, %v16013_v6 }
 0x4e0   :  { %v14349_v18 = vpack.c.bf16 %v5342_v33, %v5341_v58 }
 0x4e1   :  { %v4590_v59 = vpop.f32.mrb[244].mxu0 }
 0x4e2   :  { %v5183_v27 = vmax.f32 %v16014_v31, %v4590_v59  ;;  %v4592_v35 = vpop.f32.mrb[245].mxu0  ;;  %10384 = vmatprep.mubr.msk.bf16.mxu1 %vm5507_vm4, %v14349_v18  ;;  %v16020_v59 = vld [vmem:[#allocation136_spill] sm:$0xff] }
 0x4e3   :  { %v4593_v51 = vpop.f32.mrb[246].mxu0  ;;  %v16021_v35 = vld [vmem:[#allocation134_spill] sm:$0xff] }
 0x4e4   :  { %v5343_v26 = vmax.f32 %v5175_v3, %v5183_v27  ;;  %v5184_v19 = vmax.f32 %v16015_v49, %v4593_v51  ;;  %v4595_v29 = vpop.f32.mrb[247].mxu0  ;;  %v16022_v51 = vld [vmem:[#allocation139_spill] sm:$0xff] }
 0x4e6   :  { %v5344_v32 = vmax.f32 %v5176_v28, %v5184_v19  ;;  %4805 = vmatmul.mubr.bf16.gmra.mrb[96].mxu0 %v16016_v54  ;;  %v16024_v19 = vld [vmem:[#allocation137_spill] sm:$0xff] }
 0x4e7   :  { %9685 = vmatprep.mubr.msk.bf16.mxu0 %vm3162_vm2, %v16017_v42  ;;  %v16025_v42 = vld [vmem:[#allocation140_spill] sm:$0xff] }
 0x4e8   :  { %v14358_v58 = vpack.c.bf16 %v5344_v32, %v5343_v26 }
 0x4e9   :  { %v4598_v39 = vpop.f32.mrb[248].mxu0 }
 0x4ea   :  { %16018 = vst [vmem:[#allocation81_spill] sm:$0xff] %v14358_v58  ;;  %v5185_v33 = vmax.f32 %v16019_v61, %v4598_v39  ;;  %v4600_v50 = vpop.f32.mrb[249].mxu0  ;;  %10385 = vmatmul.mubr.msk.bf16.gmra.mrb[144].mxu1 %vm5507_vm4, %v14358_v58 }
 0x4eb   :  { %v4601_v6 = vpop.f32.mrb[250].mxu0  ;;  %v16027_v50 = vld [vmem:[#allocation143_spill] sm:$0xff] }
 0x4ec   :  { %v5345_v3 = vmax.f32 %v5177_v30, %v5185_v33  ;;  %v5186_v31 = vmax.f32 %v16020_v59, %v4601_v6  ;;  %v4603_v27 = vpop.f32.mrb[251].mxu0  ;;  %v16026_v33 = vld [vmem:[#allocation138_spill] sm:$0xff]  ;;  %v16029_v59 = vld [vmem:[#allocation141_spill] sm:$0xff] }
 0x4ee   :  { %v5346_v28 = vmax.f32 %v5178_v2, %v5186_v31  ;;  %4813 = vmatmul.mubr.bf16.gmra.mrb[100].mxu0 %v16021_v35 }
 0x4ef   :  { %9686 = vmatprep.mubr.msk.bf16.mxu0 %vm3162_vm2, %v16022_v51 }
 0x4f0   :  { %v14367_v26 = vpack.c.bf16 %v5346_v28, %v5345_v3 }
 0x4f1   :  { %v4606_v49 = vpop.f32.mrb[252].mxu0 }
 0x4f2   :  { %16023 = vst [vmem:[#allocation84_spill] sm:$0xff] %v14367_v26  ;;  %v5187_v29 = vmax.f32 %v16024_v19, %v4606_v49  ;;  %v4608_v32 = vpop.f32.mrb[253].mxu0  ;;  %10388 = vmatprep.mubr.msk.bf16.mxu1 %vm5507_vm4, %v14367_v26  ;;  %v16031_v49 = vld [vmem:[#allocation142_spill] sm:$0xff] }
 0x4f3   :  { %v4609_v54 = vpop.f32.mrb[254].mxu0 }
 0x4f4   :  { %v5347_v30 = vmax.f32 %v5179_v23, %v5187_v29  ;;  %v5188_v39 = vmax.f32 %v16025_v42, %v4609_v54  ;;  %v4611_v61 = vpop.f32.mrb[255].mxu0  ;;  %v16030_v23 = vld [vmem:[#allocation144_spill] sm:$0xff]  ;;  %v16033_v29 = vld [vmem:[#allocation145_spill] sm:$0xff]  ;;  %v16034_v42 = vld [vmem:[#allocation147_spill] sm:$0xff] }
 0x4f6   :  { %v5348_v2 = vmax.f32 %v5180_v47, %v5188_v39  ;;  %4821 = vmatmul.mubr.bf16.gmra.mrb[104].mxu0 %v16026_v33  ;;  %v16032_v47 = vld [vmem:[#allocation146_spill] sm:$0xff] }
 0x4f7   :  { %9687 = vmatprep.mubr.msk.bf16.mxu0 %vm3162_vm2, %v16027_v50  ;;  %v16036_v50 = vld [vmem:[#allocation148_spill] sm:$0xff] }
 0x4f8   :  { %v14376_v6 = vpack.c.bf16 %v5348_v2, %v5347_v30  ;;  %v16035_v2 = vld [vmem:[#allocation150_spill] sm:$0xff] }
 0x4f9   :  { %v4614_v3 = vpop.f32.mrb[0].mxu0 }
 0x4fa   :  { %16028 = vst [vmem:[#allocation82_spill] sm:$0xff] %v14376_v6  ;;  %v5189_v31 = vmax.f32 %v16029_v59, %v4614_v3  ;;  %v4616_v27 = vpop.f32.mrb[1].mxu0  ;;  %10389 = vmatmul.mubr.msk.bf16.gmra.mrb[148].mxu1 %vm5507_vm4, %v14376_v6  ;;  %v16042_v6 = vld [vmem:[#allocation153_spill] sm:$0xff] }
 0x4fb   :  { %v4617_v28 = vpop.f32.mrb[2].mxu0 }
 0x4fc   :  { %v5190_v35 = vmax.f32 %v16030_v23, %v4617_v28  ;;  %v4619_v51 = vpop.f32.mrb[3].mxu0  ;;  %v16037_v28 = vld [vmem:[#allocation151_spill] sm:$0xff] }
 0x4fe   :  { %4829 = vmatmul.mubr.bf16.gmra.mrb[108].mxu0 %v16031_v49  ;;  %v16038_v49 = vld [vmem:[#allocation149_spill] sm:$0xff] }
 0x4ff   :  { %9688 = vmatprep.mubr.msk.bf16.mxu0 %vm3162_vm2, %v16032_v47  ;;  %v16039_v47 = vld [vmem:[#allocation154_spill] sm:$0xff] }
 0x501   :  { %v4622_v19 = vpop.f32.mrb[4].mxu0 }
 0x502   :  { %v5191_v32 = vmax.f32 %v16033_v29, %v4622_v19  ;;  %v4624_v54 = vpop.f32.mrb[5].mxu0  ;;  %v16040_v29 = vld [vmem:[#allocation152_spill] sm:$0xff] }
 0x503   :  { %v4625_v30 = vpop.f32.mrb[6].mxu0 }
 0x504   :  { %v5192_v39 = vmax.f32 %v16034_v42, %v4625_v30  ;;  %v4627_v61 = vpop.f32.mrb[7].mxu0  ;;  %v16041_v42 = vld [vmem:[#allocation155_spill] sm:$0xff] }
 0x506   :  { %4837 = vmatmul.mubr.bf16.gmra.mrb[112].mxu0 %v13327_v20 }
 0x507   :  { %9689 = vmatprep.mubr.msk.bf16.mxu0 %vm3162_vm2, %v16035_v2 }
 0x509   :  { %v4630_v33 = vpop.f32.mrb[8].mxu0 }
 0x50a   :  { %v5193_v3 = vmax.f32 %v16036_v50, %v4630_v33  ;;  %v4632_v59 = vpop.f32.mrb[9].mxu0  ;;  %v16043_v33 = vld [vmem:[#allocation158_spill] sm:$0xff] }
 0x50b   :  { %v4633_v27 = vpop.f32.mrb[10].mxu0  ;;  %v16044_v59 = vld [vmem:[#allocation156_spill] sm:$0xff] }
 0x50c   :  { %v5194_v23 = vmax.f32 %v16037_v28, %v4633_v27  ;;  %v4635_v51 = vpop.f32.mrb[11].mxu0 }
 0x50e   :  { %4845 = vmatmul.mubr.bf16.gmra.mrb[116].mxu0 %v16038_v49 }
 0x50f   :  { %9690 = vmatprep.mubr.msk.bf16.mxu0 %vm3162_vm2, %v16039_v47  ;;  %v16045_v47 = vld [vmem:[#allocation159_spill] sm:$0xff] }
 0x511   :  { %v4638_v19 = vpop.f32.mrb[12].mxu0 }
 0x512   :  { %v5195_v54 = vmax.f32 %v16040_v29, %v4638_v19  ;;  %v4640_v20 = vpop.f32.mrb[13].mxu0  ;;  %v16046_v29 = vld [vmem:[#allocation157_spill] sm:$0xff] }
 0x513   :  { %v4641_v30 = vpop.f32.mrb[14].mxu0  ;;  %v16047_v20 = vld [vmem:[#allocation162_spill] sm:$0xff] }
 0x514   :  { %v5196_v61 = vmax.f32 %v16041_v42, %v4641_v30  ;;  %v4643_v2 = vpop.f32.mrb[15].mxu0  ;;  %v11624_v42 = vld [vmem:[%s15397_s8] sm:$0xff]  }
 0x515   :  { %v16048_v2 = vld [vmem:[#allocation160_spill] sm:$0xff]  ;;  %10808 = vmatprep.subr.bf16.mxu0 %v11624_v42 }
 0x516   :  { %4853 = vmatmul.mubr.bf16.gmra.mrb[120].mxu0 %v16042_v6 }
 0x517   :  { %9691 = vmatprep.mubr.msk.bf16.mxu0 %vm3162_vm2, %v16043_v33  ;;  %10809 = vmatpush3.bf16.msra.mxu0 %v11624_v42 }
 0x519   :  { %v4646_v50 = vpop.f32.mrb[16].mxu0 }
 0x51a   :  { %v5197_v27 = vmax.f32 %v16044_v59, %v4646_v50  ;;  %v4648_v28 = vpop.f32.mrb[17].mxu0 }
 0x51b   :  { %v4649_v51 = vpop.f32.mrb[18].mxu0  ;;  %v16050_v28 = vld [vmem:[#allocation161_spill] sm:$0xff] }
 0x51c   :  { %v5349_v49 = vmax.f32 %v5189_v31, %v5197_v27  ;;  %v5198_v26 = vmax.f32 %v16045_v47, %v4649_v51  ;;  %v4651_v58 = vpop.f32.mrb[19].mxu0  ;;  %v16049_v31 = vld [vmem:[#allocation163_spill] sm:$0xff]  ;;  %v16051_v51 = vld [vmem:[#allocation166_spill] sm:$0xff] }
 0x51e   :  { %v5350_v19 = vmax.f32 %v5190_v35, %v5198_v26  ;;  %4861 = vmatmul.mubr.bf16.gmra.mrb[124].mxu0 %v16046_v29 }
 0x51f   :  { %9692 = vmatprep.mubr.msk.bf16.mxu0 %vm3162_vm2, %v16047_v20 }
 0x520   :  { %v14405_v30 = vpack.c.bf16 %v5350_v19, %v5349_v49  ;;  %v16052_v19 = vld [vmem:[#allocation164_spill] sm:$0xff] }
 0x521   :  { %v4654_v6 = vpop.f32.mrb[20].mxu0 }
 0x522   :  { %v5199_v33 = vmax.f32 %v16048_v2, %v4654_v6  ;;  %v4656_v50 = vpop.f32.mrb[21].mxu0  ;;  %10392 = vmatprep.mubr.msk.bf16.mxu1 %vm5507_vm4, %v14405_v30  ;;  %v16053_v2 = vld [vmem:[#allocation167_spill] sm:$0xff] }
 0x523   :  { %v4657_v58 = vpop.f32.mrb[22].mxu0  ;;  %v16054_v50 = vld [vmem:[#allocation165_spill] sm:$0xff] }
 0x524   :  { %v5351_v26 = vmax.f32 %v5191_v32, %v5199_v33  ;;  %v5200_v35 = vmax.f32 %v16049_v31, %v4657_v58  ;;  %v4659_v59 = vpop.f32.mrb[23].mxu0  ;;  %v16055_v58 = vld [vmem:[#allocation170_spill] sm:$0xff] }
 0x526   :  { %v5352_v27 = vmax.f32 %v5192_v39, %v5200_v35  ;;  %4869 = vmatmul.mubr.bf16.gmra.mrb[128].mxu0 %v16050_v28  ;;  %v16056_v35 = vld [vmem:[#allocation168_spill] sm:$0xff] }
 0x527   :  { %9693 = vmatprep.mubr.msk.bf16.mxu0 %vm3162_vm2, %v16051_v51  ;;  %v16057_v51 = vld [vmem:[#allocation171_spill] sm:$0xff] }
 0x528   :  { %v14417_v49 = vpack.c.bf16 %v5352_v27, %v5351_v26 }
 0x529   :  { %v4662_v47 = vpop.f32.mrb[24].mxu0 }
 0x52a   :  { %v5201_v29 = vmax.f32 %v16052_v19, %v4662_v47  ;;  %v4664_v20 = vpop.f32.mrb[25].mxu0  ;;  %10393 = vmatmul.mubr.msk.bf16.gmra.mrb[152].mxu1 %vm5507_vm4, %v14417_v49 }
 0x52b   :  { %v4665_v32 = vpop.f32.mrb[26].mxu0 }
 0x52c   :  { %v5353_v6 = vmax.f32 %v5193_v3, %v5201_v29  ;;  %v5202_v33 = vmax.f32 %v16053_v2, %v4665_v32  ;;  %v4667_v42 = vpop.f32.mrb[27].mxu0  ;;  %v16058_v29 = vld [vmem:[#allocation169_spill] sm:$0xff] }
 0x52e   :  { %v5354_v39 = vmax.f32 %v5194_v23, %v5202_v33  ;;  %4877 = vmatmul.mubr.bf16.gmra.mrb[132].mxu0 %v16054_v50 }
 0x52f   :  { %9694 = vmatprep.mubr.msk.bf16.mxu0 %vm3162_vm2, %v16055_v58 }
 0x530   :  { %v14426_v26 = vpack.c.bf16 %v5354_v39, %v5353_v6  ;;  %v16059_v6 = vld [vmem:[#allocation172_spill] sm:$0xff] }
 0x531   :  { %v4670_v31 = vpop.f32.mrb[28].mxu0 }
 0x532   :  { %v5203_v59 = vmax.f32 %v16056_v35, %v4670_v31  ;;  %v4672_v27 = vpop.f32.mrb[29].mxu0  ;;  %10396 = vmatprep.mubr.msk.bf16.mxu1 %vm5507_vm4, %v14426_v26  ;;  %v11625_v31 = vld [vmem:[%s15396_s5] sm:$0xff]  }
 0x533   :  { %v4673_v28 = vpop.f32.mrb[30].mxu0  ;;  %10432 = vmatprep.subr.bf16.mxu1 %v11625_v31 }
 0x534   :  { %v5355_v3 = vmax.f32 %v5195_v54, %v5203_v59  ;;  %v5204_v47 = vmax.f32 %v16057_v51, %v4673_v28  ;;  %v4675_v19 = vpop.f32.mrb[31].mxu0  ;;  %v16060_v54 = vld [vmem:[#allocation173_spill] sm:$0xff]  ;;  %v16061_v59 = vld [vmem:[#allocation175_spill] sm:$0xff]  ;;  %10433 = vmatpush3.bf16.msra.mxu1 %v11625_v31 }
 0x536   :  { %v5356_v23 = vmax.f32 %v5196_v61, %v5204_v47  ;;  %4885 = vmatmul.mubr.bf16.gmra.mrb[136].mxu0 %v16058_v29  ;;  %v16063_v47 = vld [vmem:[#allocation177_spill] sm:$0xff]  ;;  %v16064_v29 = vld [vmem:[#allocation176_spill] sm:$0xff] }
 0x537   :  { %9695 = vmatprep.mubr.msk.bf16.mxu0 %vm3162_vm2, %v13486_v9 }
 0x538   :  { %v14435_v20 = vpack.c.bf16 %v5356_v23, %v5355_v3  ;;  %v16062_v3 = vld [vmem:[#allocation174_spill] sm:$0xff] }
 0x539   :  { %v4678_v32 = vpop.f32.mrb[32].mxu0 }
 0x53a   :  { %v5205_v2 = vmax.f32 %v16059_v6, %v4678_v32  ;;  %v4680_v33 = vpop.f32.mrb[33].mxu0  ;;  %10397 = vmatmul.mubr.msk.bf16.gmra.mrb[156].mxu1 %vm5507_vm4, %v14435_v20 }
 0x53b   :  { %v4681_v42 = vpop.f32.mrb[34].mxu0 }
 0x53c   :  { %v5206_v39 = vmax.f32 %v16060_v54, %v4681_v42  ;;  %v4683_v50 = vpop.f32.mrb[35].mxu0  ;;  %v16065_v54 = vld [vmem:[#allocation179_spill] sm:$0xff] }
 0x53e   :  { %4893 = vmatmul.mubr.bf16.gmra.mrb[140].mxu0 %v13484_v36 }
 0x53f   :  { %9696 = vmatprep.mubr.msk.bf16.mxu0 %vm3162_vm2, %v13506_v37 }
 0x541   :  { %v4686_v61 = vpop.f32.mrb[36].mxu0 }
 0x542   :  { %v5207_v9 = vmax.f32 %v13500_v44, %v4686_v61  ;;  %v4688_v58 = vpop.f32.mrb[37].mxu0  ;;  %v16066_v61 = vld [vmem:[#allocation178_spill] sm:$0xff] }
 0x543   :  { %v4689_v35 = vpop.f32.mrb[38].mxu0 }
 0x544   :  { %v5208_v27 = vmax.f32 %v16061_v59, %v4689_v35  ;;  %v4691_v28 = vpop.f32.mrb[39].mxu0 }
 0x546   :  { %4901 = vmatmul.mubr.bf16.gmra.mrb[144].mxu0 %v16062_v3 }
 0x547   :  { %9697 = vmatprep.mubr.msk.bf16.mxu0 %vm3162_vm2, %v13524_v40 }
 0x549   :  { %v4694_v37 = vpop.f32.mrb[40].mxu0 }
 0x54a   :  { %v5209_v36 = vmax.f32 %v13518_v43, %v4694_v37  ;;  %v4696_v44 = vpop.f32.mrb[41].mxu0  ;;  %v16068_v37 = vld [vmem:[#allocation180_spill] sm:$0xff] }
 0x54b   :  { %v4697_v51 = vpop.f32.mrb[42].mxu0 }
 0x54c   :  { %v5210_v19 = vmax.f32 %v16063_v47, %v4697_v51  ;;  %v4699_v23 = vpop.f32.mrb[43].mxu0 }
 0x54d   :  { %v16069_v23 = vld [vmem:[#allocation183_spill] sm:$0xff] }
 0x54e   :  { %4909 = vmatmul.mubr.bf16.gmra.mrb[148].mxu0 %v16064_v29 }
 0x54f   :  { %9698 = vmatprep.mubr.msk.bf16.mxu0 %vm3162_vm2, %v13542_v22  ;;  %v16067_v22 = vld [vmem:[#allocation181_spill] sm:$0xff] }
 0x551   :  { %v4702_v32 = vpop.f32.mrb[44].mxu0 }
 0x552   :  { %v5211_v6 = vmax.f32 %v13536_v10, %v4702_v32  ;;  %v4704_v33 = vpop.f32.mrb[45].mxu0 }
 0x553   :  { %v4705_v42 = vpop.f32.mrb[46].mxu0  ;;  %v16070_v33 = vld [vmem:[#allocation182_spill] sm:$0xff] }
 0x554   :  { %v5212_v40 = vmax.f32 %v16065_v54, %v4705_v42  ;;  %v4707_v50 = vpop.f32.mrb[47].mxu0 }
 0x556   :  { %4917 = vmatmul.mubr.bf16.gmra.mrb[152].mxu0 %v16066_v61 }
 0x557   :  { %9699 = vmatprep.mubr.msk.bf16.mxu0 %vm3162_vm2, %v13560_v46  ;;  %v11626_v46 = vld [vmem:[%s15396_s5 + $0x8] sm:$0xff]  }
 0x558   :  { %10434 = vmatprep.subr.bf16.mxu1 %v11626_v46 }
 0x559   :  { %v4710_v43 = vpop.f32.mrb[48].mxu0  ;;  %10435 = vmatpush3.bf16.msra.mxu1 %v11626_v46  ;;  %v16074_v46 = vld [vmem:[#allocation186_spill] sm:$0xff] }
 0x55a   :  { %v5213_v58 = vmax.f32 %v13554_v57, %v4710_v43  ;;  %v4712_v31 = vpop.f32.mrb[49].mxu0  ;;  %v16071_v43 = vld [vmem:[#allocation185_spill] sm:$0xff] }
 0x55b   :  { %v4713_v35 = vpop.f32.mrb[50].mxu0 }
 0x55c   :  { %v5357_v59 = vmax.f32 %v5205_v2, %v5213_v58  ;;  %v5214_v28 = vmax.f32 %v16067_v22, %v4713_v35  ;;  %v4715_v3 = vpop.f32.mrb[51].mxu0  ;;  %v16072_v35 = vld [vmem:[#allocation184_spill] sm:$0xff] }
 0x55d   :  { %v16073_v3 = vld [vmem:[#allocation187_spill] sm:$0xff] }
 0x55e   :  { %v5358_v10 = vmax.f32 %v5206_v39, %v5214_v28  ;;  %4925 = vmatmul.mubr.bf16.gmra.mrb[156].mxu0 %v16068_v37 }
 0x55f   :  { %9700 = vmatprep.mubr.msk.bf16.mxu0 %vm3162_vm2, %v13578_v63 }
 0x560   :  { %v14467_v44 = vpack.c.bf16 %v5358_v10, %v5357_v59 }
 0x561   :  { %v4718_v51 = vpop.f32.mrb[52].mxu0 }
 0x562   :  { %v5215_v57 = vmax.f32 %v13572_v21, %v4718_v51  ;;  %v4720_v47 = vpop.f32.mrb[53].mxu0  ;;  %10400 = vmatprep.mubr.msk.bf16.mxu1 %vm5507_vm4, %v14467_v44 }
 0x563   :  { %v4721_v2 = vpop.f32.mrb[54].mxu0 }
 0x564   :  { %v5359_v39 = vmax.f32 %v5207_v9, %v5215_v57  ;;  %v5216_v29 = vmax.f32 %v16069_v23, %v4721_v2  ;;  %v4723_v63 = vpop.f32.mrb[55].mxu0  ;;  %v11628_v23 = vld [vmem:[%s15397_s8 + $0x8] sm:$0xff]  }
 0x565   :  { %10810 = vmatprep.subr.bf16.mxu0 %v11628_v23 }
 0x566   :  { %v5360_v32 = vmax.f32 %v5208_v27, %v5216_v29  ;;  %4933 = vmatmul.mubr.bf16.gmra.mrb[160].mxu0 %v16070_v33  ;;  %v16077_v33 = vld [vmem:[#allocation191_spill] sm:$0xff] }
 0x567   :  { %9701 = vmatprep.mubr.msk.bf16.mxu0 %vm3162_vm2, %v13596_v16  ;;  %10811 = vmatpush3.bf16.msra.mxu0 %v11628_v23 }
 0x568   :  { %v14479_v42 = vpack.c.bf16 %v5360_v32, %v5359_v39 }
 0x569   :  { %v4726_v21 = vpop.f32.mrb[56].mxu0 }
 0x56a   :  { %v5217_v54 = vmax.f32 %v13590_v55, %v4726_v21  ;;  %v4728_v50 = vpop.f32.mrb[57].mxu0  ;;  %10401 = vmatmul.mubr.msk.bf16.gmra.mrb[160].mxu1 %vm5507_vm4, %v14479_v42 }
 0x56b   :  { %v4729_v61 = vpop.f32.mrb[58].mxu0  ;;  %v16078_v50 = vld [vmem:[#allocation190_spill] sm:$0xff] }
 0x56c   :  { %v5361_v9 = vmax.f32 %v5209_v36, %v5217_v54  ;;  %v5218_v58 = vmax.f32 %v16071_v43, %v4729_v61  ;;  %v4731_v31 = vpop.f32.mrb[59].mxu0 }
 0x56e   :  { %v5362_v27 = vmax.f32 %v5210_v19, %v5218_v58  ;;  %4941 = vmatmul.mubr.bf16.gmra.mrb[164].mxu0 %v16072_v35  ;;  %v16079_v58 = vld [vmem:[#allocation193_spill] sm:$0xff] }
 0x56f   :  { %9702 = vmatprep.mubr.msk.bf16.mxu0 %vm3162_vm2, %v13614_v34  ;;  %v11629_v35 = vld [vmem:[%s15396_s5 + $0x18] sm:$0xff]  }
 0x570   :  { %v14488_v16 = vpack.c.bf16 %v5362_v27, %v5361_v9 }
 0x571   :  { %v4734_v59 = vpop.f32.mrb[60].mxu0 }
 0x572   :  { %v5219_v55 = vmax.f32 %v13608_v56, %v4734_v59  ;;  %v4736_v22 = vpop.f32.mrb[61].mxu0  ;;  %10404 = vmatprep.mubr.msk.bf16.mxu1 %vm5507_vm4, %v14488_v16  ;;  %v11627_v56 = vld [vmem:[%s15396_s5 + $0x10] sm:$0xff]  }
 0x573   :  { %v4737_v28 = vpop.f32.mrb[62].mxu0  ;;  %10436 = vmatprep.subr.bf16.mxu1 %v11627_v56  ;;  %v16081_v22 = vld [vmem:[#allocation195_spill] sm:$0xff] }
 0x574   :  { %v5363_v36 = vmax.f32 %v5211_v6, %v5219_v55  ;;  %v5220_v10 = vmax.f32 %v16073_v3, %v4737_v28  ;;  %v4739_v37 = vpop.f32.mrb[63].mxu0  ;;  %10437 = vmatpush3.bf16.msra.mxu1 %v11627_v56  ;;  %v16082_v3 = vld [vmem:[#allocation194_spill] sm:$0xff] }
 0x575   :  { %10438 = vmatprep.subr.bf16.mxu1 %v11629_v35 }
 0x576   :  { %v5364_v19 = vmax.f32 %v5212_v40, %v5220_v10  ;;  %4949 = vmatmul.mubr.bf16.gmra.mrb[168].mxu0 %v16074_v46  ;;  %v16075_v40 = vld [vmem:[#allocation189_spill] sm:$0xff]  ;;  %v16083_v10 = vld [vmem:[#allocation196_spill] sm:$0xff] }
 0x577   :  { %9703 = vmatprep.mubr.msk.bf16.mxu0 %vm3162_vm2, %v13632_v52  ;;  %v16076_v52 = vld [vmem:[#allocation188_spill] sm:$0xff] }
 0x578   :  { %v14497_v34 = vpack.c.bf16 %v5364_v19, %v5363_v36  ;;  %10439 = vmatpush3.bf16.msra.mxu1 %v11629_v35 }
 0x579   :  { %v4742_v51 = vpop.f32.mrb[64].mxu0 }
 0x57a   :  { %v5221_v57 = vmax.f32 %v13626_v1, %v4742_v51  ;;  %v4744_v47 = vpop.f32.mrb[65].mxu0  ;;  %10405 = vmatmul.mubr.msk.bf16.gmra.mrb[164].mxu1 %vm5507_vm4, %v14497_v34  ;;  %v16084_v51 = vld [vmem:[#allocation198_spill] sm:$0xff] }
 0x57b   :  { %v4745_v6 = vpop.f32.mrb[66].mxu0 }
 0x57c   :  { %v5222_v2 = vmax.f32 %v16075_v40, %v4745_v6  ;;  %v4747_v39 = vpop.f32.mrb[67].mxu0  ;;  %v16085_v40 = vld [vmem:[#allocation197_spill] sm:$0xff] }
 0x57e   :  { %4957 = vmatmul.mubr.bf16.gmra.mrb[172].mxu0 %v16076_v52 }
 0x57f   :  { %9704 = vmatprep.mubr.msk.bf16.mxu0 %vm3162_vm2, %v13650_v7 }
 0x581   :  { %v4750_v1 = vpop.f32.mrb[68].mxu0 }
 0x582   :  { %v5223_v29 = vmax.f32 %v13644_v15, %v4750_v1  ;;  %v4752_v63 = vpop.f32.mrb[69].mxu0  ;;  %v16080_v15 = vld [vmem:[#allocation192_spill] sm:$0xff] }
 0x583   :  { %v4753_v32 = vpop.f32.mrb[70].mxu0 }
 0x584   :  { %v5224_v21 = vmax.f32 %v16077_v33, %v4753_v32  ;;  %v4755_v54 = vpop.f32.mrb[71].mxu0  ;;  %v16086_v33 = vld [vmem:[#allocation199_spill] sm:$0xff] }
 0x586   :  { %4965 = vmatmul.mubr.bf16.gmra.mrb[176].mxu0 %v16078_v50 }
 0x587   :  { %9705 = vmatprep.mubr.msk.bf16.mxu0 %vm3162_vm2, %v13668_v25 }
 0x589   :  { %v4758_v7 = vpop.f32.mrb[72].mxu0 }
 0x58a   :  { %v5225_v61 = vmax.f32 %v13662_v14, %v4758_v7  ;;  %v4760_v9 = vpop.f32.mrb[73].mxu0 }
 0x58b   :  { %v4761_v43 = vpop.f32.mrb[74].mxu0  ;;  %v16087_v9 = vld [vmem:[#allocation201_spill] sm:$0xff] }
 0x58c   :  { %v5226_v31 = vmax.f32 %v16079_v58, %v4761_v43  ;;  %v4763_v27 = vpop.f32.mrb[75].mxu0 }
 0x58e   :  { %4973 = vmatmul.mubr.bf16.gmra.mrb[180].mxu0 %v16080_v15 }
 0x58f   :  { %9706 = vmatprep.mubr.msk.bf16.mxu0 %vm3162_vm2, %v13686_v45 }
 0x591   :  { %v4766_v59 = vpop.f32.mrb[76].mxu0 }
 0x592   :  { %v5227_v25 = vmax.f32 %v13680_v11, %v4766_v59  ;;  %v4768_v55 = vpop.f32.mrb[77].mxu0 }
 0x593   :  { %v4769_v14 = vpop.f32.mrb[78].mxu0  ;;  %v16089_v55 = vld [vmem:[#allocation203_spill] sm:$0xff] }
 0x594   :  { %v5228_v28 = vmax.f32 %v16081_v22, %v4769_v14  ;;  %v4771_v36 = vpop.f32.mrb[79].mxu0 }
 0x596   :  { %4981 = vmatmul.mubr.bf16.gmra.mrb[184].mxu0 %v16082_v3  ;;  %v16090_v3 = vld [vmem:[#allocation202_spill] sm:$0xff] }
 0x597   :  { %9707 = vmatprep.mubr.msk.bf16.mxu0 %vm3162_vm2, %v13704_v4 }
 0x599   :  { %v4774_v45 = vpop.f32.mrb[80].mxu0 }
 0x59a   :  { %v5229_v37 = vmax.f32 %v16083_v10, %v4774_v45  ;;  %v4776_v19 = vpop.f32.mrb[81].mxu0 }
 0x59b   :  { %v4777_v46 = vpop.f32.mrb[82].mxu0 }
 0x59c   :  { %v5365_v56 = vmax.f32 %v5221_v57, %v5229_v37  ;;  %v5230_v47 = vmax.f32 %v16084_v51, %v4777_v46  ;;  %v4779_v11 = vpop.f32.mrb[83].mxu0 }
 0x59d   :  { %v16093_v11 = vld [vmem:[#allocation207_spill] sm:$0xff] }
 0x59e   :  { %v5366_v6 = vmax.f32 %v5222_v2, %v5230_v47  ;;  %4989 = vmatmul.mubr.bf16.gmra.mrb[188].mxu0 %v16085_v40 }
 0x59f   :  { %9708 = vmatprep.mubr.msk.bf16.mxu0 %vm3162_vm2, %v13725_v5 }
 0x5a0   :  { %v14535_v39 = vpack.c.bf16 %v5366_v6, %v5365_v56  ;;  %v16092_v56 = vld [vmem:[#allocation204_spill] sm:$0xff] }
 0x5a1   :  { %v4782_v52 = vpop.f32.mrb[84].mxu0 }
 0x5a2   :  { %v5231_v4 = vmax.f32 %v13719_v24, %v4782_v52  ;;  %v4784_v23 = vpop.f32.mrb[85].mxu0  ;;  %10408 = vmatprep.mubr.msk.bf16.mxu1 %vm5507_vm4, %v14535_v39  ;;  %v16094_v52 = vld [vmem:[#allocation206_spill] sm:$0xff] }
 0x5a3   :  { %v4785_v1 = vpop.f32.mrb[86].mxu0  ;;  %v16096_v23 = vld [vmem:[#allocation208_spill] sm:$0xff] }
 0x5a4   :  { %v5367_v57 = vmax.f32 %v5223_v29, %v5231_v4  ;;  %v5232_v63 = vmax.f32 %v13727_v48, %v4785_v1  ;;  %v4787_v32 = vpop.f32.mrb[87].mxu0  ;;  %v16095_v4 = vld [vmem:[#allocation210_spill] sm:$0xff] }
 0x5a6   :  { %v5368_v2 = vmax.f32 %v5224_v21, %v5232_v63  ;;  %4997 = vmatmul.mubr.bf16.gmra.mrb[192].mxu0 %v16086_v33  ;;  %v11630_v21 = vld [vmem:[%s15396_s5 + $0x20] ss:$0 sps:$4 sm:$0xff]   ;;  %v16097_v63 = vld [vmem:[#allocation211_spill] sm:$0xff]  ;;  %v16098_v33 = vld [vmem:[#allocation209_spill] sm:$0xff] }
 0x5a7   :  { %9709 = vmatprep.mubr.msk.bf16.mxu0 %vm3162_vm2, %v13743_v13  ;;  %v16088_v13 = vld [vmem:[#allocation200_spill] sm:$0xff]  ;;  %11281 = vmatprep.subr.msk.bf16.mxu1 %vm5604_vm3, %v11630_v21 }
 0x5a8   :  { %v14544_v5 = vpack.c.bf16 %v5368_v2, %v5367_v57 }
 0x5a9   :  { %v4790_v54 = vpop.f32.mrb[88].mxu0 }
 0x5aa   :  { %v5233_v24 = vmax.f32 %v13737_v0, %v4790_v54  ;;  %v4792_v50 = vpop.f32.mrb[89].mxu0  ;;  %10409 = vmatmul.mubr.msk.bf16.gmra.mrb[168].mxu1 %vm5507_vm4, %v14544_v5  ;;  %v5937_v0 = vsel %vm5604_vm3, %v11630_v21, 0  ;;  %v16099_v54 = vld [vmem:[#allocation214_spill] sm:$0xff] }
 0x5ab   :  { %v4793_v7 = vpop.f32.mrb[90].mxu0  ;;  %10441 = vmatpush3.bf16.msra.mxu1 %v5937_v0  ;;  %v16100_v50 = vld [vmem:[#allocation212_spill] sm:$0xff] }
 0x5ac   :  { %v5369_v29 = vmax.f32 %v5225_v61, %v5233_v24  ;;  %v5234_v48 = vmax.f32 %v16087_v9, %v4793_v7  ;;  %v4795_v43 = vpop.f32.mrb[91].mxu0 }
 0x5ae   :  { %v5370_v58 = vmax.f32 %v5226_v31, %v5234_v48  ;;  %5005 = vmatmul.mubr.bf16.gmra.mrb[196].mxu0 %v16088_v13  ;;  %v16101_v48 = vld [vmem:[#allocation215_spill] sm:$0xff]  ;;  %v16103_v13 = vld [vmem:[#allocation218_spill] sm:$0xff] }
 0x5af   :  { %9710 = vmatprep.mubr.msk.bf16.mxu0 %vm3162_vm2, %v13761_v12 }
 0x5b0   :  { %v14558_v27 = vpack.c.bf16 %v5370_v58, %v5369_v29  ;;  %v16102_v58 = vld [vmem:[#allocation213_spill] sm:$0xff] }
 0x5b1   :  { %v4798_v61 = vpop.f32.mrb[92].mxu0 }
 0x5b2   :  { %v5235_v15 = vmax.f32 %v13755_v17, %v4798_v61  ;;  %v4800_v35 = vpop.f32.mrb[93].mxu0  ;;  %10412 = vmatprep.mubr.msk.bf16.mxu1 %vm5507_vm4, %v14558_v27  ;;  %v16104_v61 = vld [vmem:[#allocation216_spill] sm:$0xff] }
 0x5b3   :  { %v4801_v31 = vpop.f32.mrb[94].mxu0 }
 0x5b4   :  { %v5371_v59 = vmax.f32 %v5227_v25, %v5235_v15  ;;  %v5236_v14 = vmax.f32 %v16089_v55, %v4801_v31  ;;  %v4803_v22 = vpop.f32.mrb[95].mxu0  ;;  %v16091_v25 = vld [vmem:[#allocation205_spill] sm:$0xff]  ;;  %v16105_v55 = vld [vmem:[#allocation219_spill] sm:$0xff] }
 0x5b6   :  { %v5372_v36 = vmax.f32 %v5228_v28, %v5236_v14  ;;  %5013 = vmatmul.mubr.bf16.gmra.mrb[200].mxu0 %v16090_v3  ;;  %v16106_v3 = vld [vmem:[#allocation217_spill] sm:$0xff] }
 0x5b7   :  { %9711 = vmatprep.mubr.msk.bf16.mxu0 %vm3162_vm2, %v13779_v38 }
 0x5b8   :  { %v14567_v12 = vpack.c.bf16 %v5372_v36, %v5371_v59 }
 0x5b9   :  { %v4806_v45 = vpop.f32.mrb[96].mxu0 }
 0x5ba   :  { %v5237_v17 = vmax.f32 %v13773_v53, %v4806_v45  ;;  %v4808_v10 = vpop.f32.mrb[97].mxu0  ;;  %10413 = vmatmul.mubr.msk.bf16.gmra.mrb[172].mxu1 %vm5507_vm4, %v14567_v12  ;;  %v14580_v53 = vld [vmem:[%s15396_s5 + $0x48] sm:$0xff]   ;;  %v16107_v45 = vld [vmem:[#allocation222_spill] sm:$0xff] }
 0x5bb   :  { %v4809_v37 = vpop.f32.mrb[98].mxu0  ;;  %10506 = vmatprep.subr.bf16.mxu1 %v14580_v53 }
 0x5bc   :  { %v5238_v19 = vmax.f32 %v16091_v25, %v4809_v37  ;;  %v4811_v46 = vpop.f32.mrb[99].mxu0  ;;  %v11633_v37 = vld [vmem:[%s15397_s8 + $0x10] sm:$0xff]  }
 0x5bd   :  { %v16108_v46 = vld [vmem:[#allocation220_spill] sm:$0xff]  ;;  %10812 = vmatprep.subr.bf16.mxu0 %v11633_v37 }
 0x5be   :  { %5021 = vmatmul.mubr.bf16.gmra.mrb[204].mxu0 %v16092_v56 }
 0x5bf   :  { %9712 = vmatprep.mubr.msk.bf16.mxu0 %vm3162_vm2, %v13797_v62  ;;  %10813 = vmatpush3.bf16.msra.mxu0 %v11633_v37 }
 0x5c1   :  { %v4814_v28 = vpop.f32.mrb[100].mxu0 }
 0x5c2   :  { %v5239_v38 = vmax.f32 %v13791_v8, %v4814_v28  ;;  %v4816_v51 = vpop.f32.mrb[101].mxu0 }
 0x5c3   :  { %v4817_v47 = vpop.f32.mrb[102].mxu0  ;;  %v16109_v51 = vld [vmem:[#allocation223_spill] sm:$0xff] }
 0x5c4   :  { %v5240_v6 = vmax.f32 %v16093_v11, %v4817_v47  ;;  %v4819_v40 = vpop.f32.mrb[103].mxu0 }
 0x5c6   :  { %5029 = vmatmul.mubr.bf16.gmra.mrb[208].mxu0 %v16094_v52  ;;  %v16110_v52 = vld [vmem:[#allocation221_spill] sm:$0xff] }
 0x5c7   :  { %9713 = vmatprep.mubr.msk.bf16.mxu0 %vm3162_vm2, %v16095_v4  ;;  %v16111_v4 = vld [vmem:[#allocation226_spill] sm:$0xff] }
 0x5c9   :  { %v4822_v62 = vpop.f32.mrb[104].mxu0 }
 0x5ca   :  { %v5241_v8 = vmax.f32 %v16096_v23, %v4822_v62  ;;  %v4824_v1 = vpop.f32.mrb[105].mxu0 }
 0x5cb   :  { %v4825_v57 = vpop.f32.mrb[106].mxu0  ;;  %v16112_v1 = vld [vmem:[#allocation224_spill] sm:$0xff] }
 0x5cc   :  { %v5242_v32 = vmax.f32 %v16097_v63, %v4825_v57  ;;  %v4827_v2 = vpop.f32.mrb[107].mxu0 }
 0x5ce   :  { %5037 = vmatmul.mubr.bf16.gmra.mrb[212].mxu0 %v16098_v33  ;;  %v16113_v33 = vld [vmem:[#allocation227_spill] sm:$0xff] }
 0x5cf   :  { %9714 = vmatprep.mubr.msk.bf16.mxu0 %vm3162_vm2, %v16099_v54 }
 0x5d1   :  { %v4830_v24 = vpop.f32.mrb[108].mxu0 }
 0x5d2   :  { %v5243_v7 = vmax.f32 %v16100_v50, %v4830_v24  ;;  %v4832_v29 = vpop.f32.mrb[109].mxu0  ;;  %v16114_v50 = vld [vmem:[#allocation225_spill] sm:$0xff] }
 0x5d3   :  { %v4833_v9 = vpop.f32.mrb[110].mxu0  ;;  %v16115_v29 = vld [vmem:[#allocation228_spill] sm:$0xff] }
 0x5d4   :  { %v5244_v43 = vmax.f32 %v16101_v48, %v4833_v9  ;;  %v4835_v21 = vpop.f32.mrb[111].mxu0 }
 0x5d5   :  { %v16116_v21 = vld [vmem:[#allocation2_spill] sm:$0xff] }
 0x5d6   :  { %5045 = vmatmul.mubr.bf16.gmra.mrb[216].mxu0 %v16102_v58 }
 0x5d7   :  { %9715 = vmatprep.mubr.msk.bf16.mxu0 %vm3162_vm2, %v16103_v13 }
 0x5d9   :  { %v4838_v0 = vpop.f32.mrb[112].mxu0 }
 0x5da   :  { %v5245_v15 = vmax.f32 %v16104_v61, %v4838_v0  ;;  %v4840_v35 = vpop.f32.mrb[113].mxu0  ;;  %v16117_v61 = vld [vmem:[#allocation229_spill] sm:$0xff] }
 0x5db   :  { %v4841_v31 = vpop.f32.mrb[114].mxu0 }
 0x5dc   :  { %v5373_v59 = vmax.f32 %v5237_v17, %v5245_v15  ;;  %v5246_v14 = vmax.f32 %v16105_v55, %v4841_v31  ;;  %v4843_v22 = vpop.f32.mrb[115].mxu0  ;;  %v16118_v31 = vld [vmem:[#allocation4_spill] sm:$0xff] }
 0x5dd   :  { %v16120_v22 = vld [vmem:[#allocation3_spill] sm:$0xff] }
 0x5de   :  { %v5374_v36 = vmax.f32 %v5238_v19, %v5246_v14  ;;  %5053 = vmatmul.mubr.bf16.gmra.mrb[220].mxu0 %v16106_v3 }
 0x5df   :  { %9716 = vmatprep.mubr.msk.bf16.mxu0 %vm3162_vm2, %v16107_v45 }
 0x5e0   :  { %v14602_v10 = vpack.c.bf16 %v5374_v36, %v5373_v59  ;;  %v16119_v59 = vld [vmem:[#allocation230_spill] sm:$0xff] }
 0x5e1   :  { %v4846_v25 = vpop.f32.mrb[116].mxu0 }
 0x5e2   :  { %v5247_v56 = vmax.f32 %v16108_v46, %v4846_v25  ;;  %v4848_v28 = vpop.f32.mrb[117].mxu0  ;;  %10416 = vmatprep.mubr.msk.bf16.mxu1 %vm5507_vm4, %v14602_v10  ;;  %v16122_v46 = vld [vmem:[#allocation6_spill] sm:$0xff] }
 0x5e3   :  { %v4849_v17 = vpop.f32.mrb[118].mxu0  ;;  %v16124_v28 = vld [vmem:[#allocation5_spill] sm:$0xff] }
 0x5e4   :  { %v5375_v19 = vmax.f32 %v5239_v38, %v5247_v56  ;;  %v5248_v47 = vmax.f32 %v16109_v51, %v4849_v17  ;;  %v4851_v11 = vpop.f32.mrb[119].mxu0 }
 0x5e6   :  { %v5376_v40 = vmax.f32 %v5240_v6, %v5248_v47  ;;  %5061 = vmatmul.mubr.bf16.gmra.mrb[224].mxu0 %v16110_v52  ;;  %v16125_v47 = vld [vmem:[#allocation233_spill] sm:$0xff]  ;;  %v16126_v52 = vld [vmem:[#allocation8_spill] sm:$0xff] }
 0x5e7   :  { %9717 = vmatprep.mubr.msk.bf16.mxu0 %vm3162_vm2, %v16111_v4  ;;  %v16127_v4 = vld [vmem:[#allocation234_spill] sm:$0xff] }
 0x5e8   :  { %v14614_v62 = vpack.c.bf16 %v5376_v40, %v5375_v19 }
 0x5e9   :  { %v4854_v23 = vpop.f32.mrb[120].mxu0 }
 0x5ea   :  { %v5249_v57 = vmax.f32 %v16112_v1, %v4854_v23  ;;  %v4856_v63 = vpop.f32.mrb[121].mxu0  ;;  %10417 = vmatmul.mubr.msk.bf16.gmra.mrb[176].mxu1 %vm5507_vm4, %v14614_v62  ;;  %v16128_v1 = vld [vmem:[#allocation7_spill] sm:$0xff] }
 0x5eb   :  { %v4857_v2 = vpop.f32.mrb[122].mxu0 }
 0x5ec   :  { %v5377_v38 = vmax.f32 %v5241_v8, %v5249_v57  ;;  %v5250_v54 = vmax.f32 %v16113_v33, %v4857_v2  ;;  %v4859_v24 = vpop.f32.mrb[123].mxu0 }
 0x5ed   :  { %v16130_v24 = vld [vmem:[#allocation10_spill] sm:$0xff] }
 0x5ee   :  { %v5378_v6 = vmax.f32 %v5242_v32, %v5250_v54  ;;  %5069 = vmatmul.mubr.bf16.gmra.mrb[228].mxu0 %v16114_v50 }
 0x5ef   :  { %9718 = vmatprep.mubr.msk.bf16.mxu0 %vm3162_vm2, %v16115_v29  ;;  %v16132_v29 = vld [vmem:[#allocation9_spill] sm:$0xff] }
 0x5f0   :  { %v14623_v9 = vpack.c.bf16 %v5378_v6, %v5377_v38  ;;  %v16129_v38 = vld [vmem:[#allocation235_spill] sm:$0xff]  ;;  %v16131_v6 = vld [vmem:[#allocation236_spill] sm:$0xff] }
 0x5f1   :  { %v4862_v48 = vpop.f32.mrb[124].mxu0 }
 0x5f2   :  { %v5251_v58 = vmax.f32 %v16116_v21, %v4862_v48  ;;  %v4864_v13 = vpop.f32.mrb[125].mxu0  ;;  %10420 = vmatprep.mubr.msk.bf16.mxu1 %vm5507_vm4, %v14623_v9 }
 0x5f3   :  { %v4865_v0 = vpop.f32.mrb[126].mxu0  ;;  %v16133_v13 = vld [vmem:[#allocation237_spill] sm:$0xff] }
 0x5f4   :  { %v5379_v8 = vmax.f32 %v5243_v7, %v5251_v58  ;;  %v5252_v15 = vmax.f32 %v16117_v61, %v4865_v0  ;;  %v4867_v35 = vpop.f32.mrb[127].mxu0  ;;  %v16121_v7 = vld [vmem:[#allocation231_spill] sm:$0xff]  ;;  %v16134_v61 = vld [vmem:[#allocation12_spill] sm:$0xff] }
 0x5f6   :  { %v5380_v32 = vmax.f32 %v5244_v43, %v5252_v15  ;;  %5077 = vmatmul.mubr.bf16.gmra.mrb[232].mxu0 %v16118_v31  ;;  %v16123_v43 = vld [vmem:[#allocation232_spill] sm:$0xff]  ;;  %v16135_v15 = vld [vmem:[#allocation238_spill] sm:$0xff] }
 0x5f7   :  { %9719 = vmatprep.mubr.msk.bf16.mxu0 %vm3162_vm2, %v16119_v59 }
 0x5f8   :  { %v14632_v55 = vpack.c.bf16 %v5380_v32, %v5379_v8  ;;  %v16136_v32 = vld [vmem:[#allocation11_spill] sm:$0xff] }
 0x5f9   :  { %v4870_v14 = vpop.f32.mrb[128].mxu0 }
 0x5fa   :  { %v5253_v36 = vmax.f32 %v16120_v22, %v4870_v14  ;;  %v4872_v3 = vpop.f32.mrb[129].mxu0  ;;  %10421 = vmatmul.mubr.msk.bf16.gmra.mrb[180].mxu1 %vm5507_vm4, %v14632_v55 }
 0x5fb   :  { %v4873_v45 = vpop.f32.mrb[130].mxu0  ;;  %v16137_v3 = vld [vmem:[#allocation239_spill] sm:$0xff] }
 0x5fc   :  { %v5254_v37 = vmax.f32 %v16121_v7, %v4873_v45  ;;  %v4875_v25 = vpop.f32.mrb[131].mxu0 }
 0x5fe   :  { %5085 = vmatmul.mubr.bf16.gmra.mrb[236].mxu0 %v16122_v46  ;;  %v16138_v46 = vld [vmem:[#allocation15_spill] sm:$0xff] }
 0x5ff   :  { %9720 = vmatprep.mubr.msk.bf16.mxu0 %vm3162_vm2, %v16123_v43 }
 0x601   :  { %v4878_v56 = vpop.f32.mrb[132].mxu0 }
 0x602   :  { %v5255_v17 = vmax.f32 %v16124_v28, %v4878_v56  ;;  %v4880_v19 = vpop.f32.mrb[133].mxu0  ;;  %v16139_v28 = vld [vmem:[#allocation13_spill] sm:$0xff] }
 0x603   :  { %v4881_v51 = vpop.f32.mrb[134].mxu0 }
 0x604   :  { %v5256_v11 = vmax.f32 %v16125_v47, %v4881_v51  ;;  %v4883_v40 = vpop.f32.mrb[135].mxu0 }
 0x606   :  { %5093 = vmatmul.mubr.bf16.gmra.mrb[240].mxu0 %v16126_v52  ;;  %v16140_v52 = vld [vmem:[#allocation16_spill] sm:$0xff] }
 0x607   :  { %9721 = vmatprep.mubr.msk.bf16.mxu0 %vm3162_vm2, %v16127_v4 }
 0x609   :  { %v4886_v23 = vpop.f32.mrb[136].mxu0 }
 0x60a   :  { %v5257_v57 = vmax.f32 %v16128_v1, %v4886_v23  ;;  %v4888_v63 = vpop.f32.mrb[137].mxu0 }
 0x60b   :  { %v4889_v2 = vpop.f32.mrb[138].mxu0  ;;  %v16141_v63 = vld [vmem:[#allocation14_spill] sm:$0xff] }
 0x60c   :  { %v5258_v33 = vmax.f32 %v16129_v38, %v4889_v2  ;;  %v4891_v54 = vpop.f32.mrb[139].mxu0 }
 0x60e   :  { %5101 = vmatmul.mubr.bf16.gmra.mrb[244].mxu0 %v16130_v24 }
 0x60f   :  { %9722 = vmatprep.mubr.msk.bf16.mxu0 %vm3162_vm2, %v16131_v6  ;;  %v16142_v6 = vld [vmem:[#allocation19_spill] sm:$0xff] }
 0x611   :  { %v4894_v50 = vpop.f32.mrb[140].mxu0 }
 0x612   :  { %v5259_v48 = vmax.f32 %v16132_v29, %v4894_v50  ;;  %v4896_v21 = vpop.f32.mrb[141].mxu0 }
 0x613   :  { %v4897_v58 = vpop.f32.mrb[142].mxu0 }
 0x614   :  { %v5260_v0 = vmax.f32 %v16133_v13, %v4897_v58  ;;  %v4899_v8 = vpop.f32.mrb[143].mxu0  ;;  %v16143_v13 = vld [vmem:[#allocation17_spill] sm:$0xff] }
 0x616   :  { %5109 = vmatmul.mubr.bf16.gmra.mrb[248].mxu0 %v16134_v61 }
 0x617   :  { %9723 = vmatprep.mubr.msk.bf16.mxu0 %vm3162_vm2, %v16135_v15 }
 0x619   :  { %v4902_v35 = vpop.f32.mrb[144].mxu0 }
 0x61a   :  { %v5261_v31 = vmax.f32 %v16136_v32, %v4902_v35  ;;  %v4904_v59 = vpop.f32.mrb[145].mxu0  ;;  %v16144_v35 = vld [vmem:[#allocation20_spill] sm:$0xff] }
 0x61b   :  { %v4905_v14 = vpop.f32.mrb[146].mxu0 }
 0x61c   :  { %v5381_v22 = vmax.f32 %v5253_v36, %v5261_v31  ;;  %v5262_v45 = vmax.f32 %v16137_v3, %v4905_v14  ;;  %v4907_v7 = vpop.f32.mrb[147].mxu0 }
 0x61d   :  { %v16146_v7 = vld [vmem:[#allocation24_spill] sm:$0xff] }
 0x61e   :  { %v5382_v25 = vmax.f32 %v5254_v37, %v5262_v45  ;;  %5117 = vmatmul.mubr.bf16.gmra.mrb[252].mxu0 %v16138_v46 }
 0x620   :  { %v14659_v43 = vpack.c.bf16 %v5382_v25, %v5381_v22  ;;  %v16145_v22 = vld [vmem:[#allocation18_spill] sm:$0xff]  ;;  %v16147_v25 = vld [vmem:[#allocation21_spill] sm:$0xff] }
 0x621   :  { %v4910_v56 = vpop.f32.mrb[148].mxu0  ;;  %v16148_v46 = vpack.c.bf16 %v16146_v7, %v16147_v25  ;;  %v16164_v7 = vld [vmem:[#allocation30_spill] sm:$0xff] }
 0x622   :  { %v5263_v19 = vmax.f32 %v16139_v28, %v4910_v56  ;;  %v4912_v51 = vpop.f32.mrb[149].mxu0  ;;  %10424 = vmatprep.mubr.msk.bf16.mxu1 %vm5507_vm4, %v14659_v43 }
 0x623   :  { %v4913_v47 = vpop.f32.mrb[150].mxu0 }
 0x624   :  { %v5383_v40 = vmax.f32 %v5255_v17, %v5263_v19  ;;  %v5264_v4 = vmax.f32 %v16140_v52, %v4913_v47  ;;  %v4915_v36 = vpop.f32.mrb[151].mxu0  ;;  %v11632_v19 = vld [vmem:[%s15396_s5 + $0x50] sm:$0xff]   ;;  %v16150_v47 = vld [vmem:[#allocation22_spill] sm:$0xff] }
 0x625   :  { %v16152_v36 = vld [vmem:[#allocation25_spill] sm:$0xff] }
 0x626   :  { %v5384_v23 = vmax.f32 %v5256_v11, %v5264_v4  ;;  %v16151_v4 = vld [vmem:[#allocation28_spill] sm:$0xff] }
 0x628   :  { %v14665_v1 = vpack.c.bf16 %v5384_v23, %v5383_v40  ;;  %v16153_v23 = vpack.c.bf16 %v16151_v4, %v16152_v36  ;;  %v16168_v4 = vld [vmem:[#allocation34_spill] sm:$0xff] }
 0x629   :  { %v4918_v37 = vpop.f32.mrb[152].mxu0 }
 0x62a   :  { %v5265_v2 = vmax.f32 %v16141_v63, %v4918_v37  ;;  %v4920_v38 = vpop.f32.mrb[153].mxu0  ;;  %10425 = vmatmul.mubr.msk.bf16.gmra.mrb[184].mxu1 %vm5507_vm4, %v14665_v1  ;;  %v16154_v63 = vld [vmem:[#allocation32_spill] sm:$0xff] }
 0x62b   :  { %v4921_v54 = vpop.f32.mrb[154].mxu0 }
 0x62c   :  { %v5385_v24 = vmax.f32 %v5257_v57, %v5265_v2  ;;  %v5266_v50 = vmax.f32 %v16142_v6, %v4921_v54  ;;  %v4923_v29 = vpop.f32.mrb[155].mxu0  ;;  %v16155_v2 = vld [vmem:[#allocation29_spill] sm:$0xff]  ;;  %v16157_v54 = vld [vmem:[#allocation27_spill] sm:$0xff] }
 0x62d   :  { %v16156_v38 = vpack.c.bf16 %v16154_v63, %v16155_v2  ;;  %v11635_v29 = vld [vmem:[%s15396_s5 + $0x60] sm:$0xff]  }
 0x62e   :  { %v5386_v21 = vmax.f32 %v5258_v33, %v5266_v50  ;;  %v11634_v50 = vld [vmem:[%s15396_s5 + $0x58] sm:$0xff]  }
 0x630   :  { %v14671_v17 = vpack.c.bf16 %v5386_v21, %v5385_v24 }
 0x631   :  { %v4926_v58 = vpop.f32.mrb[156].mxu0 }
 0x632   :  { %v5267_v11 = vmax.f32 %v16143_v13, %v4926_v58  ;;  %v4928_v8 = vpop.f32.mrb[157].mxu0  ;;  %10428 = vmatprep.mubr.msk.bf16.mxu1 %vm5507_vm4, %v14671_v17  ;;  %v16158_v58 = vld [vmem:[#allocation26_spill] sm:$0xff] }
 0x633   :  { %v4929_v61 = vpop.f32.mrb[158].mxu0  ;;  %v16159_v8 = vld [vmem:[#allocation36_spill] sm:$0xff] }
 0x634   :  { %v5387_v15 = vmax.f32 %v5259_v48, %v5267_v11  ;;  %v5268_v32 = vmax.f32 %v16144_v35, %v4929_v61  ;;  %v4931_v31 = vpop.f32.mrb[159].mxu0  ;;  %v16149_v48 = vld [vmem:[#allocation23_spill] sm:$0xff]  ;;  %v16162_v35 = vld [vmem:[#allocation48_spill] sm:$0xff] }
 0x636   :  { %v5388_v59 = vmax.f32 %v5260_v0, %v5268_v32  ;;  %v11637_v0 = vld [vmem:[%s15397_s8 + $0x18] sm:$0xff]   ;;  %v16163_v32 = vld [vmem:[#allocation31_spill] sm:$0xff] }
 0x637   :  { %10814 = vmatprep.subr.bf16.mxu0 %v11637_v0 }
 0x638   :  { %v14677_v57 = vpack.c.bf16 %v5388_v59, %v5387_v15  ;;  %10815 = vmatpush3.bf16.msra.mxu0 %v11637_v0  ;;  %v16166_v0 = vld [vmem:[#allocation55_spill] sm:$0xff] }
 0x639   :  { %v4934_v14 = vpop.f32.mrb[160].mxu0 }
 0x63a   :  { %v5269_v33 = vmax.f32 %v16145_v22, %v4934_v14  ;;  %v4936_v3 = vpop.f32.mrb[161].mxu0  ;;  %10429 = vmatmul.mubr.msk.bf16.gmra.mrb[188].mxu1 %vm5507_vm4, %v14677_v57  ;;  %v11636_v14 = vld [vmem:[%s15396_s5 + $0x68] ss:$0 sps:$4 sm:$0xff]  }
 0x63b   :  { %v4937_v45 = vpop.f32.mrb[162].mxu0  ;;  %10442 = vmatprep.mubr.msk.bf16.mxu1 %vm5507_vm4, %v16148_v46  ;;  %v6278_v22 = vsel %vm5604_vm3, %v11636_v14, 0  ;;  %v14726_v3 = vld [vmem:[%s15396_s5 + $0x6c] sm:$0xff]  }
 0x63c   :  { %v5270_v56 = vmax.f32 %v16149_v48, %v4937_v45  ;;  %v4939_v28 = vpop.f32.mrb[163].mxu0  ;;  %v16165_v48 = vld [vmem:[#allocation49_spill] sm:$0xff] }
 0x641   :  { %v4942_v51 = vpop.f32.mrb[164].mxu0 }
 0x642   :  { %v5271_v40 = vmax.f32 %v16150_v47, %v4942_v51  ;;  %v4944_v52 = vpop.f32.mrb[165].mxu0  ;;  %10443 = vmatmul.mubr.msk.bf16.vlgmr.msra.gmra.mrb[128].mxu1 %vm5507_vm4, %v16153_v23 }
 0x643   :  { %v4945_v37 = vpop.f32.mrb[166].mxu0  ;;  %10446 = vmatprep.mubr.msk.bf16.mxu1 %vm5507_vm4, %v16156_v38  ;;  %10507 = vmatpush3.bf16.msra.mxu1 %v14580_v53  ;;  %v16160_v53 = vld [vmem:[#allocation33_spill] sm:$0xff]  ;;  %v16170_v38 = vld [vmem:[#allocation39_spill] sm:$0xff] }
 0x644   :  { %v5272_v24 = vmax.f32 %v16157_v54, %v4945_v37  ;;  %v4947_v6 = vpop.f32.mrb[167].mxu0  ;;  %10508 = vmatprep.subr.bf16.mxu1 %v11632_v19  ;;  %v16161_v61 = vpack.c.bf16 %v16159_v8, %v16160_v53  ;;  %v16169_v37 = vld [vmem:[#allocation54_spill] sm:$0xff] }
 0x647   :  { %10509 = vmatpush3.bf16.msra.mxu1 %v11632_v19  ;;  %v16167_v19 = vld [vmem:[#allocation35_spill] sm:$0xff] }
 0x648   :  { %10510 = vmatprep.subr.bf16.mxu1 %v11634_v50 }
 0x649   :  { %v4950_v21 = vpop.f32.mrb[168].mxu0 }
 0x64a   :  { %v5273_v13 = vmax.f32 %v16158_v58, %v4950_v21  ;;  %v4952_v11 = vpop.f32.mrb[169].mxu0  ;;  %10447 = vmatmul.mubr.msk.bf16.gmra.mrb[132].mxu1 %vm5507_vm4, %v16161_v61  ;;  %v16171_v58 = vld [vmem:[#allocation37_spill] sm:$0xff]  ;;  %v16172_v61 = vld [vmem:[#allocation72_spill] sm:$0xff] }
 0x64b   :  { %v4953_v15 = vpop.f32.mrb[170].mxu0  ;;  %10450 = vmatprep.mubr.msk.bf16.mxu1 %vm5507_vm4, %v16162_v35  ;;  %10511 = vmatpush3.bf16.msra.mxu1 %v11634_v50  ;;  %v16173_v35 = vld [vmem:[#allocation40_spill] sm:$0xff] }
 0x64c   :  { %v5274_v31 = vmax.f32 %v16163_v32, %v4953_v15  ;;  %v4955_v59 = vpop.f32.mrb[171].mxu0  ;;  %10512 = vmatprep.subr.bf16.mxu1 %v11635_v29 }
 0x64f   :  { %10513 = vmatpush3.bf16.msra.mxu1 %v11635_v29 }
 0x650   :  { %11282 = vmatprep.subr.msk.bf16.mxu1 %vm5604_vm3, %v11636_v14 }
 0x651   :  { %v4958_v45 = vpop.f32.mrb[172].mxu0 }
 0x652   :  { %v5275_v25 = vmax.f32 %v16164_v7, %v4958_v45  ;;  %v4960_v46 = vpop.f32.mrb[173].mxu0  ;;  %10451 = vmatmul.mubr.msk.bf16.gmra.mrb[136].mxu1 %vm5507_vm4, %v16165_v48 }
 0x653   :  { %v4961_v28 = vpop.f32.mrb[174].mxu0  ;;  %10454 = vmatprep.mubr.msk.bf16.mxu1 %vm5507_vm4, %v16166_v0  ;;  %10515 = vmatpush3.bf16.msra.mxu1 %v6278_v22  ;;  %v16174_v22 = vld [vmem:[#allocation38_spill] sm:$0xff]  ;;  %v16175_v46 = vld [vmem:[#allocation73_spill] sm:$0xff]  ;;  %v16176_v0 = vld [vmem:[#allocation43_spill] sm:$0xff] }
 0x654   :  { %v5276_v51 = vmax.f32 %v16167_v19, %v4961_v28  ;;  %v4963_v47 = vpop.f32.mrb[175].mxu0  ;;  %10580 = vmatprep.subr.bf16.mxu1 %v14726_v3 }
 0x659   :  { %v4966_v52 = vpop.f32.mrb[176].mxu0 }
 0x65a   :  { %v5277_v36 = vmax.f32 %v16168_v4, %v4966_v52  ;;  %v4968_v23 = vpop.f32.mrb[177].mxu0  ;;  %10455 = vmatmul.mubr.msk.bf16.gmra.mrb[140].mxu1 %vm5507_vm4, %v16169_v37  ;;  %v16177_v4 = vld [vmem:[#allocation41_spill] sm:$0xff] }
 0x65b   :  { %v4969_v63 = vpop.f32.mrb[178].mxu0  ;;  %10458 = vmatprep.mubr.msk.bf16.mxu1 %vm5507_vm4, %v14261_v60  ;;  %v16178_v37 = vld [vmem:[#allocation81_spill] sm:$0xff] }
 0x65c   :  { %v5389_v2 = vmax.f32 %v5269_v33, %v5277_v36  ;;  %v5278_v54 = vmax.f32 %v16170_v38, %v4969_v63  ;;  %v4971_v6 = vpop.f32.mrb[179].mxu0 }
 0x65e   :  { %v5390_v50 = vmax.f32 %v5270_v56, %v5278_v54  ;;  %v16180_v54 = vld [vmem:[#allocation44_spill] sm:$0xff] }
 0x660   :  { %v14741_v29 = vpack.c.bf16 %v5390_v50, %v5389_v2  ;;  %v16179_v2 = vld [vmem:[#allocation84_spill] sm:$0xff] }
 0x661   :  { %v4974_v21 = vpop.f32.mrb[180].mxu0 }
 0x662   :  { %v5279_v11 = vmax.f32 %v16171_v58, %v4974_v21  ;;  %v4976_v8 = vpop.f32.mrb[181].mxu0  ;;  %10459 = vmatmul.mubr.msk.bf16.gmra.mrb[144].mxu1 %vm5507_vm4, %v14274_v41  ;;  %v16181_v58 = vld [vmem:[#allocation42_spill] sm:$0xff] }
 0x663   :  { %v4977_v53 = vpop.f32.mrb[182].mxu0  ;;  %10462 = vmatprep.mubr.msk.bf16.mxu1 %vm5507_vm4, %v16172_v61 }
 0x664   :  { %v5391_v15 = vmax.f32 %v5271_v40, %v5279_v11  ;;  %v5280_v33 = vmax.f32 %v16173_v35, %v4977_v53  ;;  %v4979_v32 = vpop.f32.mrb[183].mxu0  ;;  %v16182_v53 = vld [vmem:[#allocation82_spill] sm:$0xff]  ;;  %v16183_v35 = vld [vmem:[#allocation47_spill] sm:$0xff] }
 0x666   :  { %v5392_v59 = vmax.f32 %v5272_v24, %v5280_v33 }
 0x668   :  { %v14749_v14 = vpack.c.bf16 %v5392_v59, %v5391_v15  ;;  %v16184_v59 = vld [vmem:[#allocation45_spill] sm:$0xff] }
 0x669   :  { %v4982_v56 = vpop.f32.mrb[184].mxu0 }
 0x66a   :  { %v5281_v45 = vmax.f32 %v16174_v22, %v4982_v56  ;;  %v4984_v7 = vpop.f32.mrb[185].mxu0  ;;  %10463 = vmatmul.mubr.msk.bf16.gmra.mrb[148].mxu1 %vm5507_vm4, %v16175_v46 }
 0x66b   :  { %v4985_v48 = vpop.f32.mrb[186].mxu0  ;;  %10466 = vmatprep.mubr.msk.bf16.mxu1 %vm5507_vm4, %v14349_v18 }
 0x66c   :  { %v5393_v28 = vmax.f32 %v5273_v13, %v5281_v45  ;;  %v5282_v40 = vmax.f32 %v16176_v0, %v4985_v48  ;;  %v4987_v19 = vpop.f32.mrb[187].mxu0  ;;  %v16185_v45 = vld [vmem:[#allocation46_spill] sm:$0xff]  ;;  %v16186_v0 = vld [vmem:[#allocation51_spill] sm:$0xff] }
 0x66e   :  { %v5394_v47 = vmax.f32 %v5274_v31, %v5282_v40 }
 0x670   :  { %v14757_v52 = vpack.c.bf16 %v5394_v47, %v5393_v28 }
 0x671   :  { %v4990_v24 = vpop.f32.mrb[188].mxu0 }
 0x672   :  { %v5283_v36 = vmax.f32 %v16177_v4, %v4990_v24  ;;  %v4992_v23 = vpop.f32.mrb[189].mxu0  ;;  %10467 = vmatmul.mubr.msk.bf16.gmra.mrb[152].mxu1 %vm5507_vm4, %v16178_v37  ;;  %v16187_v24 = vld [vmem:[#allocation52_spill] sm:$0xff] }
 0x673   :  { %v4993_v63 = vpop.f32.mrb[190].mxu0  ;;  %10470 = vmatprep.mubr.msk.bf16.mxu1 %vm5507_vm4, %v16179_v2 }
 0x674   :  { %v5395_v38 = vmax.f32 %v5275_v25, %v5283_v36  ;;  %v5284_v13 = vmax.f32 %v16180_v54, %v4993_v63  ;;  %v4995_v6 = vpop.f32.mrb[191].mxu0  ;;  %v16188_v63 = vld [vmem:[#allocation50_spill] sm:$0xff] }
 0x675   :  { %v16189_v6 = vld [vmem:[#allocation53_spill] sm:$0xff] }
 0x676   :  { %v5396_v50 = vmax.f32 %v5276_v51, %v5284_v13 }
 0x678   :  { %v14765_v21 = vpack.c.bf16 %v5396_v50, %v5395_v38 }
 0x679   :  { %v4998_v31 = vpop.f32.mrb[192].mxu0 }
 0x67a   :  { %v5285_v11 = vmax.f32 %v16181_v58, %v4998_v31  ;;  %v5000_v8 = vpop.f32.mrb[193].mxu0  ;;  %10471 = vmatmul.mubr.msk.bf16.gmra.mrb[156].mxu1 %vm5507_vm4, %v16182_v53 }
 0x67b   :  { %v5001_v15 = vpop.f32.mrb[194].mxu0  ;;  %10474 = vmatprep.mubr.msk.bf16.mxu1 %vm5507_vm4, %v14405_v30  ;;  %v16190_v8 = vld [vmem:[#allocation56_spill] sm:$0xff] }
 0x67c   :  { %v5286_v33 = vmax.f32 %v16183_v35, %v5001_v15  ;;  %v5003_v25 = vpop.f32.mrb[195].mxu0 }
 0x681   :  { %v5006_v32 = vpop.f32.mrb[196].mxu0 }
 0x682   :  { %v5287_v56 = vmax.f32 %v16184_v59, %v5006_v32  ;;  %v5008_v51 = vpop.f32.mrb[197].mxu0  ;;  %10475 = vmatmul.mubr.msk.bf16.gmra.mrb[160].mxu1 %vm5507_vm4, %v14417_v49  ;;  %v11642_v32 = vld [vmem:[%s15397_s8 + $0x20] sm:$0xff]  }
 0x683   :  { %v5009_v22 = vpop.f32.mrb[198].mxu0  ;;  %10478 = vmatprep.mubr.msk.bf16.mxu1 %vm5507_vm4, %v14426_v26  ;;  %v16191_v51 = vld [vmem:[#allocation59_spill] sm:$0xff]  ;;  %10816 = vmatprep.subr.bf16.mxu0 %v11642_v32 }
 0x684   :  { %v5288_v7 = vmax.f32 %v16185_v45, %v5009_v22  ;;  %v5011_v48 = vpop.f32.mrb[199].mxu0  ;;  %10817 = vmatpush3.bf16.msra.mxu0 %v11642_v32 }
 0x689   :  { %v5014_v28 = vpop.f32.mrb[200].mxu0 }
 0x68a   :  { %v5289_v40 = vmax.f32 %v16186_v0, %v5014_v28  ;;  %v5016_v19 = vpop.f32.mrb[201].mxu0  ;;  %10479 = vmatmul.mubr.msk.bf16.gmra.mrb[164].mxu1 %vm5507_vm4, %v14435_v20 }
 0x68b   :  { %v5017_v47 = vpop.f32.mrb[202].mxu0  ;;  %10482 = vmatprep.mubr.msk.bf16.mxu1 %vm5507_vm4, %v14467_v44  ;;  %v16192_v19 = vld [vmem:[#allocation57_spill] sm:$0xff] }
 0x68c   :  { %v5290_v4 = vmax.f32 %v16187_v24, %v5017_v47  ;;  %v5019_v36 = vpop.f32.mrb[203].mxu0 }
 0x691   :  { %v5022_v23 = vpop.f32.mrb[204].mxu0 }
 0x692   :  { %v5291_v38 = vmax.f32 %v16188_v63, %v5022_v23  ;;  %v5024_v54 = vpop.f32.mrb[205].mxu0  ;;  %10483 = vmatmul.mubr.msk.bf16.gmra.mrb[168].mxu1 %vm5507_vm4, %v14479_v42  ;;  %v16193_v23 = vld [vmem:[#allocation60_spill] sm:$0xff] }
 0x693   :  { %v5025_v13 = vpop.f32.mrb[206].mxu0  ;;  %10486 = vmatprep.mubr.msk.bf16.mxu1 %vm5507_vm4, %v14488_v16 }
 0x694   :  { %v5292_v50 = vmax.f32 %v16189_v6, %v5025_v13  ;;  %v5027_v31 = vpop.f32.mrb[207].mxu0 }
 0x695   :  { %v16194_v31 = vld [vmem:[#allocation58_spill] sm:$0xff] }
 0x699   :  { %v5030_v58 = vpop.f32.mrb[208].mxu0 }
 0x69a   :  { %v5293_v15 = vmax.f32 %v16190_v8, %v5030_v58  ;;  %v5032_v35 = vpop.f32.mrb[209].mxu0  ;;  %10487 = vmatmul.mubr.msk.bf16.gmra.mrb[172].mxu1 %vm5507_vm4, %v14497_v34 }
 0x69b   :  { %v5033_v25 = vpop.f32.mrb[210].mxu0  ;;  %10490 = vmatprep.mubr.msk.bf16.mxu1 %vm5507_vm4, %v14535_v39 }
 0x69c   :  { %v5397_v59 = vmax.f32 %v5285_v11, %v5293_v15  ;;  %v5294_v22 = vmax.f32 %v16191_v51, %v5033_v25  ;;  %v5035_v45 = vpop.f32.mrb[211].mxu0  ;;  %v16195_v25 = vld [vmem:[#allocation63_spill] sm:$0xff] }
 0x69e   :  { %v5398_v48 = vmax.f32 %v5286_v33, %v5294_v22  ;;  %v16196_v22 = vld [vmem:[#allocation61_spill] sm:$0xff] }
 0x6a0   :  { %v14800_v28 = vpack.c.bf16 %v5398_v48, %v5397_v59 }
 0x6a1   :  { %v5038_v0 = vpop.f32.mrb[212].mxu0 }
 0x6a2   :  { %v5295_v47 = vmax.f32 %v16192_v19, %v5038_v0  ;;  %v5040_v24 = vpop.f32.mrb[213].mxu0  ;;  %10491 = vmatmul.mubr.msk.bf16.gmra.mrb[176].mxu1 %vm5507_vm4, %v14544_v5 }
 0x6a3   :  { %v5041_v36 = vpop.f32.mrb[214].mxu0  ;;  %10494 = vmatprep.mubr.msk.bf16.mxu1 %vm5507_vm4, %v14558_v27 }
 0x6a4   :  { %v5399_v11 = vmax.f32 %v5287_v56, %v5295_v47  ;;  %v5296_v63 = vmax.f32 %v16193_v23, %v5041_v36  ;;  %v5043_v54 = vpop.f32.mrb[215].mxu0  ;;  %v16197_v47 = vld [vmem:[#allocation64_spill] sm:$0xff]  ;;  %v16198_v23 = vld [vmem:[#allocation62_spill] sm:$0xff] }
 0x6a6   :  { %v5400_v13 = vmax.f32 %v5288_v7, %v5296_v63 }
 0x6a8   :  { %v14808_v33 = vpack.c.bf16 %v5400_v13, %v5399_v11 }
 0x6a9   :  { %v5046_v6 = vpop.f32.mrb[216].mxu0 }
 0x6aa   :  { %v5297_v58 = vmax.f32 %v16194_v31, %v5046_v6  ;;  %v5048_v8 = vpop.f32.mrb[217].mxu0  ;;  %10495 = vmatmul.mubr.msk.bf16.gmra.mrb[180].mxu1 %vm5507_vm4, %v14567_v12  ;;  %v16199_v6 = vld [vmem:[#allocation67_spill] sm:$0xff] }
 0x6ab   :  { %v5049_v15 = vpop.f32.mrb[218].mxu0  ;;  %10498 = vmatprep.mubr.msk.bf16.mxu1 %vm5507_vm4, %v14602_v10  ;;  %v16200_v8 = vld [vmem:[#allocation65_spill] sm:$0xff] }
 0x6ac   :  { %v5401_v35 = vmax.f32 %v5289_v40, %v5297_v58  ;;  %v5298_v56 = vmax.f32 %v16195_v25, %v5049_v15  ;;  %v5051_v32 = vpop.f32.mrb[219].mxu0 }
 0x6ae   :  { %v5402_v59 = vmax.f32 %v5290_v4, %v5298_v56 }
 0x6b0   :  { %v14816_v51 = vpack.c.bf16 %v5402_v59, %v5401_v35  ;;  %v11640_v59 = vld [vmem:[%s15396_s5 + $0x7c] sm:$0xff]  }
 0x6b1   :  { %v5054_v7 = vpop.f32.mrb[220].mxu0 }
 0x6b2   :  { %v5299_v45 = vmax.f32 %v16196_v22, %v5054_v7  ;;  %v5056_v48 = vpop.f32.mrb[221].mxu0  ;;  %10499 = vmatmul.mubr.msk.bf16.gmra.mrb[184].mxu1 %vm5507_vm4, %v14614_v62  ;;  %v16202_v22 = vld [vmem:[#allocation66_spill] sm:$0xff] }
 0x6b3   :  { %v5057_v0 = vpop.f32.mrb[222].mxu0  ;;  %10502 = vmatprep.mubr.msk.bf16.mxu1 %vm5507_vm4, %v14623_v9  ;;  %v16203_v48 = vld [vmem:[#allocation71_spill] sm:$0xff] }
 0x6b4   :  { %v5403_v19 = vmax.f32 %v5291_v38, %v5299_v45  ;;  %v5300_v40 = vmax.f32 %v16197_v47, %v5057_v0  ;;  %v5059_v24 = vpop.f32.mrb[223].mxu0  ;;  %v11643_v47 = vld [vmem:[%s15396_s5 + $0x8c] ss:$0 sps:$4 sm:$0xff]  }
 0x6b6   :  { %v5404_v36 = vmax.f32 %v5292_v50, %v5300_v40  ;;  %v11639_v50 = vld [vmem:[%s15396_s5 + $0x74] sm:$0xff]   ;;  %v6683_v40 = vsel %vm5604_vm3, %v11643_v47, 0 }
 0x6b8   :  { %v14824_v11 = vpack.c.bf16 %v5404_v36, %v5403_v19  ;;  %v16204_v36 = vld [vmem:[#allocation69_spill] sm:$0xff] }
 0x6b9   :  { %v5062_v4 = vpop.f32.mrb[224].mxu0 }
 0x6ba   :  { %v5301_v63 = vmax.f32 %v16198_v23, %v5062_v4  ;;  %v5064_v54 = vpop.f32.mrb[225].mxu0  ;;  %10503 = vmatmul.mubr.msk.bf16.gmra.mrb[188].mxu1 %vm5507_vm4, %v14632_v55 }
 0x6bb   :  { %v5065_v13 = vpop.f32.mrb[226].mxu0  ;;  %10516 = vmatprep.mubr.msk.bf16.mxu1 %vm5507_vm4, %v14261_v60  ;;  %v16201_v60 = vld [vmem:[#allocation68_spill] sm:$0xff] }
 0x6bc   :  { %v5302_v31 = vmax.f32 %v16199_v6, %v5065_v13  ;;  %v5067_v38 = vpop.f32.mrb[227].mxu0  ;;  %v16205_v13 = vld [vmem:[#allocation70_spill] sm:$0xff] }
 0x6c1   :  { %v5070_v58 = vpop.f32.mrb[228].mxu0 }
 0x6c2   :  { %v5303_v15 = vmax.f32 %v16200_v8, %v5070_v58  ;;  %v5072_v35 = vpop.f32.mrb[229].mxu0  ;;  %10517 = vmatmul.mubr.msk.bf16.vlgmr.msra.gmra.mrb[128].mxu1 %vm5507_vm4, %v14274_v41  ;;  %v11641_v41 = vld [vmem:[%s15396_s5 + $0x84] sm:$0xff]  }
 0x6c3   :  { %v5073_v25 = vpop.f32.mrb[230].mxu0  ;;  %10520 = vmatprep.mubr.msk.bf16.mxu1 %vm5507_vm4, %v16172_v61  ;;  %10581 = vmatpush3.bf16.msra.mxu1 %v14726_v3  ;;  %v16206_v58 = vld [vmem:[#allocation75_spill] sm:$0xff] }
 0x6c4   :  { %v5304_v56 = vmax.f32 %v16201_v60, %v5073_v25  ;;  %v5075_v32 = vpop.f32.mrb[231].mxu0  ;;  %10582 = vmatprep.subr.bf16.mxu1 %v11639_v50 }
 0x6c5   :  { %v16207_v32 = vld [vmem:[#allocation76_spill] sm:$0xff] }
 0x6c7   :  { %10583 = vmatpush3.bf16.msra.mxu1 %v11639_v50 }
 0x6c8   :  { %10584 = vmatprep.subr.bf16.mxu1 %v11640_v59 }
 0x6c9   :  { %v5078_v7 = vpop.f32.mrb[232].mxu0 }
 0x6ca   :  { %v5305_v45 = vmax.f32 %v16202_v22, %v5078_v7  ;;  %v5080_v61 = vpop.f32.mrb[233].mxu0  ;;  %10521 = vmatmul.mubr.msk.bf16.gmra.mrb[132].mxu1 %vm5507_vm4, %v16175_v46  ;;  %v14862_v46 = vld [vmem:[%s15396_s5 + $0x90] sm:$0xff]  }
 0x6cb   :  { %v5081_v3 = vpop.f32.mrb[234].mxu0  ;;  %10524 = vmatprep.mubr.msk.bf16.mxu1 %vm5507_vm4, %v14349_v18  ;;  %10585 = vmatpush3.bf16.msra.mxu1 %v11640_v59 }
 0x6cc   :  { %v5306_v0 = vmax.f32 %v16203_v48, %v5081_v3  ;;  %v5083_v19 = vpop.f32.mrb[235].mxu0  ;;  %10586 = vmatprep.subr.bf16.mxu1 %v11641_v41  ;;  %v16208_v3 = vld [vmem:[#allocation74_spill] sm:$0xff] }
 0x6cf   :  { %10587 = vmatpush3.bf16.msra.mxu1 %v11641_v41 }
 0x6d0   :  { %11283 = vmatprep.subr.msk.bf16.mxu1 %vm5604_vm3, %v11643_v47 }
 0x6d1   :  { %v5086_v24 = vpop.f32.mrb[236].mxu0 }
 0x6d2   :  { %v5307_v4 = vmax.f32 %v16204_v36, %v5086_v24  ;;  %v5088_v23 = vpop.f32.mrb[237].mxu0  ;;  %10525 = vmatmul.mubr.msk.bf16.gmra.mrb[136].mxu1 %vm5507_vm4, %v16178_v37 }
 0x6d3   :  { %v5089_v54 = vpop.f32.mrb[238].mxu0  ;;  %10528 = vmatprep.mubr.msk.bf16.mxu1 %vm5507_vm4, %v16179_v2  ;;  %10589 = vmatpush3.bf16.msra.mxu1 %v6683_v40  ;;  %v16209_v40 = vld [vmem:[#allocation79_spill] sm:$0xff] }
 0x6d4   :  { %v5308_v6 = vmax.f32 %v16205_v13, %v5089_v54  ;;  %v5091_v38 = vpop.f32.mrb[239].mxu0  ;;  %10654 = vmatprep.subr.bf16.mxu1 %v14862_v46  ;;  %v16210_v13 = vld [vmem:[#allocation77_spill] sm:$0xff] }
 0x6d9   :  { %v5094_v50 = vpop.f32.mrb[240].mxu0 }
 0x6da   :  { %v5309_v8 = vmax.f32 %v16206_v58, %v5094_v50  ;;  %v5096_v35 = vpop.f32.mrb[241].mxu0  ;;  %10529 = vmatmul.mubr.msk.bf16.gmra.mrb[140].mxu1 %vm5507_vm4, %v16182_v53 }
 0x6db   :  { %v5097_v25 = vpop.f32.mrb[242].mxu0  ;;  %10532 = vmatprep.mubr.msk.bf16.mxu1 %vm5507_vm4, %v14405_v30 }
 0x6dc   :  { %v14876_v60 = vmax.f32 %v5301_v63, %v5309_v8  ;;  %v5310_v59 = vmax.f32 %v16207_v32, %v5097_v25  ;;  %v5099_v41 = vpop.f32.mrb[243].mxu0  ;;  %v16211_v8 = vld [vmem:[#allocation80_spill] sm:$0xff] }
 0x6dd   :  { %v16212_v41 = vld [vmem:[#allocation78_spill] sm:$0xff] }
 0x6de   :  { %v14879_v7 = vmax.f32 %v5302_v31, %v5310_v59 }
 0x6e0   :  { %v5457_v22 = vpack.c.bf16 %v14879_v7, %v14876_v60 }
 0x6e1   :  { %v5102_v61 = vpop.f32.mrb[244].mxu0 }
 0x6e2   :  { %v5311_v48 = vmax.f32 %v16208_v3, %v5102_v61  ;;  %v5104_v19 = vpop.f32.mrb[245].mxu0  ;;  %10533 = vmatmul.mubr.msk.bf16.gmra.mrb[144].mxu1 %vm5507_vm4, %v14417_v49 }
 0x6e3   :  { %v5105_v47 = vpop.f32.mrb[246].mxu0  ;;  %10536 = vmatprep.mubr.msk.bf16.mxu1 %vm5507_vm4, %v14426_v26  ;;  %v16213_v19 = vld [vmem:[#allocation83_spill] sm:$0xff] }
 0x6e4   :  { %v14888_v63 = vmax.f32 %v5303_v15, %v5311_v48  ;;  %v5312_v24 = vmax.f32 %v16209_v40, %v5105_v47  ;;  %v5107_v31 = vpop.f32.mrb[247].mxu0 }
 0x6e5   :  { %v11647_v31 = vld [vmem:[%s15397_s8 + $0x28] sm:$0xff]  }
 0x6e6   :  { %v14891_v36 = vmax.f32 %v5304_v56, %v5312_v24  ;;  %10818 = vmatprep.subr.bf16.mxu0 %v11647_v31 }
 0x6e7   :  { %10819 = vmatpush3.bf16.msra.mxu0 %v11647_v31 }
 0x6e8   :  { %v5458_v23 = vpack.c.bf16 %v14891_v36, %v14888_v63 }
 0x6e9   :  { %v5110_v54 = vpop.f32.mrb[248].mxu0 }
 0x6ea   :  { %v5313_v38 = vmax.f32 %v16210_v13, %v5110_v54  ;;  %v5112_v50 = vpop.f32.mrb[249].mxu0  ;;  %10537 = vmatmul.mubr.msk.bf16.gmra.mrb[148].mxu1 %vm5507_vm4, %v14435_v20  ;;  %v11654_v54 = vld [vmem:[%s15397_s8 + $0x38] sm:$0xff]   ;;  %v11652_v13 = vld [vmem:[%s15398_s7 + $0x8] sm:$0xff]  }
 0x6eb   :  { %v5113_v58 = vpop.f32.mrb[250].mxu0  ;;  %10540 = vmatprep.mubr.msk.bf16.mxu1 %vm5507_vm4, %v14467_v44 }
 0x6ec   :  { %v14900_v15 = vmax.f32 %v5305_v45, %v5313_v38  ;;  %v5314_v35 = vmax.f32 %v16211_v8, %v5113_v58  ;;  %v5115_v56 = vpop.f32.mrb[251].mxu0  ;;  %v11653_v38 = vld [vmem:[%s15398_s7 + $0x10] sm:$0xff]  }
 0x6ee   :  { %v14903_v25 = vmax.f32 %v5306_v0, %v5314_v35 }
 0x6f0   :  { %v5459_v32 = vpack.c.bf16 %v14903_v25, %v14900_v15 }
 0x6f1   :  { %v5118_v59 = vpop.f32.mrb[252].mxu0 }
 0x6f2   :  { %v5315_v61 = vmax.f32 %v16212_v41, %v5118_v59  ;;  %v5120_v3 = vpop.f32.mrb[253].mxu0  ;;  %10541 = vmatmul.mubr.msk.bf16.gmra.mrb[152].mxu1 %vm5507_vm4, %v14479_v42 }
 0x6f3   :  { %v5121_v48 = vpop.f32.mrb[254].mxu0  ;;  %10544 = vmatprep.mubr.msk.bf16.mxu1 %vm5507_vm4, %v14488_v16 }
 0x6f4   :  { %v14912_v45 = vmax.f32 %v5307_v4, %v5315_v61  ;;  %v5316_v47 = vmax.f32 %v16213_v19, %v5121_v48  ;;  %v5123_v0 = vpop.f32.mrb[255].mxu0  ;;  %v11645_v4 = vld [vmem:[%s15396_s5 + $0x98] sm:$0xff]  }
 0x6f6   :  { %v14915_v40 = vmax.f32 %v5308_v6, %v5316_v47  ;;  %v11646_v6 = vld [vmem:[%s15396_s5 + $0xa0] sm:$0xff]  }
 0x6f8   :  { %v5460_v24 = vpack.c.bf16 %v14915_v40, %v14912_v45 }
 0x6fa   :  { %10545 = vmatmul.mubr.msk.bf16.gmra.mrb[156].mxu1 %vm5507_vm4, %v14497_v34 }
 0x6fb   :  { %10548 = vmatprep.mubr.msk.bf16.mxu1 %vm5507_vm4, %v14535_v39 }
 0x702   :  { %10549 = vmatmul.mubr.msk.bf16.gmra.mrb[160].mxu1 %vm5507_vm4, %v14544_v5 }
 0x703   :  { %10552 = vmatprep.mubr.msk.bf16.mxu1 %vm5507_vm4, %v14558_v27 }
 0x70a   :  { %10553 = vmatmul.mubr.msk.bf16.gmra.mrb[164].mxu1 %vm5507_vm4, %v14567_v12 }
 0x70b   :  { %10556 = vmatprep.mubr.msk.bf16.mxu1 %vm5507_vm4, %v14602_v10 }
 0x712   :  { %10557 = vmatmul.mubr.msk.bf16.gmra.mrb[168].mxu1 %vm5507_vm4, %v14614_v62 }
 0x713   :  { %10560 = vmatprep.mubr.msk.bf16.mxu1 %vm5507_vm4, %v14623_v9 }
 0x71a   :  { %10561 = vmatmul.mubr.msk.bf16.gmra.mrb[172].mxu1 %vm5507_vm4, %v14632_v55 }
 0x71b   :  { %10564 = vmatprep.mubr.msk.bf16.mxu1 %vm5507_vm4, %v14659_v43 }
 0x722   :  { %10565 = vmatmul.mubr.msk.bf16.gmra.mrb[176].mxu1 %vm5507_vm4, %v14665_v1 }
 0x723   :  { %10568 = vmatprep.mubr.msk.bf16.mxu1 %vm5507_vm4, %v14671_v17 }
 0x72a   :  { %10569 = vmatmul.mubr.msk.bf16.gmra.mrb[180].mxu1 %vm5507_vm4, %v14677_v57 }
 0x72b   :  { %10572 = vmatprep.mubr.msk.bf16.mxu1 %vm5507_vm4, %v14741_v29 }
 0x732   :  { %10573 = vmatmul.mubr.msk.bf16.gmra.mrb[184].mxu1 %vm5507_vm4, %v14749_v14 }
 0x733   :  { %10576 = vmatprep.mubr.msk.bf16.mxu1 %vm5507_vm4, %v14757_v52 }
 0x73a   :  { %10577 = vmatmul.mubr.msk.bf16.gmra.mrb[188].mxu1 %vm5507_vm4, %v14765_v21 }
 0x73b   :  { %10590 = vmatprep.mubr.msk.bf16.mxu1 %vm5507_vm4, %v14349_v18  ;;  %v11648_v18 = vld [vmem:[%s15396_s5 + $0xa8] sm:$0xff]  }
 0x742   :  { %10591 = vmatmul.mubr.msk.bf16.vlgmr.msra.gmra.mrb[128].mxu1 %vm5507_vm4, %v16178_v37  ;;  %v11649_v37 = vld [vmem:[%s15396_s5 + $0xb0] ss:$0 sps:$4 sm:$0xff]  }
 0x743   :  { %10594 = vmatprep.mubr.msk.bf16.mxu1 %vm5507_vm4, %v16179_v2  ;;  %10655 = vmatpush3.bf16.msra.mxu1 %v14862_v46  ;;  %v7088_v2 = vsel %vm5604_vm3, %v11649_v37, 0  ;;  %v11651_v46 = vld [vmem:[%s15398_s7] sm:$0xff]  }
 0x744   :  { %10656 = vmatprep.subr.bf16.mxu1 %v11645_v4 }
 0x747   :  { %10657 = vmatpush3.bf16.msra.mxu1 %v11645_v4 }
 0x748   :  { %10658 = vmatprep.subr.bf16.mxu1 %v11646_v6 }
 0x74a   :  { %10595 = vmatmul.mubr.msk.bf16.gmra.mrb[132].mxu1 %vm5507_vm4, %v16182_v53  ;;  %v11650_v53 = vld [vmem:[%s15397_s8 + $0x30] sm:$0xff]  }
 0x74b   :  { %10598 = vmatprep.mubr.msk.bf16.mxu1 %vm5507_vm4, %v14405_v30  ;;  %10659 = vmatpush3.bf16.msra.mxu1 %v11646_v6 }
 0x74c   :  { %10660 = vmatprep.subr.bf16.mxu1 %v11648_v18  ;;  %10820 = vmatprep.subr.bf16.mxu0 %v11650_v53 }
 0x74d   :  { %10821 = vmatpush3.bf16.msra.mxu0 %v11650_v53 }
 0x74e   :  { %10822 = vmatprep.subr.bf16.mxu0 %v11654_v54 }
 0x74f   :  { %10661 = vmatpush3.bf16.msra.mxu1 %v11648_v18 }
 0x750   :  { %11284 = vmatprep.subr.msk.bf16.mxu1 %vm5604_vm3, %v11649_v37 }
 0x751   :  { %10823 = vmatpush3.bf16.msra.mxu0 %v11654_v54 }
 0x752   :  { %10599 = vmatmul.mubr.msk.bf16.gmra.mrb[136].mxu1 %vm5507_vm4, %v14417_v49 }
 0x753   :  { %10602 = vmatprep.mubr.msk.bf16.mxu1 %vm5507_vm4, %v14426_v26  ;;  %10663 = vmatpush3.bf16.msra.mxu1 %v7088_v2 }
 0x754   :  { %10728 = vmatprep.subr.bf16.mxu1 %v11651_v46 }
 0x75a   :  { %10603 = vmatmul.mubr.msk.bf16.gmra.mrb[140].mxu1 %vm5507_vm4, %v14435_v20 }
 0x75b   :  { %10606 = vmatprep.mubr.msk.bf16.mxu1 %vm5507_vm4, %v14467_v44 }
 0x762   :  { %10607 = vmatmul.mubr.msk.bf16.gmra.mrb[144].mxu1 %vm5507_vm4, %v14479_v42 }
 0x763   :  { %10610 = vmatprep.mubr.msk.bf16.mxu1 %vm5507_vm4, %v14488_v16 }
 0x76a   :  { %10611 = vmatmul.mubr.msk.bf16.gmra.mrb[148].mxu1 %vm5507_vm4, %v14497_v34 }
 0x76b   :  { %10614 = vmatprep.mubr.msk.bf16.mxu1 %vm5507_vm4, %v14535_v39 }
 0x772   :  { %10615 = vmatmul.mubr.msk.bf16.gmra.mrb[152].mxu1 %vm5507_vm4, %v14544_v5 }
 0x773   :  { %10618 = vmatprep.mubr.msk.bf16.mxu1 %vm5507_vm4, %v14558_v27 }
 0x77a   :  { %10619 = vmatmul.mubr.msk.bf16.gmra.mrb[156].mxu1 %vm5507_vm4, %v14567_v12 }
 0x77b   :  { %10622 = vmatprep.mubr.msk.bf16.mxu1 %vm5507_vm4, %v14602_v10 }
 0x782   :  { %10623 = vmatmul.mubr.msk.bf16.gmra.mrb[160].mxu1 %vm5507_vm4, %v14614_v62 }
 0x783   :  { %10626 = vmatprep.mubr.msk.bf16.mxu1 %vm5507_vm4, %v14623_v9 }
 0x78a   :  { %10627 = vmatmul.mubr.msk.bf16.gmra.mrb[164].mxu1 %vm5507_vm4, %v14632_v55 }
 0x78b   :  { %10630 = vmatprep.mubr.msk.bf16.mxu1 %vm5507_vm4, %v14659_v43 }
 0x792   :  { %10631 = vmatmul.mubr.msk.bf16.gmra.mrb[168].mxu1 %vm5507_vm4, %v14665_v1 }
 0x793   :  { %10634 = vmatprep.mubr.msk.bf16.mxu1 %vm5507_vm4, %v14671_v17 }
 0x79a   :  { %10635 = vmatmul.mubr.msk.bf16.gmra.mrb[172].mxu1 %vm5507_vm4, %v14677_v57 }
 0x79b   :  { %10638 = vmatprep.mubr.msk.bf16.mxu1 %vm5507_vm4, %v14741_v29 }
 0x7a2   :  { %10639 = vmatmul.mubr.msk.bf16.gmra.mrb[176].mxu1 %vm5507_vm4, %v14749_v14 }
 0x7a3   :  { %10642 = vmatprep.mubr.msk.bf16.mxu1 %vm5507_vm4, %v14757_v52 }
 0x7aa   :  { %10643 = vmatmul.mubr.msk.bf16.gmra.mrb[180].mxu1 %vm5507_vm4, %v14765_v21 }
 0x7ab   :  { %10646 = vmatprep.mubr.msk.bf16.mxu1 %vm5507_vm4, %v14800_v28 }
 0x7b2   :  { %10647 = vmatmul.mubr.msk.bf16.gmra.mrb[184].mxu1 %vm5507_vm4, %v14808_v33 }
 0x7b3   :  { %10650 = vmatprep.mubr.msk.bf16.mxu1 %vm5507_vm4, %v14816_v51 }
 0x7ba   :  { %10651 = vmatmul.mubr.msk.bf16.gmra.mrb[188].mxu1 %vm5507_vm4, %v14824_v11 }
 0x7bb   :  { %10664 = vmatprep.mubr.msk.bf16.mxu1 %vm5507_vm4, %v14405_v30  ;;  %v11655_v30 = vld [vmem:[%s15398_s7 + $0x18] sm:$0xff]  }
 0x7c2   :  { %10665 = vmatmul.mubr.msk.bf16.vlgmr.msra.gmra.mrb[128].mxu1 %vm5507_vm4, %v14417_v49  ;;  %v11656_v49 = vld [vmem:[%s15398_s7 + $0x20] sm:$0xff]  }
 0x7c3   :  { %10668 = vmatprep.mubr.msk.bf16.mxu1 %vm5507_vm4, %v14426_v26  ;;  %10729 = vmatpush3.bf16.msra.mxu1 %v11651_v46  ;;  %v11657_v26 = vld [vmem:[%s15398_s7 + $0x28] sm:$0xff]  }
 0x7c4   :  { %10730 = vmatprep.subr.bf16.mxu1 %v11652_v13 }
 0x7c7   :  { %10731 = vmatpush3.bf16.msra.mxu1 %v11652_v13 }
 0x7c8   :  { %10732 = vmatprep.subr.bf16.mxu1 %v11653_v38 }
 0x7ca   :  { %10669 = vmatmul.mubr.msk.bf16.gmra.mrb[132].mxu1 %vm5507_vm4, %v14435_v20  ;;  %v11658_v20 = vld [vmem:[%s15398_s7 + $0x30] sm:$0xff]  }
 0x7cb   :  { %10672 = vmatprep.mubr.msk.bf16.mxu1 %vm5507_vm4, %v14467_v44  ;;  %10733 = vmatpush3.bf16.msra.mxu1 %v11653_v38  ;;  %v11659_v44 = vld [vmem:[%s15398_s7 + $0x38] sm:$0xff]  }
 0x7cc   :  { %10734 = vmatprep.subr.bf16.mxu1 %v11655_v30 }
 0x7cf   :  { %10735 = vmatpush3.bf16.msra.mxu1 %v11655_v30 }
 0x7d0   :  { %10736 = vmatprep.subr.bf16.mxu1 %v11656_v49 }
 0x7d2   :  { %10673 = vmatmul.mubr.msk.bf16.gmra.mrb[136].mxu1 %vm5507_vm4, %v14479_v42  ;;  %v15140_v42 = vld [vmem:[%s15399_s6] ss:$0 sm:$0xff] }
 0x7d3   :  { %10676 = vmatprep.mubr.msk.bf16.mxu1 %vm5507_vm4, %v14488_v16  ;;  %10737 = vmatpush3.bf16.msra.mxu1 %v11656_v49 }
 0x7d4   :  { %10738 = vmatprep.subr.bf16.mxu1 %v11657_v26 }
 0x7d7   :  { %10739 = vmatpush3.bf16.msra.mxu1 %v11657_v26 }
 0x7d8   :  { %10740 = vmatprep.subr.bf16.mxu1 %v11658_v20 }
 0x7da   :  { %10677 = vmatmul.mubr.msk.bf16.gmra.mrb[140].mxu1 %vm5507_vm4, %v14497_v34 }
 0x7db   :  { %10680 = vmatprep.mubr.msk.bf16.mxu1 %vm5507_vm4, %v14535_v39  ;;  %10741 = vmatpush3.bf16.msra.mxu1 %v11658_v20 }
 0x7dc   :  { %10742 = vmatprep.subr.bf16.mxu1 %v11659_v44 }
 0x7df   :  { %10743 = vmatpush3.bf16.msra.mxu1 %v11659_v44 }
 0x7e2   :  { %10681 = vmatmul.mubr.msk.bf16.gmra.mrb[144].mxu1 %vm5507_vm4, %v14544_v5 }
 0x7e3   :  { %10684 = vmatprep.mubr.msk.bf16.mxu1 %vm5507_vm4, %v14558_v27 }
 0x7ea   :  { %10685 = vmatmul.mubr.msk.bf16.gmra.mrb[148].mxu1 %vm5507_vm4, %v14567_v12 }
 0x7eb   :  { %10688 = vmatprep.mubr.msk.bf16.mxu1 %vm5507_vm4, %v14602_v10 }
 0x7f2   :  { %10689 = vmatmul.mubr.msk.bf16.gmra.mrb[152].mxu1 %vm5507_vm4, %v14614_v62 }
 0x7f3   :  { %10692 = vmatprep.mubr.msk.bf16.mxu1 %vm5507_vm4, %v14623_v9  ;;  %v11660_v9 = vld [vmem:[%s15400_s9 + $0x20] sm:$0xff]  }
 0x7f4   :  { %10888 = vmatprep.subr.bf16.mxu1 %v11660_v9 }
 0x7fa   :  { %10693 = vmatmul.mubr.msk.bf16.gmra.mrb[156].mxu1 %vm5507_vm4, %v14632_v55 }
 0x7fb   :  { %10696 = vmatprep.mubr.msk.bf16.mxu1 %vm5507_vm4, %v14659_v43 }
 0x802   :  { %10697 = vmatmul.mubr.msk.bf16.gmra.mrb[160].mxu1 %vm5507_vm4, %v14665_v1 }
 0x803   :  { %10700 = vmatprep.mubr.msk.bf16.mxu1 %vm5507_vm4, %v14671_v17 }
 0x80a   :  { %10701 = vmatmul.mubr.msk.bf16.gmra.mrb[164].mxu1 %vm5507_vm4, %v14677_v57 }
 0x80b   :  { %10704 = vmatprep.mubr.msk.bf16.mxu1 %vm5507_vm4, %v14741_v29 }
 0x812   :  { %10705 = vmatmul.mubr.msk.bf16.gmra.mrb[168].mxu1 %vm5507_vm4, %v14749_v14 }
 0x813   :  { %10708 = vmatprep.mubr.msk.bf16.mxu1 %vm5507_vm4, %v14757_v52 }
 0x81a   :  { %10709 = vmatmul.mubr.msk.bf16.gmra.mrb[172].mxu1 %vm5507_vm4, %v14765_v21 }
 0x81b   :  { %10712 = vmatprep.mubr.msk.bf16.mxu1 %vm5507_vm4, %v14800_v28  ;;  %v11661_v28 = vld [vmem:[%s15400_s9 + $0x28] sm:$0xff]  }
 0x822   :  { %10713 = vmatmul.mubr.msk.bf16.gmra.mrb[176].mxu1 %vm5507_vm4, %v14808_v33 }
 0x823   :  { %10716 = vmatprep.mubr.msk.bf16.mxu1 %vm5507_vm4, %v14816_v51 }
 0x82a   :  { %10717 = vmatmul.mubr.msk.bf16.gmra.mrb[180].mxu1 %vm5507_vm4, %v14824_v11 }
 0x82b   :  { %10720 = vmatprep.mubr.msk.bf16.mxu1 %vm5507_vm4, %v5457_v22 }
 0x832   :  { %10721 = vmatmul.mubr.msk.bf16.gmra.mrb[184].mxu1 %vm5507_vm4, %v5458_v23 }
 0x833   :  { %10724 = vmatprep.mubr.msk.bf16.mxu1 %vm5507_vm4, %v5459_v32 }
 0x83a   :  { %10725 = vmatmul.mubr.msk.bf16.gmra.mrb[188].mxu1 %vm5507_vm4, %v5460_v24 }
 0x895   :  { %v10666_v16 = vpop.f32.mrb[128].mxu1 }
 0x896   :  { %v7452_v34 = vadd.f32 %v10666_v16, %v15140_v42  ;;  %v7124_v39 = vpop.f32.mrb[129].mxu1 }
 0x897   :  { %v7450_v5 = vadd.f32 %v15140_v42, %v7124_v39  ;;  %v10667_v27 = vpop.f32.mrb[130].mxu1 }
 0x898   :  { %v7453_v12 = vadd.f32 %v10667_v27, %v15140_v42  ;;  %v7127_v10 = vpop.f32.mrb[131].mxu1  ;;  %v7516_v55 = vmax.f32 %v7452_v34, 0.0 }
 0x899   :  { %v7451_v62 = vadd.f32 %v15140_v42, %v7127_v10  ;;  %v7514_v1 = vmax.f32 %v7450_v5, 0.0 }
 0x89a   :  { %v7517_v43 = vmax.f32 %v7453_v12, 0.0 }
 0x89b   :  { %v7515_v17 = vmax.f32 %v7451_v62, 0.0 }
 0x89c   :  { %v7579_v57 = vpack.c.bf16 %v7517_v43, %v7516_v55 }
 0x89d   :  { %v7578_v29 = vpack.c.bf16 %v7515_v17, %v7514_v1  ;;  %v10670_v14 = vpop.f32.mrb[132].mxu1 }
 0x89e   :  { %v7456_v52 = vadd.f32 %v10670_v14, %v15140_v42  ;;  %v7140_v21 = vpop.f32.mrb[133].mxu1 }
 0x89f   :  { %v7454_v33 = vadd.f32 %v15140_v42, %v7140_v21  ;;  %v10671_v51 = vpop.f32.mrb[134].mxu1  ;;  %10744 = vmatprep.mubr.bf16.mxu1 %v7578_v29  ;;  %10824 = vmatprep.mubr.bf16.mxu0 %v7578_v29 }
 0x8a0   :  { %v7457_v11 = vadd.f32 %v10671_v51, %v15140_v42  ;;  %v7143_v60 = vpop.f32.mrb[135].mxu1  ;;  %10745 = vmatmul.mubr.bf16.vlgmr.msra.gmra.mrb[192].mxu1 %v7579_v57  ;;  %10825 = vmatmul.mubr.bf16.vlgmr.msra.gmra.mrb[0].mxu0 %v7579_v57  ;;  %v7520_v22 = vmax.f32 %v7456_v52, 0.0 }
 0x8a1   :  { %v7455_v7 = vadd.f32 %v15140_v42, %v7143_v60  ;;  %10889 = vmatpush3.bf16.msra.mxu1 %v11660_v9  ;;  %v7518_v36 = vmax.f32 %v7454_v33, 0.0 }
 0x8a2   :  { %v7521_v63 = vmax.f32 %v7457_v11, 0.0  ;;  %10890 = vmatprep.subr.bf16.mxu1 %v11661_v28 }
 0x8a3   :  { %v7519_v23 = vmax.f32 %v7455_v7, 0.0 }
 0x8a4   :  { %v7581_v50 = vpack.c.bf16 %v7521_v63, %v7520_v22 }
 0x8a5   :  { %v7580_v58 = vpack.c.bf16 %v7519_v23, %v7518_v36  ;;  %v10674_v15 = vpop.f32.mrb[136].mxu1  ;;  %10891 = vmatpush3.bf16.msra.mxu1 %v11661_v28 }
 0x8a6   :  { %v7460_v8 = vadd.f32 %v10674_v15, %v15140_v42  ;;  %v7156_v35 = vpop.f32.mrb[137].mxu1 }
 0x8a7   :  { %v7458_v56 = vadd.f32 %v15140_v42, %v7156_v35  ;;  %v10675_v25 = vpop.f32.mrb[138].mxu1  ;;  %10748 = vmatprep.mubr.bf16.mxu1 %v7580_v58  ;;  %10828 = vmatprep.mubr.bf16.mxu0 %v7580_v58 }
 0x8a8   :  { %v7461_v32 = vadd.f32 %v10675_v25, %v15140_v42  ;;  %v7159_v59 = vpop.f32.mrb[139].mxu1  ;;  %10749 = vmatmul.mubr.bf16.gmra.mrb[196].mxu1 %v7581_v50  ;;  %10829 = vmatmul.mubr.bf16.gmra.mrb[4].mxu0 %v7581_v50  ;;  %v7524_v61 = vmax.f32 %v7460_v8, 0.0 }
 0x8a9   :  { %v7459_v41 = vadd.f32 %v15140_v42, %v7159_v59  ;;  %v7522_v48 = vmax.f32 %v7458_v56, 0.0 }
 0x8aa   :  { %v7525_v3 = vmax.f32 %v7461_v32, 0.0 }
 0x8ab   :  { %v7523_v45 = vmax.f32 %v7459_v41, 0.0 }
 0x8ac   :  { %v7583_v19 = vpack.c.bf16 %v7525_v3, %v7524_v61 }
 0x8ad   :  { %v7582_v47 = vpack.c.bf16 %v7523_v45, %v7522_v48  ;;  %v10678_v0 = vpop.f32.mrb[140].mxu1 }
 0x8ae   :  { %v7464_v40 = vadd.f32 %v10678_v0, %v15140_v42  ;;  %v7172_v24 = vpop.f32.mrb[141].mxu1 }
 0x8af   :  { %v7462_v31 = vadd.f32 %v15140_v42, %v7172_v24  ;;  %v10679_v4 = vpop.f32.mrb[142].mxu1  ;;  %10752 = vmatprep.mubr.bf16.mxu1 %v7582_v47  ;;  %10832 = vmatprep.mubr.bf16.mxu0 %v7582_v47 }
 0x8b0   :  { %v7465_v6 = vadd.f32 %v10679_v4, %v15140_v42  ;;  %v7175_v18 = vpop.f32.mrb[143].mxu1  ;;  %10753 = vmatmul.mubr.bf16.gmra.mrb[200].mxu1 %v7583_v19  ;;  %10833 = vmatmul.mubr.bf16.gmra.mrb[8].mxu0 %v7583_v19  ;;  %v7528_v2 = vmax.f32 %v7464_v40, 0.0 }
 0x8b1   :  { %v7463_v37 = vadd.f32 %v15140_v42, %v7175_v18  ;;  %v7526_v46 = vmax.f32 %v7462_v31, 0.0 }
 0x8b2   :  { %v7529_v53 = vmax.f32 %v7465_v6, 0.0 }
 0x8b3   :  { %v7527_v54 = vmax.f32 %v7463_v37, 0.0 }
 0x8b4   :  { %v7585_v13 = vpack.c.bf16 %v7529_v53, %v7528_v2 }
 0x8b5   :  { %v7584_v38 = vpack.c.bf16 %v7527_v54, %v7526_v46  ;;  %v10682_v30 = vpop.f32.mrb[144].mxu1 }
 0x8b6   :  { %v7468_v49 = vadd.f32 %v10682_v30, %v15140_v42  ;;  %v7188_v26 = vpop.f32.mrb[145].mxu1 }
 0x8b7   :  { %v7466_v20 = vadd.f32 %v15140_v42, %v7188_v26  ;;  %v10683_v44 = vpop.f32.mrb[146].mxu1  ;;  %10756 = vmatprep.mubr.bf16.mxu1 %v7584_v38  ;;  %10836 = vmatprep.mubr.bf16.mxu0 %v7584_v38 }
 0x8b8   :  { %v7469_v16 = vadd.f32 %v10683_v44, %v15140_v42  ;;  %v7191_v34 = vpop.f32.mrb[147].mxu1  ;;  %10757 = vmatmul.mubr.bf16.gmra.mrb[204].mxu1 %v7585_v13  ;;  %10837 = vmatmul.mubr.bf16.gmra.mrb[12].mxu0 %v7585_v13  ;;  %v7532_v5 = vmax.f32 %v7468_v49, 0.0 }
 0x8b9   :  { %v7467_v39 = vadd.f32 %v15140_v42, %v7191_v34  ;;  %v7530_v12 = vmax.f32 %v7466_v20, 0.0 }
 0x8ba   :  { %v7533_v27 = vmax.f32 %v7469_v16, 0.0 }
 0x8bb   :  { %v7531_v10 = vmax.f32 %v7467_v39, 0.0 }
 0x8bc   :  { %v7587_v62 = vpack.c.bf16 %v7533_v27, %v7532_v5 }
 0x8bd   :  { %v7586_v9 = vpack.c.bf16 %v7531_v10, %v7530_v12  ;;  %v10686_v55 = vpop.f32.mrb[148].mxu1 }
 0x8be   :  { %v7472_v43 = vadd.f32 %v10686_v55, %v15140_v42  ;;  %v7204_v1 = vpop.f32.mrb[149].mxu1 }
 0x8bf   :  { %v7470_v17 = vadd.f32 %v15140_v42, %v7204_v1  ;;  %v10687_v57 = vpop.f32.mrb[150].mxu1  ;;  %10760 = vmatprep.mubr.bf16.mxu1 %v7586_v9  ;;  %10840 = vmatprep.mubr.bf16.mxu0 %v7586_v9 }
 0x8c0   :  { %v7473_v29 = vadd.f32 %v10687_v57, %v15140_v42  ;;  %v7207_v14 = vpop.f32.mrb[151].mxu1  ;;  %10761 = vmatmul.mubr.bf16.gmra.mrb[208].mxu1 %v7587_v62  ;;  %10841 = vmatmul.mubr.bf16.gmra.mrb[16].mxu0 %v7587_v62  ;;  %v7536_v21 = vmax.f32 %v7472_v43, 0.0 }
 0x8c1   :  { %v7471_v52 = vadd.f32 %v15140_v42, %v7207_v14  ;;  %v7534_v33 = vmax.f32 %v7470_v17, 0.0 }
 0x8c2   :  { %v7537_v28 = vmax.f32 %v7473_v29, 0.0 }
 0x8c3   :  { %v7535_v51 = vmax.f32 %v7471_v52, 0.0 }
 0x8c4   :  { %v7589_v11 = vpack.c.bf16 %v7537_v28, %v7536_v21 }
 0x8c5   :  { %v7588_v60 = vpack.c.bf16 %v7535_v51, %v7534_v33  ;;  %v10690_v7 = vpop.f32.mrb[152].mxu1 }
 0x8c6   :  { %v7476_v22 = vadd.f32 %v10690_v7, %v15140_v42  ;;  %v7220_v63 = vpop.f32.mrb[153].mxu1 }
 0x8c7   :  { %v7474_v36 = vadd.f32 %v15140_v42, %v7220_v63  ;;  %v10691_v23 = vpop.f32.mrb[154].mxu1  ;;  %10764 = vmatprep.mubr.bf16.mxu1 %v7588_v60  ;;  %10844 = vmatprep.mubr.bf16.mxu0 %v7588_v60 }
 0x8c8   :  { %v7477_v50 = vadd.f32 %v10691_v23, %v15140_v42  ;;  %v7223_v58 = vpop.f32.mrb[155].mxu1  ;;  %10765 = vmatmul.mubr.bf16.gmra.mrb[212].mxu1 %v7589_v11  ;;  %10845 = vmatmul.mubr.bf16.gmra.mrb[20].mxu0 %v7589_v11  ;;  %v7540_v8 = vmax.f32 %v7476_v22, 0.0 }
 0x8c9   :  { %v7475_v15 = vadd.f32 %v15140_v42, %v7223_v58  ;;  %v7538_v56 = vmax.f32 %v7474_v36, 0.0 }
 0x8ca   :  { %v7541_v35 = vmax.f32 %v7477_v50, 0.0 }
 0x8cb   :  { %v7539_v25 = vmax.f32 %v7475_v15, 0.0 }
 0x8cc   :  { %v7591_v32 = vpack.c.bf16 %v7541_v35, %v7540_v8 }
 0x8cd   :  { %v7590_v59 = vpack.c.bf16 %v7539_v25, %v7538_v56  ;;  %v10694_v41 = vpop.f32.mrb[156].mxu1 }
 0x8ce   :  { %v7480_v61 = vadd.f32 %v10694_v41, %v15140_v42  ;;  %v7236_v3 = vpop.f32.mrb[157].mxu1 }
 0x8cf   :  { %v7478_v48 = vadd.f32 %v15140_v42, %v7236_v3  ;;  %v10695_v45 = vpop.f32.mrb[158].mxu1  ;;  %10768 = vmatprep.mubr.bf16.mxu1 %v7590_v59  ;;  %10848 = vmatprep.mubr.bf16.mxu0 %v7590_v59 }
 0x8d0   :  { %v7481_v19 = vadd.f32 %v10695_v45, %v15140_v42  ;;  %v7239_v47 = vpop.f32.mrb[159].mxu1  ;;  %10769 = vmatmul.mubr.bf16.gmra.mrb[216].mxu1 %v7591_v32  ;;  %10849 = vmatmul.mubr.bf16.gmra.mrb[24].mxu0 %v7591_v32  ;;  %v7544_v40 = vmax.f32 %v7480_v61, 0.0 }
 0x8d1   :  { %v7479_v0 = vadd.f32 %v15140_v42, %v7239_v47  ;;  %v7542_v31 = vmax.f32 %v7478_v48, 0.0 }
 0x8d2   :  { %v7545_v24 = vmax.f32 %v7481_v19, 0.0 }
 0x8d3   :  { %v7543_v4 = vmax.f32 %v7479_v0, 0.0 }
 0x8d4   :  { %v7593_v6 = vpack.c.bf16 %v7545_v24, %v7544_v40 }
 0x8d5   :  { %v7592_v18 = vpack.c.bf16 %v7543_v4, %v7542_v31  ;;  %v10698_v37 = vpop.f32.mrb[160].mxu1 }
 0x8d6   :  { %v7484_v2 = vadd.f32 %v10698_v37, %v15140_v42  ;;  %v7252_v53 = vpop.f32.mrb[161].mxu1 }
 0x8d7   :  { %v7482_v46 = vadd.f32 %v15140_v42, %v7252_v53  ;;  %v10699_v54 = vpop.f32.mrb[162].mxu1  ;;  %10772 = vmatprep.mubr.bf16.mxu1 %v7592_v18  ;;  %10852 = vmatprep.mubr.bf16.mxu0 %v7592_v18 }
 0x8d8   :  { %v7485_v13 = vadd.f32 %v10699_v54, %v15140_v42  ;;  %v7255_v38 = vpop.f32.mrb[163].mxu1  ;;  %10773 = vmatmul.mubr.bf16.gmra.mrb[220].mxu1 %v7593_v6  ;;  %10853 = vmatmul.mubr.bf16.gmra.mrb[28].mxu0 %v7593_v6  ;;  %v7548_v49 = vmax.f32 %v7484_v2, 0.0 }
 0x8d9   :  { %v7483_v30 = vadd.f32 %v15140_v42, %v7255_v38  ;;  %v7546_v20 = vmax.f32 %v7482_v46, 0.0 }
 0x8da   :  { %v7549_v26 = vmax.f32 %v7485_v13, 0.0 }
 0x8db   :  { %v7547_v44 = vmax.f32 %v7483_v30, 0.0 }
 0x8dc   :  { %v7595_v16 = vpack.c.bf16 %v7549_v26, %v7548_v49 }
 0x8dd   :  { %v7594_v34 = vpack.c.bf16 %v7547_v44, %v7546_v20  ;;  %v10702_v39 = vpop.f32.mrb[164].mxu1 }
 0x8de   :  { %v7488_v5 = vadd.f32 %v10702_v39, %v15140_v42  ;;  %v7268_v27 = vpop.f32.mrb[165].mxu1 }
 0x8df   :  { %v7486_v12 = vadd.f32 %v15140_v42, %v7268_v27  ;;  %v10703_v10 = vpop.f32.mrb[166].mxu1  ;;  %10776 = vmatprep.mubr.bf16.mxu1 %v7594_v34  ;;  %10856 = vmatprep.mubr.bf16.mxu0 %v7594_v34 }
 0x8e0   :  { %v7489_v62 = vadd.f32 %v10703_v10, %v15140_v42  ;;  %v7271_v9 = vpop.f32.mrb[167].mxu1  ;;  %10777 = vmatmul.mubr.bf16.gmra.mrb[224].mxu1 %v7595_v16  ;;  %10857 = vmatmul.mubr.bf16.gmra.mrb[32].mxu0 %v7595_v16  ;;  %v7552_v43 = vmax.f32 %v7488_v5, 0.0  ;;  %v11662_v16 = vld [vmem:[%s15400_s9 + $0x30] sm:$0xff]  }
 0x8e1   :  { %v7487_v55 = vadd.f32 %v15140_v42, %v7271_v9  ;;  %v7550_v17 = vmax.f32 %v7486_v12, 0.0  ;;  %10892 = vmatprep.subr.bf16.mxu1 %v11662_v16 }
 0x8e2   :  { %v7553_v1 = vmax.f32 %v7489_v62, 0.0  ;;  %10893 = vmatpush3.bf16.msra.mxu1 %v11662_v16 }
 0x8e3   :  { %v7551_v57 = vmax.f32 %v7487_v55, 0.0 }
 0x8e4   :  { %v7597_v29 = vpack.c.bf16 %v7553_v1, %v7552_v43 }
 0x8e5   :  { %v7596_v14 = vpack.c.bf16 %v7551_v57, %v7550_v17  ;;  %v10706_v52 = vpop.f32.mrb[168].mxu1 }
 0x8e6   :  { %v7492_v21 = vadd.f32 %v10706_v52, %v15140_v42  ;;  %v7284_v28 = vpop.f32.mrb[169].mxu1 }
 0x8e7   :  { %v7490_v33 = vadd.f32 %v15140_v42, %v7284_v28  ;;  %v10707_v51 = vpop.f32.mrb[170].mxu1  ;;  %10780 = vmatprep.mubr.bf16.mxu1 %v7596_v14  ;;  %10860 = vmatprep.mubr.bf16.mxu0 %v7596_v14 }
 0x8e8   :  { %v7493_v11 = vadd.f32 %v10707_v51, %v15140_v42  ;;  %v7287_v60 = vpop.f32.mrb[171].mxu1  ;;  %10781 = vmatmul.mubr.bf16.gmra.mrb[228].mxu1 %v7597_v29  ;;  %10861 = vmatmul.mubr.bf16.gmra.mrb[36].mxu0 %v7597_v29  ;;  %v7556_v22 = vmax.f32 %v7492_v21, 0.0 }
 0x8e9   :  { %v7491_v7 = vadd.f32 %v15140_v42, %v7287_v60  ;;  %v7554_v36 = vmax.f32 %v7490_v33, 0.0 }
 0x8ea   :  { %v7557_v63 = vmax.f32 %v7493_v11, 0.0 }
 0x8eb   :  { %v7555_v23 = vmax.f32 %v7491_v7, 0.0 }
 0x8ec   :  { %v7599_v50 = vpack.c.bf16 %v7557_v63, %v7556_v22 }
 0x8ed   :  { %v7598_v58 = vpack.c.bf16 %v7555_v23, %v7554_v36  ;;  %v10710_v15 = vpop.f32.mrb[172].mxu1 }
 0x8ee   :  { %v7496_v8 = vadd.f32 %v10710_v15, %v15140_v42  ;;  %v7300_v35 = vpop.f32.mrb[173].mxu1 }
 0x8ef   :  { %v7494_v56 = vadd.f32 %v15140_v42, %v7300_v35  ;;  %v10711_v25 = vpop.f32.mrb[174].mxu1  ;;  %10784 = vmatprep.mubr.bf16.mxu1 %v7598_v58  ;;  %10864 = vmatprep.mubr.bf16.mxu0 %v7598_v58 }
 0x8f0   :  { %v7497_v32 = vadd.f32 %v10711_v25, %v15140_v42  ;;  %v7303_v59 = vpop.f32.mrb[175].mxu1  ;;  %10785 = vmatmul.mubr.bf16.gmra.mrb[232].mxu1 %v7599_v50  ;;  %10865 = vmatmul.mubr.bf16.gmra.mrb[40].mxu0 %v7599_v50  ;;  %v7560_v61 = vmax.f32 %v7496_v8, 0.0 }
 0x8f1   :  { %v7495_v41 = vadd.f32 %v15140_v42, %v7303_v59  ;;  %v7558_v48 = vmax.f32 %v7494_v56, 0.0 }
 0x8f2   :  { %v7561_v3 = vmax.f32 %v7497_v32, 0.0 }
 0x8f3   :  { %v7559_v45 = vmax.f32 %v7495_v41, 0.0 }
 0x8f4   :  { %v7601_v19 = vpack.c.bf16 %v7561_v3, %v7560_v61  ;;  %v11663_v61 = vld [vmem:[%s15400_s9 + $0x38] sm:$0xff]  }
 0x8f5   :  { %v7600_v47 = vpack.c.bf16 %v7559_v45, %v7558_v48  ;;  %v10714_v0 = vpop.f32.mrb[176].mxu1  ;;  %10894 = vmatprep.subr.bf16.mxu1 %v11663_v61 }
 0x8f6   :  { %v7500_v40 = vadd.f32 %v10714_v0, %v15140_v42  ;;  %v7316_v24 = vpop.f32.mrb[177].mxu1  ;;  %10895 = vmatpush3.bf16.msra.mxu1 %v11663_v61 }
 0x8f7   :  { %v7498_v31 = vadd.f32 %v15140_v42, %v7316_v24  ;;  %v10715_v4 = vpop.f32.mrb[178].mxu1  ;;  %10788 = vmatprep.mubr.bf16.mxu1 %v7600_v47  ;;  %10868 = vmatprep.mubr.bf16.mxu0 %v7600_v47 }
 0x8f8   :  { %v7501_v6 = vadd.f32 %v10715_v4, %v15140_v42  ;;  %v7319_v18 = vpop.f32.mrb[179].mxu1  ;;  %10789 = vmatmul.mubr.bf16.gmra.mrb[236].mxu1 %v7601_v19  ;;  %10869 = vmatmul.mubr.bf16.gmra.mrb[44].mxu0 %v7601_v19  ;;  %v7564_v2 = vmax.f32 %v7500_v40, 0.0 }
 0x8f9   :  { %v7499_v37 = vadd.f32 %v15140_v42, %v7319_v18  ;;  %v7562_v46 = vmax.f32 %v7498_v31, 0.0 }
 0x8fa   :  { %v7565_v53 = vmax.f32 %v7501_v6, 0.0 }
 0x8fb   :  { %v7563_v54 = vmax.f32 %v7499_v37, 0.0 }
 0x8fc   :  { %v7603_v13 = vpack.c.bf16 %v7565_v53, %v7564_v2 }
 0x8fd   :  { %v7602_v38 = vpack.c.bf16 %v7563_v54, %v7562_v46  ;;  %v10718_v30 = vpop.f32.mrb[180].mxu1 }
 0x8fe   :  { %v7504_v49 = vadd.f32 %v10718_v30, %v15140_v42  ;;  %v7332_v26 = vpop.f32.mrb[181].mxu1 }
 0x8ff   :  { %v7502_v20 = vadd.f32 %v15140_v42, %v7332_v26  ;;  %v10719_v44 = vpop.f32.mrb[182].mxu1  ;;  %10792 = vmatprep.mubr.bf16.mxu1 %v7602_v38  ;;  %10872 = vmatprep.mubr.bf16.mxu0 %v7602_v38 }
 0x900   :  { %v7505_v34 = vadd.f32 %v10719_v44, %v15140_v42  ;;  %v7335_v39 = vpop.f32.mrb[183].mxu1  ;;  %10793 = vmatmul.mubr.bf16.gmra.mrb[240].mxu1 %v7603_v13  ;;  %10873 = vmatmul.mubr.bf16.gmra.mrb[48].mxu0 %v7603_v13  ;;  %v7568_v27 = vmax.f32 %v7504_v49, 0.0 }
 0x901   :  { %v7503_v5 = vadd.f32 %v15140_v42, %v7335_v39  ;;  %v7566_v10 = vmax.f32 %v7502_v20, 0.0 }
 0x902   :  { %v7569_v12 = vmax.f32 %v7505_v34, 0.0 }
 0x903   :  { %v7567_v62 = vmax.f32 %v7503_v5, 0.0 }
 0x904   :  { %v7605_v9 = vpack.c.bf16 %v7569_v12, %v7568_v27 }
 0x905   :  { %v7604_v55 = vpack.c.bf16 %v7567_v62, %v7566_v10  ;;  %v10722_v43 = vpop.f32.mrb[184].mxu1 }
 0x906   :  { %v7508_v1 = vadd.f32 %v10722_v43, %v15140_v42  ;;  %v7348_v17 = vpop.f32.mrb[185].mxu1 }
 0x907   :  { %v7506_v57 = vadd.f32 %v15140_v42, %v7348_v17  ;;  %v10723_v29 = vpop.f32.mrb[186].mxu1  ;;  %10796 = vmatprep.mubr.bf16.mxu1 %v7604_v55  ;;  %10876 = vmatprep.mubr.bf16.mxu0 %v7604_v55 }
 0x908   :  { %v7509_v14 = vadd.f32 %v10723_v29, %v15140_v42  ;;  %v7351_v52 = vpop.f32.mrb[187].mxu1  ;;  %10797 = vmatmul.mubr.bf16.gmra.mrb[244].mxu1 %v7605_v9  ;;  %10877 = vmatmul.mubr.bf16.gmra.mrb[52].mxu0 %v7605_v9  ;;  %v7572_v28 = vmax.f32 %v7508_v1, 0.0 }
 0x909   :  { %v7507_v21 = vadd.f32 %v15140_v42, %v7351_v52  ;;  %v7570_v51 = vmax.f32 %v7506_v57, 0.0 }
 0x90a   :  { %v7573_v33 = vmax.f32 %v7509_v14, 0.0 }
 0x90b   :  { %v7571_v11 = vmax.f32 %v7507_v21, 0.0 }
 0x90c   :  { %v7607_v60 = vpack.c.bf16 %v7573_v33, %v7572_v28 }
 0x90d   :  { %v7606_v7 = vpack.c.bf16 %v7571_v11, %v7570_v51  ;;  %v10726_v22 = vpop.f32.mrb[188].mxu1 }
 0x90e   :  { %v7512_v63 = vadd.f32 %v10726_v22, %v15140_v42  ;;  %v7364_v36 = vpop.f32.mrb[189].mxu1 }
 0x90f   :  { %v7510_v23 = vadd.f32 %v15140_v42, %v7364_v36  ;;  %v10727_v50 = vpop.f32.mrb[190].mxu1  ;;  %10800 = vmatprep.mubr.bf16.mxu1 %v7606_v7  ;;  %10880 = vmatprep.mubr.bf16.mxu0 %v7606_v7 }
 0x910   :  { %v7513_v58 = vadd.f32 %v10727_v50, %v15140_v42  ;;  %v7367_v15 = vpop.f32.mrb[191].mxu1  ;;  %10801 = vmatmul.mubr.bf16.gmra.mrb[248].mxu1 %v7607_v60  ;;  %10881 = vmatmul.mubr.bf16.gmra.mrb[56].mxu0 %v7607_v60  ;;  %v7576_v35 = vmax.f32 %v7512_v63, 0.0 }
 0x911   :  { %v7511_v8 = vadd.f32 %v15140_v42, %v7367_v15  ;;  %v7574_v25 = vmax.f32 %v7510_v23, 0.0  ;;  %v15221_v42 = vld [vmem:[%s15400_s9] sm:$0xff]  }
 0x912   :  { %v7577_v56 = vmax.f32 %v7513_v58, 0.0  ;;  %10904 = vmatprep.subr.bf16.mxu1 %v15221_v42 }
 0x913   :  { %v7575_v32 = vmax.f32 %v7511_v8, 0.0 }
 0x914   :  { %v7609_v59 = vpack.c.bf16 %v7577_v56, %v7576_v35 }
 0x915   :  { %v7608_v41 = vpack.c.bf16 %v7575_v32, %v7574_v25 }
 0x917   :  { %10804 = vmatprep.mubr.bf16.mxu1 %v7608_v41  ;;  %10884 = vmatprep.mubr.bf16.mxu0 %v7608_v41 }
 0x918   :  { %10805 = vmatmul.mubr.bf16.gmra.mrb[252].mxu1 %v7609_v59  ;;  %10885 = vmatmul.mubr.bf16.gmra.mrb[60].mxu0 %v7609_v59 }
 0x973   :  { %v10746_v3 = vpop.f32.mrb[192].mxu1  ;;  %v10826_v48 = vpop.f32.mrb[0].mxu0 }
 0x974   :  { %v8318_v45 = vmax.f32 %v10746_v3, %v10826_v48  ;;  %v7708_v19 = vpop.f32.mrb[193].mxu1  ;;  %v8061_v47 = vpop.f32.mrb[1].mxu0 }
 0x975   :  { %v8316_v0 = vmax.f32 %v7708_v19, %v8061_v47  ;;  %v10747_v40 = vpop.f32.mrb[194].mxu1  ;;  %v10827_v24 = vpop.f32.mrb[2].mxu0 }
 0x976   :  { %v8319_v31 = vmax.f32 %v10747_v40, %v10827_v24  ;;  %v7711_v4 = vpop.f32.mrb[195].mxu1  ;;  %v8064_v6 = vpop.f32.mrb[3].mxu0 }
 0x977   :  { %v8317_v18 = vmax.f32 %v7711_v4, %v8064_v6 }
 0x97b   :  { %v10750_v37 = vpop.f32.mrb[196].mxu1  ;;  %v10830_v2 = vpop.f32.mrb[4].mxu0 }
 0x97c   :  { %v8322_v53 = vmax.f32 %v10750_v37, %v10830_v2  ;;  %v7724_v46 = vpop.f32.mrb[197].mxu1  ;;  %v8077_v54 = vpop.f32.mrb[5].mxu0 }
 0x97d   :  { %v8320_v13 = vmax.f32 %v7724_v46, %v8077_v54  ;;  %v10751_v38 = vpop.f32.mrb[198].mxu1  ;;  %v10831_v30 = vpop.f32.mrb[6].mxu0 }
 0x97e   :  { %v8323_v49 = vmax.f32 %v10751_v38, %v10831_v30  ;;  %v7727_v26 = vpop.f32.mrb[199].mxu1  ;;  %v8080_v20 = vpop.f32.mrb[7].mxu0 }
 0x97f   :  { %v8321_v44 = vmax.f32 %v7727_v26, %v8080_v20 }
 0x983   :  { %v10754_v16 = vpop.f32.mrb[200].mxu1  ;;  %v10834_v34 = vpop.f32.mrb[8].mxu0 }
 0x984   :  { %v8326_v39 = vmax.f32 %v10754_v16, %v10834_v34  ;;  %v7740_v5 = vpop.f32.mrb[201].mxu1  ;;  %v8093_v27 = vpop.f32.mrb[9].mxu0 }
 0x985   :  { %v8324_v12 = vmax.f32 %v7740_v5, %v8093_v27  ;;  %v10755_v10 = vpop.f32.mrb[202].mxu1  ;;  %v10835_v62 = vpop.f32.mrb[10].mxu0 }
 0x986   :  { %v15224_v9 = vmax.f32 %v8318_v45, %v8326_v39  ;;  %v8327_v55 = vmax.f32 %v10755_v10, %v10835_v62  ;;  %v7743_v43 = vpop.f32.mrb[203].mxu1  ;;  %v8096_v1 = vpop.f32.mrb[11].mxu0 }
 0x987   :  { %v15226_v17 = vmax.f32 %v8316_v0, %v8324_v12  ;;  %v8325_v57 = vmax.f32 %v7743_v43, %v8096_v1 }
 0x988   :  { %v15228_v29 = vmax.f32 %v8319_v31, %v8327_v55 }
 0x989   :  { %v15230_v14 = vmax.f32 %v8317_v18, %v8325_v57 }
 0x98a   :  { %v8413_v52 = vpack.c.bf16 %v15228_v29, %v15224_v9  ;;  %v11671_v29 = vld [vmem:[%s15400_s9 + $0x58] sm:$0xff]  }
 0x98b   :  { %v8412_v21 = vpack.c.bf16 %v15230_v14, %v15226_v17  ;;  %v10758_v28 = vpop.f32.mrb[204].mxu1  ;;  %v10838_v33 = vpop.f32.mrb[12].mxu0 }
 0x98c   :  { %v8330_v51 = vmax.f32 %v10758_v28, %v10838_v33  ;;  %v7756_v11 = vpop.f32.mrb[205].mxu1  ;;  %v8109_v60 = vpop.f32.mrb[13].mxu0 }
 0x98d   :  { %v8328_v7 = vmax.f32 %v7756_v11, %v8109_v60  ;;  %v10759_v22 = vpop.f32.mrb[206].mxu1  ;;  %v10839_v63 = vpop.f32.mrb[14].mxu0 }
 0x98e   :  { %v15236_v36 = vmax.f32 %v8322_v53, %v8330_v51  ;;  %v8331_v23 = vmax.f32 %v10759_v22, %v10839_v63  ;;  %v7759_v50 = vpop.f32.mrb[207].mxu1  ;;  %v8112_v58 = vpop.f32.mrb[15].mxu0 }
 0x98f   :  { %v15238_v15 = vmax.f32 %v8320_v13, %v8328_v7  ;;  %v8329_v8 = vmax.f32 %v7759_v50, %v8112_v58 }
 0x990   :  { %v15240_v35 = vmax.f32 %v8323_v49, %v8331_v23  ;;  %v11665_v23 = vld [vmem:[%s15400_s9 + $0x8] sm:$0xff]  }
 0x991   :  { %v15242_v56 = vmax.f32 %v8321_v44, %v8329_v8 }
 0x992   :  { %v8415_v25 = vpack.c.bf16 %v15240_v35, %v15236_v36  ;;  %v11673_v35 = vld [vmem:[%s15400_s9 + $0x68] sm:$0xff]  }
 0x993   :  { %v8414_v32 = vpack.c.bf16 %v15242_v56, %v15238_v15  ;;  %v10762_v59 = vpop.f32.mrb[208].mxu1  ;;  %v10842_v41 = vpop.f32.mrb[16].mxu0 }
 0x994   :  { %v8334_v61 = vmax.f32 %v10762_v59, %v10842_v41  ;;  %v7772_v3 = vpop.f32.mrb[209].mxu1  ;;  %v8125_v48 = vpop.f32.mrb[17].mxu0 }
 0x995   :  { %v8332_v45 = vmax.f32 %v7772_v3, %v8125_v48  ;;  %v10763_v19 = vpop.f32.mrb[210].mxu1  ;;  %v10843_v47 = vpop.f32.mrb[18].mxu0 }
 0x996   :  { %v8335_v0 = vmax.f32 %v10763_v19, %v10843_v47  ;;  %v7775_v40 = vpop.f32.mrb[211].mxu1  ;;  %v8128_v24 = vpop.f32.mrb[19].mxu0  ;;  %v11666_v47 = vld [vmem:[%s15400_s9 + $0x10] sm:$0xff]  }
 0x997   :  { %v8333_v31 = vmax.f32 %v7775_v40, %v8128_v24 }
 0x99b   :  { %v10766_v4 = vpop.f32.mrb[212].mxu1  ;;  %v10846_v6 = vpop.f32.mrb[20].mxu0 }
 0x99c   :  { %v8338_v18 = vmax.f32 %v10766_v4, %v10846_v6  ;;  %v7788_v37 = vpop.f32.mrb[213].mxu1  ;;  %v8141_v2 = vpop.f32.mrb[21].mxu0 }
 0x99d   :  { %v8336_v53 = vmax.f32 %v7788_v37, %v8141_v2  ;;  %v10767_v46 = vpop.f32.mrb[214].mxu1  ;;  %v10847_v54 = vpop.f32.mrb[22].mxu0 }
 0x99e   :  { %v8339_v13 = vmax.f32 %v10767_v46, %v10847_v54  ;;  %v7791_v38 = vpop.f32.mrb[215].mxu1  ;;  %v8144_v30 = vpop.f32.mrb[23].mxu0 }
 0x99f   :  { %v8337_v49 = vmax.f32 %v7791_v38, %v8144_v30 }
 0x9a3   :  { %v10770_v26 = vpop.f32.mrb[216].mxu1  ;;  %v10850_v20 = vpop.f32.mrb[24].mxu0 }
 0x9a4   :  { %v8342_v44 = vmax.f32 %v10770_v26, %v10850_v20  ;;  %v7804_v16 = vpop.f32.mrb[217].mxu1  ;;  %v8157_v34 = vpop.f32.mrb[25].mxu0 }
 0x9a5   :  { %v8340_v39 = vmax.f32 %v7804_v16, %v8157_v34  ;;  %v10771_v5 = vpop.f32.mrb[218].mxu1  ;;  %v10851_v27 = vpop.f32.mrb[26].mxu0 }
 0x9a6   :  { %v8390_v12 = vmax.f32 %v8334_v61, %v8342_v44  ;;  %v8343_v10 = vmax.f32 %v10771_v5, %v10851_v27  ;;  %v7807_v62 = vpop.f32.mrb[219].mxu1  ;;  %v8160_v55 = vpop.f32.mrb[27].mxu0 }
 0x9a7   :  { %v8388_v43 = vmax.f32 %v8332_v45, %v8340_v39  ;;  %v8341_v1 = vmax.f32 %v7807_v62, %v8160_v55  ;;  %v11669_v39 = vld [vmem:[%s15400_s9 + $0x48] sm:$0xff]   ;;  %v11670_v62 = vld [vmem:[%s15400_s9 + $0x50] sm:$0xff]  }
 0x9a8   :  { %v8391_v57 = vmax.f32 %v8335_v0, %v8343_v10 }
 0x9a9   :  { %v8389_v28 = vmax.f32 %v8333_v31, %v8341_v1 }
 0x9aa   :  { %v8417_v33 = vpack.c.bf16 %v8391_v57, %v8390_v12 }
 0x9ab   :  { %v8416_v51 = vpack.c.bf16 %v8389_v28, %v8388_v43  ;;  %v10774_v11 = vpop.f32.mrb[220].mxu1  ;;  %v10854_v60 = vpop.f32.mrb[28].mxu0 }
 0x9ac   :  { %v8346_v7 = vmax.f32 %v10774_v11, %v10854_v60  ;;  %v7820_v22 = vpop.f32.mrb[221].mxu1  ;;  %v8173_v63 = vpop.f32.mrb[29].mxu0 }
 0x9ad   :  { %v8344_v50 = vmax.f32 %v7820_v22, %v8173_v63  ;;  %v10775_v58 = vpop.f32.mrb[222].mxu1  ;;  %v10855_v8 = vpop.f32.mrb[30].mxu0  ;;  %10896 = vmatprep.mubr.msk.bf16.mxu1 %vm8469_vm5, %v8416_v51  ;;  %v11672_v22 = vld [vmem:[%s15400_s9 + $0x60] sm:$0xff]  }
 0x9ae   :  { %v8394_v59 = vmax.f32 %v8338_v18, %v8346_v7  ;;  %v8347_v41 = vmax.f32 %v10775_v58, %v10855_v8  ;;  %v7823_v61 = vpop.f32.mrb[223].mxu1  ;;  %v8176_v3 = vpop.f32.mrb[31].mxu0  ;;  %10897 = vmatmul.mubr.msk.bf16.vlgmr.msra.gmra.mrb[0].mxu1 %vm8469_vm5, %v8417_v33 }
 0x9af   :  { %v8392_v48 = vmax.f32 %v8336_v53, %v8344_v50  ;;  %v8345_v45 = vmax.f32 %v7823_v61, %v8176_v3  ;;  %10905 = vmatpush3.bf16.msra.mxu1 %v15221_v42  ;;  %v11667_v42 = vld [vmem:[%s15400_s9 + $0x18] sm:$0xff]  }
 0x9b0   :  { %v8395_v19 = vmax.f32 %v8339_v13, %v8347_v41  ;;  %10906 = vmatprep.subr.bf16.mxu1 %v11665_v23 }
 0x9b1   :  { %v8393_v0 = vmax.f32 %v8337_v49, %v8345_v45  ;;  %v11668_v49 = vld [vmem:[%s15400_s9 + $0x40] sm:$0xff]  }
 0x9b2   :  { %v8419_v40 = vpack.c.bf16 %v8395_v19, %v8394_v59 }
 0x9b3   :  { %v8418_v24 = vpack.c.bf16 %v8393_v0, %v8392_v48  ;;  %v10778_v31 = vpop.f32.mrb[224].mxu1  ;;  %v10858_v4 = vpop.f32.mrb[32].mxu0  ;;  %10907 = vmatpush3.bf16.msra.mxu1 %v11665_v23 }
 0x9b4   :  { %v8350_v6 = vmax.f32 %v10778_v31, %v10858_v4  ;;  %v7836_v18 = vpop.f32.mrb[225].mxu1  ;;  %v8189_v37 = vpop.f32.mrb[33].mxu0  ;;  %10908 = vmatprep.subr.bf16.mxu1 %v11666_v47  ;;  %v11674_v31 = vld [vmem:[%s15400_s9 + $0x70] sm:$0xff]  }
 0x9b5   :  { %v8348_v2 = vmax.f32 %v7836_v18, %v8189_v37  ;;  %v10779_v53 = vpop.f32.mrb[226].mxu1  ;;  %v10859_v46 = vpop.f32.mrb[34].mxu0  ;;  %10900 = vmatprep.mubr.msk.bf16.mxu1 %vm8469_vm5, %v8418_v24 }
 0x9b6   :  { %v8351_v54 = vmax.f32 %v10779_v53, %v10859_v46  ;;  %v7839_v13 = vpop.f32.mrb[227].mxu1  ;;  %v8192_v38 = vpop.f32.mrb[35].mxu0  ;;  %10901 = vmatmul.mubr.msk.bf16.gmra.mrb[4].mxu1 %vm8469_vm5, %v8419_v40 }
 0x9b7   :  { %v8349_v30 = vmax.f32 %v7839_v13, %v8192_v38  ;;  %10909 = vmatpush3.bf16.msra.mxu1 %v11666_v47  ;;  %10912 = vmatprep.mubr.msk.bf16.mxu1 %vm8469_vm5, %v8412_v21 }
 0x9b8   :  { %10910 = vmatprep.subr.bf16.mxu1 %v11667_v42 }
 0x9bb   :  { %v10782_v26 = vpop.f32.mrb[228].mxu1  ;;  %v10862_v20 = vpop.f32.mrb[36].mxu0  ;;  %10911 = vmatpush3.bf16.msra.mxu1 %v11667_v42 }
 0x9bc   :  { %v8354_v44 = vmax.f32 %v10782_v26, %v10862_v20  ;;  %v7852_v16 = vpop.f32.mrb[229].mxu1  ;;  %v8205_v34 = vpop.f32.mrb[37].mxu0  ;;  %10920 = vmatprep.subr.bf16.mxu1 %v11668_v49 }
 0x9bd   :  { %v8352_v5 = vmax.f32 %v7852_v16, %v8205_v34  ;;  %v10783_v17 = vpop.f32.mrb[230].mxu1  ;;  %v10863_v14 = vpop.f32.mrb[38].mxu0  ;;  %v11676_v16 = vld [vmem:[%s15401_s11] sm:$0xff]  }
 0x9be   :  { %v8355_v21 = vmax.f32 %v10783_v17, %v10863_v14  ;;  %v7855_v27 = vpop.f32.mrb[231].mxu1  ;;  %v8208_v12 = vpop.f32.mrb[39].mxu0  ;;  %10913 = vmatmul.mubr.msk.bf16.vlgmr.msra.gmra.mrb[0].mxu1 %vm8469_vm5, %v8413_v52 }
 0x9bf   :  { %v8353_v10 = vmax.f32 %v7855_v27, %v8208_v12  ;;  %10916 = vmatprep.mubr.msk.bf16.mxu1 %vm8469_vm5, %v8414_v32  ;;  %10921 = vmatpush3.bf16.msra.mxu1 %v11668_v49 }
 0x9c0   :  { %10922 = vmatprep.subr.bf16.mxu1 %v11669_v39 }
 0x9c3   :  { %v10786_v55 = vpop.f32.mrb[232].mxu1  ;;  %v10866_v43 = vpop.f32.mrb[40].mxu0  ;;  %10923 = vmatpush3.bf16.msra.mxu1 %v11669_v39 }
 0x9c4   :  { %v8358_v1 = vmax.f32 %v10786_v55, %v10866_v43  ;;  %v7868_v57 = vpop.f32.mrb[233].mxu1  ;;  %v8221_v9 = vpop.f32.mrb[41].mxu0  ;;  %10924 = vmatprep.subr.bf16.mxu1 %v11670_v62 }
 0x9c5   :  { %v8356_v52 = vmax.f32 %v7868_v57, %v8221_v9  ;;  %v10787_v15 = vpop.f32.mrb[234].mxu1  ;;  %v10867_v56 = vpop.f32.mrb[42].mxu0 }
 0x9c6   :  { %v8398_v32 = vmax.f32 %v8350_v6, %v8358_v1  ;;  %v8359_v28 = vmax.f32 %v10787_v15, %v10867_v56  ;;  %v7871_v33 = vpop.f32.mrb[235].mxu1  ;;  %v8224_v51 = vpop.f32.mrb[43].mxu0  ;;  %10917 = vmatmul.mubr.msk.bf16.gmra.mrb[4].mxu1 %vm8469_vm5, %v8415_v25 }
 0x9c7   :  { %v8396_v11 = vmax.f32 %v8348_v2, %v8356_v52  ;;  %v8357_v60 = vmax.f32 %v7871_v33, %v8224_v51  ;;  %10925 = vmatpush3.bf16.msra.mxu1 %v11670_v62 }
 0x9c8   :  { %v8399_v7 = vmax.f32 %v8351_v54, %v8359_v28  ;;  %10926 = vmatprep.subr.bf16.mxu1 %v11671_v29  ;;  %v11675_v54 = vld [vmem:[%s15400_s9 + $0x78] sm:$0xff]  }
 0x9c9   :  { %v8397_v63 = vmax.f32 %v8349_v30, %v8357_v60 }
 0x9ca   :  { %v8421_v23 = vpack.c.bf16 %v8399_v7, %v8398_v32 }
 0x9cb   :  { %v8420_v50 = vpack.c.bf16 %v8397_v63, %v8396_v11  ;;  %v10790_v58 = vpop.f32.mrb[236].mxu1  ;;  %v10870_v8 = vpop.f32.mrb[44].mxu0  ;;  %10927 = vmatpush3.bf16.msra.mxu1 %v11671_v29 }
 0x9cc   :  { %v8362_v59 = vmax.f32 %v10790_v58, %v10870_v8  ;;  %v7884_v41 = vpop.f32.mrb[237].mxu1  ;;  %v8237_v36 = vpop.f32.mrb[45].mxu0  ;;  %10936 = vmatprep.subr.bf16.mxu1 %v11672_v22 }
 0x9cd   :  { %v8360_v25 = vmax.f32 %v7884_v41, %v8237_v36  ;;  %v10791_v61 = vpop.f32.mrb[238].mxu1  ;;  %v10871_v3 = vpop.f32.mrb[46].mxu0  ;;  %10928 = vmatprep.mubr.msk.bf16.mxu1 %vm8469_vm5, %v8420_v50 }
 0x9ce   :  { %v8402_v48 = vmax.f32 %v8354_v44, %v8362_v59  ;;  %v8363_v45 = vmax.f32 %v10791_v61, %v10871_v3  ;;  %v7887_v19 = vpop.f32.mrb[239].mxu1  ;;  %v8240_v47 = vpop.f32.mrb[47].mxu0  ;;  %10929 = vmatmul.mubr.msk.bf16.vlgmr.msra.gmra.mrb[0].mxu1 %vm8469_vm5, %v8421_v23 }
 0x9cf   :  { %v8400_v0 = vmax.f32 %v8352_v5, %v8360_v25  ;;  %v8361_v40 = vmax.f32 %v7887_v19, %v8240_v47  ;;  %10937 = vmatpush3.bf16.msra.mxu1 %v11672_v22 }
 0x9d0   :  { %v8403_v24 = vmax.f32 %v8355_v21, %v8363_v45  ;;  %10938 = vmatprep.subr.bf16.mxu1 %v11673_v35 }
 0x9d1   :  { %v8401_v4 = vmax.f32 %v8353_v10, %v8361_v40 }
 0x9d2   :  { %v8423_v6 = vpack.c.bf16 %v8403_v24, %v8402_v48 }
 0x9d3   :  { %v8422_v18 = vpack.c.bf16 %v8401_v4, %v8400_v0  ;;  %v10794_v37 = vpop.f32.mrb[240].mxu1  ;;  %v10874_v42 = vpop.f32.mrb[48].mxu0  ;;  %10939 = vmatpush3.bf16.msra.mxu1 %v11673_v35  ;;  %v11677_v35 = vld [vmem:[%s15401_s11 + $0x8] sm:$0xff]  }
 0x9d4   :  { %v8366_v2 = vmax.f32 %v10794_v37, %v10874_v42  ;;  %v7900_v53 = vpop.f32.mrb[241].mxu1  ;;  %v8253_v46 = vpop.f32.mrb[49].mxu0  ;;  %10940 = vmatprep.subr.bf16.mxu1 %v11674_v31  ;;  %v11679_v37 = vld [vmem:[%s15401_s11 + $0x18] sm:$0xff]   ;;  %v11680_v42 = vld [vmem:[%s15401_s11 + $0x20] sm:$0xff]  }
 0x9d5   :  { %v8364_v13 = vmax.f32 %v7900_v53, %v8253_v46  ;;  %v10795_v38 = vpop.f32.mrb[242].mxu1  ;;  %v10875_v30 = vpop.f32.mrb[50].mxu0  ;;  %10932 = vmatprep.mubr.msk.bf16.mxu1 %vm8469_vm5, %v8422_v18  ;;  %v11682_v53 = vld [vmem:[%s15401_s11 + $0x30] sm:$0xff]   ;;  %v11683_v46 = vld [vmem:[%s15401_s11 + $0x38] sm:$0xff]  }
 0x9d6   :  { %v8367_v49 = vmax.f32 %v10795_v38, %v10875_v30  ;;  %v7903_v26 = vpop.f32.mrb[243].mxu1  ;;  %v8256_v20 = vpop.f32.mrb[51].mxu0  ;;  %10933 = vmatmul.mubr.msk.bf16.gmra.mrb[4].mxu1 %vm8469_vm5, %v8423_v6 }
 0x9d7   :  { %v8365_v44 = vmax.f32 %v7903_v26, %v8256_v20  ;;  %10941 = vmatpush3.bf16.msra.mxu1 %v11674_v31  ;;  %v11678_v31 = vld [vmem:[%s15401_s11 + $0x10] sm:$0xff]  }
 0x9d8   :  { %10942 = vmatprep.subr.bf16.mxu1 %v11675_v54 }
 0x9db   :  { %v10798_v34 = vpop.f32.mrb[244].mxu1  ;;  %v10878_v39 = vpop.f32.mrb[52].mxu0  ;;  %10943 = vmatpush3.bf16.msra.mxu1 %v11675_v54  ;;  %v11684_v54 = vld [vmem:[%s15402_s13] sm:$0xff]  }
 0x9dc   :  { %v8370_v5 = vmax.f32 %v10798_v34, %v10878_v39  ;;  %v7916_v17 = vpop.f32.mrb[245].mxu1  ;;  %v8269_v14 = vpop.f32.mrb[53].mxu0  ;;  %10952 = vmatprep.subr.bf16.mxu1 %v11676_v16 }
 0x9dd   :  { %v8368_v21 = vmax.f32 %v7916_v17, %v8269_v14  ;;  %v10799_v27 = vpop.f32.mrb[246].mxu1  ;;  %v10879_v12 = vpop.f32.mrb[54].mxu0 }
 0x9de   :  { %v8371_v10 = vmax.f32 %v10799_v27, %v10879_v12  ;;  %v7919_v62 = vpop.f32.mrb[247].mxu1  ;;  %v8272_v55 = vpop.f32.mrb[55].mxu0 }
 0x9df   :  { %v8369_v43 = vmax.f32 %v7919_v62, %v8272_v55  ;;  %v11685_v55 = vld [vmem:[%s15402_s13 + $0x8] sm:$0xff]  }
 0x9e3   :  { %v10802_v1 = vpop.f32.mrb[248].mxu1  ;;  %v10882_v57 = vpop.f32.mrb[56].mxu0 }
 0x9e4   :  { %v8374_v9 = vmax.f32 %v10802_v1, %v10882_v57  ;;  %v7932_v29 = vpop.f32.mrb[249].mxu1  ;;  %v8285_v52 = vpop.f32.mrb[57].mxu0 }
 0x9e5   :  { %v8372_v15 = vmax.f32 %v7932_v29, %v8285_v52  ;;  %v10803_v56 = vpop.f32.mrb[250].mxu1  ;;  %v10883_v32 = vpop.f32.mrb[58].mxu0 }
 0x9e6   :  { %v8406_v28 = vmax.f32 %v8366_v2, %v8374_v9  ;;  %v8375_v33 = vmax.f32 %v10803_v56, %v10883_v32  ;;  %v7935_v51 = vpop.f32.mrb[251].mxu1  ;;  %v8288_v11 = vpop.f32.mrb[59].mxu0  ;;  %v11681_v2 = vld [vmem:[%s15401_s11 + $0x28] sm:$0xff]   ;;  %v11686_v56 = vld [vmem:[%s15402_s13 + $0x10] sm:$0xff]  }
 0x9e7   :  { %v8404_v60 = vmax.f32 %v8364_v13, %v8372_v15  ;;  %v8373_v7 = vmax.f32 %v7935_v51, %v8288_v11  ;;  %v10018_v13 = vld [vmem:[%s15403_s10] ss:$0 sm:$0xff]  ;;  %v11687_v11 = vld [vmem:[%s15402_s13 + $0x18] sm:$0xff]  }
 0x9e8   :  { %v8407_v22 = vmax.f32 %v8367_v49, %v8375_v33 }
 0x9e9   :  { %v8405_v63 = vmax.f32 %v8365_v44, %v8373_v7  ;;  %v11689_v7 = vld [vmem:[%s15402_s13 + $0x28] sm:$0xff]  }
 0x9ea   :  { %v8425_v23 = vpack.c.bf16 %v8407_v22, %v8406_v28  ;;  %v11690_v22 = vld [vmem:[%s15402_s13 + $0x30] sm:$0xff]  }
 0x9eb   :  { %v8424_v50 = vpack.c.bf16 %v8405_v63, %v8404_v60  ;;  %v10806_v58 = vpop.f32.mrb[252].mxu1  ;;  %v10886_v8 = vpop.f32.mrb[60].mxu0  ;;  %v11688_v60 = vld [vmem:[%s15402_s13 + $0x20] sm:$0xff]   ;;  %v11691_v63 = vld [vmem:[%s15402_s13 + $0x38] sm:$0xff]  }
 0x9ec   :  { %v8378_v59 = vmax.f32 %v10806_v58, %v10886_v8  ;;  %v7948_v41 = vpop.f32.mrb[253].mxu1  ;;  %v8301_v36 = vpop.f32.mrb[61].mxu0 }
 0x9ed   :  { %v8376_v25 = vmax.f32 %v7948_v41, %v8301_v36  ;;  %v10807_v61 = vpop.f32.mrb[254].mxu1  ;;  %v10887_v3 = vpop.f32.mrb[62].mxu0  ;;  %10944 = vmatprep.mubr.msk.bf16.mxu1 %vm8469_vm5, %v8424_v50 }
 0x9ee   :  { %v8410_v48 = vmax.f32 %v8370_v5, %v8378_v59  ;;  %v8379_v45 = vmax.f32 %v10807_v61, %v10887_v3  ;;  %v7951_v19 = vpop.f32.mrb[255].mxu1  ;;  %v8304_v47 = vpop.f32.mrb[63].mxu0  ;;  %10945 = vmatmul.mubr.msk.bf16.vlgmr.msra.gmra.mrb[0].mxu1 %vm8469_vm5, %v8425_v23  ;;  %v10019_v23 = vld [vmem:[%s15404_s12] ss:$0 sm:$0xff] }
 0x9ef   :  { %v8408_v0 = vmax.f32 %v8368_v21, %v8376_v25  ;;  %v8377_v40 = vmax.f32 %v7951_v19, %v8304_v47  ;;  %10953 = vmatpush3.bf16.msra.mxu1 %v11676_v16 }
 0x9f0   :  { %v8411_v24 = vmax.f32 %v8371_v10, %v8379_v45  ;;  %10954 = vmatprep.subr.bf16.mxu1 %v11677_v35 }
 0x9f1   :  { %v8409_v4 = vmax.f32 %v8369_v43, %v8377_v40 }
 0x9f2   :  { %v8427_v6 = vpack.c.bf16 %v8411_v24, %v8410_v48 }
 0x9f3   :  { %v8426_v18 = vpack.c.bf16 %v8409_v4, %v8408_v0  ;;  %10955 = vmatpush3.bf16.msra.mxu1 %v11677_v35 }
 0x9f4   :  { %10956 = vmatprep.subr.bf16.mxu1 %v11678_v31 }
 0x9f5   :  { %10948 = vmatprep.mubr.msk.bf16.mxu1 %vm8469_vm5, %v8426_v18 }
 0x9f6   :  { %10949 = vmatmul.mubr.msk.bf16.gmra.mrb[4].mxu1 %vm8469_vm5, %v8427_v6 }
 0x9f7   :  { %10957 = vmatpush3.bf16.msra.mxu1 %v11678_v31 }
 0x9f8   :  { %10958 = vmatprep.subr.bf16.mxu1 %v11679_v37 }
 0x9fb   :  { %10959 = vmatpush3.bf16.msra.mxu1 %v11679_v37 }
 0x9fc   :  { %10960 = vmatprep.subr.bf16.mxu1 %v11680_v42 }
 0x9ff   :  { %10961 = vmatpush3.bf16.msra.mxu1 %v11680_v42 }
 0xa00   :  { %10962 = vmatprep.subr.bf16.mxu1 %v11681_v2 }
 0xa03   :  { %10963 = vmatpush3.bf16.msra.mxu1 %v11681_v2 }
 0xa04   :  { %10964 = vmatprep.subr.bf16.mxu1 %v11682_v53 }
 0xa07   :  { %10965 = vmatpush3.bf16.msra.mxu1 %v11682_v53 }
 0xa08   :  { %10966 = vmatprep.subr.bf16.mxu1 %v11683_v46 }
 0xa0b   :  { %10967 = vmatpush3.bf16.msra.mxu1 %v11683_v46 }
 0xa0c   :  { %10976 = vmatprep.subr.bf16.mxu1 %v11684_v54 }
 0xac1   :  { %v10946_v38 = vpop.f32.mrb[0].mxu1 }
 0xac2   :  { %v8893_v30 = vadd.f32 %v10946_v38, %v10018_v13  ;;  %v8845_v49 = vpop.f32.mrb[1].mxu1  ;;  %v10028_v38 = vld [vmem:[%s15405_s14] ss:$0 sm:$0xff] }
 0xac3   :  { %v8891_v26 = vadd.f32 %v10018_v13, %v8845_v49  ;;  %v10947_v20 = vpop.f32.mrb[2].mxu1 }
 0xac4   :  { %v8894_v44 = vadd.f32 %v10947_v20, %v10018_v13  ;;  %v8848_v16 = vpop.f32.mrb[3].mxu1  ;;  %v8901_v39 = vmax.f32 %v8893_v30, 0.0 }
 0xac5   :  { %v8892_v34 = vadd.f32 %v10018_v13, %v8848_v16  ;;  %v8899_v17 = vmax.f32 %v8891_v26, 0.0 }
 0xac6   :  { %v8902_v5 = vmax.f32 %v8894_v44, 0.0 }
 0xac7   :  { %v8900_v14 = vmax.f32 %v8892_v34, 0.0 }
 0xac8   :  { %v8908_v21 = vpack.c.bf16 %v8902_v5, %v8901_v39 }
 0xac9   :  { %v8907_v27 = vpack.c.bf16 %v8900_v14, %v8899_v17  ;;  %v10950_v12 = vpop.f32.mrb[4].mxu1 }
 0xaca   :  { %v8897_v10 = vadd.f32 %v10950_v12, %v10018_v13  ;;  %v8861_v62 = vpop.f32.mrb[5].mxu1 }
 0xacb   :  { %v8895_v43 = vadd.f32 %v10018_v13, %v8861_v62  ;;  %v10951_v1 = vpop.f32.mrb[6].mxu1  ;;  %10968 = vmatprep.mubr.bf16.mxu1 %v8907_v27 }
 0xacc   :  { %v8898_v57 = vadd.f32 %v10951_v1, %v10018_v13  ;;  %v8864_v9 = vpop.f32.mrb[7].mxu1  ;;  %10969 = vmatmul.mubr.bf16.vlgmr.msra.gmra.mrb[8].mxu1 %v8908_v21  ;;  %v8905_v52 = vmax.f32 %v8897_v10, 0.0 }
 0xacd   :  { %v8896_v29 = vadd.f32 %v10018_v13, %v8864_v9  ;;  %10977 = vmatpush3.bf16.msra.mxu1 %v11684_v54  ;;  %v8903_v32 = vmax.f32 %v8895_v43, 0.0 }
 0xace   :  { %v8906_v15 = vmax.f32 %v8898_v57, 0.0  ;;  %10978 = vmatprep.subr.bf16.mxu1 %v11685_v55 }
 0xacf   :  { %v8904_v28 = vmax.f32 %v8896_v29, 0.0 }
 0xad0   :  { %v8910_v33 = vpack.c.bf16 %v8906_v15, %v8905_v52 }
 0xad1   :  { %v8909_v51 = vpack.c.bf16 %v8904_v28, %v8903_v32  ;;  %10979 = vmatpush3.bf16.msra.mxu1 %v11685_v55 }
 0xad2   :  { %10980 = vmatprep.subr.bf16.mxu1 %v11686_v56 }
 0xad3   :  { %10972 = vmatprep.mubr.bf16.mxu1 %v8909_v51 }
 0xad4   :  { %10973 = vmatmul.mubr.bf16.gmra.mrb[12].mxu1 %v8910_v33 }
 0xad5   :  { %10981 = vmatpush3.bf16.msra.mxu1 %v11686_v56 }
 0xad6   :  { %10982 = vmatprep.subr.bf16.mxu1 %v11687_v11 }
 0xad9   :  { %10983 = vmatpush3.bf16.msra.mxu1 %v11687_v11 }
 0xada   :  { %10984 = vmatprep.subr.bf16.mxu1 %v11688_v60 }
 0xadd   :  { %10985 = vmatpush3.bf16.msra.mxu1 %v11688_v60 }
 0xade   :  { %10986 = vmatprep.subr.bf16.mxu1 %v11689_v7 }
 0xae1   :  { %10987 = vmatpush3.bf16.msra.mxu1 %v11689_v7 }
 0xae2   :  { %10988 = vmatprep.subr.bf16.mxu1 %v11690_v22 }
 0xae5   :  { %10989 = vmatpush3.bf16.msra.mxu1 %v11690_v22 }
 0xae6   :  { %10990 = vmatprep.subr.bf16.mxu1 %v11691_v63 }
 0xae9   :  { %10991 = vmatpush3.bf16.msra.mxu1 %v11691_v63 }
 0xb9f   :  { %v10970_v50 = vpop.f32.mrb[8].mxu1 }
 0xba0   :  { %v9025_v58 = vadd.f32 %v10970_v50, %v10019_v23  ;;  %v9016_v8 = vpop.f32.mrb[9].mxu1 }
 0xba1   :  { %v9017_v59 = vadd.f32 %v10019_v23, %v9016_v8  ;;  %v10971_v41 = vpop.f32.mrb[10].mxu1 }
 0xba2   :  { %v9028_v36 = vadd.f32 %v10971_v41, %v10019_v23  ;;  %v9019_v35 = vpop.f32.mrb[11].mxu1  ;;  %v9049_v61 = vmax.f32 %v9025_v58, 0.0 }
 0xba3   :  { %v9020_v25 = vadd.f32 %v10019_v23, %v9019_v35  ;;  %v9047_v48 = vmax.f32 %v9017_v59, 0.0 }
 0xba4   :  { %v9050_v3 = vmax.f32 %v9028_v36, 0.0 }
 0xba5   :  { %v9048_v45 = vmax.f32 %v9020_v25, 0.0 }
 0xba6   :  { %v9056_v19 = vpack.c.bf16 %v9050_v3, %v9049_v61 }
 0xba7   :  { %v9055_v47 = vpack.c.bf16 %v9048_v45, %v9047_v48  ;;  %v10974_v0 = vpop.f32.mrb[12].mxu1 }
 0xba8   :  { %v9041_v40 = vadd.f32 %v10974_v0, %v10019_v23  ;;  %v9032_v24 = vpop.f32.mrb[13].mxu1 }
 0xba9   :  { %v9033_v31 = vadd.f32 %v10019_v23, %v9032_v24  ;;  %v10975_v4 = vpop.f32.mrb[14].mxu1  ;;  %10992 = vmatprep.mubr.bf16.mxu1 %v9055_v47 }
 0xbaa   :  { %v9044_v6 = vadd.f32 %v10975_v4, %v10019_v23  ;;  %v9035_v18 = vpop.f32.mrb[15].mxu1  ;;  %10993 = vmatmul.mubr.bf16.vlgmr.msra.gmra.mrb[16].mxu1 %v9056_v19  ;;  %v9053_v42 = vmax.f32 %v9041_v40, 0.0 }
 0xbab   :  { %v9036_v37 = vadd.f32 %v10019_v23, %v9035_v18  ;;  %v9051_v53 = vmax.f32 %v9033_v31, 0.0 }
 0xbac   :  { %v9054_v2 = vmax.f32 %v9044_v6, 0.0 }
 0xbad   :  { %v9052_v46 = vmax.f32 %v9036_v37, 0.0 }
 0xbae   :  { %v9058_v54 = vpack.c.bf16 %v9054_v2, %v9053_v42 }
 0xbaf   :  { %v9057_v13 = vpack.c.bf16 %v9052_v46, %v9051_v53 }
 0xbb1   :  { %10996 = vmatprep.mubr.bf16.mxu1 %v9057_v13 }
 0xbb2   :  { %10997 = vmatmul.mubr.bf16.gmra.mrb[20].mxu1 %v9058_v54 }
 0xc7d   :  { %v10994_v30 = vpop.f32.mrb[16].mxu1 }
 0xc7e   :  { %v9173_v49 = vadd.f32 %v10994_v30, %v10028_v38  ;;  %v9164_v26 = vpop.f32.mrb[17].mxu1 }
 0xc7f   :  { %v9165_v20 = vadd.f32 %v10028_v38, %v9164_v26  ;;  %v10995_v44 = vpop.f32.mrb[18].mxu1 }
 0xc80   :  { %9197 = vst [vmem:[%s15406_s15 + $0x10] sm:$0xff] %v9173_v49  ;;  %v9176_v16 = vadd.f32 %v10995_v44, %v10028_v38  ;;  %v9167_v34 = vpop.f32.mrb[19].mxu1 }
 0xc81   :  { %9195 = vst [vmem:[%s15406_s15] sm:$0xff] %v9165_v20  ;;  %v9168_v39 = vadd.f32 %v10028_v38, %v9167_v34 }
 0xc82   :  { %9198 = vst [vmem:[%s15406_s15 + $0x18] sm:$0xff] %v9176_v16 }
 0xc83   :  { %9196 = vst [vmem:[%s15406_s15 + $0x8] sm:$0xff] %v9168_v39 }
 0xc85   :  { %v10998_v5 = vpop.f32.mrb[20].mxu1 }
 0xc86   :  { %v9189_v17 = vadd.f32 %v10998_v5, %v10028_v38  ;;  %v9180_v14 = vpop.f32.mrb[21].mxu1 }
 0xc87   :  { %v9181_v21 = vadd.f32 %v10028_v38, %v9180_v14  ;;  %v10999_v27 = vpop.f32.mrb[22].mxu1 }
 0xc88   :  { %9201 = vst [vmem:[%s15406_s15 + $0x30] sm:$0xff] %v9189_v17  ;;  %v9192_v12 = vadd.f32 %v10999_v27, %v10028_v38  ;;  %v9183_v10 = vpop.f32.mrb[23].mxu1 }
 0xc89   :  { %9199 = vst [vmem:[%s15406_s15 + $0x20] sm:$0xff] %v9181_v21  ;;  %v9184_v62 = vadd.f32 %v10028_v38, %v9183_v10 }
 0xc8a   :  { %9202 = vst [vmem:[%s15406_s15 + $0x38] sm:$0xff] %v9192_v12 }
 0xc8b   :  { %9200 = vst [vmem:[%s15406_s15 + $0x28] sm:$0xff] %v9184_v62 }

</bundles_post_ra>
